<compile_context>
chip_gen: v5e
topology: v5e:2x2
jax: 0.10.0
libtpu: 0.0.40
codegen_flags: <defaults>
</compile_context>

<pallas_src>
import functools

import jax
import jax.numpy as jnp
from jax.experimental import pallas as pl
from jax.experimental.pallas import tpu as pltpu

# ---------------------------- sizes -----------------------------------------
T = 8        # decode steps (inputs.size(0))
B = 8        # batch
E = 32       # opt.word_vec_size
H = 32       # opt.rnn_size
S = 16       # source length (context)
L = 2        # opt.layers  (kernel hardcodes 2 LSTM layers)
VOCAB = 50


# ---------------------------- Pallas kernel ---------------------------------
def decoder_kernel(embflat_ref, ctx_ref, h0_ref, c0_ref, out0_ref,
                   wih0e_ref, w0_ref, b0_ref, w1_ref, b1_ref,
                   win_ref, wout_ref,
                   out_ref, *, t_steps, batch, hidden):
    # Hoisted embedding GEMM: layer-0 gate contribution of the embeddings for
    # ALL timesteps at once (no dependence on the carried state), with the
    # layer-0 bias folded in once.
    gx_emb = (jnp.dot(embflat_ref[...], wih0e_ref[...],
                      preferred_element_type=jnp.float32)
              + b0_ref[...])                                    # (T*B, 4H)

    ctx = ctx_ref[...]                                          # (B, S, H)
    w0 = w0_ref[...]                                            # (2H, 4H)
    w1 = w1_ref[...]                                            # (2H, 4H)
    b1 = b1_ref[...]                                            # (1, 4H)
    win = win_ref[...]                                          # (H, H)
    wout = wout_ref[...]                                        # (2H, H)

    h0 = h0_ref[0]
    h1 = h0_ref[1]
    c0 = c0_ref[0]
    c1 = c0_ref[1]
    feed = out0_ref[...]                                        # (B, H)

    def lstm_gates(g, c_prev):
        i = jax.nn.sigmoid(g[:, 0 * hidden:1 * hidden])
        f = jax.nn.sigmoid(g[:, 1 * hidden:2 * hidden])
        gg = jnp.tanh(g[:, 2 * hidden:3 * hidden])
        o = jax.nn.sigmoid(g[:, 3 * hidden:4 * hidden])
        c_new = f * c_prev + i * gg
        h_new = o * jnp.tanh(c_new)
        return h_new, c_new

    outs = []
    for t in range(t_steps):      # fully unrolled; T is small and static
        # ---- StackedLSTM layer 0: gates = gx_emb[t] + [feed, h0] @ [Wih0f;Whh0]
        g0 = (gx_emb[t * batch:(t + 1) * batch, :]
              + jnp.dot(jnp.concatenate([feed, h0], axis=1), w0,
                        preferred_element_type=jnp.float32))
        h0, c0 = lstm_gates(g0, c0)

        # ---- StackedLSTM layer 1 (inter-layer dropout = identity in eval mode)
        g1 = (jnp.dot(jnp.concatenate([h0, h1], axis=1), w1,
                      preferred_element_type=jnp.float32)
              + b1)
        h1, c1 = lstm_gates(g1, c1)
        rnn_out = h1                                            # (B, H)

        # ---- GlobalAttention (VPU/XLU form; tiny bmm would waste the MXU) ----
        target = jnp.dot(rnn_out, win,
                         preferred_element_type=jnp.float32)    # (B, H)
        scores = jnp.sum(ctx * target[:, None, :], axis=-1)     # (B, S)
        scores = scores - jnp.max(scores, axis=-1, keepdims=True)
        e = jnp.exp(scores)
        denom = jnp.sum(e, axis=-1, keepdims=True)
        r = pl.reciprocal(denom, approx=True)                   # EUP slot
        r = r * (2.0 - denom * r)                               # 1 Newton step -> f32 accurate
        attn = e * r
        weighted = jnp.sum(attn[:, :, None] * ctx, axis=1)      # (B, H)
        # contextOutput = tanh(linear_out(cat([weighted, rnn_out])))
        out = jnp.tanh(jnp.dot(jnp.concatenate([weighted, rnn_out], axis=1),
                               wout, preferred_element_type=jnp.float32))

        # final self.dropout(output) is identity in eval mode
        feed = out
        outs.append(out)

    # Lane-dense single writeback: (B, T*H) = (8, 256) — unmasked full stores.
    out_ref[...] = jnp.concatenate(outs, axis=1)


def tree_decoder_w2v(emb_seq, ctx, h0, c0, out0,
                     wih0e, w0, b0, w1, b1, win, wout):
    kernel = functools.partial(decoder_kernel, t_steps=T, batch=B, hidden=H)
    vmem = pl.BlockSpec(memory_space=pltpu.MemorySpace.VMEM)

    emb_flat = emb_seq.reshape(T * B, E)       # layout-only reshape in wrapper

    out_flat = pl.pallas_call(
        kernel,
        out_shape=jax.ShapeDtypeStruct((B, T * H), jnp.float32),
        in_specs=[vmem] * 12,
        out_specs=vmem,
    )(emb_flat, ctx, h0, c0, out0, wih0e, w0, b0, w1, b1, win, wout)

    # (B, T*H) lane-dense kernel output -> (T, B, H)
    return out_flat.reshape(B, T, H).transpose(1, 0, 2)


# ---------------------------- pure-JAX reference ----------------------------
def reference(token_ids, emb_table, emb0, out0, h0, c0, ctx, params):
    (W_ih0, W_hh0, b_ih0, b_hh0,
     W_ih1, W_hh1, b_ih1, b_hh1, W_in, W_out) = params
    embs = emb_table[token_ids]                      # (T, B, E)

    def cell(x, h, c, W_ih, W_hh, b_ih, b_hh):
        g = x @ W_ih.T + b_ih + h @ W_hh.T + b_hh
        i, f, gg, o = jnp.split(g, 4, axis=1)
        c_new = jax.nn.sigmoid(f) * c + jax.nn.sigmoid(i) * jnp.tanh(gg)
        h_new = jax.nn.sigmoid(o) * jnp.tanh(c_new)
        return h_new, c_new

    emb, output, h, c = emb0, out0, h0, c0
    outs = []
    for t in range(T):
        x = jnp.concatenate([emb, output], axis=1)
        h0n, c0n = cell(x, h[0], c[0], W_ih0, W_hh0, b_ih0, b_hh0)
        h1n, c1n = cell(h0n, h[1], c[1], W_ih1, W_hh1, b_ih1, b_hh1)
        h, c = jnp.stack([h0n, h1n]), jnp.stack([c0n, c1n])
        rnn_out = h1n
        target = rnn_out @ W_in.T
        scores = jnp.einsum('bsh,bh->bs', ctx, target)
        attn = jax.nn.softmax(scores, axis=-1)
        weighted = jnp.einsum('bs,bsh->bh', attn, ctx)
        output = jnp.tanh(jnp.concatenate([weighted, rnn_out], axis=1) @ W_out.T)
        outs.append(output)
        emb = embs[t]
    return jnp.stack(outs)


# ---------------------------- main -------------------------------------------
if __name__ == "__main__":
    key = jax.random.PRNGKey(0)
    ks = jax.random.split(key, 20)

    def u(k, shape, s=0.1):
        return jax.random.uniform(k, shape, jnp.float32, -s, s)

    # PyTorch-convention parameters (weight = (out, in))
    W_ih0 = u(ks[0], (4 * H, E + H))
    W_hh0 = u(ks[1], (4 * H, H))
    b_ih0 = u(ks[2], (4 * H,))
    b_hh0 = u(ks[3], (4 * H,))
    W_ih1 = u(ks[4], (4 * H, H))
    W_hh1 = u(ks[5], (4 * H, H))
    b_ih1 = u(ks[6], (4 * H,))
    b_hh1 = u(ks[7], (4 * H,))
    W_in = u(ks[8], (H, H))          # attn.linear_in  (no bias)
    W_out = u(ks[9], (H, 2 * H))     # attn.linear_out (no bias)

    emb_table = u(ks[10], (VOCAB, E), 1.0)          # stands in for Word2Vec .wv
    token_ids = jax.random.randint(ks[11], (T, B), 0, VOCAB)

    # init_states = (emb, output, hidden=(h, c), context)
    emb0 = u(ks[12], (B, E), 1.0)
    out0 = u(ks[13], (B, H), 1.0)
    h0 = u(ks[14], (L, B, H), 1.0)
    c0 = u(ks[15], (L, B, H), 1.0)
    ctx = u(ks[16], (B, S, H), 1.0)

    # Glue: embedding gather + shift (step t consumes embs[t-1]; step 0 uses emb0)
    embs = emb_table[token_ids]                                   # (T, B, E)
    emb_seq = jnp.concatenate([emb0[None], embs[:-1]], axis=0)    # (T, B, E)

    # Glue: transpose / fuse weights so the kernel does x @ W with stacked K.
    wih0t = W_ih0.T                                       # (E+H, 4H)
    wih0e = wih0t[:E]                                     # (E, 4H)  emb part (hoisted GEMM)
    w0 = jnp.concatenate([wih0t[E:], W_hh0.T], axis=0)    # (2H, 4H) for cat([feed, h0_prev])
    b0 = (b_ih0 + b_hh0)[None, :]                         # (1, 4H)
    w1 = jnp.concatenate([W_ih1.T, W_hh1.T], axis=0)      # (2H, 4H) for cat([h0_new, h1_prev])
    b1 = (b_ih1 + b_hh1)[None, :]                         # (1, 4H)
    win = W_in.T                                          # (H, H)
    wout = W_out.T                                        # (2H, H)  for cat([weighted, rnn_out])

    out = tree_decoder_w2v(emb_seq, ctx, h0, c0, out0,
                           wih0e, w0, b0, w1, b1, win, wout)
    out = jax.block_until_ready(out)

    ref = reference(token_ids, emb_table, emb0, out0, h0, c0, ctx,
                    (W_ih0, W_hh0, b_ih0, b_hh0,
                     W_ih1, W_hh1, b_ih1, b_hh1, W_in, W_out))
    assert out.shape == (T, B, H)
    # Newton-refined reciprocal is f32-accurate; remaining diff is summation-order noise.
    assert jnp.allclose(out, ref, atol=5e-4, rtol=5e-4), "mismatch vs reference"
    print("KERNEL_OK")
</pallas_src>

<mosaic_0001>
module attributes {stable_mosaic.version = 11 : i64} {
  func.func @decoder_kernel(%arg0: memref<64x32xf32, #tpu.memory_space<vmem>>, %arg1: memref<8x16x32xf32, #tpu.memory_space<vmem>>, %arg2: memref<2x8x32xf32, #tpu.memory_space<vmem>>, %arg3: memref<2x8x32xf32, #tpu.memory_space<vmem>>, %arg4: memref<8x32xf32, #tpu.memory_space<vmem>>, %arg5: memref<32x128xf32, #tpu.memory_space<vmem>>, %arg6: memref<64x128xf32, #tpu.memory_space<vmem>>, %arg7: memref<1x128xf32, #tpu.memory_space<vmem>>, %arg8: memref<64x128xf32, #tpu.memory_space<vmem>>, %arg9: memref<1x128xf32, #tpu.memory_space<vmem>>, %arg10: memref<32x32xf32, #tpu.memory_space<vmem>>, %arg11: memref<64x32xf32, #tpu.memory_space<vmem>>, %arg12: memref<8x256xf32, #tpu.memory_space<vmem>>) attributes {dimension_semantics = [], scalar_prefetch = 0 : i64, scratch_operands = 0 : i64, tpu.core_type = #tpu.core_type<tc>} {
    %c0 = arith.constant 0 : index
    %c0_0 = arith.constant 0 : index
    %0 = vector.load %arg0[%c0, %c0_0] : memref<64x32xf32, #tpu.memory_space<vmem>>, vector<64x32xf32>
    %c0_1 = arith.constant 0 : index
    %c0_2 = arith.constant 0 : index
    %1 = vector.load %arg5[%c0_1, %c0_2] : memref<32x128xf32, #tpu.memory_space<vmem>>, vector<32x128xf32>
    %cst = arith.constant dense<0.000000e+00> : vector<64x128xf32>
    %2 = tpu.matmul %0, %1, %cst {dimension_numbers = #tpu.dot_dimension_numbers<[1], [0], [0], [1], [0, 0, 1, 1], [], []>} : vector<64x32xf32>, vector<32x128xf32>, vector<64x128xf32> -> vector<64x128xf32>
    %c0_3 = arith.constant 0 : index
    %c0_4 = arith.constant 0 : index
    %3 = vector.load %arg7[%c0_3, %c0_4] : memref<1x128xf32, #tpu.memory_space<vmem>>, vector<1x128xf32>
    %4 = vector.broadcast %3 : vector<1x128xf32> to vector<64x128xf32>
    %5 = arith.addf %2, %4 : vector<64x128xf32>
    %c0_5 = arith.constant 0 : index
    %c0_6 = arith.constant 0 : index
    %c0_7 = arith.constant 0 : index
    %6 = vector.load %arg1[%c0_5, %c0_6, %c0_7] : memref<8x16x32xf32, #tpu.memory_space<vmem>>, vector<8x16x32xf32>
    %c0_8 = arith.constant 0 : index
    %c0_9 = arith.constant 0 : index
    %7 = vector.load %arg6[%c0_8, %c0_9] : memref<64x128xf32, #tpu.memory_space<vmem>>, vector<64x128xf32>
    %c0_10 = arith.constant 0 : index
    %c0_11 = arith.constant 0 : index
    %8 = vector.load %arg8[%c0_10, %c0_11] : memref<64x128xf32, #tpu.memory_space<vmem>>, vector<64x128xf32>
    %c0_12 = arith.constant 0 : index
    %c0_13 = arith.constant 0 : index
    %9 = vector.load %arg9[%c0_12, %c0_13] : memref<1x128xf32, #tpu.memory_space<vmem>>, vector<1x128xf32>
    %c0_14 = arith.constant 0 : index
    %c0_15 = arith.constant 0 : index
    %10 = vector.load %arg10[%c0_14, %c0_15] : memref<32x32xf32, #tpu.memory_space<vmem>>, vector<32x32xf32>
    %c0_16 = arith.constant 0 : index
    %c0_17 = arith.constant 0 : index
    %11 = vector.load %arg11[%c0_16, %c0_17] : memref<64x32xf32, #tpu.memory_space<vmem>>, vector<64x32xf32>
    %c0_18 = arith.constant 0 : index
    %c0_19 = arith.constant 0 : index
    %c0_20 = arith.constant 0 : index
    %12 = vector.load %arg2[%c0_18, %c0_19, %c0_20] : memref<2x8x32xf32, #tpu.memory_space<vmem>>, vector<1x8x32xf32>
    %13 = vector.shape_cast %12 : vector<1x8x32xf32> to vector<8x32xf32>
    %c1 = arith.constant 1 : index
    %c0_21 = arith.constant 0 : index
    %c0_22 = arith.constant 0 : index
    %14 = vector.load %arg2[%c1, %c0_21, %c0_22] : memref<2x8x32xf32, #tpu.memory_space<vmem>>, vector<1x8x32xf32>
    %15 = vector.shape_cast %14 : vector<1x8x32xf32> to vector<8x32xf32>
    %c0_23 = arith.constant 0 : index
    %c0_24 = arith.constant 0 : index
    %c0_25 = arith.constant 0 : index
    %16 = vector.load %arg3[%c0_23, %c0_24, %c0_25] : memref<2x8x32xf32, #tpu.memory_space<vmem>>, vector<1x8x32xf32>
    %17 = vector.shape_cast %16 : vector<1x8x32xf32> to vector<8x32xf32>
    %c1_26 = arith.constant 1 : index
    %c0_27 = arith.constant 0 : index
    %c0_28 = arith.constant 0 : index
    %18 = vector.load %arg3[%c1_26, %c0_27, %c0_28] : memref<2x8x32xf32, #tpu.memory_space<vmem>>, vector<1x8x32xf32>
    %19 = vector.shape_cast %18 : vector<1x8x32xf32> to vector<8x32xf32>
    %c0_29 = arith.constant 0 : index
    %c0_30 = arith.constant 0 : index
    %20 = vector.load %arg4[%c0_29, %c0_30] : memref<8x32xf32, #tpu.memory_space<vmem>>, vector<8x32xf32>
    %21 = vector.extract_strided_slice %5 {offsets = [0, 0], sizes = [8, 128], strides = [1, 1]} : vector<64x128xf32> to vector<8x128xf32>
    %22 = tpu.concatenate %20, %13 in 1 : vector<8x32xf32>, vector<8x32xf32> -> vector<8x64xf32>
    %cst_31 = arith.constant dense<0.000000e+00> : vector<8x128xf32>
    %23 = tpu.matmul %22, %7, %cst_31 {dimension_numbers = #tpu.dot_dimension_numbers<[1], [0], [0], [1], [0, 0, 1, 1], [], []>} : vector<8x64xf32>, vector<64x128xf32>, vector<8x128xf32> -> vector<8x128xf32>
    %24 = arith.addf %21, %23 : vector<8x128xf32>
    %25 = vector.extract_strided_slice %24 {offsets = [0, 0], sizes = [8, 32], strides = [1, 1]} : vector<8x128xf32> to vector<8x32xf32>
    %26 = arith.negf %25 : vector<8x32xf32>
    %27 = math.exp %26 : vector<8x32xf32>
    %cst_32 = arith.constant 1.000000e+00 : f32
    %28 = vector.broadcast %cst_32 : f32 to vector<8x32xf32>
    %29 = arith.addf %28, %27 : vector<8x32xf32>
    %30 = arith.divf %28, %29 : vector<8x32xf32>
    %31 = vector.extract_strided_slice %24 {offsets = [0, 32], sizes = [8, 32], strides = [1, 1]} : vector<8x128xf32> to vector<8x32xf32>
    %32 = arith.negf %31 : vector<8x32xf32>
    %33 = math.exp %32 : vector<8x32xf32>
    %cst_33 = arith.constant 1.000000e+00 : f32
    %34 = vector.broadcast %cst_33 : f32 to vector<8x32xf32>
    %35 = arith.addf %34, %33 : vector<8x32xf32>
    %36 = arith.divf %34, %35 : vector<8x32xf32>
    %37 = vector.extract_strided_slice %24 {offsets = [0, 64], sizes = [8, 32], strides = [1, 1]} : vector<8x128xf32> to vector<8x32xf32>
    %38 = math.tanh %37 : vector<8x32xf32>
    %39 = vector.extract_strided_slice %24 {offsets = [0, 96], sizes = [8, 32], strides = [1, 1]} : vector<8x128xf32> to vector<8x32xf32>
    %40 = arith.negf %39 : vector<8x32xf32>
    %41 = math.exp %40 : vector<8x32xf32>
    %cst_34 = arith.constant 1.000000e+00 : f32
    %42 = vector.broadcast %cst_34 : f32 to vector<8x32xf32>
    %43 = arith.addf %42, %41 : vector<8x32xf32>
    %44 = arith.divf %42, %43 : vector<8x32xf32>
    %45 = arith.mulf %36, %17 : vector<8x32xf32>
    %46 = arith.mulf %30, %38 : vector<8x32xf32>
    %47 = arith.addf %45, %46 : vector<8x32xf32>
    %48 = math.tanh %47 : vector<8x32xf32>
    %49 = arith.mulf %44, %48 : vector<8x32xf32>
    %50 = tpu.concatenate %49, %15 in 1 : vector<8x32xf32>, vector<8x32xf32> -> vector<8x64xf32>
    %cst_35 = arith.constant dense<0.000000e+00> : vector<8x128xf32>
    %51 = tpu.matmul %50, %8, %cst_35 {dimension_numbers = #tpu.dot_dimension_numbers<[1], [0], [0], [1], [0, 0, 1, 1], [], []>} : vector<8x64xf32>, vector<64x128xf32>, vector<8x128xf32> -> vector<8x128xf32>
    %52 = vector.broadcast %9 : vector<1x128xf32> to vector<8x128xf32>
    %53 = arith.addf %51, %52 : vector<8x128xf32>
    %54 = vector.extract_strided_slice %53 {offsets = [0, 0], sizes = [8, 32], strides = [1, 1]} : vector<8x128xf32> to vector<8x32xf32>
    %55 = arith.negf %54 : vector<8x32xf32>
    %56 = math.exp %55 : vector<8x32xf32>
    %cst_36 = arith.constant 1.000000e+00 : f32
    %57 = vector.broadcast %cst_36 : f32 to vector<8x32xf32>
    %58 = arith.addf %57, %56 : vector<8x32xf32>
    %59 = arith.divf %57, %58 : vector<8x32xf32>
    %60 = vector.extract_strided_slice %53 {offsets = [0, 32], sizes = [8, 32], strides = [1, 1]} : vector<8x128xf32> to vector<8x32xf32>
    %61 = arith.negf %60 : vector<8x32xf32>
    %62 = math.exp %61 : vector<8x32xf32>
    %cst_37 = arith.constant 1.000000e+00 : f32
    %63 = vector.broadcast %cst_37 : f32 to vector<8x32xf32>
    %64 = arith.addf %63, %62 : vector<8x32xf32>
    %65 = arith.divf %63, %64 : vector<8x32xf32>
    %66 = vector.extract_strided_slice %53 {offsets = [0, 64], sizes = [8, 32], strides = [1, 1]} : vector<8x128xf32> to vector<8x32xf32>
    %67 = math.tanh %66 : vector<8x32xf32>
    %68 = vector.extract_strided_slice %53 {offsets = [0, 96], sizes = [8, 32], strides = [1, 1]} : vector<8x128xf32> to vector<8x32xf32>
    %69 = arith.negf %68 : vector<8x32xf32>
    %70 = math.exp %69 : vector<8x32xf32>
    %cst_38 = arith.constant 1.000000e+00 : f32
    %71 = vector.broadcast %cst_38 : f32 to vector<8x32xf32>
    %72 = arith.addf %71, %70 : vector<8x32xf32>
    %73 = arith.divf %71, %72 : vector<8x32xf32>
    %74 = arith.mulf %65, %19 : vector<8x32xf32>
    %75 = arith.mulf %59, %67 : vector<8x32xf32>
    %76 = arith.addf %74, %75 : vector<8x32xf32>
    %77 = math.tanh %76 : vector<8x32xf32>
    %78 = arith.mulf %73, %77 : vector<8x32xf32>
    %cst_39 = arith.constant dense<0.000000e+00> : vector<8x32xf32>
    %79 = tpu.matmul %78, %10, %cst_39 {dimension_numbers = #tpu.dot_dimension_numbers<[1], [0], [0], [1], [0, 0, 1, 1], [], []>} : vector<8x32xf32>, vector<32x32xf32>, vector<8x32xf32> -> vector<8x32xf32>
    %80 = vector.shape_cast %79 : vector<8x32xf32> to vector<8x1x32xf32>
    %81 = vector.broadcast %80 : vector<8x1x32xf32> to vector<8x16x32xf32>
    %82 = arith.mulf %6, %81 : vector<8x16x32xf32>
    %cst_40 = arith.constant dense<0.000000e+00> : vector<8x16xf32>
    %83 = vector.multi_reduction <add>, %82, %cst_40 [2] : vector<8x16x32xf32> to vector<8x16xf32>
    %cst_41 = arith.constant dense<0xFF800000> : vector<8xf32>
    %84 = vector.multi_reduction <maximumf>, %83, %cst_41 [1] : vector<8x16xf32> to vector<8xf32>
    %85 = vector.shape_cast %84 : vector<8xf32> to vector<8x1xf32>
    %86 = vector.broadcast %85 : vector<8x1xf32> to vector<8x16xf32>
    %87 = arith.subf %83, %86 : vector<8x16xf32>
    %88 = math.exp %87 : vector<8x16xf32>
    %cst_42 = arith.constant dense<0.000000e+00> : vector<8xf32>
    %89 = vector.multi_reduction <add>, %88, %cst_42 [1] : vector<8x16xf32> to vector<8xf32>
    %90 = vector.shape_cast %89 : vector<8xf32> to vector<8x1xf32>
    %91 = tpu.reciprocal %90 {approx = true} : vector<8x1xf32> -> vector<8x1xf32>
    %92 = arith.mulf %90, %91 : vector<8x1xf32>
    %cst_43 = arith.constant 2.000000e+00 : f32
    %93 = vector.broadcast %cst_43 : f32 to vector<8x1xf32>
    %94 = arith.subf %93, %92 : vector<8x1xf32>
    %95 = arith.mulf %91, %94 : vector<8x1xf32>
    %96 = vector.broadcast %95 : vector<8x1xf32> to vector<8x16xf32>
    %97 = arith.mulf %88, %96 : vector<8x16xf32>
    %98 = vector.shape_cast %97 : vector<8x16xf32> to vector<8x16x1xf32>
    %99 = vector.broadcast %98 : vector<8x16x1xf32> to vector<8x16x32xf32>
    %100 = arith.mulf %99, %6 : vector<8x16x32xf32>
    %cst_44 = arith.constant dense<0.000000e+00> : vector<8x32xf32>
    %101 = vector.multi_reduction <add>, %100, %cst_44 [1] : vector<8x16x32xf32> to vector<8x32xf32>
    %102 = tpu.concatenate %101, %78 in 1 : vector<8x32xf32>, vector<8x32xf32> -> vector<8x64xf32>
    %cst_45 = arith.constant dense<0.000000e+00> : vector<8x32xf32>
    %103 = tpu.matmul %102, %11, %cst_45 {dimension_numbers = #tpu.dot_dimension_numbers<[1], [0], [0], [1], [0, 0, 1, 1], [], []>} : vector<8x64xf32>, vector<64x32xf32>, vector<8x32xf32> -> vector<8x32xf32>
    %104 = math.tanh %103 : vector<8x32xf32>
    %105 = vector.extract_strided_slice %5 {offsets = [8, 0], sizes = [8, 128], strides = [1, 1]} : vector<64x128xf32> to vector<8x128xf32>
    %106 = tpu.concatenate %104, %49 in 1 : vector<8x32xf32>, vector<8x32xf32> -> vector<8x64xf32>
    %cst_46 = arith.constant dense<0.000000e+00> : vector<8x128xf32>
    %107 = tpu.matmul %106, %7, %cst_46 {dimension_numbers = #tpu.dot_dimension_numbers<[1], [0], [0], [1], [0, 0, 1, 1], [], []>} : vector<8x64xf32>, vector<64x128xf32>, vector<8x128xf32> -> vector<8x128xf32>
    %108 = arith.addf %105, %107 : vector<8x128xf32>
    %109 = vector.extract_strided_slice %108 {offsets = [0, 0], sizes = [8, 32], strides = [1, 1]} : vector<8x128xf32> to vector<8x32xf32>
    %110 = arith.negf %109 : vector<8x32xf32>
    %111 = math.exp %110 : vector<8x32xf32>
    %cst_47 = arith.constant 1.000000e+00 : f32
    %112 = vector.broadcast %cst_47 : f32 to vector<8x32xf32>
    %113 = arith.addf %112, %111 : vector<8x32xf32>
    %114 = arith.divf %112, %113 : vector<8x32xf32>
    %115 = vector.extract_strided_slice %108 {offsets = [0, 32], sizes = [8, 32], strides = [1, 1]} : vector<8x128xf32> to vector<8x32xf32>
    %116 = arith.negf %115 : vector<8x32xf32>
    %117 = math.exp %116 : vector<8x32xf32>
    %cst_48 = arith.constant 1.000000e+00 : f32
    %118 = vector.broadcast %cst_48 : f32 to vector<8x32xf32>
    %119 = arith.addf %118, %117 : vector<8x32xf32>
    %120 = arith.divf %118, %119 : vector<8x32xf32>
    %121 = vector.extract_strided_slice %108 {offsets = [0, 64], sizes = [8, 32], strides = [1, 1]} : vector<8x128xf32> to vector<8x32xf32>
    %122 = math.tanh %121 : vector<8x32xf32>
    %123 = vector.extract_strided_slice %108 {offsets = [0, 96], sizes = [8, 32], strides = [1, 1]} : vector<8x128xf32> to vector<8x32xf32>
    %124 = arith.negf %123 : vector<8x32xf32>
    %125 = math.exp %124 : vector<8x32xf32>
    %cst_49 = arith.constant 1.000000e+00 : f32
    %126 = vector.broadcast %cst_49 : f32 to vector<8x32xf32>
    %127 = arith.addf %126, %125 : vector<8x32xf32>
    %128 = arith.divf %126, %127 : vector<8x32xf32>
    %129 = arith.mulf %120, %47 : vector<8x32xf32>
    %130 = arith.mulf %114, %122 : vector<8x32xf32>
    %131 = arith.addf %129, %130 : vector<8x32xf32>
    %132 = math.tanh %131 : vector<8x32xf32>
    %133 = arith.mulf %128, %132 : vector<8x32xf32>
    %134 = tpu.concatenate %133, %78 in 1 : vector<8x32xf32>, vector<8x32xf32> -> vector<8x64xf32>
    %cst_50 = arith.constant dense<0.000000e+00> : vector<8x128xf32>
    %135 = tpu.matmul %134, %8, %cst_50 {dimension_numbers = #tpu.dot_dimension_numbers<[1], [0], [0], [1], [0, 0, 1, 1], [], []>} : vector<8x64xf32>, vector<64x128xf32>, vector<8x128xf32> -> vector<8x128xf32>
    %136 = vector.broadcast %9 : vector<1x128xf32> to vector<8x128xf32>
    %137 = arith.addf %135, %136 : vector<8x128xf32>
    %138 = vector.extract_strided_slice %137 {offsets = [0, 0], sizes = [8, 32], strides = [1, 1]} : vector<8x128xf32> to vector<8x32xf32>
    %139 = arith.negf %138 : vector<8x32xf32>
    %140 = math.exp %139 : vector<8x32xf32>
    %cst_51 = arith.constant 1.000000e+00 : f32
    %141 = vector.broadcast %cst_51 : f32 to vector<8x32xf32>
    %142 = arith.addf %141, %140 : vector<8x32xf32>
    %143 = arith.divf %141, %142 : vector<8x32xf32>
    %144 = vector.extract_strided_slice %137 {offsets = [0, 32], sizes = [8, 32], strides = [1, 1]} : vector<8x128xf32> to vector<8x32xf32>
    %145 = arith.negf %144 : vector<8x32xf32>
    %146 = math.exp %145 : vector<8x32xf32>
    %cst_52 = arith.constant 1.000000e+00 : f32
    %147 = vector.broadcast %cst_52 : f32 to vector<8x32xf32>
    %148 = arith.addf %147, %146 : vector<8x32xf32>
    %149 = arith.divf %147, %148 : vector<8x32xf32>
    %150 = vector.extract_strided_slice %137 {offsets = [0, 64], sizes = [8, 32], strides = [1, 1]} : vector<8x128xf32> to vector<8x32xf32>
    %151 = math.tanh %150 : vector<8x32xf32>
    %152 = vector.extract_strided_slice %137 {offsets = [0, 96], sizes = [8, 32], strides = [1, 1]} : vector<8x128xf32> to vector<8x32xf32>
    %153 = arith.negf %152 : vector<8x32xf32>
    %154 = math.exp %153 : vector<8x32xf32>
    %cst_53 = arith.constant 1.000000e+00 : f32
    %155 = vector.broadcast %cst_53 : f32 to vector<8x32xf32>
    %156 = arith.addf %155, %154 : vector<8x32xf32>
    %157 = arith.divf %155, %156 : vector<8x32xf32>
    %158 = arith.mulf %149, %76 : vector<8x32xf32>
    %159 = arith.mulf %143, %151 : vector<8x32xf32>
    %160 = arith.addf %158, %159 : vector<8x32xf32>
    %161 = math.tanh %160 : vector<8x32xf32>
    %162 = arith.mulf %157, %161 : vector<8x32xf32>
    %cst_54 = arith.constant dense<0.000000e+00> : vector<8x32xf32>
    %163 = tpu.matmul %162, %10, %cst_54 {dimension_numbers = #tpu.dot_dimension_numbers<[1], [0], [0], [1], [0, 0, 1, 1], [], []>} : vector<8x32xf32>, vector<32x32xf32>, vector<8x32xf32> -> vector<8x32xf32>
    %164 = vector.shape_cast %163 : vector<8x32xf32> to vector<8x1x32xf32>
    %165 = vector.broadcast %164 : vector<8x1x32xf32> to vector<8x16x32xf32>
    %166 = arith.mulf %6, %165 : vector<8x16x32xf32>
    %cst_55 = arith.constant dense<0.000000e+00> : vector<8x16xf32>
    %167 = vector.multi_reduction <add>, %166, %cst_55 [2] : vector<8x16x32xf32> to vector<8x16xf32>
    %cst_56 = arith.constant dense<0xFF800000> : vector<8xf32>
    %168 = vector.multi_reduction <maximumf>, %167, %cst_56 [1] : vector<8x16xf32> to vector<8xf32>
    %169 = vector.shape_cast %168 : vector<8xf32> to vector<8x1xf32>
    %170 = vector.broadcast %169 : vector<8x1xf32> to vector<8x16xf32>
    %171 = arith.subf %167, %170 : vector<8x16xf32>
    %172 = math.exp %171 : vector<8x16xf32>
    %cst_57 = arith.constant dense<0.000000e+00> : vector<8xf32>
    %173 = vector.multi_reduction <add>, %172, %cst_57 [1] : vector<8x16xf32> to vector<8xf32>
    %174 = vector.shape_cast %173 : vector<8xf32> to vector<8x1xf32>
    %175 = tpu.reciprocal %174 {approx = true} : vector<8x1xf32> -> vector<8x1xf32>
    %176 = arith.mulf %174, %175 : vector<8x1xf32>
    %cst_58 = arith.constant 2.000000e+00 : f32
    %177 = vector.broadcast %cst_58 : f32 to vector<8x1xf32>
    %178 = arith.subf %177, %176 : vector<8x1xf32>
    %179 = arith.mulf %175, %178 : vector<8x1xf32>
    %180 = vector.broadcast %179 : vector<8x1xf32> to vector<8x16xf32>
    %181 = arith.mulf %172, %180 : vector<8x16xf32>
    %182 = vector.shape_cast %181 : vector<8x16xf32> to vector<8x16x1xf32>
    %183 = vector.broadcast %182 : vector<8x16x1xf32> to vector<8x16x32xf32>
    %184 = arith.mulf %183, %6 : vector<8x16x32xf32>
    %cst_59 = arith.constant dense<0.000000e+00> : vector<8x32xf32>
    %185 = vector.multi_reduction <add>, %184, %cst_59 [1] : vector<8x16x32xf32> to vector<8x32xf32>
    %186 = tpu.concatenate %185, %162 in 1 : vector<8x32xf32>, vector<8x32xf32> -> vector<8x64xf32>
    %cst_60 = arith.constant dense<0.000000e+00> : vector<8x32xf32>
    %187 = tpu.matmul %186, %11, %cst_60 {dimension_numbers = #tpu.dot_dimension_numbers<[1], [0], [0], [1], [0, 0, 1, 1], [], []>} : vector<8x64xf32>, vector<64x32xf32>, vector<8x32xf32> -> vector<8x32xf32>
    %188 = math.tanh %187 : vector<8x32xf32>
    %189 = vector.extract_strided_slice %5 {offsets = [16, 0], sizes = [8, 128], strides = [1, 1]} : vector<64x128xf32> to vector<8x128xf32>
    %190 = tpu.concatenate %188, %133 in 1 : vector<8x32xf32>, vector<8x32xf32> -> vector<8x64xf32>
    %cst_61 = arith.constant dense<0.000000e+00> : vector<8x128xf32>
    %191 = tpu.matmul %190, %7, %cst_61 {dimension_numbers = #tpu.dot_dimension_numbers<[1], [0], [0], [1], [0, 0, 1, 1], [], []>} : vector<8x64xf32>, vector<64x128xf32>, vector<8x128xf32> -> vector<8x128xf32>
    %192 = arith.addf %189, %191 : vector<8x128xf32>
    %193 = vector.extract_strided_slice %192 {offsets = [0, 0], sizes = [8, 32], strides = [1, 1]} : vector<8x128xf32> to vector<8x32xf32>
    %194 = arith.negf %193 : vector<8x32xf32>
    %195 = math.exp %194 : vector<8x32xf32>
    %cst_62 = arith.constant 1.000000e+00 : f32
    %196 = vector.broadcast %cst_62 : f32 to vector<8x32xf32>
    %197 = arith.addf %196, %195 : vector<8x32xf32>
    %198 = arith.divf %196, %197 : vector<8x32xf32>
    %199 = vector.extract_strided_slice %192 {offsets = [0, 32], sizes = [8, 32], strides = [1, 1]} : vector<8x128xf32> to vector<8x32xf32>
    %200 = arith.negf %199 : vector<8x32xf32>
    %201 = math.exp %200 : vector<8x32xf32>
    %cst_63 = arith.constant 1.000000e+00 : f32
    %202 = vector.broadcast %cst_63 : f32 to vector<8x32xf32>
    %203 = arith.addf %202, %201 : vector<8x32xf32>
    %204 = arith.divf %202, %203 : vector<8x32xf32>
    %205 = vector.extract_strided_slice %192 {offsets = [0, 64], sizes = [8, 32], strides = [1, 1]} : vector<8x128xf32> to vector<8x32xf32>
    %206 = math.tanh %205 : vector<8x32xf32>
    %207 = vector.extract_strided_slice %192 {offsets = [0, 96], sizes = [8, 32], strides = [1, 1]} : vector<8x128xf32> to vector<8x32xf32>
    %208 = arith.negf %207 : vector<8x32xf32>
    %209 = math.exp %208 : vector<8x32xf32>
    %cst_64 = arith.constant 1.000000e+00 : f32
    %210 = vector.broadcast %cst_64 : f32 to vector<8x32xf32>
    %211 = arith.addf %210, %209 : vector<8x32xf32>
    %212 = arith.divf %210, %211 : vector<8x32xf32>
    %213 = arith.mulf %204, %131 : vector<8x32xf32>
    %214 = arith.mulf %198, %206 : vector<8x32xf32>
    %215 = arith.addf %213, %214 : vector<8x32xf32>
    %216 = math.tanh %215 : vector<8x32xf32>
    %217 = arith.mulf %212, %216 : vector<8x32xf32>
    %218 = tpu.concatenate %217, %162 in 1 : vector<8x32xf32>, vector<8x32xf32> -> vector<8x64xf32>
    %cst_65 = arith.constant dense<0.000000e+00> : vector<8x128xf32>
    %219 = tpu.matmul %218, %8, %cst_65 {dimension_numbers = #tpu.dot_dimension_numbers<[1], [0], [0], [1], [0, 0, 1, 1], [], []>} : vector<8x64xf32>, vector<64x128xf32>, vector<8x128xf32> -> vector<8x128xf32>
    %220 = vector.broadcast %9 : vector<1x128xf32> to vector<8x128xf32>
    %221 = arith.addf %219, %220 : vector<8x128xf32>
    %222 = vector.extract_strided_slice %221 {offsets = [0, 0], sizes = [8, 32], strides = [1, 1]} : vector<8x128xf32> to vector<8x32xf32>
    %223 = arith.negf %222 : vector<8x32xf32>
    %224 = math.exp %223 : vector<8x32xf32>
    %cst_66 = arith.constant 1.000000e+00 : f32
    %225 = vector.broadcast %cst_66 : f32 to vector<8x32xf32>
    %226 = arith.addf %225, %224 : vector<8x32xf32>
    %227 = arith.divf %225, %226 : vector<8x32xf32>
    %228 = vector.extract_strided_slice %221 {offsets = [0, 32], sizes = [8, 32], strides = [1, 1]} : vector<8x128xf32> to vector<8x32xf32>
    %229 = arith.negf %228 : vector<8x32xf32>
    %230 = math.exp %229 : vector<8x32xf32>
    %cst_67 = arith.constant 1.000000e+00 : f32
    %231 = vector.broadcast %cst_67 : f32 to vector<8x32xf32>
    %232 = arith.addf %231, %230 : vector<8x32xf32>
    %233 = arith.divf %231, %232 : vector<8x32xf32>
    %234 = vector.extract_strided_slice %221 {offsets = [0, 64], sizes = [8, 32], strides = [1, 1]} : vector<8x128xf32> to vector<8x32xf32>
    %235 = math.tanh %234 : vector<8x32xf32>
    %236 = vector.extract_strided_slice %221 {offsets = [0, 96], sizes = [8, 32], strides = [1, 1]} : vector<8x128xf32> to vector<8x32xf32>
    %237 = arith.negf %236 : vector<8x32xf32>
    %238 = math.exp %237 : vector<8x32xf32>
    %cst_68 = arith.constant 1.000000e+00 : f32
    %239 = vector.broadcast %cst_68 : f32 to vector<8x32xf32>
    %240 = arith.addf %239, %238 : vector<8x32xf32>
    %241 = arith.divf %239, %240 : vector<8x32xf32>
    %242 = arith.mulf %233, %160 : vector<8x32xf32>
    %243 = arith.mulf %227, %235 : vector<8x32xf32>
    %244 = arith.addf %242, %243 : vector<8x32xf32>
    %245 = math.tanh %244 : vector<8x32xf32>
    %246 = arith.mulf %241, %245 : vector<8x32xf32>
    %cst_69 = arith.constant dense<0.000000e+00> : vector<8x32xf32>
    %247 = tpu.matmul %246, %10, %cst_69 {dimension_numbers = #tpu.dot_dimension_numbers<[1], [0], [0], [1], [0, 0, 1, 1], [], []>} : vector<8x32xf32>, vector<32x32xf32>, vector<8x32xf32> -> vector<8x32xf32>
    %248 = vector.shape_cast %247 : vector<8x32xf32> to vector<8x1x32xf32>
    %249 = vector.broadcast %248 : vector<8x1x32xf32> to vector<8x16x32xf32>
    %250 = arith.mulf %6, %249 : vector<8x16x32xf32>
    %cst_70 = arith.constant dense<0.000000e+00> : vector<8x16xf32>
    %251 = vector.multi_reduction <add>, %250, %cst_70 [2] : vector<8x16x32xf32> to vector<8x16xf32>
    %cst_71 = arith.constant dense<0xFF800000> : vector<8xf32>
    %252 = vector.multi_reduction <maximumf>, %251, %cst_71 [1] : vector<8x16xf32> to vector<8xf32>
    %253 = vector.shape_cast %252 : vector<8xf32> to vector<8x1xf32>
    %254 = vector.broadcast %253 : vector<8x1xf32> to vector<8x16xf32>
    %255 = arith.subf %251, %254 : vector<8x16xf32>
    %256 = math.exp %255 : vector<8x16xf32>
    %cst_72 = arith.constant dense<0.000000e+00> : vector<8xf32>
    %257 = vector.multi_reduction <add>, %256, %cst_72 [1] : vector<8x16xf32> to vector<8xf32>
    %258 = vector.shape_cast %257 : vector<8xf32> to vector<8x1xf32>
    %259 = tpu.reciprocal %258 {approx = true} : vector<8x1xf32> -> vector<8x1xf32>
    %260 = arith.mulf %258, %259 : vector<8x1xf32>
    %cst_73 = arith.constant 2.000000e+00 : f32
    %261 = vector.broadcast %cst_73 : f32 to vector<8x1xf32>
    %262 = arith.subf %261, %260 : vector<8x1xf32>
    %263 = arith.mulf %259, %262 : vector<8x1xf32>
    %264 = vector.broadcast %263 : vector<8x1xf32> to vector<8x16xf32>
    %265 = arith.mulf %256, %264 : vector<8x16xf32>
    %266 = vector.shape_cast %265 : vector<8x16xf32> to vector<8x16x1xf32>
    %267 = vector.broadcast %266 : vector<8x16x1xf32> to vector<8x16x32xf32>
    %268 = arith.mulf %267, %6 : vector<8x16x32xf32>
    %cst_74 = arith.constant dense<0.000000e+00> : vector<8x32xf32>
    %269 = vector.multi_reduction <add>, %268, %cst_74 [1] : vector<8x16x32xf32> to vector<8x32xf32>
    %270 = tpu.concatenate %269, %246 in 1 : vector<8x32xf32>, vector<8x32xf32> -> vector<8x64xf32>
    %cst_75 = arith.constant dense<0.000000e+00> : vector<8x32xf32>
    %271 = tpu.matmul %270, %11, %cst_75 {dimension_numbers = #tpu.dot_dimension_numbers<[1], [0], [0], [1], [0, 0, 1, 1], [], []>} : vector<8x64xf32>, vector<64x32xf32>, vector<8x32xf32> -> vector<8x32xf32>
    %272 = math.tanh %271 : vector<8x32xf32>
    %273 = vector.extract_strided_slice %5 {offsets = [24, 0], sizes = [8, 128], strides = [1, 1]} : vector<64x128xf32> to vector<8x128xf32>
    %274 = tpu.concatenate %272, %217 in 1 : vector<8x32xf32>, vector<8x32xf32> -> vector<8x64xf32>
    %cst_76 = arith.constant dense<0.000000e+00> : vector<8x128xf32>
    %275 = tpu.matmul %274, %7, %cst_76 {dimension_numbers = #tpu.dot_dimension_numbers<[1], [0], [0], [1], [0, 0, 1, 1], [], []>} : vector<8x64xf32>, vector<64x128xf32>, vector<8x128xf32> -> vector<8x128xf32>
    %276 = arith.addf %273, %275 : vector<8x128xf32>
    %277 = vector.extract_strided_slice %276 {offsets = [0, 0], sizes = [8, 32], strides = [1, 1]} : vector<8x128xf32> to vector<8x32xf32>
    %278 = arith.negf %277 : vector<8x32xf32>
    %279 = math.exp %278 : vector<8x32xf32>
    %cst_77 = arith.constant 1.000000e+00 : f32
    %280 = vector.broadcast %cst_77 : f32 to vector<8x32xf32>
    %281 = arith.addf %280, %279 : vector<8x32xf32>
    %282 = arith.divf %280, %281 : vector<8x32xf32>
    %283 = vector.extract_strided_slice %276 {offsets = [0, 32], sizes = [8, 32], strides = [1, 1]} : vector<8x128xf32> to vector<8x32xf32>
    %284 = arith.negf %283 : vector<8x32xf32>
    %285 = math.exp %284 : vector<8x32xf32>
    %cst_78 = arith.constant 1.000000e+00 : f32
    %286 = vector.broadcast %cst_78 : f32 to vector<8x32xf32>
    %287 = arith.addf %286, %285 : vector<8x32xf32>
    %288 = arith.divf %286, %287 : vector<8x32xf32>
    %289 = vector.extract_strided_slice %276 {offsets = [0, 64], sizes = [8, 32], strides = [1, 1]} : vector<8x128xf32> to vector<8x32xf32>
    %290 = math.tanh %289 : vector<8x32xf32>
    %291 = vector.extract_strided_slice %276 {offsets = [0, 96], sizes = [8, 32], strides = [1, 1]} : vector<8x128xf32> to vector<8x32xf32>
    %292 = arith.negf %291 : vector<8x32xf32>
    %293 = math.exp %292 : vector<8x32xf32>
    %cst_79 = arith.constant 1.000000e+00 : f32
    %294 = vector.broadcast %cst_79 : f32 to vector<8x32xf32>
    %295 = arith.addf %294, %293 : vector<8x32xf32>
    %296 = arith.divf %294, %295 : vector<8x32xf32>
    %297 = arith.mulf %288, %215 : vector<8x32xf32>
    %298 = arith.mulf %282, %290 : vector<8x32xf32>
    %299 = arith.addf %297, %298 : vector<8x32xf32>
    %300 = math.tanh %299 : vector<8x32xf32>
    %301 = arith.mulf %296, %300 : vector<8x32xf32>
    %302 = tpu.concatenate %301, %246 in 1 : vector<8x32xf32>, vector<8x32xf32> -> vector<8x64xf32>
    %cst_80 = arith.constant dense<0.000000e+00> : vector<8x128xf32>
    %303 = tpu.matmul %302, %8, %cst_80 {dimension_numbers = #tpu.dot_dimension_numbers<[1], [0], [0], [1], [0, 0, 1, 1], [], []>} : vector<8x64xf32>, vector<64x128xf32>, vector<8x128xf32> -> vector<8x128xf32>
    %304 = vector.broadcast %9 : vector<1x128xf32> to vector<8x128xf32>
    %305 = arith.addf %303, %304 : vector<8x128xf32>
    %306 = vector.extract_strided_slice %305 {offsets = [0, 0], sizes = [8, 32], strides = [1, 1]} : vector<8x128xf32> to vector<8x32xf32>
    %307 = arith.negf %306 : vector<8x32xf32>
    %308 = math.exp %307 : vector<8x32xf32>
    %cst_81 = arith.constant 1.000000e+00 : f32
    %309 = vector.broadcast %cst_81 : f32 to vector<8x32xf32>
    %310 = arith.addf %309, %308 : vector<8x32xf32>
    %311 = arith.divf %309, %310 : vector<8x32xf32>
    %312 = vector.extract_strided_slice %305 {offsets = [0, 32], sizes = [8, 32], strides = [1, 1]} : vector<8x128xf32> to vector<8x32xf32>
    %313 = arith.negf %312 : vector<8x32xf32>
    %314 = math.exp %313 : vector<8x32xf32>
    %cst_82 = arith.constant 1.000000e+00 : f32
    %315 = vector.broadcast %cst_82 : f32 to vector<8x32xf32>
    %316 = arith.addf %315, %314 : vector<8x32xf32>
    %317 = arith.divf %315, %316 : vector<8x32xf32>
    %318 = vector.extract_strided_slice %305 {offsets = [0, 64], sizes = [8, 32], strides = [1, 1]} : vector<8x128xf32> to vector<8x32xf32>
    %319 = math.tanh %318 : vector<8x32xf32>
    %320 = vector.extract_strided_slice %305 {offsets = [0, 96], sizes = [8, 32], strides = [1, 1]} : vector<8x128xf32> to vector<8x32xf32>
    %321 = arith.negf %320 : vector<8x32xf32>
    %322 = math.exp %321 : vector<8x32xf32>
    %cst_83 = arith.constant 1.000000e+00 : f32
    %323 = vector.broadcast %cst_83 : f32 to vector<8x32xf32>
    %324 = arith.addf %323, %322 : vector<8x32xf32>
    %325 = arith.divf %323, %324 : vector<8x32xf32>
    %326 = arith.mulf %317, %244 : vector<8x32xf32>
    %327 = arith.mulf %311, %319 : vector<8x32xf32>
    %328 = arith.addf %326, %327 : vector<8x32xf32>
    %329 = math.tanh %328 : vector<8x32xf32>
    %330 = arith.mulf %325, %329 : vector<8x32xf32>
    %cst_84 = arith.constant dense<0.000000e+00> : vector<8x32xf32>
    %331 = tpu.matmul %330, %10, %cst_84 {dimension_numbers = #tpu.dot_dimension_numbers<[1], [0], [0], [1], [0, 0, 1, 1], [], []>} : vector<8x32xf32>, vector<32x32xf32>, vector<8x32xf32> -> vector<8x32xf32>
    %332 = vector.shape_cast %331 : vector<8x32xf32> to vector<8x1x32xf32>
    %333 = vector.broadcast %332 : vector<8x1x32xf32> to vector<8x16x32xf32>
    %334 = arith.mulf %6, %333 : vector<8x16x32xf32>
    %cst_85 = arith.constant dense<0.000000e+00> : vector<8x16xf32>
    %335 = vector.multi_reduction <add>, %334, %cst_85 [2] : vector<8x16x32xf32> to vector<8x16xf32>
    %cst_86 = arith.constant dense<0xFF800000> : vector<8xf32>
    %336 = vector.multi_reduction <maximumf>, %335, %cst_86 [1] : vector<8x16xf32> to vector<8xf32>
    %337 = vector.shape_cast %336 : vector<8xf32> to vector<8x1xf32>
    %338 = vector.broadcast %337 : vector<8x1xf32> to vector<8x16xf32>
    %339 = arith.subf %335, %338 : vector<8x16xf32>
    %340 = math.exp %339 : vector<8x16xf32>
    %cst_87 = arith.constant dense<0.000000e+00> : vector<8xf32>
    %341 = vector.multi_reduction <add>, %340, %cst_87 [1] : vector<8x16xf32> to vector<8xf32>
    %342 = vector.shape_cast %341 : vector<8xf32> to vector<8x1xf32>
    %343 = tpu.reciprocal %342 {approx = true} : vector<8x1xf32> -> vector<8x1xf32>
    %344 = arith.mulf %342, %343 : vector<8x1xf32>
    %cst_88 = arith.constant 2.000000e+00 : f32
    %345 = vector.broadcast %cst_88 : f32 to vector<8x1xf32>
    %346 = arith.subf %345, %344 : vector<8x1xf32>
    %347 = arith.mulf %343, %346 : vector<8x1xf32>
    %348 = vector.broadcast %347 : vector<8x1xf32> to vector<8x16xf32>
    %349 = arith.mulf %340, %348 : vector<8x16xf32>
    %350 = vector.shape_cast %349 : vector<8x16xf32> to vector<8x16x1xf32>
    %351 = vector.broadcast %350 : vector<8x16x1xf32> to vector<8x16x32xf32>
    %352 = arith.mulf %351, %6 : vector<8x16x32xf32>
    %cst_89 = arith.constant dense<0.000000e+00> : vector<8x32xf32>
    %353 = vector.multi_reduction <add>, %352, %cst_89 [1] : vector<8x16x32xf32> to vector<8x32xf32>
    %354 = tpu.concatenate %353, %330 in 1 : vector<8x32xf32>, vector<8x32xf32> -> vector<8x64xf32>
    %cst_90 = arith.constant dense<0.000000e+00> : vector<8x32xf32>
    %355 = tpu.matmul %354, %11, %cst_90 {dimension_numbers = #tpu.dot_dimension_numbers<[1], [0], [0], [1], [0, 0, 1, 1], [], []>} : vector<8x64xf32>, vector<64x32xf32>, vector<8x32xf32> -> vector<8x32xf32>
    %356 = math.tanh %355 : vector<8x32xf32>
    %357 = vector.extract_strided_slice %5 {offsets = [32, 0], sizes = [8, 128], strides = [1, 1]} : vector<64x128xf32> to vector<8x128xf32>
    %358 = tpu.concatenate %356, %301 in 1 : vector<8x32xf32>, vector<8x32xf32> -> vector<8x64xf32>
    %cst_91 = arith.constant dense<0.000000e+00> : vector<8x128xf32>
    %359 = tpu.matmul %358, %7, %cst_91 {dimension_numbers = #tpu.dot_dimension_numbers<[1], [0], [0], [1], [0, 0, 1, 1], [], []>} : vector<8x64xf32>, vector<64x128xf32>, vector<8x128xf32> -> vector<8x128xf32>
    %360 = arith.addf %357, %359 : vector<8x128xf32>
    %361 = vector.extract_strided_slice %360 {offsets = [0, 0], sizes = [8, 32], strides = [1, 1]} : vector<8x128xf32> to vector<8x32xf32>
    %362 = arith.negf %361 : vector<8x32xf32>
    %363 = math.exp %362 : vector<8x32xf32>
    %cst_92 = arith.constant 1.000000e+00 : f32
    %364 = vector.broadcast %cst_92 : f32 to vector<8x32xf32>
    %365 = arith.addf %364, %363 : vector<8x32xf32>
    %366 = arith.divf %364, %365 : vector<8x32xf32>
    %367 = vector.extract_strided_slice %360 {offsets = [0, 32], sizes = [8, 32], strides = [1, 1]} : vector<8x128xf32> to vector<8x32xf32>
    %368 = arith.negf %367 : vector<8x32xf32>
    %369 = math.exp %368 : vector<8x32xf32>
    %cst_93 = arith.constant 1.000000e+00 : f32
    %370 = vector.broadcast %cst_93 : f32 to vector<8x32xf32>
    %371 = arith.addf %370, %369 : vector<8x32xf32>
    %372 = arith.divf %370, %371 : vector<8x32xf32>
    %373 = vector.extract_strided_slice %360 {offsets = [0, 64], sizes = [8, 32], strides = [1, 1]} : vector<8x128xf32> to vector<8x32xf32>
    %374 = math.tanh %373 : vector<8x32xf32>
    %375 = vector.extract_strided_slice %360 {offsets = [0, 96], sizes = [8, 32], strides = [1, 1]} : vector<8x128xf32> to vector<8x32xf32>
    %376 = arith.negf %375 : vector<8x32xf32>
    %377 = math.exp %376 : vector<8x32xf32>
    %cst_94 = arith.constant 1.000000e+00 : f32
    %378 = vector.broadcast %cst_94 : f32 to vector<8x32xf32>
    %379 = arith.addf %378, %377 : vector<8x32xf32>
    %380 = arith.divf %378, %379 : vector<8x32xf32>
    %381 = arith.mulf %372, %299 : vector<8x32xf32>
    %382 = arith.mulf %366, %374 : vector<8x32xf32>
    %383 = arith.addf %381, %382 : vector<8x32xf32>
    %384 = math.tanh %383 : vector<8x32xf32>
    %385 = arith.mulf %380, %384 : vector<8x32xf32>
    %386 = tpu.concatenate %385, %330 in 1 : vector<8x32xf32>, vector<8x32xf32> -> vector<8x64xf32>
    %cst_95 = arith.constant dense<0.000000e+00> : vector<8x128xf32>
    %387 = tpu.matmul %386, %8, %cst_95 {dimension_numbers = #tpu.dot_dimension_numbers<[1], [0], [0], [1], [0, 0, 1, 1], [], []>} : vector<8x64xf32>, vector<64x128xf32>, vector<8x128xf32> -> vector<8x128xf32>
    %388 = vector.broadcast %9 : vector<1x128xf32> to vector<8x128xf32>
    %389 = arith.addf %387, %388 : vector<8x128xf32>
    %390 = vector.extract_strided_slice %389 {offsets = [0, 0], sizes = [8, 32], strides = [1, 1]} : vector<8x128xf32> to vector<8x32xf32>
    %391 = arith.negf %390 : vector<8x32xf32>
    %392 = math.exp %391 : vector<8x32xf32>
    %cst_96 = arith.constant 1.000000e+00 : f32
    %393 = vector.broadcast %cst_96 : f32 to vector<8x32xf32>
    %394 = arith.addf %393, %392 : vector<8x32xf32>
    %395 = arith.divf %393, %394 : vector<8x32xf32>
    %396 = vector.extract_strided_slice %389 {offsets = [0, 32], sizes = [8, 32], strides = [1, 1]} : vector<8x128xf32> to vector<8x32xf32>
    %397 = arith.negf %396 : vector<8x32xf32>
    %398 = math.exp %397 : vector<8x32xf32>
    %cst_97 = arith.constant 1.000000e+00 : f32
    %399 = vector.broadcast %cst_97 : f32 to vector<8x32xf32>
    %400 = arith.addf %399, %398 : vector<8x32xf32>
    %401 = arith.divf %399, %400 : vector<8x32xf32>
    %402 = vector.extract_strided_slice %389 {offsets = [0, 64], sizes = [8, 32], strides = [1, 1]} : vector<8x128xf32> to vector<8x32xf32>
    %403 = math.tanh %402 : vector<8x32xf32>
    %404 = vector.extract_strided_slice %389 {offsets = [0, 96], sizes = [8, 32], strides = [1, 1]} : vector<8x128xf32> to vector<8x32xf32>
    %405 = arith.negf %404 : vector<8x32xf32>
    %406 = math.exp %405 : vector<8x32xf32>
    %cst_98 = arith.constant 1.000000e+00 : f32
    %407 = vector.broadcast %cst_98 : f32 to vector<8x32xf32>
    %408 = arith.addf %407, %406 : vector<8x32xf32>
    %409 = arith.divf %407, %408 : vector<8x32xf32>
    %410 = arith.mulf %401, %328 : vector<8x32xf32>
    %411 = arith.mulf %395, %403 : vector<8x32xf32>
    %412 = arith.addf %410, %411 : vector<8x32xf32>
    %413 = math.tanh %412 : vector<8x32xf32>
    %414 = arith.mulf %409, %413 : vector<8x32xf32>
    %cst_99 = arith.constant dense<0.000000e+00> : vector<8x32xf32>
    %415 = tpu.matmul %414, %10, %cst_99 {dimension_numbers = #tpu.dot_dimension_numbers<[1], [0], [0], [1], [0, 0, 1, 1], [], []>} : vector<8x32xf32>, vector<32x32xf32>, vector<8x32xf32> -> vector<8x32xf32>
    %416 = vector.shape_cast %415 : vector<8x32xf32> to vector<8x1x32xf32>
    %417 = vector.broadcast %416 : vector<8x1x32xf32> to vector<8x16x32xf32>
    %418 = arith.mulf %6, %417 : vector<8x16x32xf32>
    %cst_100 = arith.constant dense<0.000000e+00> : vector<8x16xf32>
    %419 = vector.multi_reduction <add>, %418, %cst_100 [2] : vector<8x16x32xf32> to vector<8x16xf32>
    %cst_101 = arith.constant dense<0xFF800000> : vector<8xf32>
    %420 = vector.multi_reduction <maximumf>, %419, %cst_101 [1] : vector<8x16xf32> to vector<8xf32>
    %421 = vector.shape_cast %420 : vector<8xf32> to vector<8x1xf32>
    %422 = vector.broadcast %421 : vector<8x1xf32> to vector<8x16xf32>
    %423 = arith.subf %419, %422 : vector<8x16xf32>
    %424 = math.exp %423 : vector<8x16xf32>
    %cst_102 = arith.constant dense<0.000000e+00> : vector<8xf32>
    %425 = vector.multi_reduction <add>, %424, %cst_102 [1] : vector<8x16xf32> to vector<8xf32>
    %426 = vector.shape_cast %425 : vector<8xf32> to vector<8x1xf32>
    %427 = tpu.reciprocal %426 {approx = true} : vector<8x1xf32> -> vector<8x1xf32>
    %428 = arith.mulf %426, %427 : vector<8x1xf32>
    %cst_103 = arith.constant 2.000000e+00 : f32
    %429 = vector.broadcast %cst_103 : f32 to vector<8x1xf32>
    %430 = arith.subf %429, %428 : vector<8x1xf32>
    %431 = arith.mulf %427, %430 : vector<8x1xf32>
    %432 = vector.broadcast %431 : vector<8x1xf32> to vector<8x16xf32>
    %433 = arith.mulf %424, %432 : vector<8x16xf32>
    %434 = vector.shape_cast %433 : vector<8x16xf32> to vector<8x16x1xf32>
    %435 = vector.broadcast %434 : vector<8x16x1xf32> to vector<8x16x32xf32>
    %436 = arith.mulf %435, %6 : vector<8x16x32xf32>
    %cst_104 = arith.constant dense<0.000000e+00> : vector<8x32xf32>
    %437 = vector.multi_reduction <add>, %436, %cst_104 [1] : vector<8x16x32xf32> to vector<8x32xf32>
    %438 = tpu.concatenate %437, %414 in 1 : vector<8x32xf32>, vector<8x32xf32> -> vector<8x64xf32>
    %cst_105 = arith.constant dense<0.000000e+00> : vector<8x32xf32>
    %439 = tpu.matmul %438, %11, %cst_105 {dimension_numbers = #tpu.dot_dimension_numbers<[1], [0], [0], [1], [0, 0, 1, 1], [], []>} : vector<8x64xf32>, vector<64x32xf32>, vector<8x32xf32> -> vector<8x32xf32>
    %440 = math.tanh %439 : vector<8x32xf32>
    %441 = vector.extract_strided_slice %5 {offsets = [40, 0], sizes = [8, 128], strides = [1, 1]} : vector<64x128xf32> to vector<8x128xf32>
    %442 = tpu.concatenate %440, %385 in 1 : vector<8x32xf32>, vector<8x32xf32> -> vector<8x64xf32>
    %cst_106 = arith.constant dense<0.000000e+00> : vector<8x128xf32>
    %443 = tpu.matmul %442, %7, %cst_106 {dimension_numbers = #tpu.dot_dimension_numbers<[1], [0], [0], [1], [0, 0, 1, 1], [], []>} : vector<8x64xf32>, vector<64x128xf32>, vector<8x128xf32> -> vector<8x128xf32>
    %444 = arith.addf %441, %443 : vector<8x128xf32>
    %445 = vector.extract_strided_slice %444 {offsets = [0, 0], sizes = [8, 32], strides = [1, 1]} : vector<8x128xf32> to vector<8x32xf32>
    %446 = arith.negf %445 : vector<8x32xf32>
    %447 = math.exp %446 : vector<8x32xf32>
    %cst_107 = arith.constant 1.000000e+00 : f32
    %448 = vector.broadcast %cst_107 : f32 to vector<8x32xf32>
    %449 = arith.addf %448, %447 : vector<8x32xf32>
    %450 = arith.divf %448, %449 : vector<8x32xf32>
    %451 = vector.extract_strided_slice %444 {offsets = [0, 32], sizes = [8, 32], strides = [1, 1]} : vector<8x128xf32> to vector<8x32xf32>
    %452 = arith.negf %451 : vector<8x32xf32>
    %453 = math.exp %452 : vector<8x32xf32>
    %cst_108 = arith.constant 1.000000e+00 : f32
    %454 = vector.broadcast %cst_108 : f32 to vector<8x32xf32>
    %455 = arith.addf %454, %453 : vector<8x32xf32>
    %456 = arith.divf %454, %455 : vector<8x32xf32>
    %457 = vector.extract_strided_slice %444 {offsets = [0, 64], sizes = [8, 32], strides = [1, 1]} : vector<8x128xf32> to vector<8x32xf32>
    %458 = math.tanh %457 : vector<8x32xf32>
    %459 = vector.extract_strided_slice %444 {offsets = [0, 96], sizes = [8, 32], strides = [1, 1]} : vector<8x128xf32> to vector<8x32xf32>
    %460 = arith.negf %459 : vector<8x32xf32>
    %461 = math.exp %460 : vector<8x32xf32>
    %cst_109 = arith.constant 1.000000e+00 : f32
    %462 = vector.broadcast %cst_109 : f32 to vector<8x32xf32>
    %463 = arith.addf %462, %461 : vector<8x32xf32>
    %464 = arith.divf %462, %463 : vector<8x32xf32>
    %465 = arith.mulf %456, %383 : vector<8x32xf32>
    %466 = arith.mulf %450, %458 : vector<8x32xf32>
    %467 = arith.addf %465, %466 : vector<8x32xf32>
    %468 = math.tanh %467 : vector<8x32xf32>
    %469 = arith.mulf %464, %468 : vector<8x32xf32>
    %470 = tpu.concatenate %469, %414 in 1 : vector<8x32xf32>, vector<8x32xf32> -> vector<8x64xf32>
    %cst_110 = arith.constant dense<0.000000e+00> : vector<8x128xf32>
    %471 = tpu.matmul %470, %8, %cst_110 {dimension_numbers = #tpu.dot_dimension_numbers<[1], [0], [0], [1], [0, 0, 1, 1], [], []>} : vector<8x64xf32>, vector<64x128xf32>, vector<8x128xf32> -> vector<8x128xf32>
    %472 = vector.broadcast %9 : vector<1x128xf32> to vector<8x128xf32>
    %473 = arith.addf %471, %472 : vector<8x128xf32>
    %474 = vector.extract_strided_slice %473 {offsets = [0, 0], sizes = [8, 32], strides = [1, 1]} : vector<8x128xf32> to vector<8x32xf32>
    %475 = arith.negf %474 : vector<8x32xf32>
    %476 = math.exp %475 : vector<8x32xf32>
    %cst_111 = arith.constant 1.000000e+00 : f32
    %477 = vector.broadcast %cst_111 : f32 to vector<8x32xf32>
    %478 = arith.addf %477, %476 : vector<8x32xf32>
    %479 = arith.divf %477, %478 : vector<8x32xf32>
    %480 = vector.extract_strided_slice %473 {offsets = [0, 32], sizes = [8, 32], strides = [1, 1]} : vector<8x128xf32> to vector<8x32xf32>
    %481 = arith.negf %480 : vector<8x32xf32>
    %482 = math.exp %481 : vector<8x32xf32>
    %cst_112 = arith.constant 1.000000e+00 : f32
    %483 = vector.broadcast %cst_112 : f32 to vector<8x32xf32>
    %484 = arith.addf %483, %482 : vector<8x32xf32>
    %485 = arith.divf %483, %484 : vector<8x32xf32>
    %486 = vector.extract_strided_slice %473 {offsets = [0, 64], sizes = [8, 32], strides = [1, 1]} : vector<8x128xf32> to vector<8x32xf32>
    %487 = math.tanh %486 : vector<8x32xf32>
    %488 = vector.extract_strided_slice %473 {offsets = [0, 96], sizes = [8, 32], strides = [1, 1]} : vector<8x128xf32> to vector<8x32xf32>
    %489 = arith.negf %488 : vector<8x32xf32>
    %490 = math.exp %489 : vector<8x32xf32>
    %cst_113 = arith.constant 1.000000e+00 : f32
    %491 = vector.broadcast %cst_113 : f32 to vector<8x32xf32>
    %492 = arith.addf %491, %490 : vector<8x32xf32>
    %493 = arith.divf %491, %492 : vector<8x32xf32>
    %494 = arith.mulf %485, %412 : vector<8x32xf32>
    %495 = arith.mulf %479, %487 : vector<8x32xf32>
    %496 = arith.addf %494, %495 : vector<8x32xf32>
    %497 = math.tanh %496 : vector<8x32xf32>
    %498 = arith.mulf %493, %497 : vector<8x32xf32>
    %cst_114 = arith.constant dense<0.000000e+00> : vector<8x32xf32>
    %499 = tpu.matmul %498, %10, %cst_114 {dimension_numbers = #tpu.dot_dimension_numbers<[1], [0], [0], [1], [0, 0, 1, 1], [], []>} : vector<8x32xf32>, vector<32x32xf32>, vector<8x32xf32> -> vector<8x32xf32>
    %500 = vector.shape_cast %499 : vector<8x32xf32> to vector<8x1x32xf32>
    %501 = vector.broadcast %500 : vector<8x1x32xf32> to vector<8x16x32xf32>
    %502 = arith.mulf %6, %501 : vector<8x16x32xf32>
    %cst_115 = arith.constant dense<0.000000e+00> : vector<8x16xf32>
    %503 = vector.multi_reduction <add>, %502, %cst_115 [2] : vector<8x16x32xf32> to vector<8x16xf32>
    %cst_116 = arith.constant dense<0xFF800000> : vector<8xf32>
    %504 = vector.multi_reduction <maximumf>, %503, %cst_116 [1] : vector<8x16xf32> to vector<8xf32>
    %505 = vector.shape_cast %504 : vector<8xf32> to vector<8x1xf32>
    %506 = vector.broadcast %505 : vector<8x1xf32> to vector<8x16xf32>
    %507 = arith.subf %503, %506 : vector<8x16xf32>
    %508 = math.exp %507 : vector<8x16xf32>
    %cst_117 = arith.constant dense<0.000000e+00> : vector<8xf32>
    %509 = vector.multi_reduction <add>, %508, %cst_117 [1] : vector<8x16xf32> to vector<8xf32>
    %510 = vector.shape_cast %509 : vector<8xf32> to vector<8x1xf32>
    %511 = tpu.reciprocal %510 {approx = true} : vector<8x1xf32> -> vector<8x1xf32>
    %512 = arith.mulf %510, %511 : vector<8x1xf32>
    %cst_118 = arith.constant 2.000000e+00 : f32
    %513 = vector.broadcast %cst_118 : f32 to vector<8x1xf32>
    %514 = arith.subf %513, %512 : vector<8x1xf32>
    %515 = arith.mulf %511, %514 : vector<8x1xf32>
    %516 = vector.broadcast %515 : vector<8x1xf32> to vector<8x16xf32>
    %517 = arith.mulf %508, %516 : vector<8x16xf32>
    %518 = vector.shape_cast %517 : vector<8x16xf32> to vector<8x16x1xf32>
    %519 = vector.broadcast %518 : vector<8x16x1xf32> to vector<8x16x32xf32>
    %520 = arith.mulf %519, %6 : vector<8x16x32xf32>
    %cst_119 = arith.constant dense<0.000000e+00> : vector<8x32xf32>
    %521 = vector.multi_reduction <add>, %520, %cst_119 [1] : vector<8x16x32xf32> to vector<8x32xf32>
    %522 = tpu.concatenate %521, %498 in 1 : vector<8x32xf32>, vector<8x32xf32> -> vector<8x64xf32>
    %cst_120 = arith.constant dense<0.000000e+00> : vector<8x32xf32>
    %523 = tpu.matmul %522, %11, %cst_120 {dimension_numbers = #tpu.dot_dimension_numbers<[1], [0], [0], [1], [0, 0, 1, 1], [], []>} : vector<8x64xf32>, vector<64x32xf32>, vector<8x32xf32> -> vector<8x32xf32>
    %524 = math.tanh %523 : vector<8x32xf32>
    %525 = vector.extract_strided_slice %5 {offsets = [48, 0], sizes = [8, 128], strides = [1, 1]} : vector<64x128xf32> to vector<8x128xf32>
    %526 = tpu.concatenate %524, %469 in 1 : vector<8x32xf32>, vector<8x32xf32> -> vector<8x64xf32>
    %cst_121 = arith.constant dense<0.000000e+00> : vector<8x128xf32>
    %527 = tpu.matmul %526, %7, %cst_121 {dimension_numbers = #tpu.dot_dimension_numbers<[1], [0], [0], [1], [0, 0, 1, 1], [], []>} : vector<8x64xf32>, vector<64x128xf32>, vector<8x128xf32> -> vector<8x128xf32>
    %528 = arith.addf %525, %527 : vector<8x128xf32>
    %529 = vector.extract_strided_slice %528 {offsets = [0, 0], sizes = [8, 32], strides = [1, 1]} : vector<8x128xf32> to vector<8x32xf32>
    %530 = arith.negf %529 : vector<8x32xf32>
    %531 = math.exp %530 : vector<8x32xf32>
    %cst_122 = arith.constant 1.000000e+00 : f32
    %532 = vector.broadcast %cst_122 : f32 to vector<8x32xf32>
    %533 = arith.addf %532, %531 : vector<8x32xf32>
    %534 = arith.divf %532, %533 : vector<8x32xf32>
    %535 = vector.extract_strided_slice %528 {offsets = [0, 32], sizes = [8, 32], strides = [1, 1]} : vector<8x128xf32> to vector<8x32xf32>
    %536 = arith.negf %535 : vector<8x32xf32>
    %537 = math.exp %536 : vector<8x32xf32>
    %cst_123 = arith.constant 1.000000e+00 : f32
    %538 = vector.broadcast %cst_123 : f32 to vector<8x32xf32>
    %539 = arith.addf %538, %537 : vector<8x32xf32>
    %540 = arith.divf %538, %539 : vector<8x32xf32>
    %541 = vector.extract_strided_slice %528 {offsets = [0, 64], sizes = [8, 32], strides = [1, 1]} : vector<8x128xf32> to vector<8x32xf32>
    %542 = math.tanh %541 : vector<8x32xf32>
    %543 = vector.extract_strided_slice %528 {offsets = [0, 96], sizes = [8, 32], strides = [1, 1]} : vector<8x128xf32> to vector<8x32xf32>
    %544 = arith.negf %543 : vector<8x32xf32>
    %545 = math.exp %544 : vector<8x32xf32>
    %cst_124 = arith.constant 1.000000e+00 : f32
    %546 = vector.broadcast %cst_124 : f32 to vector<8x32xf32>
    %547 = arith.addf %546, %545 : vector<8x32xf32>
    %548 = arith.divf %546, %547 : vector<8x32xf32>
    %549 = arith.mulf %540, %467 : vector<8x32xf32>
    %550 = arith.mulf %534, %542 : vector<8x32xf32>
    %551 = arith.addf %549, %550 : vector<8x32xf32>
    %552 = math.tanh %551 : vector<8x32xf32>
    %553 = arith.mulf %548, %552 : vector<8x32xf32>
    %554 = tpu.concatenate %553, %498 in 1 : vector<8x32xf32>, vector<8x32xf32> -> vector<8x64xf32>
    %cst_125 = arith.constant dense<0.000000e+00> : vector<8x128xf32>
    %555 = tpu.matmul %554, %8, %cst_125 {dimension_numbers = #tpu.dot_dimension_numbers<[1], [0], [0], [1], [0, 0, 1, 1], [], []>} : vector<8x64xf32>, vector<64x128xf32>, vector<8x128xf32> -> vector<8x128xf32>
    %556 = vector.broadcast %9 : vector<1x128xf32> to vector<8x128xf32>
    %557 = arith.addf %555, %556 : vector<8x128xf32>
    %558 = vector.extract_strided_slice %557 {offsets = [0, 0], sizes = [8, 32], strides = [1, 1]} : vector<8x128xf32> to vector<8x32xf32>
    %559 = arith.negf %558 : vector<8x32xf32>
    %560 = math.exp %559 : vector<8x32xf32>
    %cst_126 = arith.constant 1.000000e+00 : f32
    %561 = vector.broadcast %cst_126 : f32 to vector<8x32xf32>
    %562 = arith.addf %561, %560 : vector<8x32xf32>
    %563 = arith.divf %561, %562 : vector<8x32xf32>
    %564 = vector.extract_strided_slice %557 {offsets = [0, 32], sizes = [8, 32], strides = [1, 1]} : vector<8x128xf32> to vector<8x32xf32>
    %565 = arith.negf %564 : vector<8x32xf32>
    %566 = math.exp %565 : vector<8x32xf32>
    %cst_127 = arith.constant 1.000000e+00 : f32
    %567 = vector.broadcast %cst_127 : f32 to vector<8x32xf32>
    %568 = arith.addf %567, %566 : vector<8x32xf32>
    %569 = arith.divf %567, %568 : vector<8x32xf32>
    %570 = vector.extract_strided_slice %557 {offsets = [0, 64], sizes = [8, 32], strides = [1, 1]} : vector<8x128xf32> to vector<8x32xf32>
    %571 = math.tanh %570 : vector<8x32xf32>
    %572 = vector.extract_strided_slice %557 {offsets = [0, 96], sizes = [8, 32], strides = [1, 1]} : vector<8x128xf32> to vector<8x32xf32>
    %573 = arith.negf %572 : vector<8x32xf32>
    %574 = math.exp %573 : vector<8x32xf32>
    %cst_128 = arith.constant 1.000000e+00 : f32
    %575 = vector.broadcast %cst_128 : f32 to vector<8x32xf32>
    %576 = arith.addf %575, %574 : vector<8x32xf32>
    %577 = arith.divf %575, %576 : vector<8x32xf32>
    %578 = arith.mulf %569, %496 : vector<8x32xf32>
    %579 = arith.mulf %563, %571 : vector<8x32xf32>
    %580 = arith.addf %578, %579 : vector<8x32xf32>
    %581 = math.tanh %580 : vector<8x32xf32>
    %582 = arith.mulf %577, %581 : vector<8x32xf32>
    %cst_129 = arith.constant dense<0.000000e+00> : vector<8x32xf32>
    %583 = tpu.matmul %582, %10, %cst_129 {dimension_numbers = #tpu.dot_dimension_numbers<[1], [0], [0], [1], [0, 0, 1, 1], [], []>} : vector<8x32xf32>, vector<32x32xf32>, vector<8x32xf32> -> vector<8x32xf32>
    %584 = vector.shape_cast %583 : vector<8x32xf32> to vector<8x1x32xf32>
    %585 = vector.broadcast %584 : vector<8x1x32xf32> to vector<8x16x32xf32>
    %586 = arith.mulf %6, %585 : vector<8x16x32xf32>
    %cst_130 = arith.constant dense<0.000000e+00> : vector<8x16xf32>
    %587 = vector.multi_reduction <add>, %586, %cst_130 [2] : vector<8x16x32xf32> to vector<8x16xf32>
    %cst_131 = arith.constant dense<0xFF800000> : vector<8xf32>
    %588 = vector.multi_reduction <maximumf>, %587, %cst_131 [1] : vector<8x16xf32> to vector<8xf32>
    %589 = vector.shape_cast %588 : vector<8xf32> to vector<8x1xf32>
    %590 = vector.broadcast %589 : vector<8x1xf32> to vector<8x16xf32>
    %591 = arith.subf %587, %590 : vector<8x16xf32>
    %592 = math.exp %591 : vector<8x16xf32>
    %cst_132 = arith.constant dense<0.000000e+00> : vector<8xf32>
    %593 = vector.multi_reduction <add>, %592, %cst_132 [1] : vector<8x16xf32> to vector<8xf32>
    %594 = vector.shape_cast %593 : vector<8xf32> to vector<8x1xf32>
    %595 = tpu.reciprocal %594 {approx = true} : vector<8x1xf32> -> vector<8x1xf32>
    %596 = arith.mulf %594, %595 : vector<8x1xf32>
    %cst_133 = arith.constant 2.000000e+00 : f32
    %597 = vector.broadcast %cst_133 : f32 to vector<8x1xf32>
    %598 = arith.subf %597, %596 : vector<8x1xf32>
    %599 = arith.mulf %595, %598 : vector<8x1xf32>
    %600 = vector.broadcast %599 : vector<8x1xf32> to vector<8x16xf32>
    %601 = arith.mulf %592, %600 : vector<8x16xf32>
    %602 = vector.shape_cast %601 : vector<8x16xf32> to vector<8x16x1xf32>
    %603 = vector.broadcast %602 : vector<8x16x1xf32> to vector<8x16x32xf32>
    %604 = arith.mulf %603, %6 : vector<8x16x32xf32>
    %cst_134 = arith.constant dense<0.000000e+00> : vector<8x32xf32>
    %605 = vector.multi_reduction <add>, %604, %cst_134 [1] : vector<8x16x32xf32> to vector<8x32xf32>
    %606 = tpu.concatenate %605, %582 in 1 : vector<8x32xf32>, vector<8x32xf32> -> vector<8x64xf32>
    %cst_135 = arith.constant dense<0.000000e+00> : vector<8x32xf32>
    %607 = tpu.matmul %606, %11, %cst_135 {dimension_numbers = #tpu.dot_dimension_numbers<[1], [0], [0], [1], [0, 0, 1, 1], [], []>} : vector<8x64xf32>, vector<64x32xf32>, vector<8x32xf32> -> vector<8x32xf32>
    %608 = math.tanh %607 : vector<8x32xf32>
    %609 = vector.extract_strided_slice %5 {offsets = [56, 0], sizes = [8, 128], strides = [1, 1]} : vector<64x128xf32> to vector<8x128xf32>
    %610 = tpu.concatenate %608, %553 in 1 : vector<8x32xf32>, vector<8x32xf32> -> vector<8x64xf32>
    %cst_136 = arith.constant dense<0.000000e+00> : vector<8x128xf32>
    %611 = tpu.matmul %610, %7, %cst_136 {dimension_numbers = #tpu.dot_dimension_numbers<[1], [0], [0], [1], [0, 0, 1, 1], [], []>} : vector<8x64xf32>, vector<64x128xf32>, vector<8x128xf32> -> vector<8x128xf32>
    %612 = arith.addf %609, %611 : vector<8x128xf32>
    %613 = vector.extract_strided_slice %612 {offsets = [0, 0], sizes = [8, 32], strides = [1, 1]} : vector<8x128xf32> to vector<8x32xf32>
    %614 = arith.negf %613 : vector<8x32xf32>
    %615 = math.exp %614 : vector<8x32xf32>
    %cst_137 = arith.constant 1.000000e+00 : f32
    %616 = vector.broadcast %cst_137 : f32 to vector<8x32xf32>
    %617 = arith.addf %616, %615 : vector<8x32xf32>
    %618 = arith.divf %616, %617 : vector<8x32xf32>
    %619 = vector.extract_strided_slice %612 {offsets = [0, 32], sizes = [8, 32], strides = [1, 1]} : vector<8x128xf32> to vector<8x32xf32>
    %620 = arith.negf %619 : vector<8x32xf32>
    %621 = math.exp %620 : vector<8x32xf32>
    %cst_138 = arith.constant 1.000000e+00 : f32
    %622 = vector.broadcast %cst_138 : f32 to vector<8x32xf32>
    %623 = arith.addf %622, %621 : vector<8x32xf32>
    %624 = arith.divf %622, %623 : vector<8x32xf32>
    %625 = vector.extract_strided_slice %612 {offsets = [0, 64], sizes = [8, 32], strides = [1, 1]} : vector<8x128xf32> to vector<8x32xf32>
    %626 = math.tanh %625 : vector<8x32xf32>
    %627 = vector.extract_strided_slice %612 {offsets = [0, 96], sizes = [8, 32], strides = [1, 1]} : vector<8x128xf32> to vector<8x32xf32>
    %628 = arith.negf %627 : vector<8x32xf32>
    %629 = math.exp %628 : vector<8x32xf32>
    %cst_139 = arith.constant 1.000000e+00 : f32
    %630 = vector.broadcast %cst_139 : f32 to vector<8x32xf32>
    %631 = arith.addf %630, %629 : vector<8x32xf32>
    %632 = arith.divf %630, %631 : vector<8x32xf32>
    %633 = arith.mulf %624, %551 : vector<8x32xf32>
    %634 = arith.mulf %618, %626 : vector<8x32xf32>
    %635 = arith.addf %633, %634 : vector<8x32xf32>
    %636 = math.tanh %635 : vector<8x32xf32>
    %637 = arith.mulf %632, %636 : vector<8x32xf32>
    %638 = tpu.concatenate %637, %582 in 1 : vector<8x32xf32>, vector<8x32xf32> -> vector<8x64xf32>
    %cst_140 = arith.constant dense<0.000000e+00> : vector<8x128xf32>
    %639 = tpu.matmul %638, %8, %cst_140 {dimension_numbers = #tpu.dot_dimension_numbers<[1], [0], [0], [1], [0, 0, 1, 1], [], []>} : vector<8x64xf32>, vector<64x128xf32>, vector<8x128xf32> -> vector<8x128xf32>
    %640 = vector.broadcast %9 : vector<1x128xf32> to vector<8x128xf32>
    %641 = arith.addf %639, %640 : vector<8x128xf32>
    %642 = vector.extract_strided_slice %641 {offsets = [0, 0], sizes = [8, 32], strides = [1, 1]} : vector<8x128xf32> to vector<8x32xf32>
    %643 = arith.negf %642 : vector<8x32xf32>
    %644 = math.exp %643 : vector<8x32xf32>
    %cst_141 = arith.constant 1.000000e+00 : f32
    %645 = vector.broadcast %cst_141 : f32 to vector<8x32xf32>
    %646 = arith.addf %645, %644 : vector<8x32xf32>
    %647 = arith.divf %645, %646 : vector<8x32xf32>
    %648 = vector.extract_strided_slice %641 {offsets = [0, 32], sizes = [8, 32], strides = [1, 1]} : vector<8x128xf32> to vector<8x32xf32>
    %649 = arith.negf %648 : vector<8x32xf32>
    %650 = math.exp %649 : vector<8x32xf32>
    %cst_142 = arith.constant 1.000000e+00 : f32
    %651 = vector.broadcast %cst_142 : f32 to vector<8x32xf32>
    %652 = arith.addf %651, %650 : vector<8x32xf32>
    %653 = arith.divf %651, %652 : vector<8x32xf32>
    %654 = vector.extract_strided_slice %641 {offsets = [0, 64], sizes = [8, 32], strides = [1, 1]} : vector<8x128xf32> to vector<8x32xf32>
    %655 = math.tanh %654 : vector<8x32xf32>
    %656 = vector.extract_strided_slice %641 {offsets = [0, 96], sizes = [8, 32], strides = [1, 1]} : vector<8x128xf32> to vector<8x32xf32>
    %657 = arith.negf %656 : vector<8x32xf32>
    %658 = math.exp %657 : vector<8x32xf32>
    %cst_143 = arith.constant 1.000000e+00 : f32
    %659 = vector.broadcast %cst_143 : f32 to vector<8x32xf32>
    %660 = arith.addf %659, %658 : vector<8x32xf32>
    %661 = arith.divf %659, %660 : vector<8x32xf32>
    %662 = arith.mulf %653, %580 : vector<8x32xf32>
    %663 = arith.mulf %647, %655 : vector<8x32xf32>
    %664 = arith.addf %662, %663 : vector<8x32xf32>
    %665 = math.tanh %664 : vector<8x32xf32>
    %666 = arith.mulf %661, %665 : vector<8x32xf32>
    %cst_144 = arith.constant dense<0.000000e+00> : vector<8x32xf32>
    %667 = tpu.matmul %666, %10, %cst_144 {dimension_numbers = #tpu.dot_dimension_numbers<[1], [0], [0], [1], [0, 0, 1, 1], [], []>} : vector<8x32xf32>, vector<32x32xf32>, vector<8x32xf32> -> vector<8x32xf32>
    %668 = vector.shape_cast %667 : vector<8x32xf32> to vector<8x1x32xf32>
    %669 = vector.broadcast %668 : vector<8x1x32xf32> to vector<8x16x32xf32>
    %670 = arith.mulf %6, %669 : vector<8x16x32xf32>
    %cst_145 = arith.constant dense<0.000000e+00> : vector<8x16xf32>
    %671 = vector.multi_reduction <add>, %670, %cst_145 [2] : vector<8x16x32xf32> to vector<8x16xf32>
    %cst_146 = arith.constant dense<0xFF800000> : vector<8xf32>
    %672 = vector.multi_reduction <maximumf>, %671, %cst_146 [1] : vector<8x16xf32> to vector<8xf32>
    %673 = vector.shape_cast %672 : vector<8xf32> to vector<8x1xf32>
    %674 = vector.broadcast %673 : vector<8x1xf32> to vector<8x16xf32>
    %675 = arith.subf %671, %674 : vector<8x16xf32>
    %676 = math.exp %675 : vector<8x16xf32>
    %cst_147 = arith.constant dense<0.000000e+00> : vector<8xf32>
    %677 = vector.multi_reduction <add>, %676, %cst_147 [1] : vector<8x16xf32> to vector<8xf32>
    %678 = vector.shape_cast %677 : vector<8xf32> to vector<8x1xf32>
    %679 = tpu.reciprocal %678 {approx = true} : vector<8x1xf32> -> vector<8x1xf32>
    %680 = arith.mulf %678, %679 : vector<8x1xf32>
    %cst_148 = arith.constant 2.000000e+00 : f32
    %681 = vector.broadcast %cst_148 : f32 to vector<8x1xf32>
    %682 = arith.subf %681, %680 : vector<8x1xf32>
    %683 = arith.mulf %679, %682 : vector<8x1xf32>
    %684 = vector.broadcast %683 : vector<8x1xf32> to vector<8x16xf32>
    %685 = arith.mulf %676, %684 : vector<8x16xf32>
    %686 = vector.shape_cast %685 : vector<8x16xf32> to vector<8x16x1xf32>
    %687 = vector.broadcast %686 : vector<8x16x1xf32> to vector<8x16x32xf32>
    %688 = arith.mulf %687, %6 : vector<8x16x32xf32>
    %cst_149 = arith.constant dense<0.000000e+00> : vector<8x32xf32>
    %689 = vector.multi_reduction <add>, %688, %cst_149 [1] : vector<8x16x32xf32> to vector<8x32xf32>
    %690 = tpu.concatenate %689, %666 in 1 : vector<8x32xf32>, vector<8x32xf32> -> vector<8x64xf32>
    %cst_150 = arith.constant dense<0.000000e+00> : vector<8x32xf32>
    %691 = tpu.matmul %690, %11, %cst_150 {dimension_numbers = #tpu.dot_dimension_numbers<[1], [0], [0], [1], [0, 0, 1, 1], [], []>} : vector<8x64xf32>, vector<64x32xf32>, vector<8x32xf32> -> vector<8x32xf32>
    %692 = math.tanh %691 : vector<8x32xf32>
    %693 = tpu.concatenate %104, %188, %272, %356, %440, %524, %608, %692 in 1 : vector<8x32xf32>, vector<8x32xf32>, vector<8x32xf32>, vector<8x32xf32>, vector<8x32xf32>, vector<8x32xf32>, vector<8x32xf32>, vector<8x32xf32> -> vector<8x256xf32>
    %c0_151 = arith.constant 0 : index
    %c0_152 = arith.constant 0 : index
    %694 = vector.load %arg12[%c0_151, %c0_152] : memref<8x256xf32, #tpu.memory_space<vmem>>, vector<8x256xf32>
    tpu.vector_store %arg12[%c0_151, %c0_152], %693 {strides = array<i32>} : memref<8x256xf32, #tpu.memory_space<vmem>>, vector<8x256xf32>,
    return
  }
}

</mosaic_0001>

<bundles_post_ra>
// kernel: tpu_custom_call.1
= control target key start
LH: loop header
LB: loop body
LE: loop exit
PB: predicated region body
PF: predicated region fallthrough
CT: control target
= control target key end

     0   :  { %17 = vsyncpa [#allocation3], 0  ;;  %s10283_s0 = inlined_call_operand.vmem [shape: f32[64,32], index: 0, kind: input, shape index: {}]   ;;  %s10284_s1 = inlined_call_operand.vmem [shape: f32[8,16,32], index: 1, kind: input, shape index: {}]   ;;  %s10285_s2 = inlined_call_operand.hbm [shape: f32[2,8,32], index: 2, kind: input, shape index: {}]   ;;  %s10286_s3 = inlined_call_operand.hbm [shape: f32[2,8,32], index: 3, kind: input, shape index: {}]   ;;  %s10287_s4 = inlined_call_operand.hbm [shape: f32[8,32], index: 4, kind: input, shape index: {}]   ;;  %s10288_s5 = inlined_call_operand.vmem [shape: f32[32,128], index: 5, kind: input, shape index: {}]   ;;  %s10289_s6 = inlined_call_operand.hbm [shape: f32[64,128], index: 6, kind: input, shape index: {}]   ;;  %s10290_s7 = inlined_call_operand.vmem [shape: f32[1,128], index: 7, kind: input, shape index: {}]   ;;  %s10291_s8 = inlined_call_operand.hbm [shape: f32[64,128], index: 8, kind: input, shape index: {}]   ;;  %s10292_s9 = inlined_call_operand.vmem [shape: f32[1,128], index: 9, kind: input, shape index: {}]   ;;  %s10293_s10 = inlined_call_operand.hbm [shape: f32[32,32], index: 10, kind: input, shape index: {}]   ;;  %s10294_s11 = inlined_call_operand.vmem [shape: f32[64,32], index: 11, kind: input, shape index: {}]   ;;  %s10295_s12 = inlined_call_operand.hbm [shape: f32[8,256], index: 12, kind: output, shape index: {}]  }
   0x1   :  { %18 = vsyncpa [#allocation6], 0 }
   0x2   :  { %19 = vsyncpa [#allocation9], 0 }
   0x3   :  { %20 = vsyncpa [#allocation12], 0 }
   0x4   :  { %21 = vsyncpa [#allocation4], 0  ;;  %s43_s23 = sshll.u32 %s10286_s3, 4  ;;  %s6915_s24 = smov [#allocation5]   ;;  %s44_s23 = int_to_ptr.hbm [resolvable:$true] %s43_s23 }
   0x5   :  { %s45_s25 = sshll.u32 %s6915_s24, 4  ;;  %s69_s28 = sshll.u32 %s10289_s6, 4  ;;  %s46_s25 = int_to_ptr.vmem [resolvable:$true] %s45_s25  ;;  %s70_s28 = int_to_ptr.hbm [resolvable:$true] %s69_s28 }
   0x6   :  { %s6916_s29 = smov 128   ;;  %s6917_s30 = smov 8  }
   0x7   :  { %51 = dma.hbm_to_vmem [thread:$0]  %s44_s23, 256, %s46_s25, [#allocation6], %s6916_s29, %s6916_s29, %s6917_s30  }
   0x8   :  { %s6918_s13 = smov [#allocation8]   ;;  %s30_s3 = sshll.u32 %s10285_s2, 4  ;;  %s31_s3 = int_to_ptr.hbm [resolvable:$true] %s30_s3 }
   0x9   :  { %s71_s14 = sshll.u32 %s6918_s13, 4  ;;  %s57_s18 = sshll.u32 %s10287_s4, 4  ;;  %s72_s14 = int_to_ptr.vmem [resolvable:$true] %s71_s14  ;;  %s58_s18 = int_to_ptr.hbm [resolvable:$true] %s57_s18 }
   0xa   :  { %77 = dma.hbm_to_vmem [thread:$0]  %s70_s28, 1024, %s72_s14, [#allocation9], %s6916_s29, %s6916_s29, %s6917_s30  }
   0xb   :  { %s6919_s19 = smov [#allocation2]   ;;  %s6920_s21 = smov [#allocation7]  }
   0xc   :  { %s32_s20 = sshll.u32 %s6919_s19, 4  ;;  %s59_s2 = sshll.u32 %s6920_s21, 4  ;;  %s33_s20 = int_to_ptr.vmem [resolvable:$true] %s32_s20  ;;  %s60_s2 = int_to_ptr.vmem [resolvable:$true] %s59_s2 }
   0xd   :  { %38 = dma.hbm_to_vmem [thread:$0]  %s31_s3, 256, %s33_s20, [#allocation3], %s6916_s29, %s6916_s29, %s6917_s30  }
   0xe   :  { %s84_s24 = sshll.u32 %s10291_s8, 4  ;;  %s99_s4 = sshll.u32 %s10293_s10, 4  ;;  %s85_s24 = int_to_ptr.hbm [resolvable:$true] %s84_s24  ;;  %s100_s4 = int_to_ptr.hbm [resolvable:$true] %s99_s4 }
   0xf   :  { %62 = dma.hbm_to_vmem [thread:$0]  %s58_s18, 128, %s60_s2, [#allocation6]  }
  0x10   :  { %s6921_s27 = smov [#allocation10]   ;;  %s6922_s13 = smov [#allocation11]  }
  0x11   :  { %s86_s28 = sshll.u32 %s6921_s27, 4  ;;  %s101_s14 = sshll.u32 %s6922_s13, 4  ;;  %s87_s28 = int_to_ptr.vmem [resolvable:$true] %s86_s28  ;;  %s102_s14 = int_to_ptr.vmem [resolvable:$true] %s101_s14 }
  0x12   :  { %92 = dma.hbm_to_vmem [thread:$0]  %s85_s24, 1024, %s87_s28, [#allocation9], %s6916_s29, %s6916_s29, %s6917_s30  }
  0x13   :  { %107 = dma.hbm_to_vmem [thread:$0]  %s100_s4, 512, %s102_s14, [#allocation12], %s6916_s29, %s6916_s29, %s6917_s30  }
  0x14   :  { %6905 = dma.done.wait [#allocation3], 256  }
  0x15   :  { %6906 = vsyncadd [#allocation3], 4294967040 }
  0x16   :  { %6907 = dma.done.wait [#allocation6], 384  }
  0x17   :  { %6908 = vsyncadd [#allocation6], 4294966912 }
  0x18   :  { %6909 = dma.done.wait [#allocation9], 2048  }
  0x19   :  { %6910 = vsyncadd [#allocation9], 4294965248 }
  0x1a   :  { %6911 = dma.done.wait [#allocation12], 512  }
  0x1b   :  { %6912 = vsyncadd [#allocation12], 4294966784  ;;  %v261_v0 = vld [vmem:[#allocation2] sm:$0xff]  ;;  %v7028_v2 = vld [vmem:[#allocation8 + $0x30] sm:$0xff]  ;;  %s6923_s8 = smov 32   ;;  %vm150_vm0 = vcmask 261120  }
  0x1c   :  { %v7026_v1 = vld [vmem:[#allocation8 + $0x38] sm:$0xff]  ;;  %269 = vrot.lane.b32.xlu0 %v261_v0, %s6923_s8  ;;  %v145_v3 = vld [vmem:[%s10288_s5 + $0x18] sm:$0xff]  ;;  %v7035_v4 = vld [vmem:[#allocation8 + $0x28] sm:$0xff]  ;;  %vm273_vm1 = vcmask 523264   ;;  %s6924_s21 = smov 64   ;;  %vm549_vm10 = vcmask 130112  }
  0x1d   :  { %285 = vmatpush.msra.mxu1 %v7026_v1  ;;  %187 = vmatpush.msra.mxu0 %v145_v3  ;;  %v144_v5 = vld [vmem:[%s10288_s5 + $0x10] sm:$0xff]  ;;  %v143_v6 = vld [vmem:[%s10288_s5 + $0x8] sm:$0xff]  ;;  %v142_v8 = vld [vmem:[%s10288_s5] sm:$0xff]  ;;  %vm572_vm11 = vcmask 1041409   ;;  %vm574_vm12 = vcmask 1042434   ;;  %vm576_vm13 = vcmask 1043459  }
  0x1e   :  { %v7044_v7 = vld [vmem:[#allocation8 + $0x20] sm:$0xff]  ;;  %v7050_v9 = vld [vmem:[#allocation8 + $0x18] sm:$0xff]  ;;  %v7053_v10 = vld [vmem:[#allocation8 + $0x10] sm:$0xff]  ;;  %vm578_vm14 = vcmask 1044484   ;;  %vm580_vm15 = vcmask 1045509   ;;  %s6926_s2 = smov 96  }
  0x1f   :  { %286 = vmatpush.msra.mxu1 %v7028_v2  ;;  %188 = vmatpush.msra.mxu0 %v144_v5  ;;  %v7056_v11 = vld [vmem:[#allocation8 + $0x8] sm:$0xff]  ;;  %v134_v12 = vld [vmem:[%s10283_s0] sm:$0xff]  ;;  %v7064_v13 = vld [vmem:[#allocation8] sm:$0xff]  ;;  %s5993_s10 = sshll.u32 %s10295_s12, 4  ;;  %s5994_s10 = int_to_ptr.hbm [resolvable:$true] %s5993_s10 }
  0x20   :  { %v264_v14 = vld [vmem:[#allocation5] sm:$0xff]  ;;  %v267_v15 = vld [vmem:[#allocation7] sm:$0xff]  ;;  %v263_v39 = vld [vmem:[#allocation2 + $0x8] sm:$0xff] }
  0x21   :  { %287 = vmatpush.msra.mxu1 %v7035_v4  ;;  %189 = vmatpush.msra.mxu0 %v143_v6  ;;  %v6078_v18 = vld [vmem:[%s10290_s7] ss:$0 sm:$0xff]  ;;  %v246_v46 = vld [vmem:[#allocation10 + $0x30] sm:$0xff]  ;;  %v245_v47 = vld [vmem:[#allocation10 + $0x28] sm:$0xff] }
  0x22   :  { %319 = vrot.lane.b32.xlu1 %v264_v14, %s6923_s8  ;;  %v247_v45 = vld [vmem:[#allocation10 + $0x38] sm:$0xff]  ;;  %v244_v48 = vld [vmem:[#allocation10 + $0x20] sm:$0xff]  ;;  %v242_v50 = vld [vmem:[#allocation10 + $0x10] sm:$0xff] }
  0x23   :  { %288 = vmatpush.msra.mxu1 %v7044_v7  ;;  %190 = vmatpush.msra.mxu0 %v142_v8  ;;  %v243_v49 = vld [vmem:[#allocation10 + $0x18] sm:$0xff]  ;;  %v241_v51 = vld [vmem:[#allocation10 + $0x8] sm:$0xff]  ;;  %v240_v54 = vld [vmem:[#allocation10] sm:$0xff] }
  0x24   :  { %6006 = vmatmul.msk.f32.vlgmr.msra.gmra.mxu0 %vm150_vm0, %v134_v12  ;;  %362 = vmatpush.msra.mxu2 %v247_v45  ;;  %v266_v55 = vld [vmem:[#allocation5 + $0x8] sm:$0xff]  ;;  %v6079_v59 = vld [vmem:[%s10292_s9] ss:$0 sm:$0xff] }
  0x25   :  { %289 = vmatpush.msra.mxu1 %v7050_v9  ;;  %2499 = vmatpush.msrb.mxu0 %v247_v45 }
  0x26   :  { %363 = vmatpush.msra.mxu2 %v246_v46 }
  0x27   :  { %290 = vmatpush.msra.mxu1 %v7053_v10  ;;  %2500 = vmatpush.msrb.mxu0 %v246_v46 }
  0x28   :  { %364 = vmatpush.msra.mxu2 %v245_v47 }
  0x29   :  { %291 = vmatpush.msra.mxu1 %v7056_v11  ;;  %2501 = vmatpush.msrb.mxu0 %v245_v47 }
  0x2a   :  { %365 = vmatpush.msra.mxu2 %v244_v48 }
  0x2b   :  { %292 = vmatpush.msra.mxu1 %v7064_v13  ;;  %2502 = vmatpush.msrb.mxu0 %v244_v48 }
  0x2c   :  { %366 = vmatpush.msra.mxu2 %v243_v49 }
  0x2d   :  { %1019 = vmatpush.msrb.mxu1 %v7026_v1  ;;  %2503 = vmatpush.msrb.mxu0 %v243_v49 }
  0x2e   :  { %367 = vmatpush.msra.mxu2 %v242_v50 }
  0x2f   :  { %1020 = vmatpush.msrb.mxu1 %v7028_v2  ;;  %2504 = vmatpush.msrb.mxu0 %v242_v50 }
  0x30   :  { %368 = vmatpush.msra.mxu2 %v241_v51 }
  0x31   :  { %1021 = vmatpush.msrb.mxu1 %v7035_v4  ;;  %2505 = vmatpush.msrb.mxu0 %v241_v51 }
  0x32   :  { %369 = vmatpush.msra.mxu2 %v240_v54 }
  0x33   :  { %1022 = vmatpush.msrb.mxu1 %v7044_v7  ;;  %2506 = vmatpush.msrb.mxu0 %v240_v54 }
  0x34   :  { %1085 = vmatpush.msrb.mxu2 %v247_v45 }
  0x35   :  { %1023 = vmatpush.msrb.mxu1 %v7050_v9 }
  0x36   :  { %1086 = vmatpush.msrb.mxu2 %v246_v46 }
  0x37   :  { %1024 = vmatpush.msrb.mxu1 %v7053_v10 }
  0x38   :  { %1087 = vmatpush.msrb.mxu2 %v245_v47 }
  0x39   :  { %1025 = vmatpush.msrb.mxu1 %v7056_v11 }
  0x3a   :  { %1088 = vmatpush.msrb.mxu2 %v244_v48 }
  0x3b   :  { %1026 = vmatpush.msrb.mxu1 %v7064_v13 }
  0x3c   :  { %1089 = vmatpush.msrb.mxu2 %v243_v49 }
  0x3e   :  { %1090 = vmatpush.msrb.mxu2 %v242_v50 }
  0x40   :  { %1091 = vmatpush.msrb.mxu2 %v241_v51 }
  0x42   :  { %1092 = vmatpush.msrb.mxu2 %v240_v54 }
  0x8e   :  { %v270_v16 = vpop.permute.xlu0 %269 }
  0x8f   :  { %v272_v17 = vsel %vm150_vm0, %v267_v15, %v270_v16 }
  0x90   :  { %6014 = vmatmul.msk.f32.vlgmr.msra.gmra.mxu1 %vm273_vm1, %v272_v17 }
  0x94   :  { %v320_v40 = vpop.permute.xlu1 %319 }
  0xa1   :  { %v192_v19 = vpop.f32.mrf.mxu0 }
  0xa2   :  { %v193_v20 = vadd.f32 %v6078_v18, %v192_v19  ;;  %v7112_v19 = vld [vmem:[#allocation11 + $0x18] sm:$0xff] }
  0xa3   :  { %432 = vmatpush.msra.mxu3 %v7112_v19  ;;  %3272 = vmatpush.msra.mxu0 %v7112_v19 }
 0x10d   :  { %v294_v21 = vpop.f32.mrf.mxu1 }
 0x10e   :  { %v297_v22 = vadd.f32 %v294_v21, %v193_v20  ;;  %v7114_v20 = vld [vmem:[#allocation11 + $0x10] sm:$0xff]  ;;  %v7118_v21 = vld [vmem:[#allocation11 + $0x8] sm:$0xff] }
 0x10f   :  { %433 = vmatpush.msra.mxu3 %v7114_v20  ;;  %3273 = vmatpush.msra.mxu0 %v7114_v20 }
 0x110   :  { %6080 = vtanh.f32 %v297_v22  ;;  %v6015_v24 = vmul.f32 -1.442695, %v297_v22  ;;  %v7122_v22 = vld [vmem:[#allocation11] sm:$0xff] }
 0x111   :  { %434 = vmatpush.msra.mxu3 %v7118_v21  ;;  %3274 = vmatpush.msra.mxu0 %v7118_v21 }
 0x112   :  { %6082 = vpow2.f32 %v6015_v24 }
 0x113   :  { %435 = vmatpush.msra.mxu3 %v7122_v22  ;;  %3275 = vmatpush.msra.mxu0 %v7122_v22 }
 0x116   :  { %v6081_v23 = vpop.eup %6080 }
 0x117   :  { %324 = vrot.lane.b32.xlu0 %v6081_v23, %s6924_s21 }
 0x118   :  { %v6083_v25 = vpop.eup %6082 }
 0x119   :  { %v301_v26 = vadd.f32 1.0, %v6083_v25 }
 0x11b   :  { %6084 = vrcp.f32 %v301_v26  ;;  %v313_v32 = vand.u32 2147483648, %v301_v26  ;;  %vm307_vm3 = vweird.f32 %v301_v26  ;;  %v311_v33 = vand.u32 2147483647, %v301_v26 }
 0x11d   :  { %v314_v35 = vor.u32 1.1754944e-38, %v313_v32  ;;  %vm312_vm5 = vcmp.eq.f32.partialorder %v311_v33, 8.507059e+37  ;;  %v7146_v32 = vld [vmem:[%s10284_s1 + $0x10] sm:$0xff] }
 0x11f   :  { %344 = vrot.lane.b32.xlu0 %v263_v39, %s6923_s8 }
 0x121   :  { %v6085_v27 = vpop.eup %6084 }
 0x122   :  { %v303_v28 = vmul.f32 %v6085_v27, %v301_v26  ;;  %vm308_vm2 = vweird.f32 %v6085_v27 }
 0x123   :  { %vm309_vm4 = vmor %vm307_vm3, %vm308_vm2  ;;  %vm582_vm2 = vcmask 1046534   ;;  %vm584_vm3 = vcmask 1047559  }
 0x124   :  { %v304_v29 = vsub.f32 1.0, %v303_v28  ;;  %v7141_v28 = vld [vmem:[%s10284_s1] sm:$0xff] }
 0x126   :  { %v305_v30 = vmul.f32 %v6085_v27, %v304_v29 }
 0x128   :  { %v306_v31 = vadd.f32 %v6085_v27, %v305_v30 }
 0x12a   :  { %v310_v34 = vsel %vm309_vm4, %v6085_v27, %v306_v31  ;;  %v7136_v27 = vld [vmem:[%s10284_s1 + $0x8] sm:$0xff]  ;;  %vm587_vm4 = vcmask 130048  }
 0x12b   :  { %v315_v36 = vsel %vm312_vm5, %v314_v35, %v310_v34 }
 0x12c   :  { %v322_v41 = vmul.f32 %v320_v40, %v315_v36  ;;  %v7156_v40 = vld [vmem:[%s10284_s1 + $0x28] sm:$0xff] }
 0x189   :  { %v325_v37 = vpop.permute.xlu0 %324 }
 0x18a   :  { %v327_v38 = vmul.f32 %v325_v37, %v315_v36 }
 0x18c   :  { %329 = vrot.lane.b32.xlu1 %v327_v38, %s6923_s8 }
 0x191   :  { %v345_v56 = vpop.permute.xlu0 %344 }
 0x1fe   :  { %v330_v42 = vpop.permute.xlu1 %329 }
 0x1ff   :  { %v7084_v43 = vadd.f32 %v330_v42, %v322_v41  ;;  %v7161_v41 = vld [vmem:[%s10284_s1 + $0x20] sm:$0xff] }
 0x201   :  { %10307 = vst [vmem:[#allocation19_spill] sm:$0xff] %v7084_v43  ;;  %6086 = vtanh.f32 %v7084_v43 }
 0x207   :  { %v6087_v44 = vpop.eup %6086 }
 0x208   :  { %335 = vrot.lane.b32.xlu2 %v6087_v44, %s6924_s21  ;;  %v7167_v44 = vld [vmem:[%s10284_s1 + $0x18] sm:$0xff] }
 0x262   :  { %v336_v52 = vpop.permute.xlu2 %335 }
 0x263   :  { %v7088_v53 = vmul.f32 %v336_v52, %v315_v36 }
 0x265   :  { %340 = vrot.lane.b32.xlu2 %v7088_v53, %s6923_s8 }
 0x26d   :  { %395 = vrot.lane.b32.xlu2 %v266_v55, %s6923_s8  ;;  %v7177_v55 = vld [vmem:[%s10284_s1 + $0x40] sm:$0xff] }
 0x2bf   :  { %v341_v57 = vpop.permute.xlu2 %340 }
 0x2c0   :  { %v347_v58 = vsel %vm150_vm0, %v341_v57, %v345_v56  ;;  %v7182_v56 = vld [vmem:[%s10284_s1 + $0x38] sm:$0xff] }
 0x2c1   :  { %6016 = vmatmul.msk.f32.vlgmr.msra.gmra.mxu2 %vm273_vm1, %v347_v58  ;;  %v7188_v58 = vld [vmem:[%s10284_s1 + $0x30] sm:$0xff] }
 0x2c2   :  { %1726 = vmatpush.msra.mxu2 %v7026_v1 }
 0x2c4   :  { %1727 = vmatpush.msra.mxu2 %v7028_v2 }
 0x2c6   :  { %1728 = vmatpush.msra.mxu2 %v7035_v4 }
 0x2c7   :  { %v396_v14 = vpop.permute.xlu2 %395 }
 0x2c8   :  { %1729 = vmatpush.msra.mxu2 %v7044_v7 }
 0x2ca   :  { %1730 = vmatpush.msra.mxu2 %v7050_v9 }
 0x2cc   :  { %1731 = vmatpush.msra.mxu2 %v7053_v10 }
 0x2ce   :  { %1732 = vmatpush.msra.mxu2 %v7056_v11 }
 0x2d0   :  { %1733 = vmatpush.msra.mxu2 %v7064_v13 }
 0x344   :  { %v371_v60 = vpop.f32.mrf.mxu2 }
 0x345   :  { %v372_v61 = vadd.f32 %v6079_v59, %v371_v60 }
 0x347   :  { %6088 = vtanh.f32 %v372_v61  ;;  %v6017_v63 = vmul.f32 -1.442695, %v372_v61 }
 0x349   :  { %6090 = vpow2.f32 %v6017_v63 }
 0x34d   :  { %v6089_v62 = vpop.eup %6088 }
 0x34e   :  { %400 = vrot.lane.b32.xlu1 %v6089_v62, %s6924_s21 }
 0x34f   :  { %v6091_v0 = vpop.eup %6090 }
 0x350   :  { %v377_v1 = vadd.f32 1.0, %v6091_v0 }
 0x352   :  { %6092 = vrcp.f32 %v377_v1  ;;  %v389_v7 = vand.u32 2147483648, %v377_v1  ;;  %vm383_vm7 = vweird.f32 %v377_v1  ;;  %v387_v8 = vand.u32 2147483647, %v377_v1 }
 0x354   :  { %v390_v10 = vor.u32 1.1754944e-38, %v389_v7  ;;  %vm388_vm9 = vcmp.eq.f32.partialorder %v387_v8, 8.507059e+37 }
 0x358   :  { %v6093_v2 = vpop.eup %6092 }
 0x359   :  { %v379_v3 = vmul.f32 %v6093_v2, %v377_v1  ;;  %vm384_vm6 = vweird.f32 %v6093_v2 }
 0x35a   :  { %vm385_vm8 = vmor %vm383_vm7, %vm384_vm6 }
 0x35b   :  { %v380_v4 = vsub.f32 1.0, %v379_v3  ;;  %v7203_v3 = vld [vmem:[%s10284_s1 + $0x50] sm:$0xff] }
 0x35d   :  { %v381_v5 = vmul.f32 %v6093_v2, %v380_v4 }
 0x35f   :  { %v382_v6 = vadd.f32 %v6093_v2, %v381_v5  ;;  %v7209_v5 = vld [vmem:[%s10284_s1 + $0x48] sm:$0xff] }
 0x361   :  { %v386_v9 = vsel %vm385_vm8, %v6093_v2, %v382_v6  ;;  %v7198_v2 = vld [vmem:[%s10284_s1 + $0x58] sm:$0xff] }
 0x362   :  { %v391_v11 = vsel %vm388_vm9, %v390_v10, %v386_v9 }
 0x363   :  { %v398_v15 = vmul.f32 %v396_v14, %v391_v11 }
 0x3c0   :  { %v401_v12 = vpop.permute.xlu1 %400 }
 0x3c1   :  { %v403_v13 = vmul.f32 %v401_v12, %v391_v11 }
 0x3c3   :  { %405 = vrot.lane.b32.xlu0 %v403_v13, %s6923_s8 }
 0x435   :  { %v406_v16 = vpop.permute.xlu0 %405 }
 0x436   :  { %v7108_v17 = vadd.f32 %v406_v16, %v398_v15  ;;  %v7219_v15 = vld [vmem:[%s10284_s1 + $0x70] sm:$0xff]  ;;  %v7224_v16 = vld [vmem:[%s10284_s1 + $0x68] sm:$0xff] }
 0x438   :  { %10308 = vst [vmem:[#allocation20_spill] sm:$0xff] %v7108_v17  ;;  %6094 = vtanh.f32 %v7108_v17 }
 0x43e   :  { %v6095_v18 = vpop.eup %6094 }
 0x43f   :  { %411 = vrot.lane.b32.xlu1 %v6095_v18, %s6924_s21 }
 0x4b1   :  { %v412_v23 = vpop.permute.xlu1 %411 }
 0x4b2   :  { %v7128_v24 = vmul.f32 %v412_v23, %v391_v11  ;;  %v7230_v23 = vld [vmem:[%s10284_s1 + $0x60] sm:$0xff] }
 0x4b4   :  { %416 = vrot.lane.b32.xlu2 %v7128_v24, %s6923_s8 }
 0x50e   :  { %v417_v25 = vpop.permute.xlu2 %416 }
 0x50f   :  { %6018 = vmatmul.msk.f32.vlgmr.msra.gmra.mxu3 %vm150_vm0, %v417_v25 }
 0x592   :  { %v437_v26 = vpop.f32.mrf.mxu3 }
 0x593   :  { %v448_v29 = vperm.slane %v437_v26, 0  ;;  %v441_v30 = vrot.slane %v437_v26, 1  ;;  %v442_v31 = vrot.slane %v437_v26, 2  ;;  %v444_v47 = vrot.slane %v437_v26, 4 }
 0x594   :  { %v443_v48 = vrot.slane %v437_v26, 3  ;;  %v445_v61 = vrot.slane %v437_v26, 5  ;;  %v447_v8 = vrot.slane %v437_v26, 7  ;;  %v446_v9 = vrot.slane %v437_v26, 6 }
 0x595   :  { %v465_v33 = vmul.f32 %v448_v29, %v7136_v27  ;;  %v464_v34 = vmul.f32 %v448_v29, %v7141_v28  ;;  %v449_v35 = vperm.slane %v441_v30, 0  ;;  %v450_v39 = vperm.slane %v442_v31, 0 }
 0x596   :  { %v452_v52 = vperm.slane %v444_v47, 0  ;;  %v451_v54 = vperm.slane %v443_v48, 0  ;;  %v453_v1 = vperm.slane %v445_v61, 0  ;;  %v455_v13 = vperm.slane %v447_v8, 0 }
 0x597   :  { %v483_v36 = vsel %vm150_vm0, %v465_v33, 0.0  ;;  %v480_v37 = vsel %vm150_vm0, %v464_v34, 0.0  ;;  %v466_v38 = vmul.f32 %v449_v35, %v7146_v32  ;;  %v469_v45 = vmul.f32 %v450_v39, %v7156_v40  ;;  %v7241_v34 = vld [vmem:[%s10284_s1 + $0x78] sm:$0xff] }
 0x598   :  { %484 = vadd.xlane.f32.xlu1 %v483_v36  ;;  %481 = vadd.xlane.f32.xlu0 %v480_v37  ;;  %v468_v46 = vmul.f32 %v450_v39, %v7161_v41  ;;  %v467_v49 = vmul.f32 %v449_v35, %v7167_v44  ;;  %v472_v59 = vmul.f32 %v452_v52, %v7177_v55  ;;  %v454_v14 = vperm.slane %v446_v9, 0 }
 0x599   :  { %v486_v42 = vsel %vm150_vm0, %v466_v38, 0.0  ;;  %v495_v50 = vsel %vm150_vm0, %v469_v45, 0.0  ;;  %v471_v60 = vmul.f32 %v451_v54, %v7182_v56  ;;  %v470_v62 = vmul.f32 %v451_v54, %v7188_v58 }
 0x59a   :  { %487 = vadd.xlane.f32.xlu2 %v486_v42  ;;  %v492_v51 = vsel %vm150_vm0, %v468_v46, 0.0  ;;  %v489_v57 = vsel %vm150_vm0, %v467_v49, 0.0  ;;  %v504_v63 = vsel %vm150_vm0, %v472_v59, 0.0  ;;  %v475_v6 = vmul.f32 %v453_v1, %v7198_v2 }
 0x59b   :  { %v501_v0 = vsel %vm150_vm0, %v471_v60, 0.0  ;;  %v498_v4 = vsel %vm150_vm0, %v470_v62, 0.0  ;;  %v474_v7 = vmul.f32 %v453_v1, %v7203_v3  ;;  %v473_v10 = vmul.f32 %v452_v52, %v7209_v5 }
 0x59c   :  { %v513_v11 = vsel %vm150_vm0, %v475_v6, 0.0  ;;  %v478_v25 = vmul.f32 %v455_v13, %v7219_v15  ;;  %v477_v26 = vmul.f32 %v454_v14, %v7224_v16  ;;  %v476_v29 = vmul.f32 %v454_v14, %v7230_v23 }
 0x59d   :  { %v510_v12 = vsel %vm150_vm0, %v474_v7, 0.0  ;;  %v507_v18 = vsel %vm150_vm0, %v473_v10, 0.0  ;;  %v479_v35 = vmul.f32 %v455_v13, %v7241_v34  ;;  %v544_v49 = vlaneseq }
 0x59e   :  { %v522_v30 = vsel %vm150_vm0, %v478_v25, 0.0  ;;  %v519_v31 = vsel %vm150_vm0, %v477_v26, 0.0  ;;  %v516_v33 = vsel %vm150_vm0, %v476_v29, 0.0 }
 0x59f   :  { %v525_v36 = vsel %vm150_vm0, %v479_v35, 0.0 }
 0x5a0   :  { %496 = vadd.xlane.f32.xlu1 %v495_v50  ;;  %493 = vadd.xlane.f32.xlu0 %v492_v51  ;;  %v7263_v51 = vand.u32 127, %v544_v49 }
 0x5a2   :  { %490 = vadd.xlane.f32.xlu2 %v489_v57  ;;  %v7268_v54 = vadd.s32 4294967288, %v7263_v51 }
 0x5a8   :  { %505 = vadd.xlane.f32.xlu1 %v504_v63  ;;  %502 = vadd.xlane.f32.xlu0 %v501_v0 }
 0x5aa   :  { %499 = vadd.xlane.f32.xlu2 %v498_v4 }
 0x5b0   :  { %514 = vadd.xlane.f32.xlu1 %v513_v11  ;;  %511 = vadd.xlane.f32.xlu0 %v510_v12 }
 0x5b2   :  { %508 = vadd.xlane.f32.xlu2 %v507_v18 }
 0x5b8   :  { %523 = vadd.xlane.f32.xlu1 %v522_v30  ;;  %520 = vadd.xlane.f32.xlu0 %v519_v31 }
 0x5ba   :  { %517 = vadd.xlane.f32.xlu2 %v516_v33 }
 0x5c2   :  { %526 = vadd.xlane.f32.xlu2 %v525_v36 }
 0x60b   :  { %v7245_v37 = vpop.xlane.xlu1 %484  ;;  %v7247_v38 = vpop.xlane.xlu0 %481 }
 0x60c   :  { %v548_v61 = vperm.slane %v7245_v37, %v7268_v54  ;;  %v546_v62 = vperm.slane %v7247_v38, %v7263_v51 }
 0x60d   :  { %v7249_v39 = vpop.xlane.xlu2 %487 }
 0x60e   :  { %v551_v63 = vperm.slane %v7249_v39, %v7263_v51  ;;  %v550_v9 = vsel %vm549_vm10, %v548_v61, %v546_v62 }
 0x613   :  { %v7251_v42 = vpop.xlane.xlu0 %493  ;;  %v7253_v45 = vpop.xlane.xlu1 %496 }
 0x614   :  { %v555_v4 = vperm.slane %v7253_v45, %v7268_v54  ;;  %v554_v6 = vperm.slane %v7251_v42, %v7263_v51 }
 0x615   :  { %v7255_v46 = vpop.xlane.xlu2 %490 }
 0x616   :  { %v552_v59 = vperm.slane %v7255_v46, %v7268_v54  ;;  %v556_v18 = vsel %vm549_vm10, %v555_v4, %v554_v6 }
 0x618   :  { %v553_v0 = vsel %vm549_vm10, %v552_v59, %v551_v63 }
 0x619   :  { %v573_v11 = vsel %vm572_vm11, %v553_v0, %v550_v9 }
 0x61a   :  { %v575_v29 = vsel %vm574_vm12, %v556_v18, %v573_v11 }
 0x61b   :  { %v7257_v47 = vpop.xlane.xlu0 %502  ;;  %v7261_v50 = vpop.xlane.xlu1 %505 }
 0x61c   :  { %v558_v10 = vperm.slane %v7257_v47, %v7268_v54  ;;  %v560_v12 = vperm.slane %v7261_v50, %v7263_v51 }
 0x61d   :  { %v7259_v48 = vpop.xlane.xlu2 %499 }
 0x61e   :  { %v557_v1 = vperm.slane %v7259_v48, %v7263_v51 }
 0x620   :  { %v559_v13 = vsel %vm549_vm10, %v558_v10, %v557_v1  ;;  %v6925_v10 = vmov 0  }
 0x621   :  { %v577_v33 = vsel %vm576_vm13, %v559_v13, %v575_v29  ;;  %6077 = vset.pattern.permute.xlu0 %v6925_v10  ;;  %6076 = vset.pattern.permute.xlu2 %v6925_v10 }
 0x622   :  { %6075 = vset.pattern.permute.xlu1 %v6925_v10 }
 0x623   :  { %v7270_v57 = vpop.xlane.xlu0 %511  ;;  %v7274_v60 = vpop.xlane.xlu1 %514 }
 0x624   :  { %v564_v30 = vperm.slane %v7274_v60, %v7268_v54  ;;  %v563_v31 = vperm.slane %v7270_v57, %v7263_v51 }
 0x625   :  { %v7265_v52 = vpop.xlane.xlu2 %508 }
 0x626   :  { %v561_v7 = vperm.slane %v7265_v52, %v7268_v54  ;;  %v565_v62 = vsel %vm549_vm10, %v564_v30, %v563_v31 }
 0x628   :  { %v562_v25 = vsel %vm549_vm10, %v561_v7, %v560_v12 }
 0x629   :  { %v579_v49 = vsel %vm578_vm14, %v562_v25, %v577_v33 }
 0x62a   :  { %v581_v1 = vsel %vm580_vm15, %v565_v62, %v579_v49 }
 0x62b   :  { %v7300_v14 = vpop.xlane.xlu0 %520  ;;  %v7312_v35 = vpop.xlane.xlu1 %523 }
 0x62c   :  { %v567_v36 = vperm.slane %v7300_v14, %v7268_v54  ;;  %v569_v63 = vperm.slane %v7312_v35, %v7263_v51 }
 0x62d   :  { %v7291_v8 = vpop.xlane.xlu2 %517 }
 0x62e   :  { %v566_v26 = vperm.slane %v7291_v8, %v7263_v51 }
 0x630   :  { %v568_v61 = vsel %vm549_vm10, %v567_v36, %v566_v26 }
 0x631   :  { %v583_v6 = vsel %vm582_vm2, %v568_v61, %v581_v1 }
 0x635   :  { %v527_v59 = vpop.xlane.xlu2 %526 }
 0x636   :  { %v570_v0 = vperm.slane %v527_v59, %v7268_v54 }
 0x638   :  { %v571_v4 = vsel %vm549_vm10, %v570_v0, %v569_v63 }
 0x639   :  { %v585_v7 = vsel %vm584_vm3, %v571_v4, %v583_v6 }
 0x63a   :  { %v588_v9 = vsel %vm587_vm4, %v585_v7, -inf }
 0x63b   :  { %589 = vmax.xlane.f32.xlu0 %v588_v9 }
 0x6ae   :  { %v7327_v11 = vpop.xlane.xlu0 %589 }
 0x6af   :  { %v593_v12 = vperm.slane %v7327_v11, 1  ;;  %v592_v13 = vperm.slane %v7327_v11, 0  ;;  %v596_v29 = vperm.slane %v7327_v11, 4  ;;  %v594_v30 = vperm.slane %v7327_v11, 2 }
 0x6b0   :  { %v595_v63 = vperm.slane %v7327_v11, 3  ;;  %v599_v9 = vperm.slane %v7327_v11, 7 }
 0x6b1   :  { %v610_v18 = vsub.f32 %v7249_v39, %v593_v12  ;;  %v609_v25 = vsub.f32 %v7245_v37, %v592_v13  ;;  %v608_v26 = vsub.f32 %v7247_v38, %v592_v13  ;;  %v617_v49 = vsub.f32 %v7265_v52, %v596_v29 }
 0x6b2   :  { %v612_v61 = vsub.f32 %v7251_v42, %v594_v30  ;;  %v611_v39 = vsub.f32 %v7255_v46, %v593_v12  ;;  %v598_v37 = vperm.slane %v7327_v11, 6  ;;  %v614_v46 = vsub.f32 %v7259_v48, %v595_v63 }
 0x6b3   :  { %v628_v31 = vmul.f32 1.442695, %v610_v18  ;;  %v626_v33 = vmul.f32 1.442695, %v609_v25  ;;  %v624_v36 = vmul.f32 1.442695, %v608_v26  ;;  %v613_v6 = vsub.f32 %v7253_v45, %v594_v30 }
 0x6b4   :  { %v642_v62 = vmul.f32 1.442695, %v617_v49  ;;  %v632_v38 = vmul.f32 1.442695, %v612_v61  ;;  %v630_v1 = vmul.f32 1.442695, %v611_v39  ;;  %v620_v42 = vsub.f32 %v7291_v8, %v598_v37 }
 0x6b5   :  { %6096 = vpow2.f32 %v628_v31  ;;  %v636_v10 = vmul.f32 1.442695, %v614_v46  ;;  %v634_v13 = vmul.f32 1.442695, %v613_v6  ;;  %v623_v48 = vsub.f32 %v527_v59, %v599_v9 }
 0x6b6   :  { %6098 = vpow2.f32 %v626_v33  ;;  %v648_v7 = vmul.f32 1.442695, %v620_v42  ;;  %v616_v45 = vsub.f32 %v7261_v50, %v596_v29  ;;  %v615_v25 = vsub.f32 %v7257_v47, %v595_v63 }
 0x6b7   :  { %6100 = vpow2.f32 %v624_v36  ;;  %v654_v26 = vmul.f32 1.442695, %v623_v48  ;;  %v597_v31 = vperm.slane %v7327_v11, 5 }
 0x6b8   :  { %6102 = vpow2.f32 %v642_v62  ;;  %v640_v30 = vmul.f32 1.442695, %v616_v45  ;;  %v638_v36 = vmul.f32 1.442695, %v615_v25 }
 0x6b9   :  { %6104 = vpow2.f32 %v632_v38  ;;  %v619_v47 = vsub.f32 %v7274_v60, %v597_v31  ;;  %v618_v50 = vsub.f32 %v7270_v57, %v597_v31  ;;  %v622_v60 = vsub.f32 %v7312_v35, %v599_v9 }
 0x6ba   :  { %6106 = vpow2.f32 %v630_v1  ;;  %v621_v57 = vsub.f32 %v7300_v14, %v598_v37 }
 0x6bb   :  { %v7341_v0 = vpop.eup %6096  ;;  %6108 = vpow2.f32 %v648_v7  ;;  %v646_v11 = vmul.f32 1.442695, %v619_v47  ;;  %v644_v61 = vmul.f32 1.442695, %v618_v50  ;;  %v652_v38 = vmul.f32 1.442695, %v622_v60 }
 0x6bc   :  { %v7343_v4 = vpop.eup %6098  ;;  %679 = vperm.xlu0 %6077, %v7341_v0   ;;  %6110 = vpow2.f32 %v636_v10  ;;  %v650_v63 = vmul.f32 1.442695, %v621_v57 }
 0x6bd   :  { %v7346_v52 = vpop.eup %6100  ;;  %676 = vperm.xlu2 %6076, %v7343_v4   ;;  %6112 = vpow2.f32 %v634_v13 }
 0x6be   :  { %673 = vperm.xlu1 %6075, %v7346_v52   ;;  %v7354_v12 = vpop.eup %6102  ;;  %6114 = vpow2.f32 %v654_v26 }
 0x6bf   :  { %v7356_v18 = vpop.eup %6104  ;;  %6116 = vpow2.f32 %v640_v30 }
 0x6c0   :  { %v7359_v8 = vpop.eup %6106  ;;  %6118 = vpow2.f32 %v638_v36 }
 0x6c1   :  { %v7366_v33 = vpop.eup %6108  ;;  %6120 = vpow2.f32 %v646_v11 }
 0x6c2   :  { %v7368_v49 = vpop.eup %6110  ;;  %6122 = vpow2.f32 %v644_v61 }
 0x6c3   :  { %v7371_v59 = vpop.eup %6112  ;;  %6124 = vpow2.f32 %v652_v38 }
 0x6c4   :  { %700 = vperm.xlu0 %6077, %v7354_v12   ;;  %v7377_v29 = vpop.eup %6114  ;;  %6126 = vpow2.f32 %v650_v63 }
 0x6c5   :  { %685 = vperm.xlu2 %6076, %v7356_v18   ;;  %v7379_v39 = vpop.eup %6116 }
 0x6c6   :  { %682 = vperm.xlu1 %6075, %v7359_v8   ;;  %v7382_v62 = vpop.eup %6118 }
 0x6c7   :  { %v7388_v1 = vpop.eup %6120 }
 0x6c8   :  { %v7390_v42 = vpop.eup %6122 }
 0x6c9   :  { %v7394_v46 = vpop.eup %6124 }
 0x6ca   :  { %v7396_v6 = vpop.eup %6126 }
 0x6cc   :  { %709 = vperm.xlu0 %6077, %v7366_v33  }
 0x6cd   :  { %691 = vperm.xlu2 %6076, %v7368_v49  }
 0x6ce   :  { %688 = vperm.xlu1 %6075, %v7371_v59  }
 0x6d4   :  { %718 = vperm.xlu0 %6077, %v7377_v29  }
 0x6d5   :  { %697 = vperm.xlu2 %6076, %v7379_v39  }
 0x6d6   :  { %694 = vperm.xlu1 %6075, %v7382_v62  }
 0x6dd   :  { %706 = vperm.xlu2 %6076, %v7388_v1  }
 0x6de   :  { %703 = vperm.xlu1 %6075, %v7390_v42  }
 0x6e5   :  { %715 = vperm.xlu2 %6076, %v7394_v46  }
 0x6e6   :  { %712 = vperm.xlu1 %6075, %v7396_v6  }
 0x717   :  { %v677_v14 = vpop.permute.xlu2 %676 }
 0x718   :  { %v721_v57 = vperm.slane %v677_v14, %v7268_v54 }
 0x71f   :  { %v686_v35 = vpop.permute.xlu2 %685 }
 0x720   :  { %v726_v60 = vperm.slane %v686_v35, %v7263_v51 }
 0x727   :  { %v692_v10 = vpop.permute.xlu2 %691 }
 0x728   :  { %v729_v38 = vperm.slane %v692_v10, %v7263_v51 }
 0x72e   :  { %v680_v7 = vpop.permute.xlu0 %679 }
 0x72f   :  { %v698_v45 = vpop.permute.xlu2 %697  ;;  %v723_v47 = vperm.slane %v680_v7, %v7263_v51 }
 0x730   :  { %v674_v37 = vpop.permute.xlu1 %673  ;;  %v732_v10 = vperm.slane %v698_v45, %v7263_v51 }
 0x731   :  { %v720_v50 = vperm.slane %v674_v37, %v7263_v51 }
 0x736   :  { %v701_v48 = vpop.permute.xlu0 %700 }
 0x737   :  { %v707_v30 = vpop.permute.xlu2 %706  ;;  %v733_v37 = vperm.slane %v701_v48, %v7268_v54 }
 0x738   :  { %v683_v9 = vpop.permute.xlu1 %682  ;;  %v736_v35 = vperm.slane %v707_v30, %v7268_v54 }
 0x739   :  { %v724_v31 = vperm.slane %v683_v9, %v7268_v54  ;;  %v722_v9 = vsel %vm549_vm10, %v721_v57, %v720_v50 }
 0x73b   :  { %v725_v63 = vsel %vm549_vm10, %v724_v31, %v723_v47 }
 0x73e   :  { %v710_v26 = vpop.permute.xlu0 %709 }
 0x73f   :  { %v716_v31 = vpop.permute.xlu2 %715  ;;  %v738_v48 = vperm.slane %v710_v26, %v7263_v51 }
 0x740   :  { %v689_v13 = vpop.permute.xlu1 %688  ;;  %v741_v30 = vperm.slane %v716_v31, %v7263_v51 }
 0x741   :  { %v727_v36 = vperm.slane %v689_v13, %v7268_v54 }
 0x743   :  { %v728_v17 = vsel %vm549_vm10, %v727_v36, %v726_v60 }
 0x746   :  { %v719_v43 = vpop.permute.xlu0 %718 }
 0x747   :  { %v742_v47 = vperm.slane %v719_v43, %v7268_v54 }
 0x748   :  { %v695_v25 = vpop.permute.xlu1 %694 }
 0x749   :  { %v730_v11 = vperm.slane %v695_v25, %v7268_v54  ;;  %v744_v25 = vsel %vm572_vm11, %v725_v63, %v722_v9 }
 0x74a   :  { %v745_v14 = vsel %vm574_vm12, %v728_v17, %v744_v25 }
 0x74b   :  { %v731_v13 = vsel %vm549_vm10, %v730_v11, %v729_v38  ;;  %v743_v38 = vsel %vm549_vm10, %v742_v47, %v741_v30 }
 0x74c   :  { %v746_v36 = vsel %vm576_vm13, %v731_v13, %v745_v14 }
 0x750   :  { %v704_v61 = vpop.permute.xlu1 %703 }
 0x751   :  { %v735_v7 = vperm.slane %v704_v61, %v7263_v51  ;;  %v734_v61 = vsel %vm549_vm10, %v733_v37, %v732_v10 }
 0x752   :  { %v747_v17 = vsel %vm578_vm14, %v734_v61, %v746_v36 }
 0x753   :  { %v737_v50 = vsel %vm549_vm10, %v736_v35, %v735_v7 }
 0x754   :  { %v748_v57 = vsel %vm580_vm15, %v737_v50, %v747_v17 }
 0x758   :  { %v713_v11 = vpop.permute.xlu1 %712 }
 0x759   :  { %v739_v60 = vperm.slane %v713_v11, %v7268_v54 }
 0x75b   :  { %v740_v45 = vsel %vm549_vm10, %v739_v60, %v738_v48 }
 0x75c   :  { %v749_v43 = vsel %vm582_vm2, %v740_v45, %v748_v57 }
 0x75d   :  { %v750_v63 = vsel %vm584_vm3, %v743_v38, %v749_v43 }
 0x75e   :  { %v752_v9 = vsel %vm587_vm4, %v750_v63, 0.0 }
 0x75f   :  { %753 = vadd.xlane.f32.xlu1 %v752_v9 }
 0x7d2   :  { %v754_v26 = vpop.xlane.xlu1 %753 }
 0x7d3   :  { %6128 = vrcp.f32 %v754_v26 }
 0x7d9   :  { %v6129_v13 = vpop.eup %6128 }
 0x7da   :  { %v756_v7 = vmul.f32 %v6129_v13, %v754_v26 }
 0x7dc   :  { %v757_v37 = vsub.f32 2.0, %v756_v7 }
 0x7de   :  { %v758_v25 = vmul.f32 %v6129_v13, %v757_v37 }
 0x7e0   :  { %v765_v35 = vperm.slane %v758_v25, 5  ;;  %v760_v14 = vperm.slane %v758_v25, 0  ;;  %v761_v47 = vperm.slane %v758_v25, 1  ;;  %v762_v61 = vperm.slane %v758_v25, 2 }
 0x7e1   :  { %v766_v30 = vperm.slane %v758_v25, 6  ;;  %v767_v17 = vperm.slane %v758_v25, 7 }
 0x7e2   :  { %v786_v10 = vmul.f32 %v7390_v42, %v765_v35  ;;  %v777_v31 = vmul.f32 %v7343_v4, %v760_v14  ;;  %v776_v36 = vmul.f32 %v7346_v52, %v760_v14  ;;  %v779_v50 = vmul.f32 %v7359_v8, %v761_v47 }
 0x7e3   :  { %v778_v11 = vmul.f32 %v7341_v0, %v761_v47  ;;  %v781_v42 = vmul.f32 %v7371_v59, %v762_v61  ;;  %v780_v4 = vmul.f32 %v7356_v18, %v762_v61  ;;  %v763_v52 = vperm.slane %v758_v25, 3 }
 0x7e4   :  { %844 = vperm.xlu1 %6075, %v786_v10   ;;  %799 = vperm.xlu0 %6077, %v777_v31   ;;  %v764_v0 = vperm.slane %v758_v25, 4  ;;  %v788_v59 = vmul.f32 %v7366_v33, %v766_v30  ;;  %v787_v18 = vmul.f32 %v7388_v1, %v765_v35 }
 0x7e5   :  { %794 = vperm.xlu2 %6076, %v776_v36   ;;  %v783_v48 = vmul.f32 %v7382_v62, %v763_v52  ;;  %v782_v60 = vmul.f32 %v7368_v49, %v763_v52  ;;  %v790_v62 = vmul.f32 %v7394_v46, %v767_v17  ;;  %v789_v49 = vmul.f32 %v7396_v6, %v766_v30 }
 0x7e6   :  { %v785_v8 = vmul.f32 %v7354_v12, %v764_v0  ;;  %v791_v12 = vmul.f32 %v7377_v29, %v767_v17 }
 0x7ec   :  { %1004 = vrot.lane.b32.xlu1 %v7088_v53, %s6924_s21  ;;  %809 = vperm.xlu0 %6077, %v779_v50   ;;  %v784_v53 = vmul.f32 %v7379_v39, %v764_v0 }
 0x7ed   :  { %804 = vperm.xlu2 %6076, %v778_v11  }
 0x7f4   :  { %819 = vperm.xlu0 %6077, %v781_v42  }
 0x7f5   :  { %814 = vperm.xlu2 %6076, %v780_v4   ;;  %v258_v4 = vld [vmem:[%s10294_s11 + $0x28] sm:$0xff] }
 0x7fc   :  { %829 = vperm.xlu0 %6077, %v783_v48  }
 0x7fd   :  { %824 = vperm.xlu2 %6076, %v782_v60  }
 0x804   :  { %839 = vperm.xlu0 %6077, %v785_v8  }
 0x805   :  { %834 = vperm.xlu2 %6076, %v784_v53  }
 0x80c   :  { %854 = vperm.xlu0 %6077, %v788_v59  }
 0x80d   :  { %849 = vperm.xlu2 %6076, %v787_v18   ;;  %v256_v18 = vld [vmem:[%s10294_s11 + $0x18] sm:$0xff] }
 0x814   :  { %864 = vperm.xlu0 %6077, %v790_v62  }
 0x815   :  { %859 = vperm.xlu2 %6076, %v789_v49  }
 0x81c   :  { %976 = vrot.lane.b32.xlu0 %v7128_v24, %s6924_s21 }
 0x81d   :  { %869 = vperm.xlu2 %6076, %v791_v12  }
 0x83f   :  { %v795_v39 = vpop.permute.xlu2 %794 }
 0x840   :  { %v872_v7 = vmul.f32 %v795_v39, %v7141_v28  ;;  %v255_v39 = vld [vmem:[%s10294_s11 + $0x10] sm:$0xff] }
 0x847   :  { %v805_v45 = vpop.permute.xlu2 %804 }
 0x848   :  { %v874_v29 = vmul.f32 %v805_v45, %v7146_v32 }
 0x84f   :  { %v815_v33 = vpop.permute.xlu2 %814 }
 0x850   :  { %v876_v37 = vmul.f32 %v815_v33, %v7161_v41  ;;  %v260_v41 = vld [vmem:[%s10294_s11 + $0x38] sm:$0xff] }
 0x851   :  { %991 = vmatpush.msrb.mxu3 %v260_v41  ;;  %1698 = vmatpush.msra.mxu1 %v260_v41 }
 0x856   :  { %v800_v57 = vpop.permute.xlu0 %799  ;;  %v845_v10 = vpop.permute.xlu1 %844 }
 0x857   :  { %v825_v1 = vpop.permute.xlu2 %824  ;;  %v873_v13 = vmul.f32 %v800_v57, %v7136_v27  ;;  %v888_v27 = vsel %vm150_vm0, %v872_v7, 0.0  ;;  %v882_v52 = vmul.f32 %v845_v10, %v7203_v3 }
 0x858   :  { %v878_v25 = vmul.f32 %v825_v1, %v7188_v58  ;;  %v259_v58 = vld [vmem:[%s10294_s11 + $0x30] sm:$0xff] }
 0x859   :  { %v889_v14 = vsel %vm150_vm0, %v873_v13, 0.0  ;;  %992 = vmatpush.msrb.mxu3 %v259_v58  ;;  %1699 = vmatpush.msra.mxu1 %v259_v58  ;;  %v933_v17 = vsel %vm150_vm0, %v882_v52, 0.0 }
 0x85a   :  { %v915_v31 = vsel %vm150_vm0, %v878_v25, 0.0  ;;  %v890_v11 = vadd.f32 %v889_v14, %v888_v27 }
 0x85b   :  { %993 = vmatpush.msrb.mxu3 %v258_v4  ;;  %1700 = vmatpush.msra.mxu1 %v258_v4 }
 0x85c   :  { %v891_v3 = vrot.slane %v890_v11, 4 }
 0x85e   :  { %v810_v38 = vpop.permute.xlu0 %809  ;;  %v892_v57 = vadd.f32 %v891_v3, %v890_v11 }
 0x85f   :  { %v835_v43 = vpop.permute.xlu2 %834  ;;  %v875_v46 = vmul.f32 %v810_v38, %v7167_v44 }
 0x860   :  { %v880_v36 = vmul.f32 %v835_v43, %v7177_v55  ;;  %v254_v43 = vld [vmem:[%s10294_s11 + $0x8] sm:$0xff] }
 0x861   :  { %v898_v35 = vsel %vm150_vm0, %v875_v46, 0.0 }
 0x862   :  { %v924_v0 = vsel %vm150_vm0, %v880_v36, 0.0 }
 0x866   :  { %v820_v63 = vpop.permute.xlu0 %819 }
 0x867   :  { %v877_v6 = vmul.f32 %v820_v63, %v7156_v40  ;;  %v850_v9 = vpop.permute.xlu2 %849  ;;  %v897_v40 = vsel %vm150_vm0, %v874_v29, 0.0 }
 0x868   :  { %v899_v28 = vadd.f32 %v898_v35, %v897_v40  ;;  %v883_v50 = vmul.f32 %v850_v9, %v7198_v2  ;;  %v257_v2 = vld [vmem:[%s10294_s11 + $0x20] sm:$0xff] }
 0x869   :  { %v907_v44 = vsel %vm150_vm0, %v877_v6, 0.0  ;;  %994 = vmatpush.msrb.mxu3 %v257_v2  ;;  %1701 = vmatpush.msra.mxu1 %v257_v2 }
 0x86a   :  { %v900_v60 = vrot.slane %v899_v28, 4  ;;  %v934_v53 = vsel %vm150_vm0, %v883_v50, 0.0 }
 0x86b   :  { %v935_v49 = vadd.f32 %v934_v53, %v933_v17  ;;  %995 = vmatpush.msrb.mxu3 %v256_v18  ;;  %1702 = vmatpush.msra.mxu1 %v256_v18 }
 0x86c   :  { %v901_v62 = vadd.f32 %v900_v60, %v899_v28 }
 0x86d   :  { %996 = vmatpush.msrb.mxu3 %v255_v39  ;;  %1703 = vmatpush.msra.mxu1 %v255_v39  ;;  %v936_v9 = vrot.slane %v935_v49, 4 }
 0x86e   :  { %v830_v26 = vpop.permute.xlu0 %829  ;;  %v902_v6 = vrot.slane %v901_v62, 2 }
 0x86f   :  { %v879_v24 = vmul.f32 %v830_v26, %v7182_v56  ;;  %v906_v56 = vsel %vm150_vm0, %v876_v37, 0.0  ;;  %v860_v55 = vpop.permute.xlu2 %859  ;;  %997 = vmatpush.msrb.mxu3 %v254_v43  ;;  %1704 = vmatpush.msra.mxu1 %v254_v43 }
 0x870   :  { %v908_v47 = vadd.f32 %v907_v44, %v906_v56  ;;  %v885_v33 = vmul.f32 %v860_v55, %v7224_v16  ;;  %v253_v16 = vld [vmem:[%s10294_s11] sm:$0xff]  ;;  %v903_v35 = vadd.f32 %v902_v6, %v901_v62  ;;  %v937_v44 = vadd.f32 %v936_v9, %v935_v49  ;;  %v6497_v9 = vld [vmem:[#allocation10 + $0x30] sm:$0xff] }
 0x871   :  { %v916_v32 = vsel %vm150_vm0, %v879_v24, 0.0  ;;  %v893_v24 = vrot.slane %v892_v57, 2  ;;  %998 = vmatpush.msrb.mxu3 %v253_v16  ;;  %1705 = vmatpush.msra.mxu1 %v253_v16  ;;  %v6496_v6 = vld [vmem:[#allocation10 + $0x38] sm:$0xff]  ;;  %v6498_v16 = vld [vmem:[#allocation10 + $0x28] sm:$0xff] }
 0x872   :  { %v917_v61 = vadd.f32 %v916_v32, %v915_v31  ;;  %v909_v8 = vrot.slane %v908_v47, 4  ;;  %v943_v29 = vsel %vm150_vm0, %v885_v33, 0.0  ;;  %v904_v31 = vrot.slane %v903_v35, 1 }
 0x873   :  { %1151 = vmatpush.msra.mxu3 %v7112_v19  ;;  %v894_v27 = vadd.f32 %v893_v24, %v892_v57  ;;  %v938_v36 = vrot.slane %v937_v44, 2  ;;  %v6502_v24 = vld [vmem:[#allocation10 + $0x8] sm:$0xff] }
 0x874   :  { %v918_v59 = vrot.slane %v917_v61, 4  ;;  %v910_v45 = vadd.f32 %v909_v8, %v908_v47  ;;  %v905_v60 = vadd.f32 %v904_v31, %v903_v35  ;;  %v1005_v35 = vpop.permute.xlu1 %1004 }
 0x875   :  { %1152 = vmatpush.msra.mxu3 %v7114_v20  ;;  %v939_v55 = vadd.f32 %v938_v36, %v937_v44 }
 0x876   :  { %v840_v42 = vpop.permute.xlu0 %839  ;;  %v919_v1 = vadd.f32 %v918_v59, %v917_v61  ;;  %v911_v26 = vrot.slane %v910_v45, 2 }
 0x877   :  { %v881_v48 = vmul.f32 %v840_v42, %v7209_v5  ;;  %v870_v37 = vpop.permute.xlu2 %869  ;;  %1153 = vmatpush.msra.mxu3 %v7118_v21 }
 0x878   :  { %v920_v7 = vrot.slane %v919_v1, 2  ;;  %v912_v14 = vadd.f32 %v911_v26, %v910_v45  ;;  %v887_v32 = vmul.f32 %v870_v37, %v7241_v34  ;;  %v895_v34 = vrot.slane %v894_v27, 1  ;;  %v6499_v26 = vld [vmem:[#allocation10 + $0x20] sm:$0xff] }
 0x879   :  { %v925_v30 = vsel %vm150_vm0, %v881_v48, 0.0  ;;  %1154 = vmatpush.msra.mxu3 %v7122_v22  ;;  %v135_v37 = vld [vmem:[%s10283_s0 + $0x8] sm:$0xff] }
 0x87a   :  { %v926_v5 = vadd.f32 %v925_v30, %v924_v0  ;;  %v921_v56 = vadd.f32 %v920_v7, %v919_v1  ;;  %v913_v50 = vrot.slane %v912_v14, 1  ;;  %v952_v11 = vsel %vm150_vm0, %v887_v32, 0.0  ;;  %v6503_v7 = vld [vmem:[#allocation10] sm:$0xff]  ;;  %6007 = vmatmul.msk.f32.gmra.mxu0 %vm150_vm0, %v135_v37 }
 0x87b   :  { %v896_v0 = vadd.f32 %v895_v34, %v894_v27 }
 0x87c   :  { %v927_v12 = vrot.slane %v926_v5, 4  ;;  %v922_v42 = vrot.slane %v921_v56, 1  ;;  %v914_v2 = vadd.f32 %v913_v50, %v912_v14  ;;  %v6504_v14 = vld [vmem:[%s10290_s7] ss:$0 sm:$0xff] }
 0x87d   :  { %v968_v59 = vsel %vm572_vm11, %v905_v60, %v896_v0 }
 0x87e   :  { %v855_v38 = vpop.permute.xlu0 %854  ;;  %v928_v63 = vadd.f32 %v927_v12, %v926_v5  ;;  %v923_v8 = vadd.f32 %v922_v42, %v921_v56  ;;  %v940_v5 = vrot.slane %v939_v55, 1  ;;  %v969_v17 = vsel %vm574_vm12, %v914_v2, %v968_v59  ;;  %v6508_v59 = vld [vmem:[#allocation11] sm:$0xff] }
 0x87f   :  { %v884_v46 = vmul.f32 %v855_v38, %v7230_v23 }
 0x880   :  { %v929_v23 = vrot.slane %v928_v63, 2  ;;  %v970_v49 = vsel %vm576_vm13, %v923_v8, %v969_v17  ;;  %v941_v45 = vadd.f32 %v940_v5, %v939_v55 }
 0x881   :  { %v942_v13 = vsel %vm150_vm0, %v884_v46, 0.0 }
 0x882   :  { %v944_v25 = vadd.f32 %v943_v29, %v942_v13  ;;  %v930_v41 = vadd.f32 %v929_v23, %v928_v63  ;;  %v6500_v29 = vld [vmem:[#allocation10 + $0x18] sm:$0xff]  ;;  %v6501_v13 = vld [vmem:[#allocation10 + $0x10] sm:$0xff] }
 0x884   :  { %v945_v40 = vrot.slane %v944_v25, 4  ;;  %v931_v52 = vrot.slane %v930_v41, 1 }
 0x886   :  { %v946_v10 = vadd.f32 %v945_v40, %v944_v25  ;;  %v865_v28 = vpop.permute.xlu0 %864  ;;  %v932_v30 = vadd.f32 %v931_v52, %v930_v41 }
 0x887   :  { %v886_v58 = vmul.f32 %v865_v28, %v7219_v15 }
 0x888   :  { %v947_v47 = vrot.slane %v946_v10, 2  ;;  %v971_v39 = vsel %vm578_vm14, %v932_v30, %v970_v49  ;;  %v6506_v30 = vld [vmem:[#allocation11 + $0x10] sm:$0xff] }
 0x889   :  { %v951_v61 = vsel %vm150_vm0, %v886_v58, 0.0  ;;  %v972_v1 = vsel %vm580_vm15, %v941_v45, %v971_v39 }
 0x88a   :  { %v953_v4 = vadd.f32 %v952_v11, %v951_v61  ;;  %v948_v48 = vadd.f32 %v947_v47, %v946_v10 }
 0x88c   :  { %v954_v15 = vrot.slane %v953_v4, 4  ;;  %v949_v3 = vrot.slane %v948_v48, 1 }
 0x88e   :  { %v955_v53 = vadd.f32 %v954_v15, %v953_v4  ;;  %v950_v12 = vadd.f32 %v949_v3, %v948_v48  ;;  %v7518_v43 = vpop.permute.xlu0 %976  ;;  %v10310_v4 = vld [vmem:[#allocation19_spill] sm:$0xff]  ;;  %v6507_v3 = vld [vmem:[#allocation11 + $0x8] sm:$0xff] }
 0x890   :  { %v956_v18 = vrot.slane %v955_v53, 2  ;;  %v973_v38 = vsel %vm582_vm2, %v950_v12, %v972_v1 }
 0x892   :  { %v957_v62 = vadd.f32 %v956_v18, %v955_v53  ;;  %v6505_v53 = vld [vmem:[#allocation11 + $0x18] sm:$0xff] }
 0x893   :  { %v6509_v18 = vld [vmem:[%s10292_s9] ss:$0 sm:$0xff] }
 0x894   :  { %v958_v33 = vrot.slane %v957_v62, 1 }
 0x896   :  { %v959_v57 = vadd.f32 %v958_v33, %v957_v62 }
 0x898   :  { %v974_v63 = vsel %vm584_vm3, %v959_v57, %v973_v38 }
 0x899   :  { %v979_v46 = vsel %vm150_vm0, %v974_v63, %v7518_v43 }
 0x89a   :  { %6019 = vmatmul.msk.f32.vlgmr.msrb.gmra.mxu3 %vm273_vm1, %v979_v46 }
 0x89b   :  { %1792 = vmatpush.msrb.mxu3 %v6496_v6 }
 0x89d   :  { %1793 = vmatpush.msrb.mxu3 %v6497_v9 }
 0x89f   :  { %1794 = vmatpush.msrb.mxu3 %v6498_v16 }
 0x8a1   :  { %1795 = vmatpush.msrb.mxu3 %v6499_v26 }
 0x8a3   :  { %1796 = vmatpush.msrb.mxu3 %v6500_v29  ;;  %v10311_v29 = vld [vmem:[#allocation20_spill] sm:$0xff] }
 0x8a5   :  { %1797 = vmatpush.msrb.mxu3 %v6501_v13 }
 0x8a7   :  { %1798 = vmatpush.msrb.mxu3 %v6502_v24 }
 0x8a9   :  { %1799 = vmatpush.msrb.mxu3 %v6503_v7 }
 0x8f7   :  { %v195_v40 = vpop.f32.mrf.mxu0 }
 0x8f8   :  { %v196_v32 = vadd.f32 %v6504_v14, %v195_v40  ;;  %v6510_v40 = vld [vmem:[#allocation8 + $0x38] sm:$0xff]  ;;  %v6511_v14 = vld [vmem:[#allocation8 + $0x30] sm:$0xff] }
 0x91d   :  { %v1000_v25 = vpop.f32.mrf.mxu3 }
 0x91e   :  { %6130 = vtanh.f32 %v1000_v25 }
 0x924   :  { %v7528_v23 = vpop.eup %6130 }
 0x925   :  { %10309 = vst [vmem:[#allocation21_spill] sm:$0xff] %v7528_v23  ;;  %v1007_v44 = vsel %vm150_vm0, %v7528_v23, %v1005_v35 }
 0x926   :  { %6020 = vmatmul.msk.f32.vlgmr.msrb.gmra.mxu1 %vm273_vm1, %v1007_v44 }
 0x927   :  { %2565 = vmatpush.msrb.mxu1 %v7112_v19 }
 0x929   :  { %2566 = vmatpush.msrb.mxu1 %v7114_v20 }
 0x92b   :  { %2567 = vmatpush.msrb.mxu1 %v7118_v21 }
 0x92d   :  { %2568 = vmatpush.msrb.mxu1 %v7122_v22 }
 0x9a3   :  { %v1028_v27 = vpop.f32.mrf.mxu1 }
 0x9a4   :  { %v1031_v56 = vadd.f32 %v1028_v27, %v196_v32  ;;  %v6512_v32 = vld [vmem:[#allocation8 + $0x28] sm:$0xff]  ;;  %v6513_v27 = vld [vmem:[#allocation8 + $0x20] sm:$0xff] }
 0x9a6   :  { %6132 = vtanh.f32 %v1031_v56  ;;  %v6021_v28 = vmul.f32 -1.442695, %v1031_v56  ;;  %v6514_v56 = vld [vmem:[#allocation8 + $0x18] sm:$0xff] }
 0x9a8   :  { %6134 = vpow2.f32 %v6021_v28  ;;  %v6516_v28 = vld [vmem:[#allocation8 + $0x8] sm:$0xff] }
 0x9ac   :  { %v6133_v10 = vpop.eup %6132 }
 0x9ad   :  { %1054 = vrot.lane.b32.xlu2 %v6133_v10, %s6924_s21  ;;  %v6515_v10 = vld [vmem:[#allocation8 + $0x10] sm:$0xff] }
 0x9ae   :  { %v6135_v19 = vpop.eup %6134 }
 0x9af   :  { %v1035_v20 = vadd.f32 1.0, %v6135_v19  ;;  %v6517_v19 = vld [vmem:[#allocation8] sm:$0xff] }
 0x9b1   :  { %6136 = vrcp.f32 %v1035_v20  ;;  %v1047_v36 = vand.u32 2147483648, %v1035_v20  ;;  %vm1041_vm6 = vweird.f32 %v1035_v20  ;;  %v1045_v47 = vand.u32 2147483647, %v1035_v20 }
 0x9b3   :  { %v1048_v11 = vor.u32 1.1754944e-38, %v1047_v36  ;;  %vm1046_vm8 = vcmp.eq.f32.partialorder %v1045_v47, 8.507059e+37  ;;  %v7578_v36 = vld [vmem:[%s10284_s1] sm:$0xff] }
 0x9b7   :  { %v6137_v21 = vpop.eup %6136 }
 0x9b8   :  { %v1037_v41 = vmul.f32 %v6137_v21, %v1035_v20  ;;  %vm1042_vm5 = vweird.f32 %v6137_v21 }
 0x9b9   :  { %vm1043_vm7 = vmor %vm1041_vm6, %vm1042_vm5 }
 0x9ba   :  { %v1038_v22 = vsub.f32 1.0, %v1037_v41 }
 0x9bc   :  { %v1039_v58 = vmul.f32 %v6137_v21, %v1038_v22 }
 0x9be   :  { %v1040_v31 = vadd.f32 %v6137_v21, %v1039_v58  ;;  %v7572_v58 = vld [vmem:[%s10284_s1 + $0x8] sm:$0xff] }
 0x9c0   :  { %v1044_v50 = vsel %vm1043_vm7, %v6137_v21, %v1040_v31 }
 0x9c1   :  { %v1049_v34 = vsel %vm1046_vm8, %v1048_v11, %v1044_v50 }
 0x9c2   :  { %v1052_v52 = vmul.f32 %v1049_v34, %v10310_v4 }
 0xa07   :  { %v1055_v61 = vpop.permute.xlu2 %1054 }
 0xa08   :  { %v1057_v42 = vmul.f32 %v1055_v61, %v1049_v34 }
 0xa0a   :  { %1059 = vrot.lane.b32.xlu0 %v1057_v42, %s6923_s8 }
 0xa7c   :  { %v1060_v48 = vpop.permute.xlu0 %1059 }
 0xa7d   :  { %v7543_v60 = vadd.f32 %v1060_v48, %v1052_v52  ;;  %v7593_v48 = vld [vmem:[%s10284_s1 + $0x20] sm:$0xff] }
 0xa7f   :  { %6138 = vtanh.f32 %v7543_v60 }
 0xa85   :  { %v6139_v55 = vpop.eup %6138 }
 0xa86   :  { %1065 = vrot.lane.b32.xlu1 %v6139_v55, %s6924_s21 }
 0xaf8   :  { %v1066_v15 = vpop.permute.xlu1 %1065 }
 0xaf9   :  { %v7547_v2 = vmul.f32 %v1066_v15, %v1049_v34  ;;  %v7586_v34 = vld [vmem:[%s10284_s1 + $0x10] sm:$0xff]  ;;  %v7599_v15 = vld [vmem:[%s10284_s1 + $0x18] sm:$0xff] }
 0xafb   :  { %1070 = vrot.lane.b32.xlu2 %v7547_v2, %s6923_s8 }
 0xb55   :  { %v1071_v0 = vpop.permute.xlu2 %1070 }
 0xb56   :  { %v1073_v8 = vsel %vm150_vm0, %v1071_v0, %v7518_v43 }
 0xb57   :  { %6022 = vmatmul.msk.f32.vlgmr.msrb.gmra.mxu2 %vm273_vm1, %v1073_v8 }
 0xb58   :  { %1858 = vmatpush.msrb.mxu2 %v6505_v53  ;;  %v7605_v53 = vld [vmem:[%s10284_s1 + $0x28] sm:$0xff] }
 0xb5a   :  { %1859 = vmatpush.msrb.mxu2 %v6506_v30 }
 0xb5c   :  { %1860 = vmatpush.msrb.mxu2 %v6507_v3 }
 0xb5e   :  { %1861 = vmatpush.msrb.mxu2 %v6508_v59 }
 0xbda   :  { %v1094_v5 = vpop.f32.mrf.mxu2 }
 0xbdb   :  { %v1095_v17 = vadd.f32 %v6509_v18, %v1094_v5 }
 0xbdd   :  { %6140 = vtanh.f32 %v1095_v17  ;;  %v6023_v49 = vmul.f32 -1.442695, %v1095_v17 }
 0xbdf   :  { %6142 = vpow2.f32 %v6023_v49  ;;  %v7614_v49 = vld [vmem:[%s10284_s1 + $0x38] sm:$0xff] }
 0xbe3   :  { %v6141_v62 = vpop.eup %6140 }
 0xbe4   :  { %1119 = vrot.lane.b32.xlu0 %v6141_v62, %s6924_s21 }
 0xbe5   :  { %v6143_v12 = vpop.eup %6142 }
 0xbe6   :  { %v1100_v39 = vadd.f32 1.0, %v6143_v12 }
 0xbe8   :  { %6144 = vrcp.f32 %v1100_v39  ;;  %v1112_v43 = vand.u32 2147483648, %v1100_v39  ;;  %vm1106_vm5 = vweird.f32 %v1100_v39  ;;  %v1110_v63 = vand.u32 2147483647, %v1100_v39 }
 0xbea   :  { %v1113_v6 = vor.u32 1.1754944e-38, %v1112_v43  ;;  %vm1111_vm7 = vcmp.eq.f32.partialorder %v1110_v63, 8.507059e+37 }
 0xbee   :  { %v6145_v45 = vpop.eup %6144 }
 0xbef   :  { %v1102_v33 = vmul.f32 %v6145_v45, %v1100_v39  ;;  %vm1107_vm9 = vweird.f32 %v6145_v45  ;;  %v7620_v39 = vld [vmem:[%s10284_s1 + $0x30] sm:$0xff] }
 0xbf0   :  { %vm1108_vm6 = vmor %vm1106_vm5, %vm1107_vm9 }
 0xbf1   :  { %v1103_v57 = vsub.f32 1.0, %v1102_v33 }
 0xbf3   :  { %v1104_v1 = vmul.f32 %v6145_v45, %v1103_v57  ;;  %v7626_v57 = vld [vmem:[%s10284_s1 + $0x40] sm:$0xff] }
 0xbf5   :  { %v1105_v38 = vadd.f32 %v6145_v45, %v1104_v1 }
 0xbf7   :  { %v1109_v46 = vsel %vm1108_vm6, %v6145_v45, %v1105_v38 }
 0xbf8   :  { %v1114_v16 = vsel %vm1111_vm7, %v1113_v6, %v1109_v46  ;;  %v7635_v6 = vld [vmem:[%s10284_s1 + $0x50] sm:$0xff] }
 0xbf9   :  { %v1117_v13 = vmul.f32 %v1114_v16, %v10311_v29 }
 0xc56   :  { %v1120_v9 = vpop.permute.xlu0 %1119 }
 0xc57   :  { %v1122_v26 = vmul.f32 %v1120_v9, %v1114_v16 }
 0xc59   :  { %1124 = vrot.lane.b32.xlu1 %v1122_v26, %s6923_s8 }
 0xccb   :  { %v1125_v24 = vpop.permute.xlu1 %1124 }
 0xccc   :  { %v7560_v7 = vadd.f32 %v1125_v24, %v1117_v13  ;;  %v7647_v13 = vld [vmem:[%s10284_s1 + $0x58] sm:$0xff] }
 0xcce   :  { %6146 = vtanh.f32 %v7560_v7 }
 0xcd4   :  { %v6147_v37 = vpop.eup %6146 }
 0xcd5   :  { %1130 = vrot.lane.b32.xlu2 %v6147_v37, %s6924_s21 }
 0xd2f   :  { %v1131_v25 = vpop.permute.xlu2 %1130 }
 0xd30   :  { %v7564_v35 = vmul.f32 %v1131_v25, %v1114_v16  ;;  %v7641_v16 = vld [vmem:[%s10284_s1 + $0x48] sm:$0xff] }
 0xd32   :  { %1135 = vrot.lane.b32.xlu0 %v7564_v35, %s6923_s8 }
 0xda4   :  { %v1136_v44 = vpop.permute.xlu0 %1135 }
 0xda5   :  { %6024 = vmatmul.msk.f32.vlgmr.msra.gmra.mxu3 %vm150_vm0, %v1136_v44 }
 0xda6   :  { %2433 = vmatpush.msra.mxu3 %v6510_v40 }
 0xda8   :  { %2434 = vmatpush.msra.mxu3 %v6511_v14 }
 0xdaa   :  { %2435 = vmatpush.msra.mxu3 %v6512_v32 }
 0xdac   :  { %2436 = vmatpush.msra.mxu3 %v6513_v27  ;;  %v7656_v27 = vld [vmem:[%s10284_s1 + $0x68] sm:$0xff] }
 0xdae   :  { %2437 = vmatpush.msra.mxu3 %v6514_v56 }
 0xdb0   :  { %2438 = vmatpush.msra.mxu3 %v6515_v10  ;;  %v7662_v10 = vld [vmem:[%s10284_s1 + $0x60] sm:$0xff] }
 0xdb2   :  { %2439 = vmatpush.msra.mxu3 %v6516_v28 }
 0xdb4   :  { %2440 = vmatpush.msra.mxu3 %v6517_v19  ;;  %v7668_v19 = vld [vmem:[%s10284_s1 + $0x70] sm:$0xff] }
 0xe28   :  { %v1156_v20 = vpop.f32.mrf.mxu3 }
 0xe29   :  { %v1167_v21 = vperm.slane %v1156_v20, 0  ;;  %v1160_v41 = vrot.slane %v1156_v20, 1  ;;  %v1161_v22 = vrot.slane %v1156_v20, 2  ;;  %v1162_v8 = vrot.slane %v1156_v20, 3 }
 0xe2a   :  { %v1163_v3 = vrot.slane %v1156_v20, 4  ;;  %v1164_v33 = vrot.slane %v1156_v20, 5  ;;  %v1165_v29 = vrot.slane %v1156_v20, 6  ;;  %v1166_v37 = vrot.slane %v1156_v20, 7 }
 0xe2b   :  { %v1184_v31 = vmul.f32 %v7572_v58, %v1167_v21  ;;  %v1183_v47 = vmul.f32 %v7578_v36, %v1167_v21  ;;  %v1168_v50 = vperm.slane %v1160_v41, 0  ;;  %v1169_v4 = vperm.slane %v1161_v22, 0 }
 0xe2c   :  { %v1170_v18 = vperm.slane %v1162_v8, 0  ;;  %v1171_v62 = vperm.slane %v1163_v3, 0  ;;  %v1172_v63 = vperm.slane %v1164_v33, 0  ;;  %v1173_v40 = vperm.slane %v1165_v29, 0 }
 0xe2d   :  { %v1202_v11 = vsel %vm150_vm0, %v1184_v31, 0.0  ;;  %v1199_v61 = vsel %vm150_vm0, %v1183_v47, 0.0  ;;  %v1185_v42 = vmul.f32 %v7586_v34, %v1168_v50  ;;  %v1187_v55 = vmul.f32 %v7593_v48, %v1169_v4  ;;  %v7677_v31 = vld [vmem:[%s10284_s1 + $0x78] sm:$0xff] }
 0xe2e   :  { %1203 = vadd.xlane.f32.xlu2 %v1202_v11  ;;  %1200 = vadd.xlane.f32.xlu1 %v1199_v61  ;;  %v1186_v0 = vmul.f32 %v7599_v15, %v1168_v50  ;;  %v1188_v30 = vmul.f32 %v7605_v53, %v1169_v4  ;;  %v1190_v12 = vmul.f32 %v7614_v49, %v1170_v18  ;;  %v1174_v32 = vperm.slane %v1166_v37, 0 }
 0xe2f   :  { %v1205_v52 = vsel %vm150_vm0, %v1185_v42, 0.0  ;;  %v1211_v59 = vsel %vm150_vm0, %v1187_v55, 0.0  ;;  %v1189_v45 = vmul.f32 %v7620_v39, %v1170_v18  ;;  %v1191_v1 = vmul.f32 %v7626_v57, %v1171_v62 }
 0xe30   :  { %1206 = vadd.xlane.f32.xlu0 %v1205_v52  ;;  %v1208_v5 = vsel %vm150_vm0, %v1186_v0, 0.0  ;;  %v1214_v17 = vsel %vm150_vm0, %v1188_v30, 0.0  ;;  %v1220_v38 = vsel %vm150_vm0, %v1190_v12, 0.0  ;;  %v1193_v9 = vmul.f32 %v7635_v6, %v1172_v63 }
 0xe31   :  { %v1217_v43 = vsel %vm150_vm0, %v1189_v45, 0.0  ;;  %v1223_v46 = vsel %vm150_vm0, %v1191_v1, 0.0  ;;  %v1192_v26 = vmul.f32 %v7641_v16, %v1171_v62  ;;  %v1194_v24 = vmul.f32 %v7647_v13, %v1172_v63 }
 0xe32   :  { %v1229_v25 = vsel %vm150_vm0, %v1193_v9, 0.0  ;;  %v1196_v56 = vmul.f32 %v7656_v27, %v1173_v40  ;;  %v1195_v28 = vmul.f32 %v7662_v10, %v1173_v40  ;;  %v1197_v20 = vmul.f32 %v7668_v19, %v1174_v32 }
 0xe33   :  { %v1226_v44 = vsel %vm150_vm0, %v1192_v26, 0.0  ;;  %v1232_v14 = vsel %vm150_vm0, %v1194_v24, 0.0  ;;  %v1198_v47 = vmul.f32 %v7677_v31, %v1174_v32 }
 0xe34   :  { %v1238_v21 = vsel %vm150_vm0, %v1196_v56, 0.0  ;;  %v1235_v41 = vsel %vm150_vm0, %v1195_v28, 0.0  ;;  %v1241_v22 = vsel %vm150_vm0, %v1197_v20, 0.0 }
 0xe35   :  { %v1244_v50 = vsel %vm150_vm0, %v1198_v47, 0.0 }
 0xe36   :  { %1212 = vadd.xlane.f32.xlu2 %v1211_v59  ;;  %1209 = vadd.xlane.f32.xlu1 %v1208_v5 }
 0xe38   :  { %1215 = vadd.xlane.f32.xlu0 %v1214_v17 }
 0xe3e   :  { %1221 = vadd.xlane.f32.xlu2 %v1220_v38  ;;  %1218 = vadd.xlane.f32.xlu1 %v1217_v43 }
 0xe40   :  { %1224 = vadd.xlane.f32.xlu0 %v1223_v46 }
 0xe46   :  { %1230 = vadd.xlane.f32.xlu2 %v1229_v25  ;;  %1227 = vadd.xlane.f32.xlu1 %v1226_v44 }
 0xe48   :  { %1233 = vadd.xlane.f32.xlu0 %v1232_v14 }
 0xe4e   :  { %1239 = vadd.xlane.f32.xlu2 %v1238_v21  ;;  %1236 = vadd.xlane.f32.xlu1 %v1235_v41 }
 0xe50   :  { %1242 = vadd.xlane.f32.xlu0 %v1241_v22 }
 0xe56   :  { %1245 = vadd.xlane.f32.xlu1 %v1244_v50 }
 0xea1   :  { %v1204_v11 = vpop.xlane.xlu2 %1203  ;;  %v1201_v61 = vpop.xlane.xlu1 %1200 }
 0xea2   :  { %v1264_v17 = vperm.slane %v1204_v11, %v7268_v54  ;;  %v1263_v62 = vperm.slane %v1201_v61, %v7263_v51 }
 0xea3   :  { %v1207_v42 = vpop.xlane.xlu0 %1206 }
 0xea4   :  { %v1266_v12 = vperm.slane %v1207_v42, %v7263_v51  ;;  %v1265_v9 = vsel %vm549_vm10, %v1264_v17, %v1263_v62 }
 0xea9   :  { %v7681_v4 = vpop.xlane.xlu2 %1212  ;;  %v1210_v52 = vpop.xlane.xlu1 %1209 }
 0xeaa   :  { %v1267_v5 = vperm.slane %v1210_v52, %v7268_v54  ;;  %v1269_v43 = vperm.slane %v7681_v4, %v7263_v51 }
 0xeab   :  { %v1216_v55 = vpop.xlane.xlu0 %1215 }
 0xeac   :  { %v1270_v45 = vperm.slane %v1216_v55, %v7268_v54  ;;  %v1268_v33 = vsel %vm549_vm10, %v1267_v5, %v1266_v12 }
 0xead   :  { %v1287_v29 = vsel %vm572_vm11, %v1268_v33, %v1265_v9 }
 0xeae   :  { %v1271_v24 = vsel %vm549_vm10, %v1270_v45, %v1269_v43 }
 0xeaf   :  { %v1288_v56 = vsel %vm574_vm12, %v1271_v24, %v1287_v29 }
 0xeb1   :  { %v7683_v0 = vpop.xlane.xlu2 %1221  ;;  %v1219_v8 = vpop.xlane.xlu1 %1218 }
 0xeb2   :  { %v1273_v1 = vperm.slane %v7683_v0, %v7268_v54  ;;  %v1272_v38 = vperm.slane %v1219_v8, %v7263_v51 }
 0xeb3   :  { %v7685_v30 = vpop.xlane.xlu0 %1224 }
 0xeb4   :  { %v1275_v37 = vperm.slane %v7685_v30, %v7263_v51  ;;  %v1274_v25 = vsel %vm549_vm10, %v1273_v1, %v1272_v38 }
 0xeb5   :  { %v1289_v20 = vsel %vm576_vm13, %v1274_v25, %v1288_v56 }
 0xeb9   :  { %v7687_v3 = vpop.xlane.xlu2 %1230  ;;  %v7689_v59 = vpop.xlane.xlu1 %1227 }
 0xeba   :  { %v1276_v63 = vperm.slane %v7689_v59, %v7268_v54  ;;  %v1278_v28 = vperm.slane %v7687_v3, %v7263_v51 }
 0xebb   :  { %v7692_v18 = vpop.xlane.xlu0 %1233 }
 0xebc   :  { %v1279_v44 = vperm.slane %v7692_v18, %v7268_v54  ;;  %v1277_v40 = vsel %vm549_vm10, %v1276_v63, %v1275_v37 }
 0xebd   :  { %v1290_v22 = vsel %vm578_vm14, %v1277_v40, %v1289_v20 }
 0xebe   :  { %v1280_v41 = vsel %vm549_vm10, %v1279_v44, %v1278_v28 }
 0xebf   :  { %v1291_v62 = vsel %vm580_vm15, %v1280_v41, %v1290_v22 }
 0xec1   :  { %v7706_v46 = vpop.xlane.xlu1 %1236  ;;  %v7709_v26 = vpop.xlane.xlu2 %1239 }
 0xec2   :  { %v1282_v14 = vperm.slane %v7709_v26, %v7268_v54  ;;  %v1281_v32 = vperm.slane %v7706_v46, %v7263_v51 }
 0xec3   :  { %v7727_v21 = vpop.xlane.xlu0 %1242 }
 0xec4   :  { %v1283_v50 = vsel %vm549_vm10, %v1282_v14, %v1281_v32  ;;  %v1284_v5 = vperm.slane %v7727_v21, %v7263_v51 }
 0xec5   :  { %v1292_v45 = vsel %vm582_vm2, %v1283_v50, %v1291_v62 }
 0xec9   :  { %v7731_v47 = vpop.xlane.xlu1 %1245 }
 0xeca   :  { %v1285_v17 = vperm.slane %v7731_v47, %v7268_v54 }
 0xecc   :  { %v1286_v12 = vsel %vm549_vm10, %v1285_v17, %v1284_v5 }
 0xecd   :  { %v1293_v33 = vsel %vm584_vm3, %v1286_v12, %v1292_v45 }
 0xece   :  { %v1295_v1 = vsel %vm587_vm4, %v1293_v33, -inf }
 0xecf   :  { %1296 = vmax.xlane.f32.xlu2 %v1295_v1 }
 0xf42   :  { %v7743_v38 = vpop.xlane.xlu2 %1296 }
 0xf43   :  { %v1300_v43 = vperm.slane %v7743_v38, 1  ;;  %v1299_v63 = vperm.slane %v7743_v38, 0  ;;  %v1302_v37 = vperm.slane %v7743_v38, 3  ;;  %v1301_v25 = vperm.slane %v7743_v38, 2 }
 0xf44   :  { %v1303_v41 = vperm.slane %v7743_v38, 4  ;;  %v1305_v17 = vperm.slane %v7743_v38, 6  ;;  %v1304_v12 = vperm.slane %v7743_v38, 5 }
 0xf45   :  { %v1317_v9 = vsub.f32 %v1207_v42, %v1300_v43  ;;  %v1316_v29 = vsub.f32 %v1204_v11, %v1299_v63  ;;  %v1315_v24 = vsub.f32 %v1201_v61, %v1299_v63  ;;  %v1321_v32 = vsub.f32 %v1219_v8, %v1302_v37 }
 0xf46   :  { %v1320_v56 = vsub.f32 %v1216_v55, %v1301_v25  ;;  %v1318_v28 = vsub.f32 %v1210_v52, %v1300_v43  ;;  %v1324_v55 = vsub.f32 %v7689_v59, %v1303_v41  ;;  %v1323_v52 = vsub.f32 %v7685_v30, %v1303_v41 }
 0xf47   :  { %v1335_v44 = vmul.f32 1.442695, %v1317_v9  ;;  %v1333_v40 = vmul.f32 1.442695, %v1316_v29  ;;  %v1331_v14 = vmul.f32 1.442695, %v1315_v24  ;;  %v1319_v8 = vsub.f32 %v7681_v4, %v1301_v25 }
 0xf48   :  { %v1343_v20 = vmul.f32 1.442695, %v1321_v32  ;;  %v1341_v22 = vmul.f32 1.442695, %v1320_v56  ;;  %v1337_v11 = vmul.f32 1.442695, %v1318_v28  ;;  %v1327_v4 = vsub.f32 %v7706_v46, %v1305_v17 }
 0xf49   :  { %6148 = vpow2.f32 %v1335_v44  ;;  %v1349_v5 = vmul.f32 1.442695, %v1324_v55  ;;  %v1347_v62 = vmul.f32 1.442695, %v1323_v52  ;;  %v1339_v33 = vmul.f32 1.442695, %v1319_v8 }
 0xf4a   :  { %6150 = vpow2.f32 %v1333_v40  ;;  %v1326_v30 = vsub.f32 %v7692_v18, %v1304_v12  ;;  %v1322_v43 = vsub.f32 %v7683_v0, %v1302_v37  ;;  %v1355_v63 = vmul.f32 1.442695, %v1327_v4 }
 0xf4b   :  { %6152 = vpow2.f32 %v1331_v14  ;;  %v1306_v9 = vperm.slane %v7743_v38, 7  ;;  %v1325_v38 = vsub.f32 %v7687_v3, %v1304_v12  ;;  %v1328_v3 = vsub.f32 %v7709_v26, %v1305_v17 }
 0xf4c   :  { %6154 = vpow2.f32 %v1343_v20  ;;  %v1353_v29 = vmul.f32 1.442695, %v1326_v30  ;;  %v1345_v25 = vmul.f32 1.442695, %v1322_v43 }
 0xf4d   :  { %6156 = vpow2.f32 %v1341_v22  ;;  %v1330_v18 = vsub.f32 %v7731_v47, %v1306_v9  ;;  %v1329_v0 = vsub.f32 %v7727_v21, %v1306_v9  ;;  %v1351_v32 = vmul.f32 1.442695, %v1325_v38 }
 0xf4e   :  { %6158 = vpow2.f32 %v1337_v11  ;;  %v1357_v47 = vmul.f32 1.442695, %v1328_v3 }
 0xf4f   :  { %v7750_v42 = vpop.eup %6148  ;;  %6160 = vpow2.f32 %v1349_v5  ;;  %v1361_v37 = vmul.f32 1.442695, %v1330_v18  ;;  %v1359_v40 = vmul.f32 1.442695, %v1329_v0 }
 0xf50   :  { %v7752_v61 = vpop.eup %6150  ;;  %1386 = vperm.xlu2 %6076, %v7750_v42   ;;  %6162 = vpow2.f32 %v1347_v62 }
 0xf51   :  { %v7755_v50 = vpop.eup %6152  ;;  %1383 = vperm.xlu1 %6075, %v7752_v61   ;;  %6164 = vpow2.f32 %v1339_v33 }
 0xf52   :  { %1380 = vperm.xlu0 %6077, %v7755_v50   ;;  %v7764_v45 = vpop.eup %6154  ;;  %6166 = vpow2.f32 %v1355_v63 }
 0xf53   :  { %v7766_v1 = vpop.eup %6156  ;;  %6168 = vpow2.f32 %v1353_v29 }
 0xf54   :  { %v7769_v59 = vpop.eup %6158  ;;  %6170 = vpow2.f32 %v1345_v25 }
 0xf55   :  { %v7777_v24 = vpop.eup %6160  ;;  %6172 = vpow2.f32 %v1361_v37 }
 0xf56   :  { %v7779_v44 = vpop.eup %6162  ;;  %6174 = vpow2.f32 %v1359_v40 }
 0xf57   :  { %v7782_v46 = vpop.eup %6164  ;;  %6176 = vpow2.f32 %v1351_v32 }
 0xf58   :  { %1398 = vperm.xlu2 %6076, %v7764_v45   ;;  %v7789_v14 = vpop.eup %6166  ;;  %6178 = vpow2.f32 %v1357_v47 }
 0xf59   :  { %1395 = vperm.xlu1 %6075, %v7766_v1   ;;  %v7791_v56 = vpop.eup %6168 }
 0xf5a   :  { %1389 = vperm.xlu0 %6077, %v7769_v59   ;;  %v7794_v28 = vpop.eup %6170 }
 0xf5b   :  { %v7799_v21 = vpop.eup %6172 }
 0xf5c   :  { %v7801_v20 = vpop.eup %6174 }
 0xf5d   :  { %v7804_v41 = vpop.eup %6176 }
 0xf5e   :  { %v7808_v22 = vpop.eup %6178 }
 0xf60   :  { %1407 = vperm.xlu2 %6076, %v7777_v24  }
 0xf61   :  { %1404 = vperm.xlu1 %6075, %v7779_v44  }
 0xf62   :  { %1392 = vperm.xlu0 %6077, %v7782_v46  }
 0xf68   :  { %1416 = vperm.xlu2 %6076, %v7789_v14  }
 0xf69   :  { %1413 = vperm.xlu1 %6075, %v7791_v56  }
 0xf6a   :  { %1401 = vperm.xlu0 %6077, %v7794_v28  }
 0xf70   :  { %1425 = vperm.xlu2 %6076, %v7799_v21  }
 0xf71   :  { %1422 = vperm.xlu1 %6075, %v7801_v20  }
 0xf72   :  { %1410 = vperm.xlu0 %6077, %v7804_v41  }
 0xf7a   :  { %1419 = vperm.xlu0 %6077, %v7808_v22  }
 0xfaa   :  { %v1387_v11 = vpop.permute.xlu2 %1386 }
 0xfab   :  { %v1430_v9 = vperm.slane %v1387_v11, %v7263_v51 }
 0xfb2   :  { %v1399_v5 = vpop.permute.xlu2 %1398 }
 0xfb3   :  { %v1436_v37 = vperm.slane %v1399_v5, %v7263_v51 }
 0xfba   :  { %v1408_v12 = vpop.permute.xlu2 %1407 }
 0xfbb   :  { %v1440_v5 = vperm.slane %v1408_v12, %v7268_v54 }
 0xfc2   :  { %v1417_v30 = vpop.permute.xlu2 %1416 }
 0xfc3   :  { %v1384_v26 = vpop.permute.xlu1 %1383 }
 0xfc4   :  { %v1381_v55 = vpop.permute.xlu0 %1380  ;;  %v1428_v29 = vperm.slane %v1384_v26, %v7268_v54 }
 0xfc5   :  { %v1427_v25 = vperm.slane %v1381_v55, %v7263_v51 }
 0xfc7   :  { %v1429_v3 = vsel %vm549_vm10, %v1428_v29, %v1427_v25  ;;  %v1445_v25 = vperm.slane %v1417_v30, %v7263_v51 }
 0xfcb   :  { %v1396_v52 = vpop.permute.xlu1 %1395 }
 0xfcc   :  { %v1390_v8 = vpop.permute.xlu0 %1389  ;;  %v1434_v38 = vperm.slane %v1396_v52, %v7268_v54 }
 0xfcd   :  { %v1431_v43 = vperm.slane %v1390_v8, %v7268_v54 }
 0xfcf   :  { %v1432_v40 = vsel %vm549_vm10, %v1431_v43, %v1430_v9 }
 0xfd0   :  { %v1451_v26 = vsel %vm572_vm11, %v1432_v40, %v1429_v3 }
 0xfd3   :  { %v1405_v62 = vpop.permute.xlu1 %1404 }
 0xfd4   :  { %v1393_v17 = vpop.permute.xlu0 %1392  ;;  %v1439_v55 = vperm.slane %v1405_v62, %v7263_v51 }
 0xfd5   :  { %v1433_v63 = vperm.slane %v1393_v17, %v7263_v51 }
 0xfd7   :  { %v1435_v32 = vsel %vm549_vm10, %v1434_v38, %v1433_v63 }
 0xfd8   :  { %v1452_v17 = vsel %vm574_vm12, %v1435_v32, %v1451_v26 }
 0xfdb   :  { %v1414_v4 = vpop.permute.xlu1 %1413 }
 0xfdc   :  { %v1402_v33 = vpop.permute.xlu0 %1401  ;;  %v1443_v52 = vperm.slane %v1414_v4, %v7268_v54 }
 0xfdd   :  { %v1437_v18 = vperm.slane %v1402_v33, %v7268_v54  ;;  %v1426_v33 = vpop.permute.xlu2 %1425 }
 0xfdf   :  { %v1438_v47 = vsel %vm549_vm10, %v1437_v18, %v1436_v37  ;;  %v1441_v18 = vsel %vm549_vm10, %v1440_v5, %v1439_v55 }
 0xfe0   :  { %v1453_v43 = vsel %vm576_vm13, %v1438_v47, %v1452_v17 }
 0xfe1   :  { %v1454_v4 = vsel %vm578_vm14, %v1441_v18, %v1453_v43 }
 0xfe3   :  { %v1423_v8 = vpop.permute.xlu1 %1422 }
 0xfe4   :  { %v1411_v0 = vpop.permute.xlu0 %1410  ;;  %v1448_v63 = vperm.slane %v1423_v8, %v7263_v51 }
 0xfe5   :  { %v1442_v11 = vperm.slane %v1411_v0, %v7263_v51  ;;  %v1449_v0 = vperm.slane %v1426_v33, %v7268_v54 }
 0xfe7   :  { %v1444_v9 = vsel %vm549_vm10, %v1443_v52, %v1442_v11  ;;  %v1450_v37 = vsel %vm549_vm10, %v1449_v0, %v1448_v63 }
 0xfe8   :  { %v1455_v38 = vsel %vm580_vm15, %v1444_v9, %v1454_v4 }
 0xfec   :  { %v1420_v29 = vpop.permute.xlu0 %1419 }
 0xfed   :  { %v1446_v62 = vperm.slane %v1420_v29, %v7268_v54 }
 0xfef   :  { %v1447_v12 = vsel %vm549_vm10, %v1446_v62, %v1445_v25 }
 0xff0   :  { %v1456_v40 = vsel %vm582_vm2, %v1447_v12, %v1455_v38 }
 0xff1   :  { %v1457_v32 = vsel %vm584_vm3, %v1450_v37, %v1456_v40 }
 0xff2   :  { %v1459_v30 = vsel %vm587_vm4, %v1457_v32, 0.0 }
 0xff3   :  { %1460 = vadd.xlane.f32.xlu0 %v1459_v30 }
0x1066   :  { %v1461_v3 = vpop.xlane.xlu0 %1460 }
0x1067   :  { %6180 = vrcp.f32 %v1461_v3 }
0x106d   :  { %v6181_v47 = vpop.eup %6180 }
0x106e   :  { %v1463_v11 = vmul.f32 %v6181_v47, %v1461_v3 }
0x1070   :  { %v1464_v26 = vsub.f32 2.0, %v1463_v11 }
0x1072   :  { %v1465_v55 = vmul.f32 %v6181_v47, %v1464_v26 }
0x1074   :  { %v1472_v8 = vperm.slane %v1465_v55, 5  ;;  %v1467_v17 = vperm.slane %v1465_v55, 0  ;;  %v1468_v43 = vperm.slane %v1465_v55, 1  ;;  %v1469_v29 = vperm.slane %v1465_v55, 2 }
0x1075   :  { %v1473_v62 = vperm.slane %v1465_v55, 6  ;;  %v1474_v0 = vperm.slane %v1465_v55, 7 }
0x1076   :  { %v1494_v52 = vmul.f32 %v7791_v56, %v1472_v8  ;;  %v1484_v5 = vmul.f32 %v7752_v61, %v1467_v17  ;;  %v1483_v33 = vmul.f32 %v7755_v50, %v1467_v17  ;;  %v1486_v63 = vmul.f32 %v7769_v59, %v1468_v43 }
0x1077   :  { %v1485_v9 = vmul.f32 %v7750_v42, %v1468_v43  ;;  %v1488_v56 = vmul.f32 %v7766_v1, %v1469_v29  ;;  %v1487_v61 = vmul.f32 %v7782_v46, %v1469_v29  ;;  %v1470_v50 = vperm.slane %v1465_v55, 3 }
0x1078   :  { %1556 = vperm.xlu0 %6077, %v1494_v52   ;;  %1506 = vperm.xlu2 %6076, %v1484_v5   ;;  %v1471_v42 = vperm.slane %v1465_v55, 4  ;;  %v1495_v1 = vmul.f32 %v7789_v14, %v1473_v62  ;;  %v1493_v46 = vmul.f32 %v7804_v41, %v1472_v8 }
0x1079   :  { %1501 = vperm.xlu1 %6075, %v1483_v33   ;;  %v1490_v25 = vmul.f32 %v7794_v28, %v1470_v50  ;;  %v1489_v18 = vmul.f32 %v7764_v45, %v1470_v50  ;;  %v1497_v28 = vmul.f32 %v7801_v20, %v1474_v0  ;;  %v1496_v45 = vmul.f32 %v7808_v22, %v1473_v62 }
0x107a   :  { %v1492_v59 = vmul.f32 %v7777_v24, %v1471_v42  ;;  %v1498_v24 = vmul.f32 %v7799_v21, %v1474_v0 }
0x1080   :  { %1711 = vrot.lane.b32.xlu0 %v7547_v2, %s6924_s21  ;;  %1516 = vperm.xlu2 %6076, %v1486_v63   ;;  %v1491_v2 = vmul.f32 %v7779_v44, %v1471_v42 }
0x1081   :  { %1511 = vperm.xlu1 %6075, %v1485_v9  }
0x1088   :  { %1526 = vperm.xlu2 %6076, %v1488_v56  }
0x1089   :  { %1521 = vperm.xlu1 %6075, %v1487_v61  }
0x1090   :  { %1536 = vperm.xlu2 %6076, %v1490_v25  }
0x1091   :  { %1531 = vperm.xlu1 %6075, %v1489_v18  }
0x1098   :  { %1546 = vperm.xlu2 %6076, %v1492_v59  }
0x1099   :  { %1541 = vperm.xlu1 %6075, %v1491_v2  }
0x10a0   :  { %1561 = vperm.xlu2 %6076, %v1495_v1  }
0x10a1   :  { %1551 = vperm.xlu1 %6075, %v1493_v46  }
0x10a8   :  { %1571 = vperm.xlu2 %6076, %v1497_v28  }
0x10a9   :  { %1566 = vperm.xlu1 %6075, %v1496_v45  }
0x10b0   :  { %1683 = vrot.lane.b32.xlu2 %v7564_v35, %s6924_s21 }
0x10b1   :  { %1576 = vperm.xlu1 %6075, %v1498_v24  }
0x10d2   :  { %v1507_v44 = vpop.permute.xlu2 %1506 }
0x10d3   :  { %v1580_v55 = vmul.f32 %v7572_v58, %v1507_v44 }
0x10d5   :  { %v1596_v5 = vsel %vm150_vm0, %v1580_v55, 0.0 }
0x10da   :  { %v1517_v14 = vpop.permute.xlu2 %1516 }
0x10db   :  { %v1582_v21 = vmul.f32 %v7599_v15, %v1517_v14 }
0x10dd   :  { %v1605_v15 = vsel %vm150_vm0, %v1582_v21, 0.0 }
0x10e2   :  { %v1527_v41 = vpop.permute.xlu2 %1526 }
0x10e3   :  { %v1584_v47 = vmul.f32 %v7605_v53, %v1527_v41 }
0x10ea   :  { %v1537_v37 = vpop.permute.xlu2 %1536  ;;  %v1557_v11 = vpop.permute.xlu0 %1556 }
0x10eb   :  { %v1502_v4 = vpop.permute.xlu1 %1501  ;;  %v1586_v8 = vmul.f32 %v7614_v49, %v1537_v37 }
0x10ec   :  { %v1579_v3 = vmul.f32 %v7578_v36, %v1502_v4  ;;  %v1590_v36 = vmul.f32 %v7647_v13, %v1557_v11 }
0x10ee   :  { %v1641_v56 = vsel %vm150_vm0, %v1590_v36, 0.0 }
0x10f2   :  { %v1547_v32 = vpop.permute.xlu2 %1546 }
0x10f3   :  { %v1512_v12 = vpop.permute.xlu1 %1511 }
0x10f4   :  { %v1581_v22 = vmul.f32 %v7586_v34, %v1512_v12  ;;  %v1588_v34 = vmul.f32 %v7641_v16, %v1547_v32  ;;  %v1623_v16 = vsel %vm150_vm0, %v1586_v8, 0.0 }
0x10f6   :  { %v1604_v17 = vsel %vm150_vm0, %v1581_v22, 0.0  ;;  %v1632_v13 = vsel %vm150_vm0, %v1588_v34, 0.0 }
0x10f7   :  { %v1606_v52 = vadd.f32 %v1605_v15, %v1604_v17 }
0x10f9   :  { %v1607_v25 = vrot.slane %v1606_v52, 4 }
0x10fa   :  { %v1562_v9 = vpop.permute.xlu2 %1561 }
0x10fb   :  { %v1522_v38 = vpop.permute.xlu1 %1521  ;;  %v1591_v62 = vmul.f32 %v7662_v10, %v1562_v9  ;;  %v1608_v46 = vadd.f32 %v1607_v25, %v1606_v52 }
0x10fc   :  { %v1583_v30 = vmul.f32 %v7593_v48, %v1522_v38 }
0x10fd   :  { %v1649_v4 = vsel %vm150_vm0, %v1591_v62, 0.0  ;;  %v1609_v41 = vrot.slane %v1608_v46, 2 }
0x10fe   :  { %v1613_v48 = vsel %vm150_vm0, %v1583_v30, 0.0 }
0x1102   :  { %v1572_v38 = vpop.permute.xlu2 %1571 }
0x1103   :  { %v1532_v40 = vpop.permute.xlu1 %1531  ;;  %v1593_v30 = vmul.f32 %v7668_v19, %v1572_v38  ;;  %v6540_v38 = vld [vmem:[%s10294_s11 + $0x8] sm:$0xff] }
0x1104   :  { %v1585_v35 = vmul.f32 %v7620_v39, %v1532_v40  ;;  %v1595_v39 = vsel %vm150_vm0, %v1579_v3, 0.0  ;;  %v1610_v3 = vadd.f32 %v1609_v41, %v1608_v46  ;;  %v6539_v41 = vld [vmem:[%s10294_s11 + $0x10] sm:$0xff] }
0x1105   :  { %v1597_v63 = vadd.f32 %v1596_v5, %v1595_v39  ;;  %v1658_v34 = vsel %vm150_vm0, %v1593_v30, 0.0 }
0x1106   :  { %v1622_v53 = vsel %vm150_vm0, %v1585_v35, 0.0  ;;  %v1611_v36 = vrot.slane %v1610_v3, 1 }
0x1107   :  { %v1624_v29 = vadd.f32 %v1623_v16, %v1622_v53  ;;  %v1598_v59 = vrot.slane %v1597_v63, 4 }
0x1108   :  { %v1612_v16 = vadd.f32 %v1611_v36, %v1610_v3 }
0x1109   :  { %v1625_v2 = vrot.slane %v1624_v29, 4  ;;  %v1599_v24 = vadd.f32 %v1598_v59, %v1597_v63 }
0x110b   :  { %v1542_v20 = vpop.permute.xlu1 %1541  ;;  %v1626_v44 = vadd.f32 %v1625_v2, %v1624_v29  ;;  %v1600_v10 = vrot.slane %v1599_v24, 2 }
0x110c   :  { %v1587_v26 = vmul.f32 %v7626_v57, %v1542_v20  ;;  %v1614_v57 = vsel %vm150_vm0, %v1584_v47, 0.0 }
0x110d   :  { %v1615_v33 = vadd.f32 %v1614_v57, %v1613_v48  ;;  %v1627_v20 = vrot.slane %v1626_v44, 2  ;;  %v1601_v55 = vadd.f32 %v1600_v10, %v1599_v24  ;;  %v6534_v24 = vld [vmem:[%s10294_s11 + $0x38] sm:$0xff] }
0x110e   :  { %v1631_v58 = vsel %vm150_vm0, %v1587_v26, 0.0 }
0x110f   :  { %v1633_v61 = vadd.f32 %v1632_v13, %v1631_v58  ;;  %v1616_v42 = vrot.slane %v1615_v33, 4  ;;  %v1628_v8 = vadd.f32 %v1627_v20, %v1626_v44  ;;  %v1602_v52 = vrot.slane %v1601_v55, 1  ;;  %v6535_v44 = vld [vmem:[%s10294_s11 + $0x30] sm:$0xff]  ;;  %v1712_v20 = vpop.permute.xlu0 %1711 }
0x1111   :  { %v1634_v1 = vrot.slane %v1633_v61, 4  ;;  %v1617_v28 = vadd.f32 %v1616_v42, %v1615_v33  ;;  %v1629_v58 = vrot.slane %v1628_v8, 1  ;;  %v1603_v13 = vadd.f32 %v1602_v52, %v1601_v55 }
0x1113   :  { %v1552_v49 = vpop.permute.xlu1 %1551  ;;  %v1635_v14 = vadd.f32 %v1634_v1, %v1633_v61  ;;  %v1618_v32 = vrot.slane %v1617_v28, 2  ;;  %v1630_v9 = vadd.f32 %v1629_v58, %v1628_v8  ;;  %v1675_v61 = vsel %vm572_vm11, %v1612_v16, %v1603_v13 }
0x1114   :  { %v1589_v43 = vmul.f32 %v7635_v6, %v1552_v49 }
0x1115   :  { %v1636_v21 = vrot.slane %v1635_v14, 2  ;;  %v1619_v11 = vadd.f32 %v1618_v32, %v1617_v28 }
0x1116   :  { %v1640_v50 = vsel %vm150_vm0, %v1589_v43, 0.0 }
0x1117   :  { %v1642_v18 = vadd.f32 %v1641_v56, %v1640_v50  ;;  %v1637_v48 = vadd.f32 %v1636_v21, %v1635_v14  ;;  %v1620_v19 = vrot.slane %v1619_v11, 1  ;;  %v6537_v14 = vld [vmem:[%s10294_s11 + $0x20] sm:$0xff] }
0x1118   :  { %v6542_v21 = vld [vmem:[%s10290_s7] ss:$0 sm:$0xff] }
0x1119   :  { %v1643_v6 = vrot.slane %v1642_v18, 4  ;;  %v1638_v5 = vrot.slane %v1637_v48, 1  ;;  %v1621_v43 = vadd.f32 %v1620_v19, %v1619_v11 }
0x111b   :  { %v1567_v0 = vpop.permute.xlu1 %1566  ;;  %v1644_v37 = vadd.f32 %v1643_v6, %v1642_v18  ;;  %v1639_v56 = vadd.f32 %v1638_v5, %v1637_v48  ;;  %v1676_v18 = vsel %vm574_vm12, %v1621_v43, %v1675_v61  ;;  %v7969_v61 = vld [vmem:[#allocation10 + $0x18] sm:$0xff] }
0x111c   :  { %v1592_v45 = vmul.f32 %v7656_v27, %v1567_v0  ;;  %v1677_v59 = vsel %vm576_vm13, %v1630_v9, %v1676_v18  ;;  %v7901_v0 = vpop.permute.xlu2 %1683  ;;  %v7960_v9 = vld [vmem:[#allocation10 + $0x30] sm:$0xff]  ;;  %10314 = vst [vmem:[#allocation22_spill] sm:$0xff] %v7969_v61  ;;  %v7978_v18 = vld [vmem:[#allocation10] sm:$0xff] }
0x111d   :  { %v1645_v27 = vrot.slane %v1644_v37, 2  ;;  %v1678_v62 = vsel %vm578_vm14, %v1639_v56, %v1677_v59  ;;  %v7966_v56 = vld [vmem:[#allocation10 + $0x20] sm:$0xff]  ;;  %10317 = vst [vmem:[#allocation25_spill] sm:$0xff] %v7978_v18  ;;  %v6551_v59 = vld [vmem:[%s10292_s9] ss:$0 sm:$0xff] }
0x111e   :  { %v1650_v12 = vsel %vm150_vm0, %v1592_v45, 0.0 }
0x111f   :  { %v1651_v40 = vadd.f32 %v1650_v12, %v1649_v4  ;;  %v1646_v39 = vadd.f32 %v1645_v27, %v1644_v37  ;;  %v6536_v4 = vld [vmem:[%s10294_s11 + $0x28] sm:$0xff]  ;;  %v6538_v12 = vld [vmem:[%s10294_s11 + $0x18] sm:$0xff]  ;;  %v6541_v37 = vld [vmem:[%s10294_s11] sm:$0xff] }
0x1121   :  { %v1652_v22 = vrot.slane %v1651_v40, 4  ;;  %v1647_v33 = vrot.slane %v1646_v39, 1 }
0x1123   :  { %v1653_v35 = vadd.f32 %v1652_v22, %v1651_v40  ;;  %v1577_v47 = vpop.permute.xlu1 %1576  ;;  %v1648_v50 = vadd.f32 %v1647_v33, %v1646_v39  ;;  %v136_v40 = vld [vmem:[%s10283_s0 + $0x10] sm:$0xff] }
0x1124   :  { %v1594_v26 = vmul.f32 %v7677_v31, %v1577_v47  ;;  %6008 = vmatmul.msk.f32.gmra.mxu0 %vm150_vm0, %v136_v40 }
0x1125   :  { %v1654_v17 = vrot.slane %v1653_v35, 2  ;;  %v1679_v46 = vsel %vm580_vm15, %v1648_v50, %v1678_v62  ;;  %v7972_v50 = vld [vmem:[#allocation10 + $0x10] sm:$0xff] }
0x1126   :  { %v1659_v15 = vsel %vm150_vm0, %v1594_v26, 0.0  ;;  %10315 = vst [vmem:[#allocation23_spill] sm:$0xff] %v7972_v50 }
0x1127   :  { %v1660_v53 = vadd.f32 %v1659_v15, %v1658_v34  ;;  %v1655_v57 = vadd.f32 %v1654_v17, %v1653_v35 }
0x1129   :  { %v1661_v49 = vrot.slane %v1660_v53, 4  ;;  %v1656_v63 = vrot.slane %v1655_v57, 1 }
0x112b   :  { %v1662_v31 = vadd.f32 %v1661_v49, %v1660_v53  ;;  %v1657_v42 = vadd.f32 %v1656_v63, %v1655_v57 }
0x112d   :  { %v1663_v29 = vrot.slane %v1662_v31, 2  ;;  %v1680_v6 = vsel %vm582_vm2, %v1657_v42, %v1679_v46 }
0x112f   :  { %v1664_v25 = vadd.f32 %v1663_v29, %v1662_v31  ;;  %v7963_v29 = vld [vmem:[#allocation10 + $0x28] sm:$0xff] }
0x1131   :  { %v1665_v2 = vrot.slane %v1664_v25, 1 }
0x1133   :  { %v1666_v1 = vadd.f32 %v1665_v2, %v1664_v25  ;;  %v7975_v25 = vld [vmem:[#allocation10 + $0x8] sm:$0xff] }
0x1134   :  { %10316 = vst [vmem:[#allocation24_spill] sm:$0xff] %v7975_v25 }
0x1135   :  { %v1681_v28 = vsel %vm584_vm3, %v1666_v1, %v1680_v6 }
0x1136   :  { %v1686_v45 = vsel %vm150_vm0, %v1681_v28, %v7901_v0 }
0x1137   :  { %6025 = vmatmul.msk.f32.vlgmr.msra.gmra.mxu1 %vm273_vm1, %v1686_v45 }
0x1138   :  { %3112 = vmatpush.msra.mxu1 %v6534_v24 }
0x113a   :  { %3113 = vmatpush.msra.mxu1 %v6535_v44 }
0x113c   :  { %3114 = vmatpush.msra.mxu1 %v6536_v4 }
0x113e   :  { %3115 = vmatpush.msra.mxu1 %v6537_v14 }
0x1140   :  { %3116 = vmatpush.msra.mxu1 %v6538_v12 }
0x1142   :  { %3117 = vmatpush.msra.mxu1 %v6539_v41 }
0x1144   :  { %3118 = vmatpush.msra.mxu1 %v6540_v38 }
0x1146   :  { %3119 = vmatpush.msra.mxu1 %v6541_v37 }
0x11a1   :  { %v198_v30 = vpop.f32.mrf.mxu0 }
0x11a2   :  { %v199_v3 = vadd.f32 %v6542_v21, %v198_v30 }
0x11b4   :  { %v1707_v32 = vpop.f32.mrf.mxu1 }
0x11b5   :  { %6182 = vtanh.f32 %v1707_v32 }
0x11bb   :  { %v7935_v10 = vpop.eup %6182 }
0x11bc   :  { %10312 = vst [vmem:[#allocation19_spill] sm:$0xff] %v7935_v10  ;;  %v1714_v22 = vsel %vm150_vm0, %v7935_v10, %v1712_v20 }
0x11bd   :  { %6026 = vmatmul.msk.f32.vlgmr.msra.gmra.mxu2 %vm273_vm1, %v1714_v22 }
0x11be   :  { %2405 = vmatpush.msra.mxu2 %v6534_v24 }
0x11c0   :  { %2406 = vmatpush.msra.mxu2 %v6535_v44 }
0x11c2   :  { %2407 = vmatpush.msra.mxu2 %v6536_v4 }
0x11c4   :  { %2408 = vmatpush.msra.mxu2 %v6537_v14 }
0x11c6   :  { %2409 = vmatpush.msra.mxu2 %v6538_v12 }
0x11c8   :  { %2410 = vmatpush.msra.mxu2 %v6539_v41 }
0x11ca   :  { %2411 = vmatpush.msra.mxu2 %v6540_v38 }
0x11cc   :  { %2412 = vmatpush.msra.mxu2 %v6541_v37 }
0x1240   :  { %v1735_v27 = vpop.f32.mrf.mxu2 }
0x1241   :  { %v1738_v35 = vadd.f32 %v1735_v27, %v199_v3 }
0x1243   :  { %6184 = vtanh.f32 %v1738_v35  ;;  %v6027_v11 = vmul.f32 -1.442695, %v1738_v35  ;;  %v6552_v35 = vld [vmem:[#allocation8 + $0x38] sm:$0xff] }
0x1245   :  { %6186 = vpow2.f32 %v6027_v11  ;;  %v6555_v11 = vld [vmem:[#allocation8 + $0x20] sm:$0xff] }
0x1249   :  { %v6185_v47 = vpop.eup %6184 }
0x124a   :  { %1761 = vrot.lane.b32.xlu1 %v6185_v47, %s6924_s21  ;;  %v6554_v47 = vld [vmem:[#allocation8 + $0x28] sm:$0xff] }
0x124b   :  { %v6187_v26 = vpop.eup %6186 }
0x124c   :  { %v1742_v55 = vadd.f32 1.0, %v6187_v26  ;;  %v6556_v26 = vld [vmem:[#allocation8 + $0x18] sm:$0xff] }
0x124e   :  { %6188 = vrcp.f32 %v1742_v55  ;;  %v1754_v36 = vand.u32 2147483648, %v1742_v55  ;;  %vm1748_vm9 = vweird.f32 %v1742_v55  ;;  %v1752_v39 = vand.u32 2147483647, %v1742_v55 }
0x1250   :  { %v1755_v19 = vor.u32 1.1754944e-38, %v1754_v36  ;;  %vm1753_vm6 = vcmp.eq.f32.partialorder %v1752_v39, 8.507059e+37  ;;  %v7999_v39 = vld [vmem:[%s10284_s1 + $0x8] sm:$0xff] }
0x1254   :  { %v6189_v8 = vpop.eup %6188 }
0x1255   :  { %v1744_v17 = vmul.f32 %v6189_v8, %v1742_v55  ;;  %vm1749_vm8 = vweird.f32 %v6189_v8  ;;  %v6557_v55 = vld [vmem:[#allocation8 + $0x10] sm:$0xff] }
0x1256   :  { %vm1750_vm5 = vmor %vm1748_vm9, %vm1749_vm8 }
0x1257   :  { %v1745_v34 = vsub.f32 1.0, %v1744_v17  ;;  %v6559_v17 = vld [vmem:[#allocation8] sm:$0xff] }
0x1259   :  { %v1746_v48 = vmul.f32 %v6189_v8, %v1745_v34 }
0x125b   :  { %v1747_v15 = vadd.f32 %v6189_v8, %v1746_v48 }
0x125d   :  { %v1751_v53 = vsel %vm1750_vm5, %v6189_v8, %v1747_v15  ;;  %v6558_v8 = vld [vmem:[#allocation8 + $0x8] sm:$0xff] }
0x125e   :  { %v1756_v52 = vsel %vm1753_vm6, %v1755_v19, %v1751_v53  ;;  %v8005_v19 = vld [vmem:[%s10284_s1] sm:$0xff] }
0x125f   :  { %v1759_v49 = vmul.f32 %v1756_v52, %v7543_v60  ;;  %v7957_v60 = vld [vmem:[#allocation10 + $0x38] sm:$0xff] }
0x12bc   :  { %v1762_v57 = vpop.permute.xlu1 %1761 }
0x12bd   :  { %v1764_v58 = vmul.f32 %v1762_v57, %v1756_v52 }
0x12bf   :  { %1766 = vrot.lane.b32.xlu2 %v1764_v58, %s6923_s8 }
0x1319   :  { %v1767_v5 = vpop.permute.xlu2 %1766 }
0x131a   :  { %v7946_v16 = vadd.f32 %v1767_v5, %v1759_v49  ;;  %v8013_v5 = vld [vmem:[%s10284_s1 + $0x10] sm:$0xff] }
0x131c   :  { %10313 = vst [vmem:[#allocation20_spill] sm:$0xff] %v7946_v16  ;;  %6190 = vtanh.f32 %v7946_v16 }
0x1322   :  { %v6191_v33 = vpop.eup %6190 }
0x1323   :  { %1772 = vrot.lane.b32.xlu0 %v6191_v33, %s6924_s21 }
0x1395   :  { %v1773_v31 = vpop.permute.xlu0 %1772 }
0x1396   :  { %v7950_v43 = vmul.f32 %v1773_v31, %v1756_v52 }
0x1398   :  { %1777 = vrot.lane.b32.xlu1 %v7950_v43, %s6923_s8 }
0x140a   :  { %v1778_v63 = vpop.permute.xlu1 %1777 }
0x140b   :  { %v1780_v13 = vsel %vm150_vm0, %v1778_v63, %v7901_v0 }
0x140c   :  { %6028 = vmatmul.msk.f32.vlgmr.msrb.gmra.mxu3 %vm273_vm1, %v1780_v13  ;;  %v8020_v13 = vld [vmem:[%s10284_s1 + $0x20] sm:$0xff] }
0x140d   :  { %3206 = vmatpush.msrb.mxu3 %v7957_v60 }
0x140f   :  { %3207 = vmatpush.msrb.mxu3 %v7960_v9 }
0x1411   :  { %3208 = vmatpush.msrb.mxu3 %v7963_v29 }
0x1413   :  { %3209 = vmatpush.msrb.mxu3 %v7966_v56 }
0x1415   :  { %3210 = vmatpush.msrb.mxu3 %v7969_v61 }
0x1417   :  { %3211 = vmatpush.msrb.mxu3 %v7972_v50 }
0x1419   :  { %3212 = vmatpush.msrb.mxu3 %v7975_v25 }
0x141b   :  { %3213 = vmatpush.msrb.mxu3 %v7978_v18 }
0x148f   :  { %v1801_v42 = vpop.f32.mrf.mxu3 }
0x1490   :  { %v1802_v2 = vadd.f32 %v6551_v59, %v1801_v42  ;;  %v8026_v59 = vld [vmem:[%s10284_s1 + $0x18] sm:$0xff] }
0x1492   :  { %6192 = vtanh.f32 %v1802_v2  ;;  %v6029_v1 = vmul.f32 -1.442695, %v1802_v2 }
0x1494   :  { %6194 = vpow2.f32 %v6029_v1  ;;  %v8032_v1 = vld [vmem:[%s10284_s1 + $0x28] sm:$0xff] }
0x1498   :  { %v6193_v62 = vpop.eup %6192 }
0x1499   :  { %1826 = vrot.lane.b32.xlu2 %v6193_v62, %s6924_s21 }
0x149a   :  { %v6195_v46 = vpop.eup %6194 }
0x149b   :  { %v1807_v6 = vadd.f32 1.0, %v6195_v46 }
0x149d   :  { %6196 = vrcp.f32 %v1807_v6  ;;  %v1819_v4 = vand.u32 2147483648, %v1807_v6  ;;  %vm1813_vm8 = vweird.f32 %v1807_v6  ;;  %v1817_v14 = vand.u32 2147483647, %v1807_v6 }
0x149f   :  { %v1820_v41 = vor.u32 1.1754944e-38, %v1819_v4  ;;  %vm1818_vm5 = vcmp.eq.f32.partialorder %v1817_v14, 8.507059e+37  ;;  %v8041_v4 = vld [vmem:[%s10284_s1 + $0x38] sm:$0xff] }
0x14a3   :  { %v6197_v0 = vpop.eup %6196 }
0x14a4   :  { %v1809_v28 = vmul.f32 %v6197_v0, %v1807_v6  ;;  %vm1814_vm7 = vweird.f32 %v6197_v0 }
0x14a5   :  { %vm1815_vm9 = vmor %vm1813_vm8, %vm1814_vm7 }
0x14a6   :  { %v1810_v45 = vsub.f32 1.0, %v1809_v28 }
0x14a8   :  { %v1811_v24 = vmul.f32 %v6197_v0, %v1810_v45 }
0x14aa   :  { %v1812_v44 = vadd.f32 %v6197_v0, %v1811_v24 }
0x14ac   :  { %v1816_v12 = vsel %vm1815_vm9, %v6197_v0, %v1812_v44 }
0x14ad   :  { %v1821_v37 = vsel %vm1818_vm5, %v1820_v41, %v1816_v12  ;;  %v8047_v12 = vld [vmem:[%s10284_s1 + $0x30] sm:$0xff] }
0x14ae   :  { %v1824_v32 = vmul.f32 %v1821_v37, %v7560_v7  ;;  %v6553_v7 = vld [vmem:[#allocation8 + $0x30] sm:$0xff] }
0x14f3   :  { %v1827_v38 = vpop.permute.xlu2 %1826 }
0x14f4   :  { %v1829_v40 = vmul.f32 %v1827_v38, %v1821_v37 }
0x14f6   :  { %1831 = vrot.lane.b32.xlu0 %v1829_v40, %s6923_s8 }
0x1568   :  { %v1832_v20 = vpop.permute.xlu0 %1831 }
0x1569   :  { %v7987_v22 = vadd.f32 %v1832_v20, %v1824_v32 }
0x156b   :  { %10318 = vst [vmem:[#allocation26_spill] sm:$0xff] %v7987_v22  ;;  %6198 = vtanh.f32 %v7987_v22 }
0x1571   :  { %v6199_v30 = vpop.eup %6198 }
0x1572   :  { %1837 = vrot.lane.b32.xlu1 %v6199_v30, %s6924_s21 }
0x15e4   :  { %v1838_v21 = vpop.permute.xlu1 %1837 }
0x15e5   :  { %v7991_v3 = vmul.f32 %v1838_v21, %v1821_v37  ;;  %v8053_v37 = vld [vmem:[%s10284_s1 + $0x40] sm:$0xff] }
0x15e7   :  { %1842 = vrot.lane.b32.xlu2 %v7991_v3, %s6923_s8 }
0x1641   :  { %v1843_v27 = vpop.permute.xlu2 %1842 }
0x1642   :  { %6030 = vmatmul.msk.f32.vlgmr.msrb.gmra.mxu2 %vm150_vm0, %v1843_v27  ;;  %v8062_v27 = vld [vmem:[%s10284_s1 + $0x50] sm:$0xff] }
0x1643   :  { %3140 = vmatpush.msrb.mxu2 %v6552_v35 }
0x1645   :  { %3141 = vmatpush.msrb.mxu2 %v6553_v7  ;;  %v8068_v7 = vld [vmem:[%s10284_s1 + $0x48] sm:$0xff] }
0x1647   :  { %3142 = vmatpush.msrb.mxu2 %v6554_v47 }
0x1649   :  { %3143 = vmatpush.msrb.mxu2 %v6555_v11 }
0x164b   :  { %3144 = vmatpush.msrb.mxu2 %v6556_v26  ;;  %v8074_v26 = vld [vmem:[%s10284_s1 + $0x58] sm:$0xff] }
0x164d   :  { %3145 = vmatpush.msrb.mxu2 %v6557_v55 }
0x164f   :  { %3146 = vmatpush.msrb.mxu2 %v6558_v8 }
0x1651   :  { %3147 = vmatpush.msrb.mxu2 %v6559_v17 }
0x16c5   :  { %v1863_v34 = vpop.f32.mrf.mxu2 }
0x16c6   :  { %v1874_v48 = vperm.slane %v1863_v34, 0  ;;  %v1867_v15 = vrot.slane %v1863_v34, 1  ;;  %v1868_v36 = vrot.slane %v1863_v34, 2  ;;  %v1869_v62 = vrot.slane %v1863_v34, 3 }
0x16c7   :  { %v1870_v6 = vrot.slane %v1863_v34, 4  ;;  %v1871_v38 = vrot.slane %v1863_v34, 5  ;;  %v1872_v11 = vrot.slane %v1863_v34, 6  ;;  %v1873_v8 = vrot.slane %v1863_v34, 7  ;;  %v8089_v34 = vld [vmem:[%s10284_s1 + $0x60] sm:$0xff] }
0x16c8   :  { %v1891_v53 = vmul.f32 %v7999_v39, %v1874_v48  ;;  %v1890_v57 = vmul.f32 %v8005_v19, %v1874_v48  ;;  %v1875_v52 = vperm.slane %v1867_v15, 0  ;;  %v1876_v31 = vperm.slane %v1868_v36, 0 }
0x16c9   :  { %v1877_v45 = vperm.slane %v1869_v62, 0  ;;  %v1878_v44 = vperm.slane %v1870_v6, 0  ;;  %v1879_v30 = vperm.slane %v1871_v38, 0  ;;  %v1880_v15 = vperm.slane %v1872_v11, 0 }
0x16ca   :  { %v1909_v58 = vsel %vm150_vm0, %v1891_v53, 0.0  ;;  %v1906_v49 = vsel %vm150_vm0, %v1890_v57, 0.0  ;;  %v1892_v33 = vmul.f32 %v8013_v5, %v1875_v52  ;;  %v1894_v42 = vmul.f32 %v8020_v13, %v1876_v31  ;;  %v8083_v57 = vld [vmem:[%s10284_s1 + $0x68] sm:$0xff] }
0x16cb   :  { %1910 = vadd.xlane.f32.xlu1 %v1909_v58  ;;  %1907 = vadd.xlane.f32.xlu0 %v1906_v49  ;;  %v1893_v2 = vmul.f32 %v8026_v59, %v1875_v52  ;;  %v1895_v46 = vmul.f32 %v8032_v1, %v1876_v31  ;;  %v1897_v14 = vmul.f32 %v8041_v4, %v1877_v45  ;;  %v1881_v53 = vperm.slane %v1873_v8, 0  ;;  %v8095_v49 = vld [vmem:[%s10284_s1 + $0x70] sm:$0xff] }
0x16cc   :  { %v1912_v63 = vsel %vm150_vm0, %v1892_v33, 0.0  ;;  %v1918_v0 = vsel %vm150_vm0, %v1894_v42, 0.0  ;;  %v1896_v41 = vmul.f32 %v8047_v12, %v1877_v45  ;;  %v1898_v40 = vmul.f32 %v8053_v37, %v1878_v44 }
0x16cd   :  { %1913 = vadd.xlane.f32.xlu2 %v1912_v63  ;;  %v1915_v28 = vsel %vm150_vm0, %v1893_v2, 0.0  ;;  %v1921_v24 = vsel %vm150_vm0, %v1895_v46, 0.0  ;;  %v1927_v32 = vsel %vm150_vm0, %v1897_v14, 0.0  ;;  %v1900_v35 = vmul.f32 %v8062_v27, %v1879_v30  ;;  %v8104_v2 = vld [vmem:[%s10284_s1 + $0x78] sm:$0xff] }
0x16ce   :  { %v1924_v20 = vsel %vm150_vm0, %v1896_v41, 0.0  ;;  %v1930_v21 = vsel %vm150_vm0, %v1898_v40, 0.0  ;;  %v1899_v47 = vmul.f32 %v8068_v7, %v1878_v44  ;;  %v1901_v55 = vmul.f32 %v8074_v26, %v1879_v30 }
0x16cf   :  { %v1936_v17 = vsel %vm150_vm0, %v1900_v35, 0.0  ;;  %v1903_v52 = vmul.f32 %v8083_v57, %v1880_v15  ;;  %v1902_v58 = vmul.f32 %v8089_v34, %v1880_v15  ;;  %v1904_v33 = vmul.f32 %v8095_v49, %v1881_v53 }
0x16d0   :  { %v1933_v48 = vsel %vm150_vm0, %v1899_v47, 0.0  ;;  %v1939_v36 = vsel %vm150_vm0, %v1901_v55, 0.0  ;;  %v1905_v62 = vmul.f32 %v8104_v2, %v1881_v53 }
0x16d1   :  { %v1945_v31 = vsel %vm150_vm0, %v1903_v52, 0.0  ;;  %v1942_v63 = vsel %vm150_vm0, %v1902_v58, 0.0  ;;  %v1948_v42 = vsel %vm150_vm0, %v1904_v33, 0.0 }
0x16d2   :  { %v1951_v46 = vsel %vm150_vm0, %v1905_v62, 0.0 }
0x16d3   :  { %1919 = vadd.xlane.f32.xlu1 %v1918_v0  ;;  %1916 = vadd.xlane.f32.xlu0 %v1915_v28 }
0x16d5   :  { %1922 = vadd.xlane.f32.xlu2 %v1921_v24 }
0x16db   :  { %1928 = vadd.xlane.f32.xlu1 %v1927_v32  ;;  %1925 = vadd.xlane.f32.xlu0 %v1924_v20 }
0x16dd   :  { %1931 = vadd.xlane.f32.xlu2 %v1930_v21 }
0x16e3   :  { %1937 = vadd.xlane.f32.xlu1 %v1936_v17  ;;  %1934 = vadd.xlane.f32.xlu0 %v1933_v48 }
0x16e5   :  { %1940 = vadd.xlane.f32.xlu2 %v1939_v36 }
0x16eb   :  { %1946 = vadd.xlane.f32.xlu1 %v1945_v31  ;;  %1943 = vadd.xlane.f32.xlu0 %v1942_v63 }
0x16ed   :  { %1949 = vadd.xlane.f32.xlu2 %v1948_v42 }
0x16f3   :  { %1952 = vadd.xlane.f32.xlu0 %v1951_v46 }
0x173e   :  { %v1911_v6 = vpop.xlane.xlu1 %1910  ;;  %v1908_v0 = vpop.xlane.xlu0 %1907 }
0x173f   :  { %v1971_v21 = vperm.slane %v1911_v6, %v7268_v54  ;;  %v1970_v35 = vperm.slane %v1908_v0, %v7263_v51 }
0x1740   :  { %v1914_v28 = vpop.xlane.xlu2 %1913 }
0x1741   :  { %v1973_v47 = vperm.slane %v1914_v28, %v7263_v51  ;;  %v1972_v53 = vsel %vm549_vm10, %v1971_v21, %v1970_v35 }
0x1746   :  { %v1920_v45 = vpop.xlane.xlu1 %1919  ;;  %v1917_v24 = vpop.xlane.xlu0 %1916 }
0x1747   :  { %v1974_v20 = vperm.slane %v1917_v24, %v7268_v54  ;;  %v1976_v48 = vperm.slane %v1920_v45, %v7263_v51 }
0x1748   :  { %v8108_v44 = vpop.xlane.xlu2 %1922 }
0x1749   :  { %v1977_v11 = vperm.slane %v8108_v44, %v7268_v54  ;;  %v1975_v55 = vsel %vm549_vm10, %v1974_v20, %v1973_v47 }
0x174a   :  { %v1994_v58 = vsel %vm572_vm11, %v1975_v55, %v1972_v53 }
0x174b   :  { %v1978_v33 = vsel %vm549_vm10, %v1977_v11, %v1976_v48 }
0x174c   :  { %v1995_v21 = vsel %vm574_vm12, %v1978_v33, %v1994_v58 }
0x174e   :  { %v1929_v14 = vpop.xlane.xlu1 %1928  ;;  %v8110_v41 = vpop.xlane.xlu0 %1925 }
0x174f   :  { %v1980_v8 = vperm.slane %v1929_v14, %v7268_v54  ;;  %v1979_v17 = vperm.slane %v8110_v41, %v7263_v51 }
0x1750   :  { %v8112_v38 = vpop.xlane.xlu2 %1931 }
0x1751   :  { %v1982_v31 = vperm.slane %v8112_v38, %v7263_v51  ;;  %v1981_v63 = vsel %vm549_vm10, %v1980_v8, %v1979_v17 }
0x1752   :  { %v1996_v47 = vsel %vm576_vm13, %v1981_v63, %v1995_v21 }
0x1756   :  { %v8114_v40 = vpop.xlane.xlu1 %1937  ;;  %v8116_v32 = vpop.xlane.xlu0 %1934 }
0x1757   :  { %v1983_v15 = vperm.slane %v8116_v32, %v7268_v54  ;;  %v1985_v35 = vperm.slane %v8114_v40, %v7263_v51 }
0x1758   :  { %v8119_v30 = vpop.xlane.xlu2 %1940 }
0x1759   :  { %v1986_v42 = vperm.slane %v8119_v30, %v7268_v54  ;;  %v1984_v62 = vsel %vm549_vm10, %v1983_v15, %v1982_v31 }
0x175a   :  { %v1997_v8 = vsel %vm578_vm14, %v1984_v62, %v1996_v47 }
0x175b   :  { %v1987_v55 = vsel %vm549_vm10, %v1986_v42, %v1985_v35 }
0x175c   :  { %v1998_v58 = vsel %vm580_vm15, %v1987_v55, %v1997_v8 }
0x175e   :  { %v8133_v36 = vpop.xlane.xlu0 %1943  ;;  %v8136_v52 = vpop.xlane.xlu1 %1946 }
0x175f   :  { %v1989_v46 = vperm.slane %v8136_v52, %v7268_v54  ;;  %v1988_v20 = vperm.slane %v8133_v36, %v7263_v51 }
0x1760   :  { %v8154_v11 = vpop.xlane.xlu2 %1949 }
0x1761   :  { %v1990_v48 = vsel %vm549_vm10, %v1989_v46, %v1988_v20  ;;  %v1991_v15 = vperm.slane %v8154_v11, %v7263_v51 }
0x1762   :  { %v1999_v31 = vsel %vm582_vm2, %v1990_v48, %v1998_v58 }
0x1766   :  { %v8158_v17 = vpop.xlane.xlu0 %1952 }
0x1767   :  { %v1992_v53 = vperm.slane %v8158_v17, %v7268_v54 }
0x1769   :  { %v1993_v33 = vsel %vm549_vm10, %v1992_v53, %v1991_v15 }
0x176a   :  { %v2000_v63 = vsel %vm584_vm3, %v1993_v33, %v1999_v31 }
0x176b   :  { %v2002_v42 = vsel %vm587_vm4, %v2000_v63, -inf }
0x176c   :  { %2003 = vmax.xlane.f32.xlu1 %v2002_v42 }
0x17df   :  { %v8170_v62 = vpop.xlane.xlu1 %2003 }
0x17e0   :  { %v2007_v46 = vperm.slane %v8170_v62, 1  ;;  %v2006_v20 = vperm.slane %v8170_v62, 0  ;;  %v2009_v21 = vperm.slane %v8170_v62, 3  ;;  %v2008_v8 = vperm.slane %v8170_v62, 2 }
0x17e1   :  { %v2011_v63 = vperm.slane %v8170_v62, 5 }
0x17e2   :  { %v2024_v35 = vsub.f32 %v1914_v28, %v2007_v46  ;;  %v2023_v55 = vsub.f32 %v1911_v6, %v2006_v20  ;;  %v2022_v15 = vsub.f32 %v1908_v0, %v2006_v20  ;;  %v2029_v48 = vsub.f32 %v1929_v14, %v2009_v21 }
0x17e3   :  { %v2026_v33 = vsub.f32 %v1920_v45, %v2008_v8  ;;  %v2025_v31 = vsub.f32 %v1917_v24, %v2007_v46  ;;  %v2032_v0 = vsub.f32 %v8114_v40, %v2011_v63  ;;  %v2028_v45 = vsub.f32 %v8110_v41, %v2009_v21 }
0x17e4   :  { %v2042_v47 = vmul.f32 1.442695, %v2024_v35  ;;  %v2040_v53 = vmul.f32 1.442695, %v2023_v55  ;;  %v2038_v58 = vmul.f32 1.442695, %v2022_v15  ;;  %v2027_v24 = vsub.f32 %v8108_v44, %v2008_v8 }
0x17e5   :  { %v2052_v42 = vmul.f32 1.442695, %v2029_v48  ;;  %v2046_v10 = vmul.f32 1.442695, %v2026_v33  ;;  %v2044_v28 = vmul.f32 1.442695, %v2025_v31 }
0x17e6   :  { %6200 = vpow2.f32 %v2042_v47  ;;  %v2012_v46 = vperm.slane %v8170_v62, 6  ;;  %v2058_v20 = vmul.f32 1.442695, %v2032_v0  ;;  %v2010_v40 = vperm.slane %v8170_v62, 4 }
0x17e7   :  { %6202 = vpow2.f32 %v2040_v53  ;;  %v2050_v47 = vmul.f32 1.442695, %v2028_v45  ;;  %v2048_v55 = vmul.f32 1.442695, %v2027_v24 }
0x17e8   :  { %6204 = vpow2.f32 %v2038_v58  ;;  %v2035_v41 = vsub.f32 %v8136_v52, %v2012_v46  ;;  %v2031_v44 = vsub.f32 %v8116_v32, %v2010_v40  ;;  %v2030_v21 = vsub.f32 %v8112_v38, %v2010_v40 }
0x17e9   :  { %6206 = vpow2.f32 %v2052_v42  ;;  %v2034_v32 = vsub.f32 %v8133_v36, %v2012_v46  ;;  %v2033_v38 = vsub.f32 %v8119_v30, %v2011_v63  ;;  %v2013_v42 = vperm.slane %v8170_v62, 7 }
0x17ea   :  { %6208 = vpow2.f32 %v2046_v10  ;;  %v2064_v8 = vmul.f32 1.442695, %v2035_v41  ;;  %v2056_v53 = vmul.f32 1.442695, %v2031_v44  ;;  %v2054_v58 = vmul.f32 1.442695, %v2030_v21 }
0x17eb   :  { %6210 = vpow2.f32 %v2044_v28  ;;  %v2062_v28 = vmul.f32 1.442695, %v2034_v32  ;;  %v2060_v0 = vmul.f32 1.442695, %v2033_v38  ;;  %v2037_v36 = vsub.f32 %v8158_v17, %v2013_v42 }
0x17ec   :  { %v8177_v23 = vpop.eup %6200  ;;  %6212 = vpow2.f32 %v2058_v20  ;;  %v2036_v30 = vsub.f32 %v8154_v11, %v2013_v42 }
0x17ed   :  { %2093 = vperm.xlu1 %6075, %v8177_v23   ;;  %v8180_v6 = vpop.eup %6202  ;;  %6214 = vpow2.f32 %v2050_v47  ;;  %v2068_v63 = vmul.f32 1.442695, %v2037_v36 }
0x17ee   :  { %v8183_v14 = vpop.eup %6204  ;;  %2090 = vperm.xlu0 %6077, %v8180_v6   ;;  %6216 = vpow2.f32 %v2048_v55  ;;  %v2066_v62 = vmul.f32 1.442695, %v2036_v30 }
0x17ef   :  { %2087 = vperm.xlu2 %6076, %v8183_v14   ;;  %v8190_v35 = vpop.eup %6206  ;;  %6218 = vpow2.f32 %v2064_v8 }
0x17f0   :  { %v8194_v15 = vpop.eup %6208  ;;  %6220 = vpow2.f32 %v2056_v53 }
0x17f1   :  { %v8197_v10 = vpop.eup %6210  ;;  %6222 = vpow2.f32 %v2054_v58 }
0x17f2   :  { %v8203_v48 = vpop.eup %6212  ;;  %6224 = vpow2.f32 %v2062_v28 }
0x17f3   :  { %v8206_v52 = vpop.eup %6214  ;;  %6226 = vpow2.f32 %v2060_v0 }
0x17f4   :  { %v8208_v33 = vpop.eup %6216  ;;  %6228 = vpow2.f32 %v2068_v63 }
0x17f5   :  { %2108 = vperm.xlu1 %6075, %v8190_v35   ;;  %v8214_v31 = vpop.eup %6218  ;;  %6230 = vpow2.f32 %v2066_v62 }
0x17f6   :  { %2099 = vperm.xlu0 %6077, %v8194_v15   ;;  %v8218_v45 = vpop.eup %6220 }
0x17f7   :  { %2096 = vperm.xlu2 %6076, %v8197_v10   ;;  %v8220_v24 = vpop.eup %6222 }
0x17f8   :  { %v8226_v46 = vpop.eup %6224 }
0x17f9   :  { %v8228_v20 = vpop.eup %6226 }
0x17fa   :  { %v8232_v40 = vpop.eup %6228 }
0x17fb   :  { %v8234_v17 = vpop.eup %6230 }
0x17fd   :  { %2117 = vperm.xlu1 %6075, %v8203_v48  }
0x17fe   :  { %2105 = vperm.xlu0 %6077, %v8206_v52  }
0x17ff   :  { %2102 = vperm.xlu2 %6076, %v8208_v33  }
0x1805   :  { %2126 = vperm.xlu1 %6075, %v8214_v31  }
0x1806   :  { %2114 = vperm.xlu0 %6077, %v8218_v45  }
0x1807   :  { %2111 = vperm.xlu2 %6076, %v8220_v24  }
0x180e   :  { %2123 = vperm.xlu0 %6077, %v8226_v46  }
0x180f   :  { %2120 = vperm.xlu2 %6076, %v8228_v20  }
0x1816   :  { %2132 = vperm.xlu0 %6077, %v8232_v40  }
0x1817   :  { %2129 = vperm.xlu2 %6076, %v8234_v17  }
0x1849   :  { %v2088_v11 = vpop.permute.xlu2 %2087 }
0x184a   :  { %v2134_v30 = vperm.slane %v2088_v11, %v7263_v51 }
0x1851   :  { %v2097_v47 = vpop.permute.xlu2 %2096 }
0x1852   :  { %v2138_v63 = vperm.slane %v2097_v47, %v7268_v54 }
0x1859   :  { %v2103_v44 = vpop.permute.xlu2 %2102 }
0x185a   :  { %v2141_v22 = vperm.slane %v2103_v44, %v7268_v54 }
0x185f   :  { %v2094_v41 = vpop.permute.xlu1 %2093 }
0x1860   :  { %v2091_v55 = vpop.permute.xlu0 %2090  ;;  %v2137_v28 = vperm.slane %v2094_v41, %v7263_v51 }
0x1861   :  { %v2112_v58 = vpop.permute.xlu2 %2111  ;;  %v2135_v0 = vperm.slane %v2091_v55, %v7268_v54 }
0x1862   :  { %v2139_v25 = vsel %vm549_vm10, %v2138_v63, %v2137_v28  ;;  %v2146_v55 = vperm.slane %v2112_v58, %v7263_v51 }
0x1863   :  { %v2136_v50 = vsel %vm549_vm10, %v2135_v0, %v2134_v30 }
0x1867   :  { %v2109_v8 = vpop.permute.xlu1 %2108 }
0x1868   :  { %v2100_v21 = vpop.permute.xlu0 %2099  ;;  %v2144_v41 = vperm.slane %v2109_v8, %v7268_v54 }
0x1869   :  { %v2121_v42 = vpop.permute.xlu2 %2120  ;;  %v2140_v36 = vperm.slane %v2100_v21, %v7263_v51 }
0x186b   :  { %v2142_v21 = vsel %vm549_vm10, %v2141_v22, %v2140_v36  ;;  %v2150_v22 = vperm.slane %v2121_v42, %v7268_v54 }
0x186f   :  { %v2118_v38 = vpop.permute.xlu1 %2117 }
0x1870   :  { %v2106_v53 = vpop.permute.xlu0 %2105  ;;  %v2149_v28 = vperm.slane %v2118_v38, %v7263_v51 }
0x1871   :  { %v2143_v62 = vperm.slane %v2106_v53, %v7263_v51  ;;  %v2158_v53 = vsel %vm572_vm11, %v2139_v25, %v2136_v50  ;;  %v2130_v8 = vpop.permute.xlu2 %2129 }
0x1872   :  { %v2159_v61 = vsel %vm574_vm12, %v2142_v21, %v2158_v53  ;;  %v2155_v25 = vperm.slane %v2130_v8, %v7263_v51 }
0x1873   :  { %v2145_v11 = vsel %vm549_vm10, %v2144_v41, %v2143_v62 }
0x1874   :  { %v2160_v0 = vsel %vm576_vm13, %v2145_v11, %v2159_v61 }
0x1877   :  { %v2127_v47 = vpop.permute.xlu1 %2126 }
0x1878   :  { %v2115_v32 = vpop.permute.xlu0 %2114  ;;  %v2153_v58 = vperm.slane %v2127_v47, %v7268_v54 }
0x1879   :  { %v2147_v16 = vperm.slane %v2115_v32, %v7268_v54 }
0x187b   :  { %v2148_v44 = vsel %vm549_vm10, %v2147_v16, %v2146_v55  ;;  %v2151_v16 = vsel %vm549_vm10, %v2150_v22, %v2149_v28 }
0x187c   :  { %v2161_v36 = vsel %vm578_vm14, %v2148_v44, %v2160_v0 }
0x187d   :  { %v2162_v38 = vsel %vm580_vm15, %v2151_v16, %v2161_v36 }
0x1880   :  { %v2124_v18 = vpop.permute.xlu0 %2123 }
0x1881   :  { %v2152_v32 = vperm.slane %v2124_v18, %v7263_v51 }
0x1883   :  { %v2154_v30 = vsel %vm549_vm10, %v2153_v58, %v2152_v32 }
0x1884   :  { %v2163_v63 = vsel %vm582_vm2, %v2154_v30, %v2162_v38 }
0x1888   :  { %v2133_v50 = vpop.permute.xlu0 %2132 }
0x1889   :  { %v2156_v18 = vperm.slane %v2133_v50, %v7268_v54 }
0x188b   :  { %v2157_v61 = vsel %vm549_vm10, %v2156_v18, %v2155_v25 }
0x188c   :  { %v2164_v62 = vsel %vm584_vm3, %v2157_v61, %v2163_v63 }
0x188d   :  { %v2166_v42 = vsel %vm587_vm4, %v2164_v62, 0.0 }
0x188e   :  { %2167 = vadd.xlane.f32.xlu1 %v2166_v42 }
0x1901   :  { %v2168_v41 = vpop.xlane.xlu1 %2167 }
0x1902   :  { %6232 = vrcp.f32 %v2168_v41 }
0x1908   :  { %v6233_v55 = vpop.eup %6232 }
0x1909   :  { %v2170_v21 = vmul.f32 %v6233_v55, %v2168_v41 }
0x190b   :  { %v2171_v11 = vsub.f32 2.0, %v2170_v21 }
0x190d   :  { %v2172_v47 = vmul.f32 %v6233_v55, %v2171_v11 }
0x190f   :  { %v2179_v53 = vperm.slane %v2172_v47, 5  ;;  %v2174_v44 = vperm.slane %v2172_v47, 0  ;;  %v2175_v8 = vperm.slane %v2172_v47, 1  ;;  %v2176_v36 = vperm.slane %v2172_v47, 2 }
0x1910   :  { %v2180_v16 = vperm.slane %v2172_v47, 6  ;;  %v2181_v25 = vperm.slane %v2172_v47, 7 }
0x1911   :  { %v2200_v32 = vmul.f32 %v8203_v48, %v2179_v53  ;;  %v2191_v28 = vmul.f32 %v8180_v6, %v2174_v44  ;;  %v2190_v0 = vmul.f32 %v8183_v14, %v2174_v44  ;;  %v2193_v58 = vmul.f32 %v8197_v10, %v2175_v8 }
0x1912   :  { %v2192_v22 = vmul.f32 %v8177_v23, %v2175_v8  ;;  %v2195_v48 = vmul.f32 %v8208_v33, %v2176_v36  ;;  %v2194_v6 = vmul.f32 %v8194_v15, %v2176_v36  ;;  %v2177_v14 = vperm.slane %v2172_v47, 3 }
0x1913   :  { %2258 = vperm.xlu1 %6075, %v2200_v32   ;;  %2213 = vperm.xlu0 %6077, %v2191_v28   ;;  %v2178_v23 = vperm.slane %v2172_v47, 4  ;;  %v2202_v33 = vmul.f32 %v8226_v46, %v2180_v16  ;;  %v2201_v15 = vmul.f32 %v8228_v20, %v2179_v53 }
0x1914   :  { %2208 = vperm.xlu2 %6076, %v2190_v0   ;;  %v2197_v30 = vmul.f32 %v8190_v35, %v2177_v14  ;;  %v2196_v50 = vmul.f32 %v8206_v52, %v2177_v14  ;;  %v2204_v35 = vmul.f32 %v8234_v17, %v2181_v25  ;;  %v2203_v52 = vmul.f32 %v8214_v31, %v2180_v16 }
0x1915   :  { %v2199_v10 = vmul.f32 %v8218_v45, %v2178_v23  ;;  %v2205_v45 = vmul.f32 %v8232_v40, %v2181_v25 }
0x191b   :  { %2418 = vrot.lane.b32.xlu1 %v7950_v43, %s6924_s21  ;;  %2223 = vperm.xlu0 %6077, %v2193_v58   ;;  %v2198_v43 = vmul.f32 %v8220_v24, %v2178_v23 }
0x191c   :  { %2218 = vperm.xlu2 %6076, %v2192_v22  }
0x1923   :  { %2233 = vperm.xlu0 %6077, %v2195_v48  }
0x1924   :  { %2228 = vperm.xlu2 %6076, %v2194_v6  }
0x192b   :  { %2243 = vperm.xlu0 %6077, %v2197_v30  }
0x192c   :  { %2238 = vperm.xlu2 %6076, %v2196_v50  }
0x1933   :  { %2253 = vperm.xlu0 %6077, %v2199_v10  }
0x1934   :  { %2248 = vperm.xlu2 %6076, %v2198_v43  }
0x193b   :  { %2268 = vperm.xlu0 %6077, %v2202_v33  }
0x193c   :  { %2263 = vperm.xlu2 %6076, %v2201_v15  }
0x1943   :  { %2278 = vperm.xlu0 %6077, %v2204_v35  }
0x1944   :  { %2273 = vperm.xlu2 %6076, %v2203_v52  }
0x194b   :  { %2390 = vrot.lane.b32.xlu0 %v7991_v3, %s6924_s21 }
0x194c   :  { %2283 = vperm.xlu2 %6076, %v2205_v45  }
0x196e   :  { %v2209_v24 = vpop.permute.xlu2 %2208 }
0x196f   :  { %v2286_v21 = vmul.f32 %v8005_v19, %v2209_v24 }
0x1976   :  { %v2219_v18 = vpop.permute.xlu2 %2218 }
0x1977   :  { %v2288_v40 = vmul.f32 %v8013_v5, %v2219_v18 }
0x197e   :  { %v2229_v46 = vpop.permute.xlu2 %2228 }
0x197f   :  { %v2290_v11 = vmul.f32 %v8020_v13, %v2229_v46 }
0x1985   :  { %v2214_v38 = vpop.permute.xlu0 %2213  ;;  %v2259_v32 = vpop.permute.xlu1 %2258 }
0x1986   :  { %v2239_v20 = vpop.permute.xlu2 %2238  ;;  %v2287_v55 = vmul.f32 %v7999_v39, %v2214_v38  ;;  %v2302_v39 = vsel %vm150_vm0, %v2286_v21, 0.0  ;;  %v2296_v36 = vmul.f32 %v8062_v27, %v2259_v32 }
0x1987   :  { %v2292_v47 = vmul.f32 %v8047_v12, %v2239_v20 }
0x1988   :  { %v2303_v44 = vsel %vm150_vm0, %v2287_v55, 0.0 }
0x1989   :  { %v2329_v13 = vsel %vm150_vm0, %v2292_v47, 0.0  ;;  %v2304_v8 = vadd.f32 %v2303_v44, %v2302_v39 }
0x198d   :  { %v2224_v61 = vpop.permute.xlu0 %2223 }
0x198e   :  { %v2249_v63 = vpop.permute.xlu2 %2248  ;;  %v2289_v17 = vmul.f32 %v8026_v59, %v2224_v61 }
0x198f   :  { %v2294_v12 = vmul.f32 %v8053_v37, %v2249_v63  ;;  %v2305_v37 = vrot.slane %v2304_v8, 4 }
0x1990   :  { %v2312_v53 = vsel %vm150_vm0, %v2289_v17, 0.0 }
0x1991   :  { %v2338_v30 = vsel %vm150_vm0, %v2294_v12, 0.0  ;;  %v2306_v35 = vadd.f32 %v2305_v37, %v2304_v8 }
0x1995   :  { %v2234_v62 = vpop.permute.xlu0 %2233 }
0x1996   :  { %v2291_v31 = vmul.f32 %v8032_v1, %v2234_v62  ;;  %v2264_v42 = vpop.permute.xlu2 %2263  ;;  %v2311_v1 = vsel %vm150_vm0, %v2288_v40, 0.0  ;;  %v2307_v62 = vrot.slane %v2306_v35, 2 }
0x1997   :  { %v2313_v19 = vadd.f32 %v2312_v53, %v2311_v1  ;;  %v2297_v0 = vmul.f32 %v8074_v26, %v2264_v42  ;;  %v2347_v26 = vsel %vm150_vm0, %v2296_v36, 0.0 }
0x1998   :  { %v2321_v59 = vsel %vm150_vm0, %v2291_v31, 0.0 }
0x1999   :  { %v2314_v6 = vrot.slane %v2313_v19, 4  ;;  %v2348_v23 = vsel %vm150_vm0, %v2297_v0, 0.0 }
0x199a   :  { %v2349_v15 = vadd.f32 %v2348_v23, %v2347_v26 }
0x199b   :  { %v2315_v33 = vadd.f32 %v2314_v6, %v2313_v19 }
0x199c   :  { %v2350_v38 = vrot.slane %v2349_v15, 4 }
0x199d   :  { %v2244_v41 = vpop.permute.xlu0 %2243  ;;  %v2316_v46 = vrot.slane %v2315_v33, 2 }
0x199e   :  { %v2293_v3 = vmul.f32 %v8041_v4, %v2244_v41  ;;  %v2320_v4 = vsel %vm150_vm0, %v2290_v11, 0.0  ;;  %v2274_v14 = vpop.permute.xlu2 %2273  ;;  %v2308_v11 = vadd.f32 %v2307_v62, %v2306_v35  ;;  %v6577_v62 = vld [vmem:[#allocation11 + $0x10] sm:$0xff] }
0x199f   :  { %v2322_v28 = vadd.f32 %v2321_v59, %v2320_v4  ;;  %v2317_v40 = vadd.f32 %v2316_v46, %v2315_v33  ;;  %v10320_v46 = vld [vmem:[#allocation23_spill] sm:$0xff] }
0x19a0   :  { %v2330_v5 = vsel %vm150_vm0, %v2293_v3, 0.0 }
0x19a1   :  { %v2331_v58 = vadd.f32 %v2330_v5, %v2329_v13  ;;  %v2323_v50 = vrot.slane %v2322_v28, 4  ;;  %v2318_v44 = vrot.slane %v2317_v40, 1  ;;  %v2309_v13 = vrot.slane %v2308_v11, 1 }
0x19a3   :  { %v2332_v43 = vrot.slane %v2331_v58, 4  ;;  %v2324_v27 = vadd.f32 %v2323_v50, %v2322_v28  ;;  %v2319_v8 = vadd.f32 %v2318_v44, %v2317_v40 }
0x19a5   :  { %v2254_v22 = vpop.permute.xlu0 %2253  ;;  %v2333_v52 = vadd.f32 %v2332_v43, %v2331_v58  ;;  %v2325_v20 = vrot.slane %v2324_v27, 2 }
0x19a6   :  { %v2295_v48 = vmul.f32 %v8068_v7, %v2254_v22  ;;  %v2299_v7 = vmul.f32 %v8083_v57, %v2274_v14  ;;  %v2284_v31 = vpop.permute.xlu2 %2283  ;;  %v2351_v57 = vadd.f32 %v2350_v38, %v2349_v15  ;;  %v10321_v38 = vld [vmem:[#allocation24_spill] sm:$0xff] }
0x19a7   :  { %v2334_v17 = vrot.slane %v2333_v52, 2  ;;  %v2326_v3 = vadd.f32 %v2325_v20, %v2324_v27  ;;  %v2301_v21 = vmul.f32 %v8104_v2, %v2284_v31  ;;  %v10322_v20 = vld [vmem:[#allocation25_spill] sm:$0xff] }
0x19a8   :  { %v2339_v10 = vsel %vm150_vm0, %v2295_v48, 0.0  ;;  %v2357_v61 = vsel %vm150_vm0, %v2299_v7, 0.0  ;;  %v2352_v5 = vrot.slane %v2351_v57, 2  ;;  %v2310_v48 = vadd.f32 %v2309_v13, %v2308_v11  ;;  %v6579_v31 = vld [vmem:[#allocation11] sm:$0xff] }
0x19a9   :  { %v2340_v16 = vadd.f32 %v2339_v10, %v2338_v30  ;;  %v2327_v4 = vrot.slane %v2326_v3, 1  ;;  %v2366_v32 = vsel %vm150_vm0, %v2301_v21, 0.0 }
0x19aa   :  { %v2353_v58 = vadd.f32 %v2352_v5, %v2351_v57  ;;  %v2382_v50 = vsel %vm572_vm11, %v2319_v8, %v2310_v48  ;;  %v140_v48 = vld [vmem:[%s10283_s0 + $0x30] sm:$0xff] }
0x19ab   :  { %v2341_v25 = vrot.slane %v2340_v16, 4  ;;  %v2328_v36 = vadd.f32 %v2327_v4, %v2326_v3 }
0x19ac   :  { %v2354_v23 = vrot.slane %v2353_v58, 1 }
0x19ad   :  { %v2269_v45 = vpop.permute.xlu0 %2268  ;;  %v2342_v24 = vadd.f32 %v2341_v25, %v2340_v16  ;;  %v2383_v37 = vsel %vm574_vm12, %v2328_v36, %v2382_v50  ;;  %v139_v36 = vld [vmem:[%s10283_s0 + $0x28] sm:$0xff] }
0x19ae   :  { %v2298_v18 = vmul.f32 %v8089_v34, %v2269_v45  ;;  %v2335_v34 = vadd.f32 %v2334_v17, %v2333_v52  ;;  %v2355_v15 = vadd.f32 %v2354_v23, %v2353_v58  ;;  %v6578_v17 = vld [vmem:[#allocation11 + $0x8] sm:$0xff]  ;;  %v6581_v23 = vld [vmem:[%s10294_s11 + $0x38] sm:$0xff] }
0x19af   :  { %v2343_v41 = vrot.slane %v2342_v24, 2 }
0x19b0   :  { %v2356_v63 = vsel %vm150_vm0, %v2298_v18, 0.0  ;;  %v2336_v12 = vrot.slane %v2335_v34, 1  ;;  %v10319_v18 = vld [vmem:[#allocation22_spill] sm:$0xff] }
0x19b1   :  { %v2358_v42 = vadd.f32 %v2357_v61, %v2356_v63  ;;  %v2344_v59 = vadd.f32 %v2343_v41, %v2342_v24  ;;  %v137_v61 = vld [vmem:[%s10283_s0 + $0x18] sm:$0xff]  ;;  %v6576_v63 = vld [vmem:[#allocation11 + $0x18] sm:$0xff] }
0x19b2   :  { %v2337_v6 = vadd.f32 %v2336_v12, %v2335_v34  ;;  %6009 = vmatmul.msk.f32.gmra.mxu0 %vm150_vm0, %v137_v61  ;;  %v6580_v41 = vld [vmem:[%s10290_s7] ss:$0 sm:$0xff] }
0x19b3   :  { %v2359_v55 = vrot.slane %v2358_v42, 4  ;;  %v2345_v0 = vrot.slane %v2344_v59, 1 }
0x19b4   :  { %v2384_v16 = vsel %vm576_vm13, %v2337_v6, %v2383_v37  ;;  %v141_v6 = vld [vmem:[%s10283_s0 + $0x38] sm:$0xff]  ;;  %v6583_v37 = vld [vmem:[%s10294_s11 + $0x28] sm:$0xff] }
0x19b5   :  { %v2360_v47 = vadd.f32 %v2359_v55, %v2358_v42  ;;  %v2279_v53 = vpop.permute.xlu0 %2278  ;;  %v2346_v14 = vadd.f32 %v2345_v0, %v2344_v59 }
0x19b6   :  { %v2300_v1 = vmul.f32 %v8095_v49, %v2279_v53 }
0x19b7   :  { %v2361_v39 = vrot.slane %v2360_v47, 2  ;;  %v2385_v33 = vsel %vm578_vm14, %v2346_v14, %v2384_v16  ;;  %v6585_v16 = vld [vmem:[%s10294_s11 + $0x18] sm:$0xff] }
0x19b8   :  { %v2365_v19 = vsel %vm150_vm0, %v2300_v1, 0.0  ;;  %v2386_v7 = vsel %vm580_vm15, %v2355_v15, %v2385_v33  ;;  %v6587_v33 = vld [vmem:[%s10294_s11 + $0x8] sm:$0xff]  ;;  %v6588_v15 = vld [vmem:[%s10294_s11] sm:$0xff] }
0x19b9   :  { %v2367_v28 = vadd.f32 %v2366_v32, %v2365_v19  ;;  %v2362_v2 = vadd.f32 %v2361_v39, %v2360_v47 }
0x19bb   :  { %v2368_v22 = vrot.slane %v2367_v28, 4  ;;  %v2363_v30 = vrot.slane %v2362_v2, 1 }
0x19bd   :  { %v2369_v49 = vadd.f32 %v2368_v22, %v2367_v28  ;;  %v2364_v26 = vadd.f32 %v2363_v30, %v2362_v2  ;;  %v8328_v52 = vpop.permute.xlu0 %2390  ;;  %v10324_v28 = vld [vmem:[#allocation20_spill] sm:$0xff] }
0x19be   :  { %v138_v22 = vld [vmem:[%s10283_s0 + $0x20] sm:$0xff] }
0x19bf   :  { %v2370_v10 = vrot.slane %v2369_v49, 2  ;;  %v2387_v35 = vsel %vm582_vm2, %v2364_v26, %v2386_v7  ;;  %6010 = vmatmul.msk.f32.gmra.mxu0 %vm150_vm0, %v138_v22  ;;  %v6586_v26 = vld [vmem:[%s10294_s11 + $0x10] sm:$0xff] }
0x19c1   :  { %v2371_v43 = vadd.f32 %v2370_v10, %v2369_v49  ;;  %v6582_v10 = vld [vmem:[%s10294_s11 + $0x30] sm:$0xff] }
0x19c3   :  { %v2372_v25 = vrot.slane %v2371_v43, 1 }
0x19c5   :  { %v2373_v27 = vadd.f32 %v2372_v25, %v2371_v43  ;;  %v6584_v43 = vld [vmem:[%s10294_s11 + $0x20] sm:$0xff] }
0x19c7   :  { %v2388_v45 = vsel %vm584_vm3, %v2373_v27, %v2387_v35  ;;  %6011 = vmatmul.msk.f32.gmra.mxu0 %vm150_vm0, %v139_v36  ;;  %v8440_v36 = vld [vmem:[%s10284_s1] sm:$0xff] }
0x19c8   :  { %v2393_v24 = vsel %vm150_vm0, %v2388_v45, %v8328_v52  ;;  %v6589_v45 = vld [vmem:[%s10292_s9] ss:$0 sm:$0xff] }
0x19c9   :  { %6031 = vmatmul.msk.f32.vlgmr.msra.gmra.mxu2 %vm273_vm1, %v2393_v24 }
0x19ca   :  { %3913 = vmatpush.msra.mxu2 %v7957_v60 }
0x19cc   :  { %3914 = vmatpush.msra.mxu2 %v7960_v9 }
0x19ce   :  { %3915 = vmatpush.msra.mxu2 %v7963_v29  ;;  %v2419_v29 = vpop.permute.xlu1 %2418 }
0x19cf   :  { %6012 = vmatmul.msk.f32.gmra.mxu0 %vm150_vm0, %v140_v48 }
0x19d0   :  { %3916 = vmatpush.msra.mxu2 %v7966_v56 }
0x19d2   :  { %3917 = vmatpush.msra.mxu2 %v10319_v18 }
0x19d4   :  { %3918 = vmatpush.msra.mxu2 %v10320_v46 }
0x19d6   :  { %3919 = vmatpush.msra.mxu2 %v10321_v38 }
0x19d7   :  { %6013 = vmatmul.msk.f32.gmra.mxu0 %vm150_vm0, %v141_v6 }
0x19d8   :  { %3920 = vmatpush.msra.mxu2 %v10322_v20 }
0x1a2f   :  { %v201_v42 = vpop.f32.mrf.mxu0 }
0x1a30   :  { %v202_v40 = vadd.f32 %v6580_v41, %v201_v42 }
0x1a3c   :  { %v8408_v25 = vpop.f32.mrf.mxu0 }
0x1a44   :  { %v8410_v27 = vpop.f32.mrf.mxu0 }
0x1a4c   :  { %v2414_v60 = vpop.f32.mrf.mxu2  ;;  %v8412_v7 = vpop.f32.mrf.mxu0 }
0x1a4d   :  { %6234 = vtanh.f32 %v2414_v60  ;;  %10325 = vst [vmem:[#allocation23_spill] sm:$0xff] %v8412_v7 }
0x1a53   :  { %v8346_v9 = vpop.eup %6234 }
0x1a54   :  { %10323 = vst [vmem:[#allocation22_spill] sm:$0xff] %v8346_v9  ;;  %v2421_v56 = vsel %vm150_vm0, %v8346_v9, %v2419_v29  ;;  %v8414_v35 = vpop.f32.mrf.mxu0 }
0x1a55   :  { %6032 = vmatmul.msk.f32.vlgmr.msra.gmra.mxu3 %vm273_vm1, %v2421_v56  ;;  %10326 = vst [vmem:[#allocation24_spill] sm:$0xff] %v8414_v35 }
0x1a56   :  { %3979 = vmatpush.msra.mxu3 %v6576_v63 }
0x1a58   :  { %3980 = vmatpush.msra.mxu3 %v6577_v62 }
0x1a5a   :  { %3981 = vmatpush.msra.mxu3 %v6578_v17 }
0x1a5c   :  { %3982 = vmatpush.msra.mxu3 %v6579_v31 }
0x1ad8   :  { %v2442_v57 = vpop.f32.mrf.mxu3 }
0x1ad9   :  { %v2445_v55 = vadd.f32 %v2442_v57, %v202_v40 }
0x1adb   :  { %6236 = vtanh.f32 %v2445_v55  ;;  %v6033_v21 = vmul.f32 -1.442695, %v2445_v55  ;;  %v10327_v55 = vld [vmem:[#allocation26_spill] sm:$0xff] }
0x1add   :  { %6238 = vpow2.f32 %v6033_v21 }
0x1ae1   :  { %v6237_v3 = vpop.eup %6236 }
0x1ae2   :  { %2468 = vrot.lane.b32.xlu2 %v6237_v3, %s6924_s21 }
0x1ae3   :  { %v6239_v11 = vpop.eup %6238 }
0x1ae4   :  { %v2449_v34 = vadd.f32 1.0, %v6239_v11 }
0x1ae6   :  { %6240 = vrcp.f32 %v2449_v34  ;;  %v2461_v5 = vand.u32 2147483648, %v2449_v34  ;;  %vm2455_vm7 = vweird.f32 %v2449_v34  ;;  %v2459_v39 = vand.u32 2147483647, %v2449_v34 }
0x1ae8   :  { %v2462_v32 = vor.u32 1.1754944e-38, %v2461_v5  ;;  %vm2460_vm9 = vcmp.eq.f32.partialorder %v2459_v39, 8.507059e+37  ;;  %v6592_v5 = vld [vmem:[#allocation8 + $0x28] sm:$0xff]  ;;  %v6593_v39 = vld [vmem:[#allocation8 + $0x20] sm:$0xff] }
0x1aec   :  { %v6241_v47 = vpop.eup %6240 }
0x1aed   :  { %v2451_v53 = vmul.f32 %v6241_v47, %v2449_v34  ;;  %vm2456_vm6 = vweird.f32 %v6241_v47 }
0x1aee   :  { %vm2457_vm8 = vmor %vm2455_vm7, %vm2456_vm6 }
0x1aef   :  { %v2452_v59 = vsub.f32 1.0, %v2451_v53 }
0x1af1   :  { %v2453_v1 = vmul.f32 %v6241_v47, %v2452_v59 }
0x1af3   :  { %v2454_v44 = vadd.f32 %v6241_v47, %v2453_v1  ;;  %v6590_v1 = vld [vmem:[#allocation8 + $0x38] sm:$0xff] }
0x1af5   :  { %v2458_v4 = vsel %vm2457_vm8, %v6241_v47, %v2454_v44  ;;  %v6591_v44 = vld [vmem:[#allocation8 + $0x30] sm:$0xff] }
0x1af6   :  { %v2463_v13 = vsel %vm2460_vm9, %v2462_v32, %v2458_v4  ;;  %v6594_v4 = vld [vmem:[#allocation8 + $0x18] sm:$0xff]  ;;  %v6595_v32 = vld [vmem:[#allocation8 + $0x10] sm:$0xff] }
0x1af7   :  { %v2466_v0 = vmul.f32 %v2463_v13, %v10324_v28 }
0x1b3c   :  { %v2469_v19 = vpop.permute.xlu2 %2468 }
0x1b3d   :  { %v2471_v12 = vmul.f32 %v2469_v19, %v2463_v13  ;;  %v6596_v19 = vld [vmem:[#allocation8 + $0x8] sm:$0xff] }
0x1b3f   :  { %2473 = vrot.lane.b32.xlu0 %v2471_v12, %s6923_s8 }
0x1bb1   :  { %v2474_v2 = vpop.permute.xlu0 %2473 }
0x1bb2   :  { %v8357_v8 = vadd.f32 %v2474_v2, %v2466_v0 }
0x1bb4   :  { %6242 = vtanh.f32 %v8357_v8 }
0x1bba   :  { %v6243_v58 = vpop.eup %6242 }
0x1bbb   :  { %2479 = vrot.lane.b32.xlu1 %v6243_v58, %s6924_s21  ;;  %v8434_v58 = vld [vmem:[%s10284_s1 + $0x8] sm:$0xff] }
0x1c2d   :  { %v2480_v49 = vpop.permute.xlu1 %2479 }
0x1c2e   :  { %v8377_v14 = vmul.f32 %v2480_v49, %v2463_v13  ;;  %v6597_v13 = vld [vmem:[#allocation8] sm:$0xff] }
0x1c30   :  { %2484 = vrot.lane.b32.xlu2 %v8377_v14, %s6923_s8 }
0x1c8a   :  { %v2485_v30 = vpop.permute.xlu2 %2484 }
0x1c8b   :  { %v2487_v50 = vsel %vm150_vm0, %v2485_v30, %v8328_v52 }
0x1c8c   :  { %6034 = vmatmul.msk.f32.vlgmr.msrb.gmra.mxu0 %vm273_vm1, %v2487_v50  ;;  %v8448_v50 = vld [vmem:[%s10284_s1 + $0x10] sm:$0xff] }
0x1c8d   :  { %3819 = vmatpush.msrb.mxu0 %v6581_v23 }
0x1c8f   :  { %3820 = vmatpush.msrb.mxu0 %v6582_v10 }
0x1c91   :  { %3821 = vmatpush.msrb.mxu0 %v6583_v37 }
0x1c93   :  { %3822 = vmatpush.msrb.mxu0 %v6584_v43  ;;  %v8455_v43 = vld [vmem:[%s10284_s1 + $0x20] sm:$0xff] }
0x1c95   :  { %3823 = vmatpush.msrb.mxu0 %v6585_v16 }
0x1c97   :  { %3824 = vmatpush.msrb.mxu0 %v6586_v26  ;;  %v8461_v26 = vld [vmem:[%s10284_s1 + $0x18] sm:$0xff] }
0x1c99   :  { %3825 = vmatpush.msrb.mxu0 %v6587_v33 }
0x1c9b   :  { %3826 = vmatpush.msrb.mxu0 %v6588_v15 }
0x1d09   :  { %v2508_v52 = vpop.f32.mrf.mxu0 }
0x1d0a   :  { %v2509_v24 = vadd.f32 %v6589_v45, %v2508_v52  ;;  %v8467_v52 = vld [vmem:[%s10284_s1 + $0x28] sm:$0xff] }
0x1d0c   :  { %6244 = vtanh.f32 %v2509_v24  ;;  %v6035_v46 = vmul.f32 -1.442695, %v2509_v24 }
0x1d0e   :  { %6246 = vpow2.f32 %v6035_v46 }
0x1d12   :  { %v6245_v18 = vpop.eup %6244 }
0x1d13   :  { %2533 = vrot.lane.b32.xlu0 %v6245_v18, %s6924_s21 }
0x1d14   :  { %v6247_v38 = vpop.eup %6246 }
0x1d15   :  { %v2514_v20 = vadd.f32 1.0, %v6247_v38 }
0x1d17   :  { %6248 = vrcp.f32 %v2514_v20  ;;  %v2526_v62 = vand.u32 2147483648, %v2514_v20  ;;  %vm2520_vm6 = vweird.f32 %v2514_v20  ;;  %v2524_v17 = vand.u32 2147483647, %v2514_v20 }
0x1d19   :  { %v2527_v42 = vor.u32 1.1754944e-38, %v2526_v62  ;;  %vm2525_vm8 = vcmp.eq.f32.partialorder %v2524_v17, 8.507059e+37  ;;  %v8488_v17 = vld [vmem:[%s10284_s1 + $0x40] sm:$0xff] }
0x1d1d   :  { %v6249_v61 = vpop.eup %6248 }
0x1d1e   :  { %v2516_v60 = vmul.f32 %v6249_v61, %v2514_v20  ;;  %vm2521_vm5 = vweird.f32 %v6249_v61 }
0x1d1f   :  { %vm2522_vm7 = vmor %vm2520_vm6, %vm2521_vm5 }
0x1d20   :  { %v2517_v29 = vsub.f32 1.0, %v2516_v60  ;;  %v8476_v60 = vld [vmem:[%s10284_s1 + $0x38] sm:$0xff] }
0x1d22   :  { %v2518_v56 = vmul.f32 %v6249_v61, %v2517_v29 }
0x1d24   :  { %v2519_v63 = vadd.f32 %v6249_v61, %v2518_v56  ;;  %v8482_v56 = vld [vmem:[%s10284_s1 + $0x30] sm:$0xff] }
0x1d26   :  { %v2523_v31 = vsel %vm2522_vm7, %v6249_v61, %v2519_v63 }
0x1d27   :  { %v2528_v40 = vsel %vm2525_vm8, %v2527_v42, %v2523_v31 }
0x1d28   :  { %v2531_v3 = vmul.f32 %v2528_v40, %v10327_v55  ;;  %v8497_v55 = vld [vmem:[%s10284_s1 + $0x50] sm:$0xff] }
0x1d85   :  { %v2534_v41 = vpop.permute.xlu0 %2533 }
0x1d86   :  { %v2536_v57 = vmul.f32 %v2534_v41, %v2528_v40 }
0x1d88   :  { %2538 = vrot.lane.b32.xlu1 %v2536_v57, %s6923_s8 }
0x1dfa   :  { %v2539_v21 = vpop.permute.xlu1 %2538 }
0x1dfb   :  { %v8422_v11 = vadd.f32 %v2539_v21, %v2531_v3  ;;  %v8503_v21 = vld [vmem:[%s10284_s1 + $0x48] sm:$0xff] }
0x1dfd   :  { %6250 = vtanh.f32 %v8422_v11 }
0x1e03   :  { %v6251_v34 = vpop.eup %6250 }
0x1e04   :  { %2544 = vrot.lane.b32.xlu2 %v6251_v34, %s6924_s21 }
0x1e5e   :  { %v2545_v47 = vpop.permute.xlu2 %2544 }
0x1e5f   :  { %v8426_v53 = vmul.f32 %v2545_v47, %v2528_v40 }
0x1e61   :  { %2549 = vrot.lane.b32.xlu0 %v8426_v53, %s6923_s8 }
0x1ed3   :  { %v2550_v59 = vpop.permute.xlu0 %2549 }
0x1ed4   :  { %6036 = vmatmul.msk.f32.vlgmr.msrb.gmra.mxu1 %vm150_vm0, %v2550_v59  ;;  %v8509_v59 = vld [vmem:[%s10284_s1 + $0x58] sm:$0xff] }
0x1ed5   :  { %3847 = vmatpush.msrb.mxu1 %v6590_v1 }
0x1ed7   :  { %3848 = vmatpush.msrb.mxu1 %v6591_v44 }
0x1ed9   :  { %3849 = vmatpush.msrb.mxu1 %v6592_v5 }
0x1edb   :  { %3850 = vmatpush.msrb.mxu1 %v6593_v39 }
0x1edd   :  { %3851 = vmatpush.msrb.mxu1 %v6594_v4 }
0x1edf   :  { %3852 = vmatpush.msrb.mxu1 %v6595_v32 }
0x1ee1   :  { %3853 = vmatpush.msrb.mxu1 %v6596_v19 }
0x1ee3   :  { %3854 = vmatpush.msrb.mxu1 %v6597_v13  ;;  %v8518_v13 = vld [vmem:[%s10284_s1 + $0x68] sm:$0xff] }
0x1f51   :  { %v2570_v12 = vpop.f32.mrf.mxu1 }
0x1f52   :  { %v2581_v28 = vperm.slane %v2570_v12, 0  ;;  %v2574_v0 = vrot.slane %v2570_v12, 1  ;;  %v2575_v2 = vrot.slane %v2570_v12, 2  ;;  %v2576_v15 = vrot.slane %v2570_v12, 3 }
0x1f53   :  { %v2577_v24 = vrot.slane %v2570_v12, 4  ;;  %v2578_v62 = vrot.slane %v2570_v12, 5  ;;  %v2579_v47 = vrot.slane %v2570_v12, 6  ;;  %v2580_v44 = vrot.slane %v2570_v12, 7  ;;  %v8524_v12 = vld [vmem:[%s10284_s1 + $0x60] sm:$0xff] }
0x1f54   :  { %v2598_v22 = vmul.f32 %v8434_v58, %v2581_v28  ;;  %v2597_v48 = vmul.f32 %v8440_v36, %v2581_v28  ;;  %v2582_v6 = vperm.slane %v2574_v0, 0  ;;  %v2583_v10 = vperm.slane %v2575_v2, 0  ;;  %v8530_v2 = vld [vmem:[%s10284_s1 + $0x70] sm:$0xff] }
0x1f55   :  { %v2584_v38 = vperm.slane %v2576_v15, 0  ;;  %v2585_v61 = vperm.slane %v2577_v24, 0  ;;  %v2586_v40 = vperm.slane %v2578_v62, 0  ;;  %v2587_v4 = vperm.slane %v2579_v47, 0 }
0x1f56   :  { %v2616_v49 = vsel %vm150_vm0, %v2598_v22, 0.0  ;;  %v2613_v30 = vsel %vm150_vm0, %v2597_v48, 0.0  ;;  %v2599_v23 = vmul.f32 %v8448_v50, %v2582_v6  ;;  %v2601_v16 = vmul.f32 %v8455_v43, %v2583_v10 }
0x1f57   :  { %2617 = vadd.xlane.f32.xlu2 %v2616_v49  ;;  %2614 = vadd.xlane.f32.xlu1 %v2613_v30  ;;  %v2600_v33 = vmul.f32 %v8461_v26, %v2582_v6  ;;  %v2602_v45 = vmul.f32 %v8467_v52, %v2583_v10  ;;  %v2604_v29 = vmul.f32 %v8476_v60, %v2584_v38  ;;  %v2588_v19 = vperm.slane %v2580_v44, 0  ;;  %v8539_v30 = vld [vmem:[%s10284_s1 + $0x78] sm:$0xff] }
0x1f58   :  { %v2619_v37 = vsel %vm150_vm0, %v2599_v23, 0.0  ;;  %v2625_v18 = vsel %vm150_vm0, %v2601_v16, 0.0  ;;  %v2603_v63 = vmul.f32 %v8482_v56, %v2584_v38  ;;  %v2605_v31 = vmul.f32 %v8488_v17, %v2585_v61 }
0x1f59   :  { %2620 = vadd.xlane.f32.xlu0 %v2619_v37  ;;  %v2622_v46 = vsel %vm150_vm0, %v2600_v33, 0.0  ;;  %v2628_v20 = vsel %vm150_vm0, %v2602_v45, 0.0  ;;  %v2634_v42 = vsel %vm150_vm0, %v2604_v29, 0.0  ;;  %v2607_v3 = vmul.f32 %v8497_v55, %v2586_v40 }
0x1f5a   :  { %v2631_v41 = vsel %vm150_vm0, %v2603_v63, 0.0  ;;  %v2637_v57 = vsel %vm150_vm0, %v2605_v31, 0.0  ;;  %v2606_v34 = vmul.f32 %v8503_v21, %v2585_v61  ;;  %v2608_v1 = vmul.f32 %v8509_v59, %v2586_v40 }
0x1f5b   :  { %v2643_v5 = vsel %vm150_vm0, %v2607_v3, 0.0  ;;  %v2610_v28 = vmul.f32 %v8518_v13, %v2587_v4  ;;  %v2609_v0 = vmul.f32 %v8524_v12, %v2587_v4  ;;  %v2611_v22 = vmul.f32 %v8530_v2, %v2588_v19 }
0x1f5c   :  { %v2640_v39 = vsel %vm150_vm0, %v2606_v34, 0.0  ;;  %v2646_v32 = vsel %vm150_vm0, %v2608_v1, 0.0  ;;  %v2612_v23 = vmul.f32 %v8539_v30, %v2588_v19 }
0x1f5d   :  { %v2652_v48 = vsel %vm150_vm0, %v2610_v28, 0.0  ;;  %v2649_v6 = vsel %vm150_vm0, %v2609_v0, 0.0  ;;  %v2655_v49 = vsel %vm150_vm0, %v2611_v22, 0.0 }
0x1f5e   :  { %v2658_v10 = vsel %vm150_vm0, %v2612_v23, 0.0 }
0x1f5f   :  { %2626 = vadd.xlane.f32.xlu2 %v2625_v18  ;;  %2623 = vadd.xlane.f32.xlu1 %v2622_v46 }
0x1f61   :  { %2629 = vadd.xlane.f32.xlu0 %v2628_v20 }
0x1f67   :  { %2635 = vadd.xlane.f32.xlu2 %v2634_v42  ;;  %2632 = vadd.xlane.f32.xlu1 %v2631_v41 }
0x1f69   :  { %2638 = vadd.xlane.f32.xlu0 %v2637_v57 }
0x1f6f   :  { %2644 = vadd.xlane.f32.xlu2 %v2643_v5  ;;  %2641 = vadd.xlane.f32.xlu1 %v2640_v39 }
0x1f71   :  { %2647 = vadd.xlane.f32.xlu0 %v2646_v32 }
0x1f77   :  { %2653 = vadd.xlane.f32.xlu2 %v2652_v48  ;;  %2650 = vadd.xlane.f32.xlu1 %v2649_v6 }
0x1f79   :  { %2656 = vadd.xlane.f32.xlu0 %v2655_v49 }
0x1f7f   :  { %2659 = vadd.xlane.f32.xlu1 %v2658_v10 }
0x1fca   :  { %v2618_v37 = vpop.xlane.xlu2 %2617  ;;  %v2615_v16 = vpop.xlane.xlu1 %2614 }
0x1fcb   :  { %v2678_v62 = vperm.slane %v2618_v37, %v7268_v54  ;;  %v2677_v31 = vperm.slane %v2615_v16, %v7263_v51 }
0x1fcc   :  { %v2621_v33 = vpop.xlane.xlu0 %2620 }
0x1fcd   :  { %v2680_v42 = vperm.slane %v2621_v33, %v7263_v51  ;;  %v2679_v44 = vsel %vm549_vm10, %v2678_v62, %v2677_v31 }
0x1fd2   :  { %v8543_v15 = vpop.xlane.xlu2 %2626  ;;  %v2624_v45 = vpop.xlane.xlu1 %2623 }
0x1fd3   :  { %v2681_v29 = vperm.slane %v2624_v45, %v7268_v54  ;;  %v2683_v34 = vperm.slane %v8543_v15, %v7263_v51 }
0x1fd4   :  { %v2630_v24 = vpop.xlane.xlu0 %2629 }
0x1fd5   :  { %v2684_v41 = vperm.slane %v2630_v24, %v7268_v54  ;;  %v2682_v40 = vsel %vm549_vm10, %v2681_v29, %v2680_v42 }
0x1fd6   :  { %v2701_v39 = vsel %vm572_vm11, %v2682_v40, %v2679_v44 }
0x1fd7   :  { %v2685_v4 = vsel %vm549_vm10, %v2684_v41, %v2683_v34 }
0x1fd8   :  { %v2702_v6 = vsel %vm574_vm12, %v2685_v4, %v2701_v39 }
0x1fda   :  { %v8545_v18 = vpop.xlane.xlu2 %2635  ;;  %v2633_v46 = vpop.xlane.xlu1 %2632 }
0x1fdb   :  { %v2687_v57 = vperm.slane %v8545_v18, %v7268_v54  ;;  %v2686_v3 = vperm.slane %v2633_v46, %v7263_v51 }
0x1fdc   :  { %v8547_v38 = vpop.xlane.xlu0 %2638 }
0x1fdd   :  { %v2689_v32 = vperm.slane %v8547_v38, %v7263_v51  ;;  %v2688_v19 = vsel %vm549_vm10, %v2687_v57, %v2686_v3 }
0x1fde   :  { %v2703_v23 = vsel %vm576_vm13, %v2688_v19, %v2702_v6 }
0x1fe2   :  { %v8549_v20 = vpop.xlane.xlu2 %2644  ;;  %v8551_v61 = vpop.xlane.xlu1 %2641 }
0x1fe3   :  { %v2690_v47 = vperm.slane %v8551_v61, %v7268_v54  ;;  %v2692_v49 = vperm.slane %v8549_v20, %v7263_v51 }
0x1fe4   :  { %v8554_v63 = vpop.xlane.xlu0 %2647 }
0x1fe5   :  { %v2693_v28 = vperm.slane %v8554_v63, %v7268_v54  ;;  %v2691_v0 = vsel %vm549_vm10, %v2690_v47, %v2689_v32 }
0x1fe6   :  { %v2704_v62 = vsel %vm578_vm14, %v2691_v0, %v2703_v23 }
0x1fe7   :  { %v2694_v29 = vsel %vm549_vm10, %v2693_v28, %v2692_v49 }
0x1fe8   :  { %v2705_v57 = vsel %vm580_vm15, %v2694_v29, %v2704_v62 }
0x1fea   :  { %v8568_v1 = vpop.xlane.xlu1 %2650  ;;  %v8571_v5 = vpop.xlane.xlu2 %2653 }
0x1feb   :  { %v2696_v22 = vperm.slane %v8571_v5, %v7268_v54  ;;  %v2695_v48 = vperm.slane %v8568_v1, %v7263_v51 }
0x1fec   :  { %v8589_v10 = vpop.xlane.xlu0 %2656 }
0x1fed   :  { %v2697_v42 = vsel %vm549_vm10, %v2696_v22, %v2695_v48  ;;  %v2698_v41 = vperm.slane %v8589_v10, %v7263_v51 }
0x1fee   :  { %v2706_v34 = vsel %vm582_vm2, %v2697_v42, %v2705_v57 }
0x1ff2   :  { %v8593_v31 = vpop.xlane.xlu1 %2659 }
0x1ff3   :  { %v2699_v40 = vperm.slane %v8593_v31, %v7268_v54 }
0x1ff5   :  { %v2700_v3 = vsel %vm549_vm10, %v2699_v40, %v2698_v41 }
0x1ff6   :  { %v2707_v47 = vsel %vm584_vm3, %v2700_v3, %v2706_v34 }
0x1ff7   :  { %v2709_v44 = vsel %vm587_vm4, %v2707_v47, -inf }
0x1ff8   :  { %2710 = vmax.xlane.f32.xlu2 %v2709_v44 }
0x206b   :  { %v8605_v39 = vpop.xlane.xlu2 %2710 }
0x206c   :  { %v2713_v4 = vperm.slane %v8605_v39, 0  ;;  %v2714_v32 = vperm.slane %v8605_v39, 1  ;;  %v2716_v22 = vperm.slane %v8605_v39, 3  ;;  %v2715_v48 = vperm.slane %v8605_v39, 2 }
0x206d   :  { %v2717_v41 = vperm.slane %v8605_v39, 4  ;;  %v2719_v34 = vperm.slane %v8605_v39, 6  ;;  %v2718_v44 = vperm.slane %v8605_v39, 5 }
0x206e   :  { %v2729_v19 = vsub.f32 %v2615_v16, %v2713_v4  ;;  %v2730_v28 = vsub.f32 %v2618_v37, %v2713_v4  ;;  %v2731_v0 = vsub.f32 %v2621_v33, %v2714_v32  ;;  %v2735_v29 = vsub.f32 %v2633_v46, %v2716_v22 }
0x206f   :  { %v2734_v62 = vsub.f32 %v2630_v24, %v2715_v48  ;;  %v2732_v42 = vsub.f32 %v2624_v45, %v2714_v32  ;;  %v2738_v46 = vsub.f32 %v8551_v61, %v2717_v41  ;;  %v2737_v45 = vsub.f32 %v8547_v38, %v2717_v41 }
0x2070   :  { %v2745_v6 = vmul.f32 1.442695, %v2729_v19  ;;  %v2747_v49 = vmul.f32 1.442695, %v2730_v28  ;;  %v2749_v23 = vmul.f32 1.442695, %v2731_v0  ;;  %v2733_v24 = vsub.f32 %v8543_v15, %v2715_v48 }
0x2071   :  { %v2757_v40 = vmul.f32 1.442695, %v2735_v29  ;;  %v2755_v57 = vmul.f32 1.442695, %v2734_v62  ;;  %v2751_v37 = vmul.f32 1.442695, %v2732_v42  ;;  %v2741_v28 = vsub.f32 %v8568_v1, %v2719_v34 }
0x2072   :  { %6252 = vpow2.f32 %v2749_v23  ;;  %v2763_v47 = vmul.f32 1.442695, %v2738_v46  ;;  %v2761_v4 = vmul.f32 1.442695, %v2737_v45  ;;  %v2753_v61 = vmul.f32 1.442695, %v2733_v24 }
0x2073   :  { %6254 = vpow2.f32 %v2747_v49  ;;  %v2740_v15 = vsub.f32 %v8554_v63, %v2718_v44  ;;  %v2736_v0 = vsub.f32 %v8545_v18, %v2716_v22  ;;  %v2720_v48 = vperm.slane %v8605_v39, 7 }
0x2074   :  { %6256 = vpow2.f32 %v2745_v6  ;;  %v2769_v6 = vmul.f32 1.442695, %v2741_v28  ;;  %v2739_v39 = vsub.f32 %v8549_v20, %v2718_v44  ;;  %v2742_v20 = vsub.f32 %v8571_v5, %v2719_v34 }
0x2075   :  { %6258 = vpow2.f32 %v2757_v40  ;;  %v2767_v49 = vmul.f32 1.442695, %v2740_v15  ;;  %v2759_v29 = vmul.f32 1.442695, %v2736_v0  ;;  %v2744_v63 = vsub.f32 %v8593_v31, %v2720_v48 }
0x2076   :  { %6260 = vpow2.f32 %v2755_v57  ;;  %v2743_v18 = vsub.f32 %v8589_v10, %v2720_v48  ;;  %v2765_v40 = vmul.f32 1.442695, %v2739_v39 }
0x2077   :  { %6262 = vpow2.f32 %v2751_v37  ;;  %v2775_v22 = vmul.f32 1.442695, %v2744_v63  ;;  %v2771_v37 = vmul.f32 1.442695, %v2742_v20 }
0x2078   :  { %v8612_v16 = vpop.eup %6252  ;;  %6264 = vpow2.f32 %v2763_v47  ;;  %v2773_v42 = vmul.f32 1.442695, %v2743_v18 }
0x2079   :  { %v8614_v33 = vpop.eup %6254  ;;  %2800 = vperm.xlu2 %6076, %v8612_v16   ;;  %6266 = vpow2.f32 %v2761_v4 }
0x207a   :  { %v8617_v3 = vpop.eup %6256  ;;  %2797 = vperm.xlu1 %6075, %v8614_v33   ;;  %6268 = vpow2.f32 %v2753_v61 }
0x207b   :  { %2794 = vperm.xlu0 %6077, %v8617_v3   ;;  %v8626_v32 = vpop.eup %6258  ;;  %6270 = vpow2.f32 %v2769_v6 }
0x207c   :  { %v8628_v19 = vpop.eup %6260  ;;  %6272 = vpow2.f32 %v2767_v49 }
0x207d   :  { %v8631_v38 = vpop.eup %6262  ;;  %6274 = vpow2.f32 %v2759_v29 }
0x207e   :  { %v8639_v23 = vpop.eup %6264  ;;  %6276 = vpow2.f32 %v2775_v22 }
0x207f   :  { %v8641_v62 = vpop.eup %6266  ;;  %6278 = vpow2.f32 %v2773_v42 }
0x2080   :  { %v8644_v1 = vpop.eup %6268  ;;  %6280 = vpow2.f32 %v2765_v40 }
0x2081   :  { %2812 = vperm.xlu2 %6076, %v8626_v32   ;;  %v8651_v41 = vpop.eup %6270  ;;  %6282 = vpow2.f32 %v2771_v37 }
0x2082   :  { %2809 = vperm.xlu1 %6075, %v8628_v19   ;;  %v8653_v57 = vpop.eup %6272 }
0x2083   :  { %2803 = vperm.xlu0 %6077, %v8631_v38   ;;  %v8656_v31 = vpop.eup %6274 }
0x2084   :  { %v8661_v10 = vpop.eup %6276 }
0x2085   :  { %v8663_v46 = vpop.eup %6278 }
0x2086   :  { %v8666_v45 = vpop.eup %6280 }
0x2087   :  { %v8670_v24 = vpop.eup %6282 }
0x2089   :  { %2821 = vperm.xlu2 %6076, %v8639_v23  }
0x208a   :  { %2818 = vperm.xlu1 %6075, %v8641_v62  }
0x208b   :  { %2806 = vperm.xlu0 %6077, %v8644_v1  }
0x2091   :  { %2830 = vperm.xlu2 %6076, %v8651_v41  }
0x2092   :  { %2827 = vperm.xlu1 %6075, %v8653_v57  }
0x2093   :  { %2815 = vperm.xlu0 %6077, %v8656_v31  }
0x2099   :  { %2839 = vperm.xlu2 %6076, %v8661_v10  }
0x209a   :  { %2836 = vperm.xlu1 %6075, %v8663_v46  }
0x209b   :  { %2824 = vperm.xlu0 %6077, %v8666_v45  }
0x20a3   :  { %2833 = vperm.xlu0 %6077, %v8670_v24  }
0x20d3   :  { %v2801_v5 = vpop.permute.xlu2 %2800 }
0x20d4   :  { %v2844_v18 = vperm.slane %v2801_v5, %v7263_v51 }
0x20db   :  { %v2813_v61 = vpop.permute.xlu2 %2812 }
0x20dc   :  { %v2850_v37 = vperm.slane %v2813_v61, %v7263_v51 }
0x20e3   :  { %v2822_v0 = vpop.permute.xlu2 %2821 }
0x20e4   :  { %v2854_v61 = vperm.slane %v2822_v0, %v7268_v54 }
0x20eb   :  { %v2831_v49 = vpop.permute.xlu2 %2830 }
0x20ec   :  { %v2798_v34 = vpop.permute.xlu1 %2797 }
0x20ed   :  { %v2795_v47 = vpop.permute.xlu0 %2794  ;;  %v2842_v39 = vperm.slane %v2798_v34, %v7268_v54 }
0x20ee   :  { %v2841_v22 = vperm.slane %v2795_v47, %v7263_v51 }
0x20f4   :  { %v2810_v44 = vpop.permute.xlu1 %2809 }
0x20f5   :  { %v2804_v4 = vpop.permute.xlu0 %2803  ;;  %v2848_v20 = vperm.slane %v2810_v44, %v7268_v54 }
0x20f6   :  { %v2845_v29 = vperm.slane %v2804_v4, %v7268_v54  ;;  %v2843_v4 = vsel %vm549_vm10, %v2842_v39, %v2841_v22 }
0x20f8   :  { %v2846_v9 = vsel %vm549_vm10, %v2845_v29, %v2844_v18  ;;  %v2840_v29 = vpop.permute.xlu2 %2839 }
0x20f9   :  { %v2865_v34 = vsel %vm572_vm11, %v2846_v9, %v2843_v4 }
0x20fc   :  { %v2819_v15 = vpop.permute.xlu1 %2818 }
0x20fd   :  { %v2807_v28 = vpop.permute.xlu0 %2806  ;;  %v2853_v47 = vperm.slane %v2819_v15, %v7263_v51 }
0x20fe   :  { %v2847_v63 = vperm.slane %v2807_v28, %v7263_v51 }
0x20ff   :  { %v2855_v9 = vsel %vm549_vm10, %v2854_v61, %v2853_v47 }
0x2100   :  { %v2849_v35 = vsel %vm549_vm10, %v2848_v20, %v2847_v63 }
0x2101   :  { %v2866_v7 = vsel %vm574_vm12, %v2849_v35, %v2865_v34  ;;  %v2863_v35 = vperm.slane %v2840_v29, %v7268_v54 }
0x2104   :  { %v2828_v6 = vpop.permute.xlu1 %2827 }
0x2105   :  { %v2816_v48 = vpop.permute.xlu0 %2815  ;;  %v2857_v44 = vperm.slane %v2828_v6, %v7268_v54 }
0x2106   :  { %v2851_v42 = vperm.slane %v2816_v48, %v7268_v54 }
0x2108   :  { %v2852_v28 = vsel %vm549_vm10, %v2851_v42, %v2850_v37  ;;  %v2859_v42 = vperm.slane %v2831_v49, %v7263_v51 }
0x2109   :  { %v2867_v63 = vsel %vm576_vm13, %v2852_v28, %v2866_v7 }
0x210a   :  { %v2868_v6 = vsel %vm578_vm14, %v2855_v9, %v2867_v63 }
0x210c   :  { %v2837_v48 = vpop.permute.xlu1 %2836 }
0x210d   :  { %v2825_v40 = vpop.permute.xlu0 %2824  ;;  %v2862_v18 = vperm.slane %v2837_v48, %v7263_v51 }
0x210e   :  { %v2856_v5 = vperm.slane %v2825_v40, %v7263_v51 }
0x210f   :  { %v2864_v7 = vsel %vm549_vm10, %v2863_v35, %v2862_v18 }
0x2110   :  { %v2858_v39 = vsel %vm549_vm10, %v2857_v44, %v2856_v5 }
0x2111   :  { %v2869_v40 = vsel %vm580_vm15, %v2858_v39, %v2868_v6 }
0x2115   :  { %v2834_v22 = vpop.permute.xlu0 %2833 }
0x2116   :  { %v2860_v15 = vperm.slane %v2834_v22, %v7268_v54 }
0x2118   :  { %v2861_v0 = vsel %vm549_vm10, %v2860_v15, %v2859_v42 }
0x2119   :  { %v2870_v20 = vsel %vm582_vm2, %v2861_v0, %v2869_v40 }
0x211a   :  { %v2871_v37 = vsel %vm584_vm3, %v2864_v7, %v2870_v20 }
0x211b   :  { %v2873_v49 = vsel %vm587_vm4, %v2871_v37, 0.0 }
0x211c   :  { %2874 = vadd.xlane.f32.xlu0 %v2873_v49 }
0x218f   :  { %v2875_v4 = vpop.xlane.xlu0 %2874 }
0x2190   :  { %6284 = vrcp.f32 %v2875_v4 }
0x2196   :  { %v6285_v28 = vpop.eup %6284 }
0x2197   :  { %v2877_v5 = vmul.f32 %v6285_v28, %v2875_v4 }
0x2199   :  { %v2878_v34 = vsub.f32 2.0, %v2877_v5 }
0x219b   :  { %v2879_v47 = vmul.f32 %v6285_v28, %v2878_v34 }
0x219d   :  { %v2886_v48 = vperm.slane %v2879_v47, 5  ;;  %v2881_v44 = vperm.slane %v2879_v47, 0  ;;  %v2882_v18 = vperm.slane %v2879_v47, 1  ;;  %v2883_v42 = vperm.slane %v2879_v47, 2 }
0x219e   :  { %v2887_v35 = vperm.slane %v2879_v47, 6  ;;  %v2888_v6 = vperm.slane %v2879_v47, 7 }
0x219f   :  { %v2908_v61 = vmul.f32 %v8653_v57, %v2886_v48  ;;  %v2898_v29 = vmul.f32 %v8614_v33, %v2881_v44  ;;  %v2897_v63 = vmul.f32 %v8617_v3, %v2881_v44  ;;  %v2900_v39 = vmul.f32 %v8631_v38, %v2882_v18 }
0x21a0   :  { %v2899_v22 = vmul.f32 %v8612_v16, %v2882_v18  ;;  %v2902_v57 = vmul.f32 %v8628_v19, %v2883_v42  ;;  %v2901_v33 = vmul.f32 %v8644_v1, %v2883_v42  ;;  %v2884_v3 = vperm.slane %v2879_v47, 3 }
0x21a1   :  { %2970 = vperm.xlu0 %6077, %v2908_v61   ;;  %2920 = vperm.xlu2 %6076, %v2898_v29   ;;  %v2885_v16 = vperm.slane %v2879_v47, 4  ;;  %v2909_v19 = vmul.f32 %v8651_v41, %v2887_v35  ;;  %v2907_v1 = vmul.f32 %v8666_v45, %v2886_v48 }
0x21a2   :  { %2915 = vperm.xlu1 %6075, %v2897_v63   ;;  %v2904_v9 = vmul.f32 %v8656_v31, %v2884_v3  ;;  %v2903_v15 = vmul.f32 %v8626_v32, %v2884_v3  ;;  %v2911_v31 = vmul.f32 %v8663_v46, %v2888_v6  ;;  %v2910_v32 = vmul.f32 %v8670_v24, %v2887_v35 }
0x21a3   :  { %v2906_v38 = vmul.f32 %v8639_v23, %v2885_v16  ;;  %v2912_v23 = vmul.f32 %v8661_v10, %v2888_v6 }
0x21a9   :  { %3125 = vrot.lane.b32.xlu0 %v8377_v14, %s6924_s21  ;;  %2930 = vperm.xlu2 %6076, %v2900_v39   ;;  %v2905_v14 = vmul.f32 %v8641_v62, %v2885_v16 }
0x21aa   :  { %2925 = vperm.xlu1 %6075, %v2899_v22  }
0x21b1   :  { %2940 = vperm.xlu2 %6076, %v2902_v57  }
0x21b2   :  { %2935 = vperm.xlu1 %6075, %v2901_v33  }
0x21b9   :  { %2950 = vperm.xlu2 %6076, %v2904_v9  }
0x21ba   :  { %2945 = vperm.xlu1 %6075, %v2903_v15  }
0x21c1   :  { %2960 = vperm.xlu2 %6076, %v2906_v38  }
0x21c2   :  { %2955 = vperm.xlu1 %6075, %v2905_v14  }
0x21c9   :  { %2975 = vperm.xlu2 %6076, %v2909_v19  }
0x21ca   :  { %2965 = vperm.xlu1 %6075, %v2907_v1  }
0x21d1   :  { %2985 = vperm.xlu2 %6076, %v2911_v31  }
0x21d2   :  { %2980 = vperm.xlu1 %6075, %v2910_v32  }
0x21d9   :  { %3097 = vrot.lane.b32.xlu2 %v8426_v53, %s6924_s21 }
0x21da   :  { %2990 = vperm.xlu1 %6075, %v2912_v23  }
0x21fb   :  { %v2921_v62 = vpop.permute.xlu2 %2920 }
0x21fc   :  { %v2994_v48 = vmul.f32 %v8434_v58, %v2921_v62 }
0x21fe   :  { %v3010_v63 = vsel %vm150_vm0, %v2994_v48, 0.0 }
0x2203   :  { %v2931_v41 = vpop.permute.xlu2 %2930 }
0x2204   :  { %v2996_v10 = vmul.f32 %v8461_v26, %v2931_v41 }
0x2206   :  { %v3019_v26 = vsel %vm150_vm0, %v2996_v10, 0.0 }
0x220b   :  { %v2941_v45 = vpop.permute.xlu2 %2940 }
0x220c   :  { %v2998_v5 = vmul.f32 %v8467_v52, %v2941_v45 }
0x2213   :  { %v2951_v20 = vpop.permute.xlu2 %2950  ;;  %v2971_v34 = vpop.permute.xlu0 %2970 }
0x2214   :  { %v2916_v0 = vpop.permute.xlu1 %2915  ;;  %v3000_v44 = vmul.f32 %v8476_v60, %v2951_v20 }
0x2215   :  { %v2993_v28 = vmul.f32 %v8440_v36, %v2916_v0  ;;  %v3004_v36 = vmul.f32 %v8509_v59, %v2971_v34 }
0x2217   :  { %v3055_v33 = vsel %vm150_vm0, %v3004_v36, 0.0 }
0x221b   :  { %v2961_v49 = vpop.permute.xlu2 %2960 }
0x221c   :  { %v2926_v40 = vpop.permute.xlu1 %2925 }
0x221d   :  { %v2995_v24 = vmul.f32 %v8448_v50, %v2926_v40  ;;  %v3002_v50 = vmul.f32 %v8503_v21, %v2961_v49  ;;  %v3037_v21 = vsel %vm150_vm0, %v3000_v44, 0.0 }
0x221f   :  { %v3018_v61 = vsel %vm150_vm0, %v2995_v24, 0.0  ;;  %v3046_v59 = vsel %vm150_vm0, %v3002_v50, 0.0 }
0x2220   :  { %v3020_v29 = vadd.f32 %v3019_v26, %v3018_v61 }
0x2222   :  { %v3021_v15 = vrot.slane %v3020_v29, 4 }
0x2223   :  { %v2976_v42 = vpop.permute.xlu2 %2975 }
0x2224   :  { %v2936_v7 = vpop.permute.xlu1 %2935  ;;  %v3005_v19 = vmul.f32 %v8524_v12, %v2976_v42  ;;  %v3022_v6 = vadd.f32 %v3021_v15, %v3020_v29 }
0x2225   :  { %v2997_v4 = vmul.f32 %v8455_v43, %v2936_v7 }
0x2226   :  { %v3063_v41 = vsel %vm150_vm0, %v3005_v19, 0.0  ;;  %v3023_v7 = vrot.slane %v3022_v6, 2 }
0x2227   :  { %v3027_v43 = vsel %vm150_vm0, %v2997_v4, 0.0 }
0x222b   :  { %v2986_v20 = vpop.permute.xlu2 %2985 }
0x222c   :  { %v2946_v37 = vpop.permute.xlu1 %2945  ;;  %v3007_v10 = vmul.f32 %v8530_v2, %v2986_v20  ;;  %v6619_v20 = vld [vmem:[#allocation10 + $0x10] sm:$0xff] }
0x222d   :  { %v2999_v53 = vmul.f32 %v8482_v56, %v2946_v37  ;;  %v3009_v56 = vsel %vm150_vm0, %v2993_v28, 0.0 }
0x222e   :  { %v3011_v22 = vadd.f32 %v3010_v63, %v3009_v56 }
0x222f   :  { %v3036_v52 = vsel %vm150_vm0, %v2999_v53, 0.0  ;;  %v3024_v53 = vadd.f32 %v3023_v7, %v3022_v6  ;;  %v6618_v7 = vld [vmem:[#allocation10 + $0x18] sm:$0xff] }
0x2230   :  { %v3038_v57 = vadd.f32 %v3037_v21, %v3036_v52  ;;  %v3012_v14 = vrot.slane %v3011_v22, 4 }
0x2231   :  { %v3025_v56 = vrot.slane %v3024_v53, 1 }
0x2232   :  { %v3039_v35 = vrot.slane %v3038_v57, 4  ;;  %v3013_v62 = vadd.f32 %v3012_v14, %v3011_v22 }
0x2234   :  { %v2956_v46 = vpop.permute.xlu1 %2955  ;;  %v3040_v0 = vadd.f32 %v3039_v35, %v3038_v57  ;;  %v3014_v12 = vrot.slane %v3013_v62, 2 }
0x2235   :  { %v3001_v47 = vmul.f32 %v8488_v17, %v2956_v46  ;;  %v3028_v17 = vsel %vm150_vm0, %v2998_v5, 0.0 }
0x2236   :  { %v3029_v18 = vadd.f32 %v3028_v17, %v3027_v43  ;;  %v3041_v24 = vrot.slane %v3040_v0, 2  ;;  %v3015_v44 = vadd.f32 %v3014_v12, %v3013_v62  ;;  %v3072_v43 = vsel %vm150_vm0, %v3007_v10, 0.0  ;;  %v6622_v10 = vld [vmem:[#allocation11 + $0x18] sm:$0xff] }
0x2237   :  { %v3045_v58 = vsel %vm150_vm0, %v3001_v47, 0.0 }
0x2238   :  { %v3047_v3 = vadd.f32 %v3046_v59, %v3045_v58  ;;  %v3030_v38 = vrot.slane %v3029_v18, 4  ;;  %v3042_v61 = vadd.f32 %v3041_v24, %v3040_v0  ;;  %v3016_v58 = vrot.slane %v3015_v44, 1  ;;  %v6614_v0 = vld [vmem:[#allocation10 + $0x38] sm:$0xff]  ;;  %v3126_v24 = vpop.permute.xlu0 %3125 }
0x223a   :  { %v3048_v1 = vrot.slane %v3047_v3, 4  ;;  %v3031_v32 = vadd.f32 %v3030_v38, %v3029_v18  ;;  %v3026_v18 = vadd.f32 %v3025_v56, %v3024_v53  ;;  %v3017_v42 = vadd.f32 %v3016_v58, %v3015_v44  ;;  %v6624_v53 = vld [vmem:[#allocation11 + $0x8] sm:$0xff] }
0x223c   :  { %v2966_v60 = vpop.permute.xlu1 %2965  ;;  %v3049_v40 = vadd.f32 %v3048_v1, %v3047_v3  ;;  %v3032_v46 = vrot.slane %v3031_v32, 2 }
0x223d   :  { %v3003_v39 = vmul.f32 %v8497_v55, %v2966_v60  ;;  %v3043_v60 = vrot.slane %v3042_v61, 1 }
0x223e   :  { %v3050_v28 = vrot.slane %v3049_v40, 2  ;;  %v3033_v47 = vadd.f32 %v3032_v46, %v3031_v32  ;;  %v8763_v32 = vpop.permute.xlu2 %3097 }
0x223f   :  { %v3054_v9 = vsel %vm150_vm0, %v3003_v39, 0.0  ;;  %v3044_v57 = vadd.f32 %v3043_v60, %v3042_v61 }
0x2240   :  { %v3056_v16 = vadd.f32 %v3055_v33, %v3054_v9  ;;  %v3051_v26 = vadd.f32 %v3050_v28, %v3049_v40  ;;  %v3034_v2 = vrot.slane %v3033_v47, 1  ;;  %v3089_v9 = vsel %vm572_vm11, %v3026_v18, %v3017_v42  ;;  %v6616_v40 = vld [vmem:[#allocation10 + $0x28] sm:$0xff]  ;;  %v6623_v28 = vld [vmem:[#allocation11 + $0x10] sm:$0xff] }
0x2242   :  { %v3057_v55 = vrot.slane %v3056_v16, 4  ;;  %v3052_v21 = vrot.slane %v3051_v26, 1  ;;  %v3035_v22 = vadd.f32 %v3034_v2, %v3033_v47 }
0x2244   :  { %v2981_v31 = vpop.permute.xlu1 %2980  ;;  %v3058_v37 = vadd.f32 %v3057_v55, %v3056_v16  ;;  %v3053_v3 = vadd.f32 %v3052_v21, %v3051_v26  ;;  %v3090_v38 = vsel %vm574_vm12, %v3035_v22, %v3089_v9  ;;  %v6629_v9 = vld [vmem:[%s10294_s11 + $0x28] sm:$0xff] }
0x2245   :  { %v3006_v23 = vmul.f32 %v8518_v13, %v2981_v31  ;;  %v3091_v35 = vsel %vm576_vm13, %v3044_v57, %v3090_v38  ;;  %v6632_v38 = vld [vmem:[%s10294_s11 + $0x10] sm:$0xff] }
0x2246   :  { %v3059_v13 = vrot.slane %v3058_v37, 2  ;;  %v3092_v1 = vsel %vm578_vm14, %v3053_v3, %v3091_v35  ;;  %v6628_v3 = vld [vmem:[%s10294_s11 + $0x30] sm:$0xff]  ;;  %v6634_v35 = vld [vmem:[%s10294_s11] sm:$0xff] }
0x2247   :  { %v3064_v45 = vsel %vm150_vm0, %v3006_v23, 0.0 }
0x2248   :  { %v3065_v49 = vadd.f32 %v3064_v45, %v3063_v41  ;;  %v3060_v52 = vadd.f32 %v3059_v13, %v3058_v37  ;;  %v6615_v41 = vld [vmem:[#allocation10 + $0x30] sm:$0xff]  ;;  %v6617_v45 = vld [vmem:[#allocation10 + $0x20] sm:$0xff]  ;;  %v6620_v37 = vld [vmem:[#allocation10 + $0x8] sm:$0xff] }
0x2249   :  { %v6625_v13 = vld [vmem:[#allocation11] sm:$0xff] }
0x224a   :  { %v3066_v4 = vrot.slane %v3065_v49, 4  ;;  %v3061_v39 = vrot.slane %v3060_v52, 1 }
0x224c   :  { %v3067_v5 = vadd.f32 %v3066_v4, %v3065_v49  ;;  %v2991_v34 = vpop.permute.xlu1 %2990  ;;  %v3062_v15 = vadd.f32 %v3061_v39, %v3060_v52  ;;  %v6621_v49 = vld [vmem:[#allocation10] sm:$0xff] }
0x224d   :  { %v3008_v48 = vmul.f32 %v8539_v30, %v2991_v34 }
0x224e   :  { %v3068_v50 = vrot.slane %v3067_v5, 2  ;;  %v3093_v55 = vsel %vm580_vm15, %v3062_v15, %v3092_v1  ;;  %v6630_v15 = vld [vmem:[%s10294_s11 + $0x20] sm:$0xff] }
0x224f   :  { %v3073_v36 = vsel %vm150_vm0, %v3008_v48, 0.0  ;;  %v6635_v1 = vld [vmem:[%s10292_s9] ss:$0 sm:$0xff] }
0x2250   :  { %v3074_v17 = vadd.f32 %v3073_v36, %v3072_v43  ;;  %v3069_v29 = vadd.f32 %v3068_v50, %v3067_v5  ;;  %v6626_v5 = vld [vmem:[%s10290_s7] ss:$0 sm:$0xff] }
0x2251   :  { %v205_v34 = vadd.f32 %v6626_v5, %v8408_v25 }
0x2252   :  { %v3075_v63 = vrot.slane %v3074_v17, 4  ;;  %v3070_v59 = vrot.slane %v3069_v29, 1 }
0x2254   :  { %v3076_v30 = vadd.f32 %v3075_v63, %v3074_v17  ;;  %v3071_v14 = vadd.f32 %v3070_v59, %v3069_v29 }
0x2256   :  { %v3077_v33 = vrot.slane %v3076_v30, 2  ;;  %v3094_v31 = vsel %vm582_vm2, %v3071_v14, %v3093_v55  ;;  %v6633_v14 = vld [vmem:[%s10294_s11 + $0x8] sm:$0xff] }
0x2258   :  { %v3078_v16 = vadd.f32 %v3077_v33, %v3076_v30 }
0x225a   :  { %v3079_v19 = vrot.slane %v3078_v16, 1 }
0x225c   :  { %v3080_v6 = vadd.f32 %v3079_v19, %v3078_v16  ;;  %v6631_v16 = vld [vmem:[%s10294_s11 + $0x18] sm:$0xff] }
0x225e   :  { %v3095_v23 = vsel %vm584_vm3, %v3080_v6, %v3094_v31 }
0x225f   :  { %v3100_v62 = vsel %vm150_vm0, %v3095_v23, %v8763_v32 }
0x2260   :  { %6037 = vmatmul.msk.f32.vlgmr.msra.gmra.mxu1 %vm273_vm1, %v3100_v62 }
0x2261   :  { %4620 = vmatpush.msra.mxu1 %v6614_v0 }
0x2263   :  { %4621 = vmatpush.msra.mxu1 %v6615_v41 }
0x2265   :  { %4622 = vmatpush.msra.mxu1 %v6616_v40 }
0x2267   :  { %4623 = vmatpush.msra.mxu1 %v6617_v45 }
0x2269   :  { %4624 = vmatpush.msra.mxu1 %v6618_v7 }
0x226b   :  { %4625 = vmatpush.msra.mxu1 %v6619_v20 }
0x226d   :  { %4626 = vmatpush.msra.mxu1 %v6620_v37 }
0x226f   :  { %4627 = vmatpush.msra.mxu1 %v6621_v49 }
0x22dd   :  { %v3121_v46 = vpop.f32.mrf.mxu1 }
0x22de   :  { %6286 = vtanh.f32 %v3121_v46 }
0x22e4   :  { %v8769_v12 = vpop.eup %6286 }
0x22e5   :  { %v3128_v4 = vsel %vm150_vm0, %v8769_v12, %v3126_v24 }
0x22e6   :  { %6038 = vmatmul.msk.f32.vlgmr.msrb.gmra.mxu2 %vm273_vm1, %v3128_v4 }
0x22e7   :  { %4686 = vmatpush.msrb.mxu2 %v6622_v10 }
0x22e9   :  { %4687 = vmatpush.msrb.mxu2 %v6623_v28 }
0x22eb   :  { %4688 = vmatpush.msrb.mxu2 %v6624_v53 }
0x22ed   :  { %4689 = vmatpush.msrb.mxu2 %v6625_v13 }
0x2369   :  { %v3149_v47 = vpop.f32.mrf.mxu2 }
0x236a   :  { %v3152_v48 = vadd.f32 %v3149_v47, %v205_v34 }
0x236c   :  { %6288 = vtanh.f32 %v3152_v48  ;;  %v6039_v61 = vmul.f32 -1.442695, %v3152_v48  ;;  %v6636_v48 = vld [vmem:[#allocation8 + $0x38] sm:$0xff] }
0x236e   :  { %6290 = vpow2.f32 %v6039_v61  ;;  %v6639_v61 = vld [vmem:[#allocation8 + $0x20] sm:$0xff] }
0x2372   :  { %v6289_v44 = vpop.eup %6288 }
0x2373   :  { %3175 = vrot.lane.b32.xlu1 %v6289_v44, %s6924_s21  ;;  %v6638_v44 = vld [vmem:[#allocation8 + $0x28] sm:$0xff] }
0x2374   :  { %v6291_v50 = vpop.eup %6290 }
0x2375   :  { %v3156_v43 = vadd.f32 1.0, %v6291_v50  ;;  %v6640_v50 = vld [vmem:[#allocation8 + $0x18] sm:$0xff] }
0x2377   :  { %6292 = vrcp.f32 %v3156_v43  ;;  %v3168_v2 = vand.u32 2147483648, %v3156_v43  ;;  %vm3162_vm5 = vweird.f32 %v3156_v43  ;;  %v3166_v25 = vand.u32 2147483647, %v3156_v43 }
0x2379   :  { %v3169_v58 = vor.u32 1.1754944e-38, %v3168_v2  ;;  %vm3167_vm7 = vcmp.eq.f32.partialorder %v3166_v25, 8.507059e+37  ;;  %v8834_v25 = vld [vmem:[%s10284_s1 + $0x8] sm:$0xff] }
0x237d   :  { %v6293_v26 = vpop.eup %6292 }
0x237e   :  { %v3158_v36 = vmul.f32 %v6293_v26, %v3156_v43  ;;  %vm3163_vm9 = vweird.f32 %v6293_v26  ;;  %v6641_v43 = vld [vmem:[#allocation8 + $0x10] sm:$0xff] }
0x237f   :  { %vm3164_vm6 = vmor %vm3162_vm5, %vm3163_vm9 }
0x2380   :  { %v3159_v56 = vsub.f32 1.0, %v3158_v36  ;;  %v6643_v36 = vld [vmem:[#allocation8] sm:$0xff] }
0x2382   :  { %v3160_v52 = vmul.f32 %v6293_v26, %v3159_v56 }
0x2384   :  { %v3161_v17 = vadd.f32 %v6293_v26, %v3160_v52 }
0x2386   :  { %v3165_v29 = vsel %vm3164_vm6, %v6293_v26, %v3161_v17  ;;  %v6642_v26 = vld [vmem:[#allocation8 + $0x8] sm:$0xff] }
0x2387   :  { %v3170_v63 = vsel %vm3167_vm7, %v3169_v58, %v3165_v29  ;;  %v8840_v58 = vld [vmem:[%s10284_s1] sm:$0xff] }
0x2388   :  { %v3173_v18 = vmul.f32 %v3170_v63, %v8357_v8  ;;  %v6627_v8 = vld [vmem:[%s10294_s11 + $0x38] sm:$0xff] }
0x23e5   :  { %v3176_v60 = vpop.permute.xlu1 %3175 }
0x23e6   :  { %v3178_v21 = vmul.f32 %v3176_v60, %v3170_v63 }
0x23e8   :  { %3180 = vrot.lane.b32.xlu2 %v3178_v21, %s6923_s8 }
0x2442   :  { %v3181_v39 = vpop.permute.xlu2 %3180 }
0x2443   :  { %v8781_v30 = vadd.f32 %v3181_v39, %v3173_v18  ;;  %v8848_v39 = vld [vmem:[%s10284_s1 + $0x10] sm:$0xff] }
0x2445   :  { %6294 = vtanh.f32 %v8781_v30 }
0x244b   :  { %v6295_v22 = vpop.eup %6294 }
0x244c   :  { %3186 = vrot.lane.b32.xlu0 %v6295_v22, %s6924_s21 }
0x24be   :  { %v3187_v59 = vpop.permute.xlu0 %3186 }
0x24bf   :  { %v8785_v42 = vmul.f32 %v3187_v59, %v3170_v63 }
0x24c1   :  { %3191 = vrot.lane.b32.xlu1 %v8785_v42, %s6923_s8 }
0x2533   :  { %v3192_v57 = vpop.permute.xlu1 %3191 }
0x2534   :  { %v3194_v33 = vsel %vm150_vm0, %v3192_v57, %v8763_v32 }
0x2535   :  { %6040 = vmatmul.msk.f32.vlgmr.msrb.gmra.mxu3 %vm273_vm1, %v3194_v33  ;;  %v8855_v33 = vld [vmem:[%s10284_s1 + $0x20] sm:$0xff] }
0x2536   :  { %4526 = vmatpush.msrb.mxu3 %v6627_v8 }
0x2538   :  { %4527 = vmatpush.msrb.mxu3 %v6628_v3  ;;  %v8861_v3 = vld [vmem:[%s10284_s1 + $0x18] sm:$0xff] }
0x253a   :  { %4528 = vmatpush.msrb.mxu3 %v6629_v9 }
0x253c   :  { %4529 = vmatpush.msrb.mxu3 %v6630_v15 }
0x253e   :  { %4530 = vmatpush.msrb.mxu3 %v6631_v16  ;;  %v8867_v16 = vld [vmem:[%s10284_s1 + $0x28] sm:$0xff] }
0x2540   :  { %4531 = vmatpush.msrb.mxu3 %v6632_v38 }
0x2542   :  { %4532 = vmatpush.msrb.mxu3 %v6633_v14 }
0x2544   :  { %4533 = vmatpush.msrb.mxu3 %v6634_v35 }
0x25b8   :  { %v3215_v19 = vpop.f32.mrf.mxu3 }
0x25b9   :  { %v3216_v6 = vadd.f32 %v6635_v1, %v3215_v19 }
0x25bb   :  { %6296 = vtanh.f32 %v3216_v6  ;;  %v6041_v31 = vmul.f32 -1.442695, %v3216_v6 }
0x25bd   :  { %6298 = vpow2.f32 %v6041_v31  ;;  %v8876_v31 = vld [vmem:[%s10284_s1 + $0x38] sm:$0xff] }
0x25c1   :  { %v6297_v55 = vpop.eup %6296 }
0x25c2   :  { %3240 = vrot.lane.b32.xlu2 %v6297_v55, %s6924_s21 }
0x25c3   :  { %v6299_v32 = vpop.eup %6298 }
0x25c4   :  { %v3221_v23 = vadd.f32 1.0, %v6299_v32 }
0x25c6   :  { %6300 = vrcp.f32 %v3221_v23  ;;  %v3233_v7 = vand.u32 2147483648, %v3221_v23  ;;  %vm3227_vm9 = vweird.f32 %v3221_v23  ;;  %v3231_v20 = vand.u32 2147483647, %v3221_v23 }
0x25c8   :  { %v3234_v49 = vor.u32 1.1754944e-38, %v3233_v7  ;;  %vm3232_vm6 = vcmp.eq.f32.partialorder %v3231_v20, 8.507059e+37 }
0x25cc   :  { %v6301_v62 = vpop.eup %6300 }
0x25cd   :  { %v3223_v0 = vmul.f32 %v6301_v62, %v3221_v23  ;;  %vm3228_vm8 = vweird.f32 %v6301_v62  ;;  %v8882_v23 = vld [vmem:[%s10284_s1 + $0x30] sm:$0xff] }
0x25ce   :  { %vm3229_vm5 = vmor %vm3227_vm9, %vm3228_vm8 }
0x25cf   :  { %v3224_v41 = vsub.f32 1.0, %v3223_v0 }
0x25d1   :  { %v3225_v40 = vmul.f32 %v6301_v62, %v3224_v41  ;;  %v8888_v41 = vld [vmem:[%s10284_s1 + $0x40] sm:$0xff] }
0x25d3   :  { %v3226_v45 = vadd.f32 %v6301_v62, %v3225_v40 }
0x25d5   :  { %v3230_v37 = vsel %vm3229_vm5, %v6301_v62, %v3226_v45 }
0x25d6   :  { %v3235_v24 = vsel %vm3232_vm6, %v3234_v49, %v3230_v37  ;;  %v8897_v49 = vld [vmem:[%s10284_s1 + $0x50] sm:$0xff] }
0x25d7   :  { %v3238_v10 = vmul.f32 %v3235_v24, %v8422_v11  ;;  %v6637_v11 = vld [vmem:[#allocation8 + $0x30] sm:$0xff] }
0x261c   :  { %v3241_v46 = vpop.permute.xlu2 %3240 }
0x261d   :  { %v3243_v4 = vmul.f32 %v3241_v46, %v3235_v24 }
0x261f   :  { %3245 = vrot.lane.b32.xlu0 %v3243_v4, %s6923_s8 }
0x2691   :  { %v3246_v28 = vpop.permute.xlu0 %3245 }
0x2692   :  { %v8822_v53 = vadd.f32 %v3246_v28, %v3238_v10  ;;  %v8909_v28 = vld [vmem:[%s10284_s1 + $0x58] sm:$0xff] }
0x2694   :  { %6302 = vtanh.f32 %v8822_v53 }
0x269a   :  { %v6303_v13 = vpop.eup %6302 }
0x269b   :  { %3251 = vrot.lane.b32.xlu1 %v6303_v13, %s6924_s21 }
0x270d   :  { %v3252_v5 = vpop.permute.xlu1 %3251 }
0x270e   :  { %v8826_v34 = vmul.f32 %v3252_v5, %v3235_v24  ;;  %v8903_v24 = vld [vmem:[%s10284_s1 + $0x48] sm:$0xff] }
0x2710   :  { %3256 = vrot.lane.b32.xlu2 %v8826_v34, %s6923_s8 }
0x276a   :  { %v3257_v47 = vpop.permute.xlu2 %3256 }
0x276b   :  { %6042 = vmatmul.msk.f32.vlgmr.msra.gmra.mxu0 %vm150_vm0, %v3257_v47 }
0x276c   :  { %4554 = vmatpush.msra.mxu0 %v6636_v48 }
0x276e   :  { %4555 = vmatpush.msra.mxu0 %v6637_v11 }
0x2770   :  { %4556 = vmatpush.msra.mxu0 %v6638_v44 }
0x2772   :  { %4557 = vmatpush.msra.mxu0 %v6639_v61 }
0x2774   :  { %4558 = vmatpush.msra.mxu0 %v6640_v50  ;;  %v8918_v50 = vld [vmem:[%s10284_s1 + $0x68] sm:$0xff] }
0x2776   :  { %4559 = vmatpush.msra.mxu0 %v6641_v43 }
0x2778   :  { %4560 = vmatpush.msra.mxu0 %v6642_v26  ;;  %v8924_v26 = vld [vmem:[%s10284_s1 + $0x60] sm:$0xff] }
0x277a   :  { %4561 = vmatpush.msra.mxu0 %v6643_v36 }
0x27e8   :  { %v3277_v56 = vpop.f32.mrf.mxu0 }
0x27e9   :  { %v3288_v52 = vperm.slane %v3277_v56, 0  ;;  %v3281_v17 = vrot.slane %v3277_v56, 1  ;;  %v3282_v2 = vrot.slane %v3277_v56, 2  ;;  %v3283_v15 = vrot.slane %v3277_v56, 3 }
0x27ea   :  { %v3284_v14 = vrot.slane %v3277_v56, 4  ;;  %v3285_v0 = vrot.slane %v3277_v56, 5  ;;  %v3286_v10 = vrot.slane %v3277_v56, 6  ;;  %v3287_v5 = vrot.slane %v3277_v56, 7  ;;  %v8930_v56 = vld [vmem:[%s10284_s1 + $0x70] sm:$0xff] }
0x27eb   :  { %v3305_v29 = vmul.f32 %v8834_v25, %v3288_v52  ;;  %v3304_v60 = vmul.f32 %v8840_v58, %v3288_v52  ;;  %v3289_v63 = vperm.slane %v3281_v17, 0  ;;  %v3290_v59 = vperm.slane %v3282_v2, 0 }
0x27ec   :  { %v3291_v1 = vperm.slane %v3283_v15, 0  ;;  %v3292_v55 = vperm.slane %v3284_v14, 0  ;;  %v3293_v20 = vperm.slane %v3285_v0, 0  ;;  %v3294_v11 = vperm.slane %v3286_v10, 0 }
0x27ed   :  { %v3323_v21 = vsel %vm150_vm0, %v3305_v29, 0.0  ;;  %v3320_v18 = vsel %vm150_vm0, %v3304_v60, 0.0  ;;  %v3306_v22 = vmul.f32 %v8848_v39, %v3289_v63  ;;  %v3308_v8 = vmul.f32 %v8855_v33, %v3290_v59  ;;  %v8939_v60 = vld [vmem:[%s10284_s1 + $0x78] sm:$0xff] }
0x27ee   :  { %3324 = vadd.xlane.f32.xlu1 %v3323_v21  ;;  %3321 = vadd.xlane.f32.xlu0 %v3320_v18  ;;  %v3307_v9 = vmul.f32 %v8861_v3, %v3289_v63  ;;  %v3309_v38 = vmul.f32 %v8867_v16, %v3290_v59  ;;  %v3311_v32 = vmul.f32 %v8876_v31, %v3291_v1  ;;  %v3295_v61 = vperm.slane %v3287_v5, 0 }
0x27ef   :  { %v3326_v57 = vsel %vm150_vm0, %v3306_v22, 0.0  ;;  %v3332_v35 = vsel %vm150_vm0, %v3308_v8, 0.0  ;;  %v3310_v62 = vmul.f32 %v8882_v23, %v3291_v1  ;;  %v3312_v40 = vmul.f32 %v8888_v41, %v3292_v55 }
0x27f0   :  { %3327 = vadd.xlane.f32.xlu2 %v3326_v57  ;;  %v3329_v19 = vsel %vm150_vm0, %v3307_v9, 0.0  ;;  %v3335_v6 = vsel %vm150_vm0, %v3309_v38, 0.0  ;;  %v3341_v45 = vsel %vm150_vm0, %v3311_v32, 0.0  ;;  %v3314_v46 = vmul.f32 %v8897_v49, %v3293_v20 }
0x27f1   :  { %v3338_v7 = vsel %vm150_vm0, %v3310_v62, 0.0  ;;  %v3344_v37 = vsel %vm150_vm0, %v3312_v40, 0.0  ;;  %v3313_v4 = vmul.f32 %v8903_v24, %v3292_v55  ;;  %v3315_v13 = vmul.f32 %v8909_v28, %v3293_v20 }
0x27f2   :  { %v3350_v47 = vsel %vm150_vm0, %v3314_v46, 0.0  ;;  %v3317_v43 = vmul.f32 %v8918_v50, %v3294_v11  ;;  %v3316_v36 = vmul.f32 %v8924_v26, %v3294_v11  ;;  %v3318_v52 = vmul.f32 %v8930_v56, %v3295_v61 }
0x27f3   :  { %v3347_v48 = vsel %vm150_vm0, %v3313_v4, 0.0  ;;  %v3353_v44 = vsel %vm150_vm0, %v3315_v13, 0.0  ;;  %v3319_v63 = vmul.f32 %v8939_v60, %v3295_v61 }
0x27f4   :  { %v3359_v17 = vsel %vm150_vm0, %v3317_v43, 0.0  ;;  %v3356_v2 = vsel %vm150_vm0, %v3316_v36, 0.0  ;;  %v3362_v29 = vsel %vm150_vm0, %v3318_v52, 0.0 }
0x27f5   :  { %v3365_v21 = vsel %vm150_vm0, %v3319_v63, 0.0 }
0x27f6   :  { %3333 = vadd.xlane.f32.xlu1 %v3332_v35  ;;  %3330 = vadd.xlane.f32.xlu0 %v3329_v19 }
0x27f8   :  { %3336 = vadd.xlane.f32.xlu2 %v3335_v6 }
0x27fe   :  { %3342 = vadd.xlane.f32.xlu1 %v3341_v45  ;;  %3339 = vadd.xlane.f32.xlu0 %v3338_v7 }
0x2800   :  { %3345 = vadd.xlane.f32.xlu2 %v3344_v37 }
0x2806   :  { %3351 = vadd.xlane.f32.xlu1 %v3350_v47  ;;  %3348 = vadd.xlane.f32.xlu0 %v3347_v48 }
0x2808   :  { %3354 = vadd.xlane.f32.xlu2 %v3353_v44 }
0x280e   :  { %3360 = vadd.xlane.f32.xlu1 %v3359_v17  ;;  %3357 = vadd.xlane.f32.xlu0 %v3356_v2 }
0x2810   :  { %3363 = vadd.xlane.f32.xlu2 %v3362_v29 }
0x2816   :  { %3366 = vadd.xlane.f32.xlu0 %v3365_v21 }
0x2861   :  { %v3325_v18 = vpop.xlane.xlu1 %3324  ;;  %v3322_v22 = vpop.xlane.xlu0 %3321 }
0x2862   :  { %v3385_v55 = vperm.slane %v3325_v18, %v7268_v54  ;;  %v3384_v32 = vperm.slane %v3322_v22, %v7263_v51 }
0x2863   :  { %v3328_v59 = vpop.xlane.xlu2 %3327 }
0x2864   :  { %v3387_v62 = vperm.slane %v3328_v59, %v7263_v51  ;;  %v3386_v4 = vsel %vm549_vm10, %v3385_v55, %v3384_v32 }
0x2869   :  { %v3334_v57 = vpop.xlane.xlu1 %3333  ;;  %v3331_v8 = vpop.xlane.xlu0 %3330 }
0x286a   :  { %v3388_v1 = vperm.slane %v3331_v8, %v7268_v54  ;;  %v3390_v20 = vperm.slane %v3334_v57, %v7263_v51 }
0x286b   :  { %v3337_v9 = vpop.xlane.xlu2 %3336 }
0x286c   :  { %v3391_v0 = vperm.slane %v3337_v9, %v7268_v54  ;;  %v3389_v40 = vsel %vm549_vm10, %v3388_v1, %v3387_v62 }
0x286d   :  { %v3408_v13 = vsel %vm572_vm11, %v3389_v40, %v3386_v4 }
0x286e   :  { %v3392_v5 = vsel %vm549_vm10, %v3391_v0, %v3390_v20 }
0x286f   :  { %v3409_v36 = vsel %vm574_vm12, %v3392_v5, %v3408_v13 }
0x2871   :  { %v8943_v15 = vpop.xlane.xlu1 %3342  ;;  %v8945_v38 = vpop.xlane.xlu0 %3339 }
0x2872   :  { %v3394_v45 = vperm.slane %v8943_v15, %v7268_v54  ;;  %v3393_v7 = vperm.slane %v8945_v38, %v7263_v51 }
0x2873   :  { %v8947_v14 = vpop.xlane.xlu2 %3345 }
0x2874   :  { %v3396_v47 = vperm.slane %v8947_v14, %v7263_v51  ;;  %v3395_v48 = vsel %vm549_vm10, %v3394_v45, %v3393_v7 }
0x2875   :  { %v3410_v17 = vsel %vm576_vm13, %v3395_v48, %v3409_v36 }
0x2879   :  { %v8949_v35 = vpop.xlane.xlu1 %3351  ;;  %v8951_v19 = vpop.xlane.xlu0 %3348 }
0x287a   :  { %v3397_v37 = vperm.slane %v8951_v19, %v7268_v54  ;;  %v3399_v52 = vperm.slane %v8949_v35, %v7263_v51 }
0x287b   :  { %v8954_v6 = vpop.xlane.xlu2 %3354 }
0x287c   :  { %v3400_v11 = vperm.slane %v8954_v6, %v7268_v54  ;;  %v3398_v44 = vsel %vm549_vm10, %v3397_v37, %v3396_v47 }
0x287d   :  { %v3411_v63 = vsel %vm578_vm14, %v3398_v44, %v3410_v17 }
0x287e   :  { %v3401_v29 = vsel %vm549_vm10, %v3400_v11, %v3399_v52 }
0x287f   :  { %v3412_v62 = vsel %vm580_vm15, %v3401_v29, %v3411_v63 }
0x2881   :  { %v8968_v46 = vpop.xlane.xlu0 %3357  ;;  %v8971_v10 = vpop.xlane.xlu1 %3360 }
0x2882   :  { %v3403_v61 = vperm.slane %v8971_v10, %v7268_v54  ;;  %v3402_v43 = vperm.slane %v8968_v46, %v7263_v51 }
0x2883   :  { %v8989_v2 = vpop.xlane.xlu2 %3363 }
0x2884   :  { %v3404_v1 = vsel %vm549_vm10, %v3403_v61, %v3402_v43  ;;  %v3405_v55 = vperm.slane %v8989_v2, %v7263_v51 }
0x2885   :  { %v3413_v40 = vsel %vm582_vm2, %v3404_v1, %v3412_v62 }
0x2889   :  { %v8993_v21 = vpop.xlane.xlu0 %3366 }
0x288a   :  { %v3406_v32 = vperm.slane %v8993_v21, %v7268_v54 }
0x288c   :  { %v3407_v0 = vsel %vm549_vm10, %v3406_v32, %v3405_v55 }
0x288d   :  { %v3414_v45 = vsel %vm584_vm3, %v3407_v0, %v3413_v40 }
0x288e   :  { %v3416_v7 = vsel %vm587_vm4, %v3414_v45, -inf }
0x288f   :  { %3417 = vmax.xlane.f32.xlu1 %v3416_v7 }
0x2902   :  { %v9005_v20 = vpop.xlane.xlu1 %3417 }
0x2903   :  { %v3420_v37 = vperm.slane %v9005_v20, 0  ;;  %v3421_v4 = vperm.slane %v9005_v20, 1  ;;  %v3422_v48 = vperm.slane %v9005_v20, 2  ;;  %v3424_v17 = vperm.slane %v9005_v20, 4 }
0x2904   :  { %v3423_v63 = vperm.slane %v9005_v20, 3  ;;  %v3425_v32 = vperm.slane %v9005_v20, 5 }
0x2905   :  { %v3436_v13 = vsub.f32 %v3322_v22, %v3420_v37  ;;  %v3437_v5 = vsub.f32 %v3325_v18, %v3420_v37  ;;  %v3438_v47 = vsub.f32 %v3328_v59, %v3421_v4  ;;  %v3441_v43 = vsub.f32 %v3337_v9, %v3422_v48 }
0x2906   :  { %v3440_v36 = vsub.f32 %v3334_v57, %v3422_v48  ;;  %v3439_v52 = vsub.f32 %v3331_v8, %v3421_v4  ;;  %v3444_v57 = vsub.f32 %v8947_v14, %v3424_v17  ;;  %v3443_v8 = vsub.f32 %v8943_v15, %v3423_v63 }
0x2907   :  { %v3452_v11 = vmul.f32 1.442695, %v3436_v13  ;;  %v3454_v44 = vmul.f32 1.442695, %v3437_v5  ;;  %v3456_v61 = vmul.f32 1.442695, %v3438_v47  ;;  %v3442_v9 = vsub.f32 %v8945_v38, %v3423_v63 }
0x2908   :  { %v3462_v29 = vmul.f32 1.442695, %v3441_v43  ;;  %v3460_v1 = vmul.f32 1.442695, %v3440_v36  ;;  %v3458_v18 = vmul.f32 1.442695, %v3439_v52  ;;  %v3447_v15 = vsub.f32 %v8954_v6, %v3425_v32 }
0x2909   :  { %6304 = vpow2.f32 %v3456_v61  ;;  %v3468_v62 = vmul.f32 1.442695, %v3444_v57  ;;  %v3466_v0 = vmul.f32 1.442695, %v3443_v8  ;;  %v3464_v45 = vmul.f32 1.442695, %v3442_v9 }
0x290a   :  { %6306 = vpow2.f32 %v3454_v44  ;;  %v3446_v38 = vsub.f32 %v8949_v35, %v3425_v32  ;;  %v3445_v37 = vsub.f32 %v8951_v19, %v3424_v17  ;;  %v3427_v4 = vperm.slane %v9005_v20, 7 }
0x290b   :  { %6308 = vpow2.f32 %v3452_v11  ;;  %v3474_v13 = vmul.f32 1.442695, %v3447_v15  ;;  %v3426_v5 = vperm.slane %v9005_v20, 6 }
0x290c   :  { %6310 = vpow2.f32 %v3462_v29  ;;  %v3472_v47 = vmul.f32 1.442695, %v3446_v38  ;;  %v3470_v6 = vmul.f32 1.442695, %v3445_v37  ;;  %v3450_v44 = vsub.f32 %v8989_v2, %v3427_v4 }
0x290d   :  { %6312 = vpow2.f32 %v3460_v1  ;;  %v3449_v19 = vsub.f32 %v8971_v10, %v3426_v5  ;;  %v3448_v20 = vsub.f32 %v8968_v46, %v3426_v5  ;;  %v3451_v46 = vsub.f32 %v8993_v21, %v3427_v4 }
0x290e   :  { %6314 = vpow2.f32 %v3458_v18  ;;  %v3480_v61 = vmul.f32 1.442695, %v3450_v44 }
0x290f   :  { %v9012_v22 = vpop.eup %6304  ;;  %6316 = vpow2.f32 %v3468_v62  ;;  %v3478_v43 = vmul.f32 1.442695, %v3449_v19  ;;  %v3476_v52 = vmul.f32 1.442695, %v3448_v20  ;;  %v3482_v29 = vmul.f32 1.442695, %v3451_v46 }
0x2910   :  { %v9014_v59 = vpop.eup %6306  ;;  %3507 = vperm.xlu1 %6075, %v9012_v22   ;;  %6318 = vpow2.f32 %v3466_v0 }
0x2911   :  { %v9017_v55 = vpop.eup %6308  ;;  %3504 = vperm.xlu0 %6077, %v9014_v59   ;;  %6320 = vpow2.f32 %v3464_v45 }
0x2912   :  { %3501 = vperm.xlu2 %6076, %v9017_v55   ;;  %v9025_v40 = vpop.eup %6310  ;;  %6322 = vpow2.f32 %v3474_v13 }
0x2913   :  { %v9027_v7 = vpop.eup %6312  ;;  %6324 = vpow2.f32 %v3472_v47 }
0x2914   :  { %v9030_v14 = vpop.eup %6314  ;;  %6326 = vpow2.f32 %v3470_v6 }
0x2915   :  { %v9039_v48 = vpop.eup %6316  ;;  %6328 = vpow2.f32 %v3480_v61 }
0x2916   :  { %v9041_v11 = vpop.eup %6318  ;;  %6330 = vpow2.f32 %v3478_v43 }
0x2917   :  { %v9044_v35 = vpop.eup %6320  ;;  %6332 = vpow2.f32 %v3476_v52 }
0x2918   :  { %3516 = vperm.xlu1 %6075, %v9025_v40   ;;  %v9051_v36 = vpop.eup %6322  ;;  %6334 = vpow2.f32 %v3482_v29 }
0x2919   :  { %3513 = vperm.xlu0 %6077, %v9027_v7   ;;  %v9053_v17 = vpop.eup %6324 }
0x291a   :  { %3510 = vperm.xlu2 %6076, %v9030_v14   ;;  %v9056_v2 = vpop.eup %6326 }
0x291b   :  { %v9061_v10 = vpop.eup %6328 }
0x291c   :  { %v9063_v63 = vpop.eup %6330 }
0x291d   :  { %v9066_v1 = vpop.eup %6332 }
0x291e   :  { %v9070_v18 = vpop.eup %6334 }
0x2920   :  { %3525 = vperm.xlu1 %6075, %v9039_v48  }
0x2921   :  { %3522 = vperm.xlu0 %6077, %v9041_v11  }
0x2922   :  { %3519 = vperm.xlu2 %6076, %v9044_v35  }
0x2928   :  { %3534 = vperm.xlu1 %6075, %v9051_v36  }
0x2929   :  { %3531 = vperm.xlu0 %6077, %v9053_v17  }
0x292a   :  { %3528 = vperm.xlu2 %6076, %v9056_v2  }
0x2930   :  { %3543 = vperm.xlu1 %6075, %v9061_v10  }
0x2931   :  { %3540 = vperm.xlu0 %6077, %v9063_v63  }
0x2932   :  { %3537 = vperm.xlu2 %6076, %v9066_v1  }
0x293a   :  { %3546 = vperm.xlu2 %6076, %v9070_v18  }
0x296c   :  { %v3502_v21 = vpop.permute.xlu2 %3501 }
0x296d   :  { %v3548_v44 = vperm.slane %v3502_v21, %v7263_v51 }
0x2974   :  { %v3511_v57 = vpop.permute.xlu2 %3510 }
0x2975   :  { %v3552_v19 = vperm.slane %v3511_v57, %v7268_v54 }
0x297c   :  { %v3520_v8 = vpop.permute.xlu2 %3519 }
0x297d   :  { %v3557_v43 = vperm.slane %v3520_v8, %v7263_v51 }
0x2982   :  { %v3508_v9 = vpop.permute.xlu1 %3507 }
0x2983   :  { %v3505_v32 = vpop.permute.xlu0 %3504  ;;  %v3551_v4 = vperm.slane %v3508_v9, %v7263_v51 }
0x2984   :  { %v3529_v45 = vpop.permute.xlu2 %3528  ;;  %v3549_v13 = vperm.slane %v3505_v32, %v7268_v54 }
0x2985   :  { %v3553_v52 = vsel %vm549_vm10, %v3552_v19, %v3551_v4 }
0x2986   :  { %v3550_v46 = vsel %vm549_vm10, %v3549_v13, %v3548_v44 }
0x2987   :  { %v3572_v57 = vsel %vm572_vm11, %v3553_v52, %v3550_v46 }
0x298a   :  { %v3517_v62 = vpop.permute.xlu1 %3516 }
0x298b   :  { %v3514_v0 = vpop.permute.xlu0 %3513  ;;  %v3555_v5 = vperm.slane %v3517_v62, %v7268_v54 }
0x298c   :  { %v3538_v37 = vpop.permute.xlu2 %3537  ;;  %v3554_v47 = vperm.slane %v3514_v0, %v7263_v51  ;;  %v3561_v0 = vperm.slane %v3529_v45, %v7268_v54 }
0x298d   :  { %v3566_v19 = vperm.slane %v3538_v37, %v7263_v51 }
0x298e   :  { %v3556_v29 = vsel %vm549_vm10, %v3555_v5, %v3554_v47 }
0x298f   :  { %v3573_v8 = vsel %vm574_vm12, %v3556_v29, %v3572_v57 }
0x2992   :  { %v3526_v15 = vpop.permute.xlu1 %3525 }
0x2993   :  { %v3523_v38 = vpop.permute.xlu0 %3522  ;;  %v3560_v9 = vperm.slane %v3526_v15, %v7263_v51 }
0x2994   :  { %v3558_v20 = vperm.slane %v3523_v38, %v7268_v54  ;;  %v3547_v38 = vpop.permute.xlu2 %3546 }
0x2995   :  { %v3562_v4 = vsel %vm549_vm10, %v3561_v0, %v3560_v9  ;;  %v3570_v15 = vperm.slane %v3547_v38, %v7268_v54 }
0x2996   :  { %v3559_v32 = vsel %vm549_vm10, %v3558_v20, %v3557_v43 }
0x2997   :  { %v3574_v13 = vsel %vm576_vm13, %v3559_v32, %v3573_v8 }
0x299a   :  { %v3535_v6 = vpop.permute.xlu1 %3534 }
0x299b   :  { %v3532_v61 = vpop.permute.xlu0 %3531  ;;  %v3564_v62 = vperm.slane %v3535_v6, %v7268_v54 }
0x299c   :  { %v3563_v21 = vperm.slane %v3532_v61, %v7263_v51  ;;  %v3575_v61 = vsel %vm578_vm14, %v3562_v4, %v3574_v13 }
0x299e   :  { %v3565_v47 = vsel %vm549_vm10, %v3564_v62, %v3563_v21 }
0x299f   :  { %v3576_v52 = vsel %vm580_vm15, %v3565_v47, %v3575_v61 }
0x29a2   :  { %v3544_v5 = vpop.permute.xlu1 %3543 }
0x29a3   :  { %v3569_v6 = vperm.slane %v3544_v5, %v7263_v51  ;;  %v3541_v44 = vpop.permute.xlu0 %3540 }
0x29a4   :  { %v3567_v20 = vperm.slane %v3541_v44, %v7268_v54 }
0x29a5   :  { %v3571_v45 = vsel %vm549_vm10, %v3570_v15, %v3569_v6 }
0x29a6   :  { %v3568_v43 = vsel %vm549_vm10, %v3567_v20, %v3566_v19 }
0x29a7   :  { %v3577_v46 = vsel %vm582_vm2, %v3568_v43, %v3576_v52 }
0x29a8   :  { %v3578_v29 = vsel %vm584_vm3, %v3571_v45, %v3577_v46 }
0x29a9   :  { %v3580_v9 = vsel %vm587_vm4, %v3578_v29, 0.0 }
0x29aa   :  { %3581 = vadd.xlane.f32.xlu0 %v3580_v9 }
0x2a1d   :  { %v3582_v32 = vpop.xlane.xlu0 %3581 }
0x2a1e   :  { %6336 = vrcp.f32 %v3582_v32 }
0x2a24   :  { %v6337_v37 = vpop.eup %6336 }
0x2a25   :  { %v3584_v62 = vmul.f32 %v6337_v37, %v3582_v32 }
0x2a27   :  { %v3585_v21 = vsub.f32 2.0, %v3584_v62 }
0x2a29   :  { %v3586_v57 = vmul.f32 %v6337_v37, %v3585_v21 }
0x2a2b   :  { %v3593_v0 = vperm.slane %v3586_v57, 5  ;;  %v3588_v38 = vperm.slane %v3586_v57, 0  ;;  %v3595_v5 = vperm.slane %v3586_v57, 7  ;;  %v3589_v15 = vperm.slane %v3586_v57, 1 }
0x2a2c   :  { %v3590_v19 = vperm.slane %v3586_v57, 2  ;;  %v3594_v61 = vperm.slane %v3586_v57, 6 }
0x2a2d   :  { %v3614_v8 = vmul.f32 %v9053_v17, %v3593_v0  ;;  %v3605_v4 = vmul.f32 %v9014_v59, %v3588_v38  ;;  %v3604_v13 = vmul.f32 %v9017_v55, %v3588_v38  ;;  %v3619_v47 = vmul.f32 %v9070_v18, %v3595_v5 }
0x2a2e   :  { %v3607_v6 = vmul.f32 %v9030_v14, %v3589_v15  ;;  %v3606_v44 = vmul.f32 %v9012_v22, %v3589_v15  ;;  %v3609_v17 = vmul.f32 %v9025_v40, %v3590_v19  ;;  %v3608_v59 = vmul.f32 %v9027_v7, %v3590_v19 }
0x2a2f   :  { %3672 = vperm.xlu0 %6077, %v3614_v8   ;;  %3627 = vperm.xlu2 %6076, %v3605_v4   ;;  %v3591_v55 = vperm.slane %v3586_v57, 3  ;;  %v3592_v14 = vperm.slane %v3586_v57, 4  ;;  %v3616_v40 = vmul.f32 %v9066_v1, %v3594_v61  ;;  %v3615_v7 = vmul.f32 %v9051_v36, %v3593_v0 }
0x2a30   :  { %3622 = vperm.xlu1 %6075, %v3604_v13  }
0x2a31   :  { %v3611_v20 = vmul.f32 %v9041_v11, %v3591_v55  ;;  %v3610_v45 = vmul.f32 %v9044_v35, %v3591_v55  ;;  %v3613_v22 = vmul.f32 %v9056_v2, %v3592_v14  ;;  %v3612_v18 = vmul.f32 %v9039_v48, %v3592_v14 }
0x2a32   :  { %v3618_v11 = vmul.f32 %v9061_v10, %v3595_v5  ;;  %v3617_v35 = vmul.f32 %v9063_v63, %v3594_v61 }
0x2a37   :  { %3697 = vperm.xlu0 %6077, %v3619_v47   ;;  %3637 = vperm.xlu2 %6076, %v3607_v6  }
0x2a38   :  { %3632 = vperm.xlu1 %6075, %v3606_v44  }
0x2a3f   :  { %3647 = vperm.xlu2 %6076, %v3609_v17  }
0x2a40   :  { %3642 = vperm.xlu1 %6075, %v3608_v59  }
0x2a47   :  { %3657 = vperm.xlu2 %6076, %v3611_v20  }
0x2a48   :  { %3652 = vperm.xlu1 %6075, %v3610_v45  }
0x2a4f   :  { %3667 = vperm.xlu2 %6076, %v3613_v22  }
0x2a50   :  { %3662 = vperm.xlu1 %6075, %v3612_v18  }
0x2a57   :  { %3682 = vperm.xlu2 %6076, %v3616_v40  }
0x2a58   :  { %3677 = vperm.xlu1 %6075, %v3615_v7  }
0x2a5f   :  { %3692 = vperm.xlu2 %6076, %v3618_v11  }
0x2a60   :  { %3687 = vperm.xlu1 %6075, %v3617_v35  }
0x2a67   :  { %3832 = vrot.lane.b32.xlu2 %v8785_v42, %s6924_s21 }
0x2a68   :  { %3804 = vrot.lane.b32.xlu1 %v8826_v34, %s6924_s21 }
0x2a89   :  { %v3628_v48 = vpop.permute.xlu2 %3627 }
0x2a8a   :  { %v3701_v57 = vmul.f32 %v8834_v25, %v3628_v48 }
0x2a8c   :  { %v3717_v5 = vsel %vm150_vm0, %v3701_v57, 0.0 }
0x2a91   :  { %v3638_v2 = vpop.permute.xlu2 %3637 }
0x2a92   :  { %v3703_v42 = vmul.f32 %v8861_v3, %v3638_v2 }
0x2a99   :  { %v3648_v43 = vpop.permute.xlu2 %3647 }
0x2a9a   :  { %v3705_v21 = vmul.f32 %v8867_v16, %v3648_v43 }
0x2a9c   :  { %v3735_v16 = vsel %vm150_vm0, %v3705_v21, 0.0 }
0x2aa1   :  { %v3658_v52 = vpop.permute.xlu2 %3657  ;;  %v3673_v10 = vpop.permute.xlu0 %3672 }
0x2aa2   :  { %v3623_v1 = vpop.permute.xlu1 %3622  ;;  %v3707_v0 = vmul.f32 %v8876_v31, %v3658_v52  ;;  %v3710_v14 = vmul.f32 %v8897_v49, %v3673_v10 }
0x2aa3   :  { %v3700_v62 = vmul.f32 %v8840_v58, %v3623_v1 }
0x2aa5   :  { %v3716_v3 = vsel %vm150_vm0, %v3700_v62, 0.0 }
0x2aa6   :  { %v3718_v6 = vadd.f32 %v3717_v5, %v3716_v3 }
0x2aa8   :  { %v3719_v22 = vrot.slane %v3718_v6, 4 }
0x2aa9   :  { %v3668_v46 = vpop.permute.xlu2 %3667  ;;  %v3698_v13 = vpop.permute.xlu0 %3697 }
0x2aaa   :  { %v3633_v36 = vpop.permute.xlu1 %3632  ;;  %v3709_v8 = vmul.f32 %v8903_v24, %v3668_v46  ;;  %v3744_v24 = vsel %vm150_vm0, %v3707_v0, 0.0  ;;  %v3715_v59 = vmul.f32 %v8939_v60, %v3698_v13  ;;  %v3761_v60 = vsel %vm150_vm0, %v3710_v14, 0.0 }
0x2aab   :  { %v3702_v63 = vmul.f32 %v8848_v39, %v3633_v36  ;;  %v3720_v2 = vadd.f32 %v3719_v22, %v3718_v6 }
0x2aac   :  { %v3753_v44 = vsel %vm150_vm0, %v3709_v8, 0.0  ;;  %v3780_v61 = vsel %vm150_vm0, %v3715_v59, 0.0 }
0x2aad   :  { %v3725_v38 = vsel %vm150_vm0, %v3702_v63, 0.0 }
0x2ab1   :  { %v3683_v9 = vpop.permute.xlu2 %3682 }
0x2ab2   :  { %v3643_v29 = vpop.permute.xlu1 %3642  ;;  %v3712_v63 = vmul.f32 %v8924_v26, %v3683_v9 }
0x2ab3   :  { %v3704_v37 = vmul.f32 %v8855_v33, %v3643_v29  ;;  %v3726_v33 = vsel %vm150_vm0, %v3703_v42, 0.0 }
0x2ab4   :  { %v3727_v25 = vadd.f32 %v3726_v33, %v3725_v38 }
0x2ab5   :  { %v3734_v39 = vsel %vm150_vm0, %v3704_v37, 0.0 }
0x2ab6   :  { %v3736_v15 = vadd.f32 %v3735_v16, %v3734_v39  ;;  %v3728_v20 = vrot.slane %v3727_v25, 4  ;;  %v3770_v39 = vsel %vm150_vm0, %v3712_v63, 0.0 }
0x2ab8   :  { %v3737_v45 = vrot.slane %v3736_v15, 4  ;;  %v3729_v7 = vadd.f32 %v3728_v20, %v3727_v25 }
0x2ab9   :  { %v3693_v4 = vpop.permute.xlu2 %3692 }
0x2aba   :  { %v3653_v32 = vpop.permute.xlu1 %3652  ;;  %v3714_v47 = vmul.f32 %v8930_v56, %v3693_v4  ;;  %v3738_v48 = vadd.f32 %v3737_v45, %v3736_v15  ;;  %v3730_v49 = vrot.slane %v3729_v7, 2 }
0x2abb   :  { %v3706_v34 = vmul.f32 %v8882_v23, %v3653_v32  ;;  %v3721_v32 = vrot.slane %v3720_v2, 2 }
0x2abc   :  { %v3739_v29 = vrot.slane %v3738_v48, 2 }
0x2abd   :  { %v3743_v58 = vsel %vm150_vm0, %v3706_v34, 0.0  ;;  %v3731_v34 = vadd.f32 %v3730_v49, %v3729_v7  ;;  %v3722_v8 = vadd.f32 %v3721_v32, %v3720_v2  ;;  %v6660_v2 = vld [vmem:[#allocation10 + $0x38] sm:$0xff]  ;;  %v6665_v49 = vld [vmem:[#allocation10 + $0x10] sm:$0xff] }
0x2abe   :  { %v3745_v19 = vadd.f32 %v3744_v24, %v3743_v58  ;;  %v3740_v0 = vadd.f32 %v3739_v29, %v3738_v48  ;;  %v6667_v29 = vld [vmem:[#allocation10] sm:$0xff] }
0x2abf   :  { %v3723_v25 = vrot.slane %v3722_v8, 1 }
0x2ac0   :  { %v3746_v18 = vrot.slane %v3745_v19, 4  ;;  %v3741_v16 = vrot.slane %v3740_v0, 1 }
0x2ac1   :  { %v3833_v63 = vpop.permute.xlu2 %3832 }
0x2ac2   :  { %v3663_v23 = vpop.permute.xlu1 %3662  ;;  %v3747_v43 = vadd.f32 %v3746_v18, %v3745_v19  ;;  %v3742_v6 = vadd.f32 %v3741_v16, %v3740_v0  ;;  %v3724_v19 = vadd.f32 %v3723_v25, %v3722_v8 }
0x2ac3   :  { %v3708_v31 = vmul.f32 %v8888_v41, %v3663_v23  ;;  %v3779_v41 = vsel %vm150_vm0, %v3714_v47, 0.0  ;;  %v3732_v23 = vrot.slane %v3731_v34, 1 }
0x2ac4   :  { %v3781_v11 = vadd.f32 %v3780_v61, %v3779_v41  ;;  %v3748_v37 = vrot.slane %v3747_v43, 2 }
0x2ac5   :  { %v3752_v17 = vsel %vm150_vm0, %v3708_v31, 0.0 }
0x2ac6   :  { %v3754_v55 = vadd.f32 %v3753_v44, %v3752_v17  ;;  %v3782_v46 = vrot.slane %v3781_v11, 4  ;;  %v3749_v4 = vadd.f32 %v3748_v37, %v3747_v43  ;;  %v6661_v43 = vld [vmem:[#allocation10 + $0x30] sm:$0xff] }
0x2ac8   :  { %v3755_v56 = vrot.slane %v3754_v55, 4  ;;  %v3783_v21 = vadd.f32 %v3782_v46, %v3781_v11  ;;  %v3750_v31 = vrot.slane %v3749_v4, 1  ;;  %v6666_v46 = vld [vmem:[#allocation10 + $0x8] sm:$0xff] }
0x2aca   :  { %v3678_v40 = vpop.permute.xlu1 %3677  ;;  %v3756_v52 = vadd.f32 %v3755_v56, %v3754_v55  ;;  %v3784_v26 = vrot.slane %v3783_v21, 2  ;;  %v3751_v17 = vadd.f32 %v3750_v31, %v3749_v4 }
0x2acb   :  { %v3711_v35 = vmul.f32 %v8909_v28, %v3678_v40 }
0x2acc   :  { %v3757_v42 = vrot.slane %v3756_v52, 2  ;;  %v3785_v15 = vadd.f32 %v3784_v26, %v3783_v21  ;;  %v6672_v21 = vld [vmem:[%s10290_s7] ss:$0 sm:$0xff] }
0x2acd   :  { %v3762_v1 = vsel %vm150_vm0, %v3711_v35, 0.0 }
0x2ace   :  { %v3763_v36 = vadd.f32 %v3762_v1, %v3761_v60  ;;  %v3758_v3 = vadd.f32 %v3757_v42, %v3756_v52  ;;  %v3786_v45 = vrot.slane %v3785_v15, 1  ;;  %v6662_v1 = vld [vmem:[#allocation10 + $0x28] sm:$0xff]  ;;  %v6663_v52 = vld [vmem:[#allocation10 + $0x20] sm:$0xff]  ;;  %v6668_v42 = vld [vmem:[#allocation11 + $0x18] sm:$0xff] }
0x2ad0   :  { %v3764_v10 = vrot.slane %v3763_v36, 4  ;;  %v3759_v5 = vrot.slane %v3758_v3, 1  ;;  %v3787_v40 = vadd.f32 %v3786_v45, %v3785_v15  ;;  %v6676_v45 = vld [vmem:[%s10294_s11 + $0x20] sm:$0xff] }
0x2ad2   :  { %v3765_v62 = vadd.f32 %v3764_v10, %v3763_v36  ;;  %v3688_v28 = vpop.permute.xlu1 %3687  ;;  %v3760_v59 = vadd.f32 %v3759_v5, %v3758_v3  ;;  %v6664_v36 = vld [vmem:[#allocation10 + $0x18] sm:$0xff] }
0x2ad3   :  { %v3713_v57 = vmul.f32 %v8918_v50, %v3688_v28  ;;  %v3733_v50 = vadd.f32 %v3732_v23, %v3731_v34  ;;  %v6670_v28 = vld [vmem:[#allocation11 + $0x8] sm:$0xff]  ;;  %v6671_v34 = vld [vmem:[#allocation11] sm:$0xff] }
0x2ad4   :  { %v3766_v38 = vrot.slane %v3765_v62, 2 }
0x2ad5   :  { %v3771_v33 = vsel %vm150_vm0, %v3713_v57, 0.0  ;;  %v3796_v20 = vsel %vm572_vm11, %v3733_v50, %v3724_v19  ;;  %v208_v57 = vadd.f32 %v6672_v21, %v8410_v27 }
0x2ad6   :  { %v3772_v58 = vadd.f32 %v3771_v33, %v3770_v39  ;;  %v3767_v9 = vadd.f32 %v3766_v38, %v3765_v62  ;;  %v3797_v14 = vsel %vm574_vm12, %v3742_v6, %v3796_v20  ;;  %v6669_v62 = vld [vmem:[#allocation11 + $0x10] sm:$0xff]  ;;  %v6675_v20 = vld [vmem:[%s10294_s11 + $0x28] sm:$0xff] }
0x2ad7   :  { %v3798_v18 = vsel %vm576_vm13, %v3751_v17, %v3797_v14  ;;  %v6678_v14 = vld [vmem:[%s10294_s11 + $0x10] sm:$0xff] }
0x2ad8   :  { %v3773_v13 = vrot.slane %v3772_v58, 4  ;;  %v3768_v47 = vrot.slane %v3767_v9, 1  ;;  %v3799_v56 = vsel %vm578_vm14, %v3760_v59, %v3798_v18  ;;  %v6680_v18 = vld [vmem:[%s10294_s11] sm:$0xff] }
0x2ada   :  { %v3774_v24 = vadd.f32 %v3773_v13, %v3772_v58  ;;  %v3769_v41 = vadd.f32 %v3768_v47, %v3767_v9  ;;  %v9164_v48 = vpop.permute.xlu1 %3804 }
0x2adc   :  { %v3775_v44 = vrot.slane %v3774_v24, 2  ;;  %v3800_v7 = vsel %vm580_vm15, %v3769_v41, %v3799_v56  ;;  %v6677_v41 = vld [vmem:[%s10294_s11 + $0x18] sm:$0xff]  ;;  %v6681_v56 = vld [vmem:[%s10292_s9] ss:$0 sm:$0xff] }
0x2ade   :  { %v3776_v55 = vadd.f32 %v3775_v44, %v3774_v24 }
0x2ae0   :  { %v3777_v22 = vrot.slane %v3776_v55, 1 }
0x2ae2   :  { %v3778_v61 = vadd.f32 %v3777_v22, %v3776_v55  ;;  %v6674_v55 = vld [vmem:[%s10294_s11 + $0x30] sm:$0xff]  ;;  %v6679_v22 = vld [vmem:[%s10294_s11 + $0x8] sm:$0xff] }
0x2ae4   :  { %v3801_v11 = vsel %vm582_vm2, %v3778_v61, %v3800_v7 }
0x2ae5   :  { %v3802_v35 = vsel %vm584_vm3, %v3787_v40, %v3801_v11 }
0x2ae6   :  { %v3807_v60 = vsel %vm150_vm0, %v3802_v35, %v9164_v48 }
0x2ae7   :  { %6043 = vmatmul.msk.f32.vlgmr.msrb.gmra.mxu0 %vm273_vm1, %v3807_v60 }
0x2ae8   :  { %5327 = vmatpush.msrb.mxu0 %v6660_v2 }
0x2aea   :  { %5328 = vmatpush.msrb.mxu0 %v6661_v43 }
0x2aec   :  { %5329 = vmatpush.msrb.mxu0 %v6662_v1 }
0x2aee   :  { %5330 = vmatpush.msrb.mxu0 %v6663_v52 }
0x2af0   :  { %5331 = vmatpush.msrb.mxu0 %v6664_v36 }
0x2af2   :  { %5332 = vmatpush.msrb.mxu0 %v6665_v49 }
0x2af4   :  { %5333 = vmatpush.msrb.mxu0 %v6666_v46 }
0x2af6   :  { %5334 = vmatpush.msrb.mxu0 %v6667_v29 }
0x2b64   :  { %v3828_v10 = vpop.f32.mrf.mxu0 }
0x2b65   :  { %6338 = vtanh.f32 %v3828_v10 }
0x2b6b   :  { %v9169_v32 = vpop.eup %6338 }
0x2b6c   :  { %v3835_v37 = vsel %vm150_vm0, %v9169_v32, %v3833_v63 }
0x2b6d   :  { %6044 = vmatmul.msk.f32.vlgmr.msrb.gmra.mxu1 %vm273_vm1, %v3835_v37 }
0x2b6e   :  { %5393 = vmatpush.msrb.mxu1 %v6668_v42 }
0x2b70   :  { %5394 = vmatpush.msrb.mxu1 %v6669_v62 }
0x2b72   :  { %5395 = vmatpush.msrb.mxu1 %v6670_v28 }
0x2b74   :  { %5396 = vmatpush.msrb.mxu1 %v6671_v34 }
0x2bea   :  { %v3856_v0 = vpop.f32.mrf.mxu1 }
0x2beb   :  { %v3859_v38 = vadd.f32 %v3856_v0, %v208_v57 }
0x2bed   :  { %6340 = vtanh.f32 %v3859_v38  ;;  %v6045_v39 = vmul.f32 -1.442695, %v3859_v38  ;;  %v6682_v38 = vld [vmem:[#allocation8 + $0x38] sm:$0xff] }
0x2bef   :  { %6342 = vpow2.f32 %v6045_v39  ;;  %v6685_v39 = vld [vmem:[#allocation8 + $0x20] sm:$0xff] }
0x2bf3   :  { %v6341_v8 = vpop.eup %6340 }
0x2bf4   :  { %3882 = vrot.lane.b32.xlu0 %v6341_v8, %s6924_s21  ;;  %v6684_v8 = vld [vmem:[#allocation8 + $0x28] sm:$0xff] }
0x2bf5   :  { %v6343_v4 = vpop.eup %6342 }
0x2bf6   :  { %v3863_v33 = vadd.f32 1.0, %v6343_v4  ;;  %v6686_v4 = vld [vmem:[#allocation8 + $0x18] sm:$0xff] }
0x2bf8   :  { %6344 = vrcp.f32 %v3863_v33  ;;  %v3875_v16 = vand.u32 2147483648, %v3863_v33  ;;  %vm3869_vm8 = vweird.f32 %v3863_v33  ;;  %v3873_v27 = vand.u32 2147483647, %v3863_v33 }
0x2bfa   :  { %v3876_v25 = vor.u32 1.1754944e-38, %v3875_v16  ;;  %vm3874_vm5 = vcmp.eq.f32.partialorder %v3873_v27, 8.507059e+37  ;;  %v9234_v27 = vld [vmem:[%s10284_s1 + $0x8] sm:$0xff] }
0x2bfe   :  { %v6345_v3 = vpop.eup %6344 }
0x2bff   :  { %v3865_v58 = vmul.f32 %v6345_v3, %v3863_v33  ;;  %vm3870_vm7 = vweird.f32 %v6345_v3  ;;  %v6687_v33 = vld [vmem:[#allocation8 + $0x10] sm:$0xff] }
0x2c00   :  { %vm3871_vm9 = vmor %vm3869_vm8, %vm3870_vm7 }
0x2c01   :  { %v3866_v23 = vsub.f32 1.0, %v3865_v58  ;;  %v6689_v58 = vld [vmem:[#allocation8] sm:$0xff] }
0x2c03   :  { %v3867_v26 = vmul.f32 %v6345_v3, %v3866_v23 }
0x2c05   :  { %v3868_v9 = vadd.f32 %v6345_v3, %v3867_v26 }
0x2c07   :  { %v3872_v13 = vsel %vm3871_vm9, %v6345_v3, %v3868_v9  ;;  %v6688_v3 = vld [vmem:[#allocation8 + $0x8] sm:$0xff] }
0x2c08   :  { %v3877_v5 = vsel %vm3874_vm5, %v3876_v25, %v3872_v13  ;;  %v9240_v25 = vld [vmem:[%s10284_s1] sm:$0xff] }
0x2c09   :  { %v3880_v50 = vmul.f32 %v3877_v5, %v8781_v30  ;;  %v6673_v30 = vld [vmem:[%s10294_s11 + $0x38] sm:$0xff] }
0x2c66   :  { %v3883_v31 = vpop.permute.xlu0 %3882 }
0x2c67   :  { %v3885_v24 = vmul.f32 %v3883_v31, %v3877_v5 }
0x2c69   :  { %3887 = vrot.lane.b32.xlu1 %v3885_v24, %s6923_s8 }
0x2cdb   :  { %v3888_v15 = vpop.permute.xlu1 %3887 }
0x2cdc   :  { %v9181_v47 = vadd.f32 %v3888_v15, %v3880_v50 }
0x2cde   :  { %6346 = vtanh.f32 %v9181_v47 }
0x2ce4   :  { %v6347_v6 = vpop.eup %6346 }
0x2ce5   :  { %3893 = vrot.lane.b32.xlu2 %v6347_v6, %s6924_s21  ;;  %v9248_v6 = vld [vmem:[%s10284_s1 + $0x10] sm:$0xff] }
0x2d3f   :  { %v3894_v44 = vpop.permute.xlu2 %3893 }
0x2d40   :  { %v9185_v19 = vmul.f32 %v3894_v44, %v3877_v5 }
0x2d42   :  { %3898 = vrot.lane.b32.xlu0 %v9185_v19, %s6923_s8 }
0x2db4   :  { %v3899_v17 = vpop.permute.xlu0 %3898 }
0x2db5   :  { %v3901_v59 = vsel %vm150_vm0, %v3899_v17, %v9164_v48 }
0x2db6   :  { %6046 = vmatmul.msk.f32.vlgmr.msra.gmra.mxu2 %vm273_vm1, %v3901_v59 }
0x2db7   :  { %5233 = vmatpush.msra.mxu2 %v6673_v30 }
0x2db9   :  { %5234 = vmatpush.msra.mxu2 %v6674_v55  ;;  %v9255_v55 = vld [vmem:[%s10284_s1 + $0x20] sm:$0xff] }
0x2dbb   :  { %5235 = vmatpush.msra.mxu2 %v6675_v20 }
0x2dbd   :  { %5236 = vmatpush.msra.mxu2 %v6676_v45  ;;  %v9261_v45 = vld [vmem:[%s10284_s1 + $0x18] sm:$0xff] }
0x2dbf   :  { %5237 = vmatpush.msra.mxu2 %v6677_v41 }
0x2dc1   :  { %5238 = vmatpush.msra.mxu2 %v6678_v14  ;;  %v9267_v14 = vld [vmem:[%s10284_s1 + $0x30] sm:$0xff] }
0x2dc3   :  { %5239 = vmatpush.msra.mxu2 %v6679_v22 }
0x2dc5   :  { %5240 = vmatpush.msra.mxu2 %v6680_v18 }
0x2e39   :  { %v3922_v61 = vpop.f32.mrf.mxu2 }
0x2e3a   :  { %v3923_v40 = vadd.f32 %v6681_v56, %v3922_v61 }
0x2e3c   :  { %6348 = vtanh.f32 %v3923_v40  ;;  %v6047_v11 = vmul.f32 -1.442695, %v3923_v40 }
0x2e3e   :  { %6350 = vpow2.f32 %v6047_v11  ;;  %v9276_v11 = vld [vmem:[%s10284_s1 + $0x38] sm:$0xff] }
0x2e42   :  { %v6349_v7 = vpop.eup %6348 }
0x2e43   :  { %3947 = vrot.lane.b32.xlu1 %v6349_v7, %s6924_s21 }
0x2e44   :  { %v6351_v35 = vpop.eup %6350 }
0x2e45   :  { %v3928_v48 = vadd.f32 1.0, %v6351_v35 }
0x2e47   :  { %6352 = vrcp.f32 %v3928_v48  ;;  %v3940_v36 = vand.u32 2147483648, %v3928_v48  ;;  %vm3934_vm7 = vweird.f32 %v3928_v48  ;;  %v3938_v49 = vand.u32 2147483647, %v3928_v48 }
0x2e49   :  { %v3941_v29 = vor.u32 1.1754944e-38, %v3940_v36  ;;  %vm3939_vm9 = vcmp.eq.f32.partialorder %v3938_v49, 8.507059e+37 }
0x2e4d   :  { %v6353_v60 = vpop.eup %6352 }
0x2e4e   :  { %v3930_v2 = vmul.f32 %v6353_v60, %v3928_v48  ;;  %vm3935_vm6 = vweird.f32 %v6353_v60  ;;  %v9282_v48 = vld [vmem:[%s10284_s1 + $0x28] sm:$0xff] }
0x2e4f   :  { %vm3936_vm8 = vmor %vm3934_vm7, %vm3935_vm6 }
0x2e50   :  { %v3931_v43 = vsub.f32 1.0, %v3930_v2 }
0x2e52   :  { %v3932_v1 = vmul.f32 %v6353_v60, %v3931_v43  ;;  %v9288_v43 = vld [vmem:[%s10284_s1 + $0x48] sm:$0xff] }
0x2e54   :  { %v3933_v52 = vadd.f32 %v6353_v60, %v3932_v1 }
0x2e56   :  { %v3937_v46 = vsel %vm3936_vm8, %v6353_v60, %v3933_v52 }
0x2e57   :  { %v3942_v63 = vsel %vm3939_vm9, %v3941_v29, %v3937_v46 }
0x2e58   :  { %v3945_v42 = vmul.f32 %v3942_v63, %v8822_v53  ;;  %v6683_v53 = vld [vmem:[#allocation8 + $0x30] sm:$0xff] }
0x2eb5   :  { %v3948_v10 = vpop.permute.xlu1 %3947 }
0x2eb6   :  { %v3950_v37 = vmul.f32 %v3948_v10, %v3942_v63 }
0x2eb8   :  { %3952 = vrot.lane.b32.xlu2 %v3950_v37, %s6923_s8 }
0x2f12   :  { %v3953_v62 = vpop.permute.xlu2 %3952 }
0x2f13   :  { %v9222_v28 = vadd.f32 %v3953_v62, %v3945_v42  ;;  %v9303_v42 = vld [vmem:[%s10284_s1 + $0x40] sm:$0xff] }
0x2f15   :  { %6354 = vtanh.f32 %v9222_v28 }
0x2f1b   :  { %v6355_v34 = vpop.eup %6354 }
0x2f1c   :  { %3958 = vrot.lane.b32.xlu0 %v6355_v34, %s6924_s21  ;;  %v9309_v34 = vld [vmem:[%s10284_s1 + $0x60] sm:$0xff] }
0x2f8e   :  { %v3959_v21 = vpop.permute.xlu0 %3958 }
0x2f8f   :  { %v9226_v57 = vmul.f32 %v3959_v21, %v3942_v63  ;;  %v9297_v63 = vld [vmem:[%s10284_s1 + $0x50] sm:$0xff] }
0x2f91   :  { %3963 = vrot.lane.b32.xlu1 %v9226_v57, %s6923_s8 }
0x3003   :  { %v3964_v0 = vpop.permute.xlu1 %3963 }
0x3004   :  { %6048 = vmatmul.msk.f32.vlgmr.msra.gmra.mxu3 %vm150_vm0, %v3964_v0 }
0x3005   :  { %5261 = vmatpush.msra.mxu3 %v6682_v38 }
0x3007   :  { %5262 = vmatpush.msra.mxu3 %v6683_v53 }
0x3009   :  { %5263 = vmatpush.msra.mxu3 %v6684_v8 }
0x300b   :  { %5264 = vmatpush.msra.mxu3 %v6685_v39 }
0x300d   :  { %5265 = vmatpush.msra.mxu3 %v6686_v4  ;;  %v9318_v4 = vld [vmem:[%s10284_s1 + $0x68] sm:$0xff] }
0x300f   :  { %5266 = vmatpush.msra.mxu3 %v6687_v33 }
0x3011   :  { %5267 = vmatpush.msra.mxu3 %v6688_v3  ;;  %v9324_v3 = vld [vmem:[%s10284_s1 + $0x58] sm:$0xff] }
0x3013   :  { %5268 = vmatpush.msra.mxu3 %v6689_v58 }
0x3087   :  { %v3984_v23 = vpop.f32.mrf.mxu3 }
0x3088   :  { %v3995_v26 = vperm.slane %v3984_v23, 0  ;;  %v3988_v9 = vrot.slane %v3984_v23, 1  ;;  %v3989_v16 = vrot.slane %v3984_v23, 2  ;;  %v3990_v24 = vrot.slane %v3984_v23, 3 }
0x3089   :  { %v3991_v18 = vrot.slane %v3984_v23, 4  ;;  %v3992_v2 = vrot.slane %v3984_v23, 5  ;;  %v3993_v52 = vrot.slane %v3984_v23, 6  ;;  %v3994_v0 = vrot.slane %v3984_v23, 7  ;;  %v9330_v23 = vld [vmem:[%s10284_s1 + $0x78] sm:$0xff] }
0x308a   :  { %v4012_v13 = vmul.f32 %v9234_v27, %v3995_v26  ;;  %v4011_v31 = vmul.f32 %v9240_v25, %v3995_v26  ;;  %v3996_v5 = vperm.slane %v3988_v9, 0  ;;  %v3997_v17 = vperm.slane %v3989_v16, 0 }
0x308b   :  { %v3998_v30 = vperm.slane %v3990_v24, 0  ;;  %v3999_v7 = vperm.slane %v3991_v18, 0  ;;  %v4000_v46 = vperm.slane %v3992_v2, 0  ;;  %v4001_v10 = vperm.slane %v3993_v52, 0 }
0x308c   :  { %v4030_v50 = vsel %vm150_vm0, %v4012_v13, 0.0  ;;  %v4027_v15 = vsel %vm150_vm0, %v4011_v31, 0.0  ;;  %v4013_v44 = vmul.f32 %v9248_v6, %v3996_v5  ;;  %v4015_v20 = vmul.f32 %v9255_v55, %v3997_v17  ;;  %v9339_v31 = vld [vmem:[%s10284_s1 + $0x70] sm:$0xff] }
0x308d   :  { %4031 = vadd.xlane.f32.xlu0 %v4030_v50  ;;  %4028 = vadd.xlane.f32.xlu2 %v4027_v15  ;;  %v4014_v41 = vmul.f32 %v9261_v45, %v3996_v5  ;;  %v4017_v22 = vmul.f32 %v9267_v14, %v3998_v30  ;;  %v4018_v35 = vmul.f32 %v9276_v11, %v3998_v30  ;;  %v4002_v39 = vperm.slane %v3994_v0, 0 }
0x308e   :  { %v4033_v59 = vsel %vm150_vm0, %v4013_v44, 0.0  ;;  %v4039_v61 = vsel %vm150_vm0, %v4015_v20, 0.0  ;;  %v4016_v60 = vmul.f32 %v9282_v48, %v3997_v17  ;;  %v4020_v1 = vmul.f32 %v9288_v43, %v3999_v7 }
0x308f   :  { %4034 = vadd.xlane.f32.xlu1 %v4033_v59  ;;  %v4036_v56 = vsel %vm150_vm0, %v4014_v41, 0.0  ;;  %v4045_v40 = vsel %vm150_vm0, %v4017_v22, 0.0  ;;  %v4048_v36 = vsel %vm150_vm0, %v4018_v35, 0.0  ;;  %v4021_v37 = vmul.f32 %v9297_v63, %v4000_v46 }
0x3090   :  { %v4042_v49 = vsel %vm150_vm0, %v4016_v60, 0.0  ;;  %v4054_v29 = vsel %vm150_vm0, %v4020_v1, 0.0  ;;  %v4019_v62 = vmul.f32 %v9303_v42, %v3999_v7  ;;  %v4023_v21 = vmul.f32 %v9309_v34, %v4001_v10 }
0x3091   :  { %v4057_v38 = vsel %vm150_vm0, %v4021_v37, 0.0  ;;  %v4024_v33 = vmul.f32 %v9318_v4, %v4001_v10  ;;  %v4022_v58 = vmul.f32 %v9324_v3, %v4000_v46  ;;  %v4026_v26 = vmul.f32 %v9330_v23, %v4002_v39 }
0x3092   :  { %v4051_v53 = vsel %vm150_vm0, %v4019_v62, 0.0  ;;  %v4063_v8 = vsel %vm150_vm0, %v4023_v21, 0.0  ;;  %v4025_v5 = vmul.f32 %v9339_v31, %v4002_v39 }
0x3093   :  { %v4066_v9 = vsel %vm150_vm0, %v4024_v33, 0.0  ;;  %v4060_v16 = vsel %vm150_vm0, %v4022_v58, 0.0  ;;  %v4072_v13 = vsel %vm150_vm0, %v4026_v26, 0.0 }
0x3094   :  { %v4069_v24 = vsel %vm150_vm0, %v4025_v5, 0.0 }
0x3095   :  { %4040 = vadd.xlane.f32.xlu0 %v4039_v61  ;;  %4037 = vadd.xlane.f32.xlu2 %v4036_v56 }
0x3097   :  { %4046 = vadd.xlane.f32.xlu1 %v4045_v40 }
0x309d   :  { %4049 = vadd.xlane.f32.xlu0 %v4048_v36  ;;  %4043 = vadd.xlane.f32.xlu2 %v4042_v49 }
0x309f   :  { %4055 = vadd.xlane.f32.xlu1 %v4054_v29 }
0x30a5   :  { %4058 = vadd.xlane.f32.xlu0 %v4057_v38  ;;  %4052 = vadd.xlane.f32.xlu2 %v4051_v53 }
0x30a7   :  { %4064 = vadd.xlane.f32.xlu1 %v4063_v8 }
0x30ad   :  { %4067 = vadd.xlane.f32.xlu0 %v4066_v9  ;;  %4061 = vadd.xlane.f32.xlu2 %v4060_v16 }
0x30af   :  { %4073 = vadd.xlane.f32.xlu1 %v4072_v13 }
0x30b5   :  { %4070 = vadd.xlane.f32.xlu2 %v4069_v24 }
0x3100   :  { %v4032_v50 = vpop.xlane.xlu0 %4031  ;;  %v4029_v15 = vpop.xlane.xlu2 %4028 }
0x3101   :  { %v4092_v35 = vperm.slane %v4032_v50, %v7268_v54  ;;  %v4091_v60 = vperm.slane %v4029_v15, %v7263_v51 }
0x3102   :  { %v4035_v44 = vpop.xlane.xlu1 %4034 }
0x3103   :  { %v4094_v2 = vperm.slane %v4035_v44, %v7263_v51  ;;  %v4093_v10 = vsel %vm549_vm10, %v4092_v35, %v4091_v60 }
0x3108   :  { %v4041_v17 = vpop.xlane.xlu0 %4040  ;;  %v4038_v59 = vpop.xlane.xlu2 %4037 }
0x3109   :  { %v4095_v56 = vperm.slane %v4038_v59, %v7268_v54  ;;  %v4097_v1 = vperm.slane %v4041_v17, %v7263_v51 }
0x310a   :  { %v9343_v30 = vpop.xlane.xlu1 %4046 }
0x310b   :  { %v4096_v52 = vsel %vm549_vm10, %v4095_v56, %v4094_v2  ;;  %v4100_v37 = vperm.slane %v9343_v30, %v7263_v51 }
0x310c   :  { %v4115_v0 = vsel %vm572_vm11, %v4096_v52, %v4093_v10 }
0x3110   :  { %v9345_v20 = vpop.xlane.xlu0 %4049  ;;  %v4044_v41 = vpop.xlane.xlu2 %4043 }
0x3111   :  { %v4098_v40 = vperm.slane %v4044_v41, %v7268_v54  ;;  %v4101_v36 = vperm.slane %v9345_v20, %v7268_v54 }
0x3112   :  { %v9347_v22 = vpop.xlane.xlu1 %4055 }
0x3113   :  { %v4099_v49 = vsel %vm549_vm10, %v4098_v40, %v4097_v1  ;;  %v4104_v38 = vperm.slane %v9347_v22, %v7268_v54  ;;  %v4102_v53 = vsel %vm549_vm10, %v4101_v36, %v4100_v37 }
0x3114   :  { %v4116_v8 = vsel %vm574_vm12, %v4099_v49, %v4115_v0 }
0x3115   :  { %v4117_v13 = vsel %vm576_vm13, %v4102_v53, %v4116_v8 }
0x3118   :  { %v9349_v18 = vpop.xlane.xlu0 %4058  ;;  %v9351_v61 = vpop.xlane.xlu2 %4052 }
0x3119   :  { %v4103_v46 = vperm.slane %v9351_v61, %v7263_v51  ;;  %v4106_v39 = vperm.slane %v9349_v18, %v7263_v51 }
0x311a   :  { %v9355_v7 = vpop.xlane.xlu1 %4064 }
0x311b   :  { %v4105_v33 = vsel %vm549_vm10, %v4104_v38, %v4103_v46  ;;  %v4109_v9 = vperm.slane %v9355_v7, %v7263_v51 }
0x311c   :  { %v4118_v5 = vsel %vm578_vm14, %v4105_v33, %v4117_v13 }
0x3120   :  { %v9367_v29 = vpop.xlane.xlu2 %4061  ;;  %v9372_v62 = vpop.xlane.xlu0 %4067 }
0x3121   :  { %v4107_v21 = vperm.slane %v9367_v29, %v7268_v54  ;;  %v4110_v58 = vperm.slane %v9372_v62, %v7268_v54 }
0x3122   :  { %v9389_v16 = vpop.xlane.xlu1 %4073 }
0x3123   :  { %v4108_v26 = vsel %vm549_vm10, %v4107_v21, %v4106_v39  ;;  %v4111_v56 = vsel %vm549_vm10, %v4110_v58, %v4109_v9  ;;  %v4113_v35 = vperm.slane %v9389_v16, %v7268_v54 }
0x3124   :  { %v4119_v40 = vsel %vm580_vm15, %v4108_v26, %v4118_v5 }
0x3125   :  { %v4120_v1 = vsel %vm582_vm2, %v4111_v56, %v4119_v40 }
0x3128   :  { %v9393_v24 = vpop.xlane.xlu2 %4070 }
0x3129   :  { %v4112_v60 = vperm.slane %v9393_v24, %v7263_v51 }
0x312b   :  { %v4114_v2 = vsel %vm549_vm10, %v4113_v35, %v4112_v60 }
0x312c   :  { %v4121_v52 = vsel %vm584_vm3, %v4114_v2, %v4120_v1 }
0x312d   :  { %v4123_v36 = vsel %vm587_vm4, %v4121_v52, -inf }
0x312e   :  { %4124 = vmax.xlane.f32.xlu0 %v4123_v36 }
0x31a1   :  { %v9405_v49 = vpop.xlane.xlu0 %4124 }
0x31a2   :  { %v4127_v46 = vperm.slane %v9405_v49, 0  ;;  %v4128_v10 = vperm.slane %v9405_v49, 1  ;;  %v4129_v38 = vperm.slane %v9405_v49, 2  ;;  %v4131_v9 = vperm.slane %v9405_v49, 4 }
0x31a3   :  { %v4130_v5 = vperm.slane %v9405_v49, 3  ;;  %v4132_v35 = vperm.slane %v9405_v49, 5 }
0x31a4   :  { %v4143_v37 = vsub.f32 %v4029_v15, %v4127_v46  ;;  %v4144_v21 = vsub.f32 %v4032_v50, %v4127_v46  ;;  %v4145_v0 = vsub.f32 %v4035_v44, %v4128_v10  ;;  %v4148_v33 = vsub.f32 %v4044_v41, %v4129_v38 }
0x31a5   :  { %v4147_v58 = vsub.f32 %v4041_v17, %v4129_v38  ;;  %v4146_v26 = vsub.f32 %v4038_v59, %v4128_v10  ;;  %v4151_v17 = vsub.f32 %v9351_v61, %v4131_v9  ;;  %v4150_v59 = vsub.f32 %v9345_v20, %v4130_v5 }
0x31a6   :  { %v4159_v53 = vmul.f32 1.442695, %v4143_v37  ;;  %v4161_v8 = vmul.f32 1.442695, %v4144_v21  ;;  %v4163_v39 = vmul.f32 1.442695, %v4145_v0  ;;  %v4149_v41 = vsub.f32 %v9343_v30, %v4130_v5 }
0x31a7   :  { %v4169_v13 = vmul.f32 1.442695, %v4148_v33  ;;  %v4167_v56 = vmul.f32 1.442695, %v4147_v58  ;;  %v4165_v50 = vmul.f32 1.442695, %v4146_v26  ;;  %v4154_v20 = vsub.f32 %v9367_v29, %v4132_v35 }
0x31a8   :  { %6356 = vpow2.f32 %v4163_v39  ;;  %v4175_v60 = vmul.f32 1.442695, %v4151_v17  ;;  %v4173_v2 = vmul.f32 1.442695, %v4150_v59  ;;  %v4171_v52 = vmul.f32 1.442695, %v4149_v41 }
0x31a9   :  { %6358 = vpow2.f32 %v4161_v8  ;;  %v4153_v30 = vsub.f32 %v9349_v18, %v4132_v35  ;;  %v4152_v46 = vsub.f32 %v9347_v22, %v4131_v9  ;;  %v4134_v10 = vperm.slane %v9405_v49, 7 }
0x31aa   :  { %6360 = vpow2.f32 %v4159_v53  ;;  %v4181_v37 = vmul.f32 1.442695, %v4154_v20  ;;  %v4133_v21 = vperm.slane %v9405_v49, 6 }
0x31ab   :  { %6362 = vpow2.f32 %v4169_v13  ;;  %v4179_v0 = vmul.f32 1.442695, %v4153_v30  ;;  %v4177_v29 = vmul.f32 1.442695, %v4152_v46  ;;  %v4157_v8 = vsub.f32 %v9393_v24, %v4134_v10 }
0x31ac   :  { %6364 = vpow2.f32 %v4167_v56  ;;  %v4156_v22 = vsub.f32 %v9372_v62, %v4133_v21  ;;  %v4155_v49 = vsub.f32 %v9355_v7, %v4133_v21  ;;  %v4158_v7 = vsub.f32 %v9389_v16, %v4134_v10 }
0x31ad   :  { %6366 = vpow2.f32 %v4165_v50  ;;  %v4187_v39 = vmul.f32 1.442695, %v4157_v8 }
0x31ae   :  { %v9412_v15 = vpop.eup %6356  ;;  %6368 = vpow2.f32 %v4175_v60  ;;  %v4185_v33 = vmul.f32 1.442695, %v4156_v22  ;;  %v4183_v26 = vmul.f32 1.442695, %v4155_v49  ;;  %v4189_v13 = vmul.f32 1.442695, %v4158_v7 }
0x31af   :  { %v9414_v44 = vpop.eup %6358  ;;  %4214 = vperm.xlu0 %6077, %v9412_v15   ;;  %6370 = vpow2.f32 %v4173_v2 }
0x31b0   :  { %v9417_v40 = vpop.eup %6360  ;;  %4211 = vperm.xlu1 %6075, %v9414_v44   ;;  %6372 = vpow2.f32 %v4171_v52 }
0x31b1   :  { %4208 = vperm.xlu2 %6076, %v9417_v40   ;;  %v9425_v1 = vpop.eup %6362  ;;  %6374 = vpow2.f32 %v4181_v37 }
0x31b2   :  { %v9427_v36 = vpop.eup %6364  ;;  %6376 = vpow2.f32 %v4179_v0 }
0x31b3   :  { %v9430_v61 = vpop.eup %6366  ;;  %6378 = vpow2.f32 %v4177_v29 }
0x31b4   :  { %v9439_v38 = vpop.eup %6368  ;;  %6380 = vpow2.f32 %v4187_v39 }
0x31b5   :  { %v9441_v53 = vpop.eup %6370  ;;  %6382 = vpow2.f32 %v4185_v33 }
0x31b6   :  { %v9444_v18 = vpop.eup %6372  ;;  %6384 = vpow2.f32 %v4183_v26 }
0x31b7   :  { %4223 = vperm.xlu0 %6077, %v9425_v1   ;;  %v9451_v58 = vpop.eup %6374  ;;  %6386 = vpow2.f32 %v4189_v13 }
0x31b8   :  { %4220 = vperm.xlu1 %6075, %v9427_v36   ;;  %v9453_v9 = vpop.eup %6376 }
0x31b9   :  { %4217 = vperm.xlu2 %6076, %v9430_v61   ;;  %v9456_v24 = vpop.eup %6378 }
0x31ba   :  { %v9461_v62 = vpop.eup %6380 }
0x31bb   :  { %v9463_v5 = vpop.eup %6382 }
0x31bc   :  { %v9466_v56 = vpop.eup %6384 }
0x31bd   :  { %v9470_v50 = vpop.eup %6386 }
0x31bf   :  { %4232 = vperm.xlu0 %6077, %v9439_v38  }
0x31c0   :  { %4229 = vperm.xlu1 %6075, %v9441_v53  }
0x31c1   :  { %4226 = vperm.xlu2 %6076, %v9444_v18  }
0x31c7   :  { %4241 = vperm.xlu0 %6077, %v9451_v58  }
0x31c8   :  { %4238 = vperm.xlu1 %6075, %v9453_v9  }
0x31c9   :  { %4235 = vperm.xlu2 %6076, %v9456_v24  }
0x31cf   :  { %4250 = vperm.xlu0 %6077, %v9461_v62  }
0x31d0   :  { %4247 = vperm.xlu1 %6075, %v9463_v5  }
0x31d1   :  { %4244 = vperm.xlu2 %6076, %v9466_v56  }
0x31d9   :  { %4253 = vperm.xlu2 %6076, %v9470_v50  }
0x320b   :  { %v4209_v16 = vpop.permute.xlu2 %4208 }
0x320c   :  { %v4255_v8 = vperm.slane %v4209_v16, %v7263_v51 }
0x3213   :  { %v4218_v17 = vpop.permute.xlu2 %4217 }
0x3214   :  { %v4259_v22 = vperm.slane %v4218_v17, %v7268_v54 }
0x321b   :  { %v4227_v59 = vpop.permute.xlu2 %4226 }
0x321c   :  { %v4264_v33 = vperm.slane %v4227_v59, %v7263_v51 }
0x3221   :  { %v4215_v41 = vpop.permute.xlu0 %4214 }
0x3222   :  { %v4212_v35 = vpop.permute.xlu1 %4211  ;;  %v4258_v10 = vperm.slane %v4215_v41, %v7263_v51 }
0x3223   :  { %v4236_v52 = vpop.permute.xlu2 %4235  ;;  %v4256_v37 = vperm.slane %v4212_v35, %v7268_v54 }
0x3224   :  { %v4260_v26 = vsel %vm549_vm10, %v4259_v22, %v4258_v10 }
0x3225   :  { %v4257_v7 = vsel %vm549_vm10, %v4256_v37, %v4255_v8 }
0x3226   :  { %v4279_v17 = vsel %vm572_vm11, %v4260_v26, %v4257_v7 }
0x3229   :  { %v4224_v60 = vpop.permute.xlu0 %4223 }
0x322a   :  { %v4221_v2 = vpop.permute.xlu1 %4220  ;;  %v4262_v21 = vperm.slane %v4224_v60, %v7268_v54 }
0x322b   :  { %v4245_v46 = vpop.permute.xlu2 %4244  ;;  %v4261_v0 = vperm.slane %v4221_v2, %v7263_v51  ;;  %v4268_v2 = vperm.slane %v4236_v52, %v7268_v54 }
0x322c   :  { %v4273_v22 = vperm.slane %v4245_v46, %v7263_v51 }
0x322d   :  { %v4263_v13 = vsel %vm549_vm10, %v4262_v21, %v4261_v0 }
0x322e   :  { %v4280_v59 = vsel %vm574_vm12, %v4263_v13, %v4279_v17 }
0x3231   :  { %v4233_v20 = vpop.permute.xlu0 %4232 }
0x3232   :  { %v4230_v30 = vpop.permute.xlu1 %4229  ;;  %v4267_v41 = vperm.slane %v4233_v20, %v7263_v51 }
0x3233   :  { %v4265_v49 = vperm.slane %v4230_v30, %v7268_v54  ;;  %v4254_v30 = vpop.permute.xlu2 %4253 }
0x3234   :  { %v4269_v10 = vsel %vm549_vm10, %v4268_v2, %v4267_v41  ;;  %v4277_v20 = vperm.slane %v4254_v30, %v7268_v54 }
0x3235   :  { %v4266_v35 = vsel %vm549_vm10, %v4265_v49, %v4264_v33 }
0x3236   :  { %v4281_v37 = vsel %vm576_vm13, %v4266_v35, %v4280_v59 }
0x3239   :  { %v4242_v29 = vpop.permute.xlu0 %4241 }
0x323a   :  { %v4239_v39 = vpop.permute.xlu1 %4238  ;;  %v4271_v60 = vperm.slane %v4242_v29, %v7268_v54 }
0x323b   :  { %v4270_v16 = vperm.slane %v4239_v39, %v7263_v51  ;;  %v4282_v39 = vsel %vm578_vm14, %v4269_v10, %v4281_v37 }
0x323d   :  { %v4272_v0 = vsel %vm549_vm10, %v4271_v60, %v4270_v16 }
0x323e   :  { %v4283_v26 = vsel %vm580_vm15, %v4272_v0, %v4282_v39 }
0x3241   :  { %v4251_v21 = vpop.permute.xlu0 %4250 }
0x3242   :  { %v4276_v29 = vperm.slane %v4251_v21, %v7263_v51  ;;  %v4248_v8 = vpop.permute.xlu1 %4247 }
0x3243   :  { %v4274_v49 = vperm.slane %v4248_v8, %v7268_v54 }
0x3244   :  { %v4278_v52 = vsel %vm549_vm10, %v4277_v20, %v4276_v29 }
0x3245   :  { %v4275_v33 = vsel %vm549_vm10, %v4274_v49, %v4273_v22 }
0x3246   :  { %v4284_v7 = vsel %vm582_vm2, %v4275_v33, %v4283_v26 }
0x3247   :  { %v4285_v13 = vsel %vm584_vm3, %v4278_v52, %v4284_v7 }
0x3248   :  { %v4287_v41 = vsel %vm587_vm4, %v4285_v13, 0.0 }
0x3249   :  { %4288 = vadd.xlane.f32.xlu1 %v4287_v41 }
0x32bc   :  { %v4289_v35 = vpop.xlane.xlu1 %4288 }
0x32bd   :  { %6388 = vrcp.f32 %v4289_v35 }
0x32c3   :  { %v6389_v46 = vpop.eup %6388 }
0x32c4   :  { %v4291_v60 = vmul.f32 %v6389_v46, %v4289_v35 }
0x32c6   :  { %v4292_v16 = vsub.f32 2.0, %v4291_v60 }
0x32c8   :  { %v4293_v17 = vmul.f32 %v6389_v46, %v4292_v16 }
0x32ca   :  { %v4300_v2 = vperm.slane %v4293_v17, 5  ;;  %v4295_v30 = vperm.slane %v4293_v17, 0  ;;  %v4296_v21 = vperm.slane %v4293_v17, 1  ;;  %v4297_v29 = vperm.slane %v4293_v17, 2 }
0x32cb   :  { %v4299_v49 = vperm.slane %v4293_v17, 4  ;;  %v4301_v52 = vperm.slane %v4293_v17, 6  ;;  %v4302_v39 = vperm.slane %v4293_v17, 7 }
0x32cc   :  { %v4322_v59 = vmul.f32 %v9451_v58, %v4300_v2  ;;  %v4312_v10 = vmul.f32 %v9414_v44, %v4295_v30  ;;  %v4311_v37 = vmul.f32 %v9417_v40, %v4295_v30  ;;  %v4314_v20 = vmul.f32 %v9430_v61, %v4296_v21 }
0x32cd   :  { %v4313_v0 = vmul.f32 %v9412_v15, %v4296_v21  ;;  %v4316_v8 = vmul.f32 %v9425_v1, %v4297_v29  ;;  %v4315_v22 = vmul.f32 %v9427_v36, %v4297_v29  ;;  %v4298_v44 = vperm.slane %v4293_v17, 3 }
0x32ce   :  { %4384 = vperm.xlu1 %6075, %v4322_v59   ;;  %4334 = vperm.xlu2 %6076, %v4312_v10   ;;  %v4320_v61 = vmul.f32 %v9456_v24, %v4299_v49  ;;  %v4319_v15 = vmul.f32 %v9439_v38, %v4299_v49  ;;  %v4323_v1 = vmul.f32 %v9466_v56, %v4301_v52 }
0x32cf   :  { %4329 = vperm.xlu0 %6077, %v4311_v37   ;;  %v4318_v40 = vmul.f32 %v9441_v53, %v4298_v44  ;;  %v4317_v58 = vmul.f32 %v9444_v18, %v4298_v44  ;;  %v4321_v36 = vmul.f32 %v9453_v9, %v4300_v2  ;;  %v4325_v53 = vmul.f32 %v9461_v62, %v4302_v39 }
0x32d0   :  { %v4324_v18 = vmul.f32 %v9463_v5, %v4301_v52  ;;  %v4326_v24 = vmul.f32 %v9470_v50, %v4302_v39 }
0x32d6   :  { %4344 = vperm.xlu2 %6076, %v4314_v20  }
0x32d7   :  { %4339 = vperm.xlu0 %6077, %v4313_v0  }
0x32de   :  { %4354 = vperm.xlu2 %6076, %v4316_v8  }
0x32df   :  { %4349 = vperm.xlu0 %6077, %v4315_v22  }
0x32e6   :  { %4364 = vperm.xlu2 %6076, %v4318_v40  }
0x32e7   :  { %4359 = vperm.xlu0 %6077, %v4317_v58  }
0x32ee   :  { %4374 = vperm.xlu2 %6076, %v4320_v61  }
0x32ef   :  { %4369 = vperm.xlu0 %6077, %v4319_v15  }
0x32f6   :  { %4389 = vperm.xlu2 %6076, %v4323_v1  }
0x32f7   :  { %4379 = vperm.xlu0 %6077, %v4321_v36  }
0x32fe   :  { %4399 = vperm.xlu2 %6076, %v4325_v53  }
0x32ff   :  { %4394 = vperm.xlu0 %6077, %v4324_v18  }
0x3306   :  { %4511 = vrot.lane.b32.xlu2 %v9226_v57, %s6924_s21 }
0x3307   :  { %4404 = vperm.xlu0 %6077, %v4326_v24  }
0x330f   :  { %4539 = vrot.lane.b32.xlu0 %v9185_v19, %s6924_s21 }
0x3328   :  { %v4335_v38 = vpop.permute.xlu2 %4334 }
0x3329   :  { %v4408_v2 = vmul.f32 %v9234_v27, %v4335_v38 }
0x332b   :  { %v4424_v40 = vsel %vm150_vm0, %v4408_v2, 0.0 }
0x3330   :  { %v4345_v56 = vpop.permute.xlu2 %4344 }
0x3331   :  { %v4410_v57 = vmul.f32 %v9261_v45, %v4345_v56 }
0x3333   :  { %v4433_v21 = vsel %vm150_vm0, %v4410_v57, 0.0 }
0x3338   :  { %v4355_v26 = vpop.permute.xlu2 %4354 }
0x3339   :  { %v4412_v60 = vmul.f32 %v9282_v48, %v4355_v26 }
0x333b   :  { %v4442_v29 = vsel %vm150_vm0, %v4412_v60, 0.0 }
0x3340   :  { %v4365_v62 = vpop.permute.xlu2 %4364  ;;  %v4385_v16 = vpop.permute.xlu1 %4384 }
0x3341   :  { %v4330_v9 = vpop.permute.xlu0 %4329  ;;  %v4414_v30 = vmul.f32 %v9276_v11, %v4365_v62  ;;  %v4418_v20 = vmul.f32 %v9324_v3, %v4385_v16 }
0x3342   :  { %v4407_v46 = vmul.f32 %v9240_v25, %v4330_v9 }
0x3343   :  { %v4469_v36 = vsel %vm150_vm0, %v4418_v20, 0.0 }
0x3348   :  { %v4375_v5 = vpop.permute.xlu2 %4374 }
0x3349   :  { %v4340_v33 = vpop.permute.xlu0 %4339  ;;  %v4416_v10 = vmul.f32 %v9288_v43, %v4375_v5  ;;  %v4451_v43 = vsel %vm150_vm0, %v4414_v30, 0.0 }
0x334a   :  { %v4409_v35 = vmul.f32 %v9248_v6, %v4340_v33 }
0x334b   :  { %v4460_v15 = vsel %vm150_vm0, %v4416_v10, 0.0 }
0x334c   :  { %v4432_v59 = vsel %vm150_vm0, %v4409_v35, 0.0 }
0x334d   :  { %v4434_v8 = vadd.f32 %v4433_v21, %v4432_v59 }
0x334f   :  { %v4435_v18 = vrot.slane %v4434_v8, 4 }
0x3350   :  { %v4390_v52 = vpop.permute.xlu2 %4389 }
0x3351   :  { %v4350_v7 = vpop.permute.xlu0 %4349  ;;  %v4419_v33 = vmul.f32 %v9309_v34, %v4390_v52 }
0x3352   :  { %v4411_v50 = vmul.f32 %v9255_v55, %v4350_v7  ;;  %v4436_v7 = vadd.f32 %v4435_v18, %v4434_v8 }
0x3353   :  { %v4477_v57 = vsel %vm150_vm0, %v4419_v33, 0.0 }
0x3354   :  { %v4441_v37 = vsel %vm150_vm0, %v4411_v50, 0.0  ;;  %v4437_v60 = vrot.slane %v4436_v7, 2 }
0x3355   :  { %v4443_v58 = vadd.f32 %v4442_v29, %v4441_v37 }
0x3356   :  { %v4438_v20 = vadd.f32 %v4437_v60, %v4436_v7 }
0x3357   :  { %v4444_v38 = vrot.slane %v4443_v58, 4 }
0x3358   :  { %v4400_v16 = vpop.permute.xlu2 %4399 }
0x3359   :  { %v4360_v13 = vpop.permute.xlu0 %4359  ;;  %v4445_v5 = vadd.f32 %v4444_v38, %v4443_v58  ;;  %v4421_v37 = vmul.f32 %v9339_v31, %v4400_v16 }
0x335a   :  { %v4413_v19 = vmul.f32 %v9267_v14, %v4360_v13  ;;  %v4423_v14 = vsel %vm150_vm0, %v4407_v46, 0.0 }
0x335b   :  { %v4425_v61 = vadd.f32 %v4424_v40, %v4423_v14  ;;  %v4446_v30 = vrot.slane %v4445_v5, 2  ;;  %v4486_v58 = vsel %vm150_vm0, %v4421_v37, 0.0 }
0x335c   :  { %v4450_v0 = vsel %vm150_vm0, %v4413_v19, 0.0 }
0x335d   :  { %v4452_v1 = vadd.f32 %v4451_v43, %v4450_v0  ;;  %v4426_v9 = vrot.slane %v4425_v61, 4  ;;  %v4447_v8 = vadd.f32 %v4446_v30, %v4445_v5 }
0x335f   :  { %v4453_v56 = vrot.slane %v4452_v1, 4  ;;  %v4427_v35 = vadd.f32 %v4426_v9, %v4425_v61 }
0x3361   :  { %v4370_v41 = vpop.permute.xlu0 %4369  ;;  %v4454_v50 = vadd.f32 %v4453_v56, %v4452_v1  ;;  %v4428_v34 = vrot.slane %v4427_v35, 2 }
0x3362   :  { %v4415_v17 = vmul.f32 %v9303_v42, %v4370_v41 }
0x3363   :  { %v4455_v59 = vrot.slane %v4454_v50, 2 }
0x3364   :  { %v4459_v22 = vsel %vm150_vm0, %v4415_v17, 0.0 }
0x3365   :  { %v4461_v39 = vadd.f32 %v4460_v15, %v4459_v22  ;;  %v4456_v40 = vadd.f32 %v4455_v59, %v4454_v50  ;;  %v4439_v15 = vrot.slane %v4438_v20, 1 }
0x3367   :  { %v4462_v26 = vrot.slane %v4461_v39, 4  ;;  %v4457_v18 = vrot.slane %v4456_v40, 1  ;;  %v4440_v9 = vadd.f32 %v4439_v15, %v4438_v20 }
0x3369   :  { %v4380_v44 = vpop.permute.xlu0 %4379  ;;  %v4463_v46 = vadd.f32 %v4462_v26, %v4461_v39 }
0x336a   :  { %v4417_v49 = vmul.f32 %v9297_v63, %v4380_v44  ;;  %v4429_v44 = vadd.f32 %v4428_v34, %v4427_v35  ;;  %v4512_v34 = vpop.permute.xlu2 %4511 }
0x336b   :  { %v4464_v21 = vrot.slane %v4463_v46, 2 }
0x336c   :  { %v4468_v53 = vsel %vm150_vm0, %v4417_v49, 0.0 }
0x336d   :  { %v4470_v24 = vadd.f32 %v4469_v36, %v4468_v53  ;;  %v4465_v49 = vadd.f32 %v4464_v21, %v4463_v46  ;;  %v4448_v36 = vrot.slane %v4447_v8, 1  ;;  %v4430_v53 = vrot.slane %v4429_v44, 1 }
0x336f   :  { %v4471_v62 = vrot.slane %v4470_v24, 4  ;;  %v4466_v38 = vrot.slane %v4465_v49, 1  ;;  %v4449_v33 = vadd.f32 %v4448_v36, %v4447_v8  ;;  %v4431_v7 = vadd.f32 %v4430_v53, %v4429_v44 }
0x3371   :  { %v4395_v13 = vpop.permute.xlu0 %4394  ;;  %v4472_v17 = vadd.f32 %v4471_v62, %v4470_v24  ;;  %v4458_v62 = vadd.f32 %v4457_v18, %v4456_v40  ;;  %v4467_v5 = vadd.f32 %v4466_v38, %v4465_v49 }
0x3372   :  { %v4420_v41 = vmul.f32 %v9318_v4, %v4395_v13 }
0x3373   :  { %v4473_v14 = vrot.slane %v4472_v17, 2 }
0x3374   :  { %v4478_v19 = vsel %vm150_vm0, %v4420_v41, 0.0  ;;  %v4503_v41 = vsel %vm572_vm11, %v4440_v9, %v4431_v7 }
0x3375   :  { %v4479_v2 = vadd.f32 %v4478_v19, %v4477_v57  ;;  %v4474_v52 = vadd.f32 %v4473_v14, %v4472_v17  ;;  %v4504_v57 = vsel %vm574_vm12, %v4449_v33, %v4503_v41 }
0x3376   :  { %v4505_v19 = vsel %vm576_vm13, %v4458_v62, %v4504_v57  ;;  %v6710_v57 = vld [vmem:[%s10294_s11 + $0x20] sm:$0xff] }
0x3377   :  { %v4480_v10 = vrot.slane %v4479_v2, 4  ;;  %v4475_v56 = vrot.slane %v4474_v52, 1  ;;  %v4506_v16 = vsel %vm578_vm14, %v4467_v5, %v4505_v19  ;;  %v6712_v19 = vld [vmem:[%s10294_s11 + $0x10] sm:$0xff] }
0x3379   :  { %v4481_v0 = vadd.f32 %v4480_v10, %v4479_v2  ;;  %v4405_v29 = vpop.permute.xlu0 %4404  ;;  %v4476_v35 = vadd.f32 %v4475_v56, %v4474_v52 }
0x337a   :  { %v4422_v22 = vmul.f32 %v9330_v23, %v4405_v29  ;;  %v10328_v29 = vld [vmem:[#allocation23_spill] sm:$0xff] }
0x337b   :  { %v4482_v43 = vrot.slane %v4481_v0, 2  ;;  %v4507_v2 = vsel %vm580_vm15, %v4476_v35, %v4506_v16  ;;  %v6708_v35 = vld [vmem:[%s10294_s11 + $0x30] sm:$0xff]  ;;  %v6714_v16 = vld [vmem:[%s10294_s11] sm:$0xff] }
0x337c   :  { %v4487_v61 = vsel %vm150_vm0, %v4422_v22, 0.0 }
0x337d   :  { %v4488_v1 = vadd.f32 %v4487_v61, %v4486_v58  ;;  %v4483_v39 = vadd.f32 %v4482_v43, %v4481_v0  ;;  %v9574_v0 = vld [vmem:[%s10290_s7] ss:$0 sm:$0xff] }
0x337e   :  { %v211_v8 = vadd.f32 %v9574_v0, %v10328_v29 }
0x337f   :  { %v4489_v24 = vrot.slane %v4488_v1, 4  ;;  %v4484_v26 = vrot.slane %v4483_v39, 1 }
0x3381   :  { %v4490_v23 = vadd.f32 %v4489_v24, %v4488_v1  ;;  %v4485_v46 = vadd.f32 %v4484_v26, %v4483_v39  ;;  %v4540_v20 = vpop.permute.xlu0 %4539 }
0x3383   :  { %v4491_v13 = vrot.slane %v4490_v23, 2  ;;  %v4508_v30 = vsel %vm582_vm2, %v4485_v46, %v4507_v2  ;;  %v6711_v46 = vld [vmem:[%s10294_s11 + $0x18] sm:$0xff]  ;;  %v9618_v2 = vld [vmem:[%s10292_s9] ss:$0 sm:$0xff] }
0x3385   :  { %v4492_v50 = vadd.f32 %v4491_v13, %v4490_v23 }
0x3387   :  { %v4493_v60 = vrot.slane %v4492_v50, 1 }
0x3389   :  { %v4494_v17 = vadd.f32 %v4493_v60, %v4492_v50  ;;  %v6709_v50 = vld [vmem:[%s10294_s11 + $0x28] sm:$0xff] }
0x338a   :  { %v6713_v60 = vld [vmem:[%s10294_s11 + $0x8] sm:$0xff] }
0x338b   :  { %v4509_v59 = vsel %vm584_vm3, %v4494_v17, %v4508_v30 }
0x338c   :  { %v4514_v10 = vsel %vm150_vm0, %v4509_v59, %v4512_v34 }
0x338d   :  { %6049 = vmatmul.msk.f32.vlgmr.msrb.gmra.mxu3 %vm273_vm1, %v4514_v10 }
0x3410   :  { %v4535_v37 = vpop.f32.mrf.mxu3 }
0x3411   :  { %6390 = vtanh.f32 %v4535_v37 }
0x3417   :  { %v9566_v21 = vpop.eup %6390 }
0x3418   :  { %v4542_v14 = vsel %vm150_vm0, %v9566_v21, %v4540_v20 }
0x3419   :  { %6050 = vmatmul.msk.f32.vlgmr.msra.gmra.mxu0 %vm273_vm1, %v4542_v14 }
0x3496   :  { %v4563_v22 = vpop.f32.mrf.mxu0 }
0x3497   :  { %v4566_v44 = vadd.f32 %v4563_v22, %v211_v8 }
0x3499   :  { %6392 = vtanh.f32 %v4566_v44  ;;  %v6051_v43 = vmul.f32 -1.442695, %v4566_v44 }
0x349b   :  { %6394 = vpow2.f32 %v6051_v43 }
0x349f   :  { %v6393_v40 = vpop.eup %6392 }
0x34a0   :  { %4589 = vrot.lane.b32.xlu1 %v6393_v40, %s6924_s21 }
0x34a1   :  { %v6395_v58 = vpop.eup %6394 }
0x34a2   :  { %v4570_v49 = vadd.f32 1.0, %v6395_v58 }
0x34a4   :  { %6396 = vrcp.f32 %v4570_v49  ;;  %v4582_v39 = vand.u32 2147483648, %v4570_v49  ;;  %vm4576_vm6 = vweird.f32 %v4570_v49  ;;  %v4580_v53 = vand.u32 2147483647, %v4570_v49 }
0x34a6   :  { %v4583_v24 = vor.u32 1.1754944e-38, %v4582_v39  ;;  %vm4581_vm8 = vcmp.eq.f32.partialorder %v4580_v53, 8.507059e+37 }
0x34aa   :  { %v6397_v61 = vpop.eup %6396 }
0x34ab   :  { %v4572_v15 = vmul.f32 %v6397_v61, %v4570_v49  ;;  %vm4577_vm5 = vweird.f32 %v6397_v61 }
0x34ac   :  { %vm4578_vm7 = vmor %vm4576_vm6, %vm4577_vm5 }
0x34ad   :  { %v4573_v52 = vsub.f32 1.0, %v4572_v15 }
0x34af   :  { %v4574_v1 = vmul.f32 %v6397_v61, %v4573_v52 }
0x34b1   :  { %v4575_v36 = vadd.f32 %v6397_v61, %v4574_v1 }
0x34b3   :  { %v4579_v18 = vsel %vm4578_vm7, %v6397_v61, %v4575_v36 }
0x34b4   :  { %v4584_v9 = vsel %vm4581_vm8, %v4583_v24, %v4579_v18 }
0x34b5   :  { %v4587_v23 = vmul.f32 %v4584_v9, %v9181_v47  ;;  %v6707_v47 = vld [vmem:[%s10294_s11 + $0x38] sm:$0xff] }
0x3512   :  { %v4590_v38 = vpop.permute.xlu1 %4589 }
0x3513   :  { %v4592_v56 = vmul.f32 %v4590_v38, %v4584_v9 }
0x3515   :  { %4594 = vrot.lane.b32.xlu2 %v4592_v56, %s6923_s8 }
0x356f   :  { %v4595_v33 = vpop.permute.xlu2 %4594 }
0x3570   :  { %v9581_v26 = vadd.f32 %v4595_v33, %v4587_v23 }
0x3572   :  { %6398 = vtanh.f32 %v9581_v26 }
0x3578   :  { %v6399_v7 = vpop.eup %6398 }
0x3579   :  { %4600 = vrot.lane.b32.xlu0 %v6399_v7, %s6924_s21 }
0x35eb   :  { %v4601_v62 = vpop.permute.xlu0 %4600 }
0x35ec   :  { %v9585_v13 = vmul.f32 %v4601_v62, %v4584_v9 }
0x35ee   :  { %4605 = vrot.lane.b32.xlu1 %v9585_v13, %s6923_s8 }
0x3660   :  { %v4606_v5 = vpop.permute.xlu1 %4605 }
0x3661   :  { %v4608_v41 = vsel %vm150_vm0, %v4606_v5, %v4512_v34 }
0x3662   :  { %6052 = vmatmul.msk.f32.vlgmr.msra.gmra.mxu1 %vm273_vm1, %v4608_v41 }
0x3663   :  { %5940 = vmatpush.msra.mxu1 %v6707_v47 }
0x3665   :  { %5941 = vmatpush.msra.mxu1 %v6708_v35 }
0x3667   :  { %5942 = vmatpush.msra.mxu1 %v6709_v50 }
0x3669   :  { %5943 = vmatpush.msra.mxu1 %v6710_v57 }
0x366b   :  { %5944 = vmatpush.msra.mxu1 %v6711_v46 }
0x366d   :  { %5945 = vmatpush.msra.mxu1 %v6712_v19 }
0x366f   :  { %5946 = vmatpush.msra.mxu1 %v6713_v60 }
0x3671   :  { %5947 = vmatpush.msra.mxu1 %v6714_v16 }
0x36df   :  { %v4629_v17 = vpop.f32.mrf.mxu1 }
0x36e0   :  { %v4630_v30 = vadd.f32 %v9618_v2, %v4629_v17 }
0x36e2   :  { %6400 = vtanh.f32 %v4630_v30  ;;  %v6053_v59 = vmul.f32 -1.442695, %v4630_v30 }
0x36e4   :  { %6402 = vpow2.f32 %v6053_v59 }
0x36e8   :  { %v6401_v34 = vpop.eup %6400 }
0x36e9   :  { %4654 = vrot.lane.b32.xlu2 %v6401_v34, %s6924_s21 }
0x36ea   :  { %v6403_v10 = vpop.eup %6402 }
0x36eb   :  { %v4635_v37 = vadd.f32 1.0, %v6403_v10 }
0x36ed   :  { %6404 = vrcp.f32 %v4635_v37  ;;  %v4647_v44 = vand.u32 2147483648, %v4635_v37  ;;  %vm4641_vm5 = vweird.f32 %v4635_v37  ;;  %v4645_v40 = vand.u32 2147483647, %v4635_v37 }
0x36ef   :  { %v4648_v58 = vor.u32 1.1754944e-38, %v4647_v44  ;;  %vm4646_vm7 = vcmp.eq.f32.partialorder %v4645_v40, 8.507059e+37 }
0x36f3   :  { %v6405_v20 = vpop.eup %6404 }
0x36f4   :  { %v4637_v14 = vmul.f32 %v6405_v20, %v4635_v37  ;;  %vm4642_vm9 = vweird.f32 %v6405_v20 }
0x36f5   :  { %vm4643_vm6 = vmor %vm4641_vm5, %vm4642_vm9 }
0x36f6   :  { %v4638_v29 = vsub.f32 1.0, %v4637_v14  ;;  %v9660_v14 = vld [vmem:[%s10284_s1 + $0x48] sm:$0xff] }
0x36f8   :  { %v4639_v8 = vmul.f32 %v6405_v20, %v4638_v29 }
0x36fa   :  { %v4640_v22 = vadd.f32 %v6405_v20, %v4639_v8 }
0x36fc   :  { %v4644_v43 = vsel %vm4643_vm6, %v6405_v20, %v4640_v22 }
0x36fd   :  { %v4649_v61 = vsel %vm4646_vm7, %v4648_v58, %v4644_v43 }
0x36fe   :  { %v4652_v52 = vmul.f32 %v4649_v61, %v9222_v28 }
0x3743   :  { %v4655_v49 = vpop.permute.xlu2 %4654 }
0x3744   :  { %v4657_v15 = vmul.f32 %v4655_v49, %v4649_v61 }
0x3746   :  { %4659 = vrot.lane.b32.xlu0 %v4657_v15, %s6923_s8 }
0x37b8   :  { %v4660_v1 = vpop.permute.xlu0 %4659 }
0x37b9   :  { %v9624_v36 = vadd.f32 %v4660_v1, %v4652_v52 }
0x37bb   :  { %6406 = vtanh.f32 %v9624_v36 }
0x37c1   :  { %v6407_v39 = vpop.eup %6406 }
0x37c2   :  { %4665 = vrot.lane.b32.xlu1 %v6407_v39, %s6924_s21 }
0x3834   :  { %v4666_v53 = vpop.permute.xlu1 %4665 }
0x3835   :  { %v9628_v18 = vmul.f32 %v4666_v53, %v4649_v61  ;;  %v9671_v61 = vld [vmem:[%s10284_s1 + $0x60] sm:$0xff] }
0x3837   :  { %4670 = vrot.lane.b32.xlu2 %v9628_v18, %s6923_s8 }
0x3891   :  { %v4671_v24 = vpop.permute.xlu2 %4670 }
0x3892   :  { %6054 = vmatmul.msk.f32.vlgmr.msrb.gmra.mxu2 %vm150_vm0, %v4671_v24 }
0x3915   :  { %v4691_v38 = vpop.f32.mrf.mxu2 }
0x3916   :  { %v4702_v9 = vperm.slane %v4691_v38, 0  ;;  %v4695_v28 = vrot.slane %v4691_v38, 1  ;;  %v4696_v56 = vrot.slane %v4691_v38, 2  ;;  %v4698_v46 = vrot.slane %v4691_v38, 4 }
0x3917   :  { %v4701_v22 = vrot.slane %v4691_v38, 7 }
0x3918   :  { %v4719_v23 = vmul.f32 %v9234_v27, %v4702_v9  ;;  %v4718_v33 = vmul.f32 %v9240_v25, %v4702_v9  ;;  %v4703_v7 = vperm.slane %v4695_v28, 0  ;;  %v4704_v47 = vperm.slane %v4696_v56, 0 }
0x3919   :  { %v4697_v27 = vrot.slane %v4691_v38, 3  ;;  %v4706_v17 = vperm.slane %v4698_v46, 0  ;;  %v4709_v58 = vperm.slane %v4701_v22, 0 }
0x391a   :  { %v4737_v62 = vsel %vm150_vm0, %v4719_v23, 0.0  ;;  %v4734_v5 = vsel %vm150_vm0, %v4718_v33, 0.0  ;;  %v4720_v41 = vmul.f32 %v9248_v6, %v4703_v7  ;;  %v4722_v50 = vmul.f32 %v9255_v55, %v4704_v47  ;;  %v9649_v55 = vld [vmem:[%s10284_s1 + $0x30] sm:$0xff] }
0x391b   :  { %4738 = vadd.xlane.f32.xlu1 %v4737_v62  ;;  %4735 = vadd.xlane.f32.xlu0 %v4734_v5  ;;  %v4721_v57 = vmul.f32 %v9261_v45, %v4703_v7  ;;  %v4723_v25 = vmul.f32 %v9282_v48, %v4704_v47  ;;  %v4705_v16 = vperm.slane %v4697_v27, 0  ;;  %v4699_v48 = vrot.slane %v4691_v38, 5 }
0x391c   :  { %v4740_v35 = vsel %vm150_vm0, %v4720_v41, 0.0  ;;  %v4746_v19 = vsel %vm150_vm0, %v4722_v50, 0.0  ;;  %v4726_v34 = vmul.f32 %v9303_v42, %v4706_v17  ;;  %v4727_v29 = vmul.f32 %v9660_v14, %v4706_v17 }
0x391d   :  { %4741 = vadd.xlane.f32.xlu2 %v4740_v35  ;;  %v4743_v60 = vsel %vm150_vm0, %v4721_v57, 0.0  ;;  %v4749_v6 = vsel %vm150_vm0, %v4723_v25, 0.0  ;;  %v4725_v30 = vmul.f32 %v9276_v11, %v4705_v16  ;;  %v4724_v45 = vmul.f32 %v9649_v55, %v4705_v16 }
0x391e   :  { %v4707_v37 = vperm.slane %v4699_v48, 0  ;;  %v4758_v20 = vsel %vm150_vm0, %v4726_v34, 0.0  ;;  %v4700_v42 = vrot.slane %v4691_v38, 6  ;;  %v4761_v40 = vsel %vm150_vm0, %v4727_v29, 0.0 }
0x391f   :  { %v4755_v59 = vsel %vm150_vm0, %v4725_v30, 0.0  ;;  %v4752_v10 = vsel %vm150_vm0, %v4724_v45, 0.0  ;;  %v4732_v15 = vmul.f32 %v9339_v31, %v4709_v58 }
0x3920   :  { %v4728_v11 = vmul.f32 %v9297_v63, %v4707_v37  ;;  %v4729_v8 = vmul.f32 %v9324_v3, %v4707_v37  ;;  %v4708_v43 = vperm.slane %v4700_v42, 0 }
0x3921   :  { %v4776_v39 = vsel %vm150_vm0, %v4732_v15, 0.0 }
0x3922   :  { %v4764_v44 = vsel %vm150_vm0, %v4728_v11, 0.0  ;;  %v4767_v63 = vsel %vm150_vm0, %v4729_v8, 0.0  ;;  %v4731_v49 = vmul.f32 %v9318_v4, %v4708_v43  ;;  %v4730_v3 = vmul.f32 %v9671_v61, %v4708_v43  ;;  %v9681_v4 = vld [vmem:[%s10284_s1 + $0x78] sm:$0xff] }
0x3923   :  { %4747 = vadd.xlane.f32.xlu1 %v4746_v19  ;;  %4744 = vadd.xlane.f32.xlu0 %v4743_v60  ;;  %v4733_v53 = vmul.f32 %v9681_v4, %v4709_v58 }
0x3924   :  { %v4773_v52 = vsel %vm150_vm0, %v4731_v49, 0.0  ;;  %v4770_v1 = vsel %vm150_vm0, %v4730_v3, 0.0 }
0x3925   :  { %4750 = vadd.xlane.f32.xlu2 %v4749_v6  ;;  %v4779_v24 = vsel %vm150_vm0, %v4733_v53, 0.0 }
0x392b   :  { %4756 = vadd.xlane.f32.xlu1 %v4755_v59  ;;  %4753 = vadd.xlane.f32.xlu0 %v4752_v10 }
0x392d   :  { %4759 = vadd.xlane.f32.xlu2 %v4758_v20 }
0x3933   :  { %4765 = vadd.xlane.f32.xlu1 %v4764_v44  ;;  %4762 = vadd.xlane.f32.xlu0 %v4761_v40 }
0x3935   :  { %4768 = vadd.xlane.f32.xlu2 %v4767_v63 }
0x393b   :  { %4774 = vadd.xlane.f32.xlu1 %v4773_v52  ;;  %4771 = vadd.xlane.f32.xlu0 %v4770_v1 }
0x393d   :  { %4777 = vadd.xlane.f32.xlu2 %v4776_v39 }
0x3943   :  { %4780 = vadd.xlane.f32.xlu0 %v4779_v24 }
0x398e   :  { %v4739_v31 = vpop.xlane.xlu1 %4738  ;;  %v4736_v38 = vpop.xlane.xlu0 %4735 }
0x398f   :  { %v4799_v50 = vperm.slane %v4739_v31, %v7268_v54  ;;  %v4798_v57 = vperm.slane %v4736_v38, %v7263_v51 }
0x3990   :  { %v4742_v9 = vpop.xlane.xlu2 %4741 }
0x3991   :  { %v4801_v27 = vperm.slane %v4742_v9, %v7263_v51  ;;  %v4800_v30 = vsel %vm549_vm10, %v4799_v50, %v4798_v57 }
0x3996   :  { %v4748_v28 = vpop.xlane.xlu1 %4747  ;;  %v4745_v56 = vpop.xlane.xlu0 %4744 }
0x3997   :  { %v4802_v47 = vperm.slane %v4745_v56, %v7268_v54  ;;  %v4804_v16 = vperm.slane %v4748_v28, %v7263_v51 }
0x3998   :  { %v4751_v23 = vpop.xlane.xlu2 %4750 }
0x3999   :  { %v4805_v25 = vperm.slane %v4751_v23, %v7268_v54  ;;  %v4803_v46 = vsel %vm549_vm10, %v4802_v47, %v4801_v27 }
0x399a   :  { %v4822_v48 = vsel %vm572_vm11, %v4803_v46, %v4800_v30 }
0x399b   :  { %v4806_v34 = vsel %vm549_vm10, %v4805_v25, %v4804_v16 }
0x399c   :  { %v4823_v42 = vsel %vm574_vm12, %v4806_v34, %v4822_v48 }
0x399e   :  { %v9685_v33 = vpop.xlane.xlu1 %4756  ;;  %v9687_v7 = vpop.xlane.xlu0 %4753 }
0x399f   :  { %v4808_v19 = vperm.slane %v9685_v33, %v7268_v54  ;;  %v4807_v60 = vperm.slane %v9687_v7, %v7263_v51 }
0x39a0   :  { %v9689_v62 = vpop.xlane.xlu2 %4759 }
0x39a1   :  { %v4810_v59 = vperm.slane %v9689_v62, %v7263_v51  ;;  %v4809_v10 = vsel %vm549_vm10, %v4808_v19, %v4807_v60 }
0x39a2   :  { %v4824_v22 = vsel %vm576_vm13, %v4809_v10, %v4823_v42 }
0x39a6   :  { %v9691_v5 = vpop.xlane.xlu1 %4765  ;;  %v9693_v41 = vpop.xlane.xlu0 %4762 }
0x39a7   :  { %v4811_v6 = vperm.slane %v9693_v41, %v7268_v54  ;;  %v4813_v8 = vperm.slane %v9691_v5, %v7263_v51 }
0x39a8   :  { %v9696_v35 = vpop.xlane.xlu2 %4768 }
0x39a9   :  { %v4814_v37 = vperm.slane %v9696_v35, %v7268_v54  ;;  %v4812_v20 = vsel %vm549_vm10, %v4811_v6, %v4810_v59 }
0x39aa   :  { %v4825_v40 = vsel %vm578_vm14, %v4812_v20, %v4824_v22 }
0x39ab   :  { %v4815_v43 = vsel %vm549_vm10, %v4814_v37, %v4813_v8 }
0x39ac   :  { %v4826_v15 = vsel %vm580_vm15, %v4815_v43, %v4825_v40 }
0x39ae   :  { %v9710_v17 = vpop.xlane.xlu0 %4771  ;;  %v9713_v45 = vpop.xlane.xlu1 %4774 }
0x39af   :  { %v4817_v11 = vperm.slane %v9713_v45, %v7268_v54  ;;  %v4816_v29 = vperm.slane %v9710_v17, %v7263_v51 }
0x39b0   :  { %v9731_v44 = vpop.xlane.xlu2 %4777 }
0x39b1   :  { %v4818_v63 = vsel %vm549_vm10, %v4817_v11, %v4816_v29  ;;  %v4819_v49 = vperm.slane %v9731_v44, %v7263_v51 }
0x39b2   :  { %v4827_v1 = vsel %vm582_vm2, %v4818_v63, %v4826_v15 }
0x39b6   :  { %v9736_v58 = vpop.xlane.xlu0 %4780 }
0x39b7   :  { %v4820_v3 = vperm.slane %v9736_v58, %v7268_v54 }
0x39b9   :  { %v4821_v52 = vsel %vm549_vm10, %v4820_v3, %v4819_v49 }
0x39ba   :  { %v4828_v39 = vsel %vm584_vm3, %v4821_v52, %v4827_v1 }
0x39bb   :  { %v4830_v53 = vsel %vm587_vm4, %v4828_v39, -inf }
0x39bc   :  { %4831 = vmax.xlane.f32.xlu1 %v4830_v53 }
0x3a2f   :  { %v9747_v24 = vpop.xlane.xlu1 %4831 }
0x3a30   :  { %v4834_v47 = vperm.slane %v9747_v24, 0  ;;  %v4835_v50 = vperm.slane %v9747_v24, 1  ;;  %v4836_v46 = vperm.slane %v9747_v24, 2  ;;  %v4837_v34 = vperm.slane %v9747_v24, 3 }
0x3a31   :  { %v4839_v29 = vperm.slane %v9747_v24, 5  ;;  %v4840_v63 = vperm.slane %v9747_v24, 6  ;;  %v4841_v52 = vperm.slane %v9747_v24, 7 }
0x3a32   :  { %v4850_v57 = vsub.f32 %v4736_v38, %v4834_v47  ;;  %v4851_v27 = vsub.f32 %v4739_v31, %v4834_v47  ;;  %v4852_v25 = vsub.f32 %v4742_v9, %v4835_v50  ;;  %v4853_v6 = vsub.f32 %v4745_v56, %v4835_v50 }
0x3a33   :  { %v4854_v30 = vsub.f32 %v4748_v28, %v4836_v46  ;;  %v4855_v48 = vsub.f32 %v4751_v23, %v4836_v46  ;;  %v4838_v31 = vperm.slane %v9747_v24, 4  ;;  %v4856_v28 = vsub.f32 %v9687_v7, %v4837_v34 }
0x3a34   :  { %v4866_v19 = vmul.f32 1.442695, %v4850_v57  ;;  %v4868_v60 = vmul.f32 1.442695, %v4851_v27  ;;  %v4870_v16 = vmul.f32 1.442695, %v4852_v25  ;;  %v4857_v56 = vsub.f32 %v9685_v33, %v4837_v34 }
0x3a35   :  { %v4872_v59 = vmul.f32 1.442695, %v4853_v6  ;;  %v4874_v10 = vmul.f32 1.442695, %v4854_v30  ;;  %v4876_v38 = vmul.f32 1.442695, %v4855_v48  ;;  %v4858_v23 = vsub.f32 %v9689_v62, %v4838_v31 }
0x3a36   :  { %6408 = vpow2.f32 %v4866_v19  ;;  %v4878_v11 = vmul.f32 1.442695, %v4856_v28  ;;  %v4880_v42 = vmul.f32 1.442695, %v4857_v56  ;;  %v4859_v33 = vsub.f32 %v9693_v41, %v4838_v31 }
0x3a37   :  { %6410 = vpow2.f32 %v4868_v60  ;;  %v4882_v22 = vmul.f32 1.442695, %v4858_v23  ;;  %v4860_v62 = vsub.f32 %v9691_v5, %v4839_v29  ;;  %v4861_v43 = vsub.f32 %v9696_v35, %v4839_v29 }
0x3a38   :  { %6412 = vpow2.f32 %v4870_v16  ;;  %v4884_v49 = vmul.f32 1.442695, %v4859_v33  ;;  %v4862_v39 = vsub.f32 %v9710_v17, %v4840_v63  ;;  %v4863_v35 = vsub.f32 %v9713_v45, %v4840_v63 }
0x3a39   :  { %6414 = vpow2.f32 %v4872_v59  ;;  %v4886_v3 = vmul.f32 1.442695, %v4860_v62  ;;  %v4888_v41 = vmul.f32 1.442695, %v4861_v43  ;;  %v4864_v53 = vsub.f32 %v9731_v44, %v4841_v52 }
0x3a3a   :  { %6416 = vpow2.f32 %v4874_v10  ;;  %v4890_v24 = vmul.f32 1.442695, %v4862_v39  ;;  %v4892_v47 = vmul.f32 1.442695, %v4863_v35  ;;  %v4865_v25 = vsub.f32 %v9736_v58, %v4841_v52 }
0x3a3b   :  { %6418 = vpow2.f32 %v4876_v38  ;;  %v4894_v57 = vmul.f32 1.442695, %v4864_v53 }
0x3a3c   :  { %v9753_v37 = vpop.eup %6408  ;;  %6420 = vpow2.f32 %v4878_v11  ;;  %v4896_v45 = vmul.f32 1.442695, %v4865_v25 }
0x3a3d   :  { %v9756_v9 = vpop.eup %6410  ;;  %4915 = vperm.xlu2 %6076, %v9753_v37   ;;  %6422 = vpow2.f32 %v4880_v42 }
0x3a3e   :  { %v9759_v20 = vpop.eup %6412  ;;  %4918 = vperm.xlu0 %6077, %v9756_v9   ;;  %6424 = vpow2.f32 %v4882_v22 }
0x3a3f   :  { %4921 = vperm.xlu1 %6075, %v9759_v20   ;;  %v9767_v8 = vpop.eup %6414  ;;  %6426 = vpow2.f32 %v4884_v49 }
0x3a40   :  { %v9769_v40 = vpop.eup %6416  ;;  %6428 = vpow2.f32 %v4886_v3 }
0x3a41   :  { %v9772_v7 = vpop.eup %6418  ;;  %6430 = vpow2.f32 %v4888_v41 }
0x3a42   :  { %v9780_v15 = vpop.eup %6420  ;;  %6432 = vpow2.f32 %v4890_v24 }
0x3a43   :  { %v9783_v1 = vpop.eup %6422  ;;  %6434 = vpow2.f32 %v4892_v47 }
0x3a44   :  { %v9786_v5 = vpop.eup %6424  ;;  %6436 = vpow2.f32 %v4894_v57 }
0x3a45   :  { %4924 = vperm.xlu2 %6076, %v9767_v8   ;;  %v9793_v50 = vpop.eup %6426  ;;  %6438 = vpow2.f32 %v4896_v45 }
0x3a46   :  { %4927 = vperm.xlu0 %6077, %v9769_v40   ;;  %v9795_v27 = vpop.eup %6428 }
0x3a47   :  { %4930 = vperm.xlu1 %6075, %v9772_v7   ;;  %v9798_v17 = vpop.eup %6430 }
0x3a48   :  { %v9803_v44 = vpop.eup %6432 }
0x3a49   :  { %v9805_v46 = vpop.eup %6434 }
0x3a4a   :  { %v9808_v19 = vpop.eup %6436 }
0x3a4b   :  { %v9812_v58 = vpop.eup %6438 }
0x3a4d   :  { %4933 = vperm.xlu2 %6076, %v9780_v15  }
0x3a4e   :  { %4936 = vperm.xlu0 %6077, %v9783_v1  }
0x3a4f   :  { %4939 = vperm.xlu1 %6075, %v9786_v5  }
0x3a55   :  { %4942 = vperm.xlu2 %6076, %v9793_v50  }
0x3a56   :  { %4945 = vperm.xlu0 %6077, %v9795_v27  }
0x3a57   :  { %4948 = vperm.xlu1 %6075, %v9798_v17  }
0x3a5d   :  { %4951 = vperm.xlu2 %6076, %v9803_v44  }
0x3a5e   :  { %4954 = vperm.xlu0 %6077, %v9805_v46  }
0x3a5f   :  { %4957 = vperm.xlu1 %6075, %v9808_v19  }
0x3a65   :  { %4960 = vperm.xlu2 %6076, %v9812_v58  }
0x3a97   :  { %v4916_v60 = vpop.permute.xlu2 %4915 }
0x3a98   :  { %v4962_v42 = vperm.slane %v4916_v60, %v7263_v51 }
0x3a9f   :  { %v4925_v16 = vpop.permute.xlu2 %4924 }
0x3aa0   :  { %v4966_v22 = vperm.slane %v4925_v16, %v7268_v54 }
0x3aa7   :  { %v4934_v30 = vpop.permute.xlu2 %4933 }
0x3aa8   :  { %v4971_v63 = vperm.slane %v4934_v30, %v7263_v51 }
0x3aaf   :  { %v4943_v10 = vpop.permute.xlu2 %4942 }
0x3ab0   :  { %v4919_v6 = vpop.permute.xlu0 %4918  ;;  %v4975_v47 = vperm.slane %v4943_v10, %v7268_v54 }
0x3ab1   :  { %v4922_v48 = vpop.permute.xlu1 %4921  ;;  %v4963_v23 = vperm.slane %v4919_v6, %v7268_v54 }
0x3ab2   :  { %v4965_v56 = vperm.slane %v4922_v48, %v7263_v51 }
0x3ab3   :  { %v4964_v3 = vsel %vm549_vm10, %v4963_v23, %v4962_v42 }
0x3ab4   :  { %v4967_v49 = vsel %vm549_vm10, %v4966_v22, %v4965_v56 }
0x3ab5   :  { %v4986_v24 = vsel %vm572_vm11, %v4967_v49, %v4964_v3 }
0x3ab7   :  { %v4952_v28 = vpop.permute.xlu2 %4951 }
0x3ab8   :  { %v4928_v34 = vpop.permute.xlu0 %4927  ;;  %v4980_v30 = vperm.slane %v4952_v28, %v7263_v51 }
0x3ab9   :  { %v4931_v59 = vpop.permute.xlu1 %4930  ;;  %v4968_v29 = vperm.slane %v4928_v34, %v7263_v51 }
0x3aba   :  { %v4969_v11 = vperm.slane %v4931_v59, %v7268_v54 }
0x3abc   :  { %v4970_v52 = vsel %vm549_vm10, %v4969_v11, %v4968_v29 }
0x3abd   :  { %v4987_v57 = vsel %vm574_vm12, %v4970_v52, %v4986_v24 }
0x3abf   :  { %v4961_v60 = vpop.permute.xlu2 %4960 }
0x3ac0   :  { %v4937_v31 = vpop.permute.xlu0 %4936  ;;  %v4984_v59 = vperm.slane %v4961_v60, %v7268_v54 }
0x3ac1   :  { %v4940_v38 = vpop.permute.xlu1 %4939  ;;  %v4972_v33 = vperm.slane %v4937_v31, %v7268_v54 }
0x3ac2   :  { %v4974_v41 = vperm.slane %v4940_v38, %v7263_v51 }
0x3ac3   :  { %v4973_v39 = vsel %vm549_vm10, %v4972_v33, %v4971_v63 }
0x3ac4   :  { %v4976_v25 = vsel %vm549_vm10, %v4975_v47, %v4974_v41  ;;  %v4988_v45 = vsel %vm576_vm13, %v4973_v39, %v4987_v57 }
0x3ac5   :  { %v4989_v10 = vsel %vm578_vm14, %v4976_v25, %v4988_v45 }
0x3ac8   :  { %v4946_v62 = vpop.permute.xlu0 %4945 }
0x3ac9   :  { %v4949_v43 = vpop.permute.xlu1 %4948  ;;  %v4977_v53 = vperm.slane %v4946_v62, %v7263_v51 }
0x3aca   :  { %v4978_v35 = vperm.slane %v4949_v43, %v7268_v54 }
0x3acc   :  { %v4979_v16 = vsel %vm549_vm10, %v4978_v35, %v4977_v53 }
0x3acd   :  { %v4990_v56 = vsel %vm580_vm15, %v4979_v16, %v4989_v10  ;;  %v9884_v10 = vld [vmem:[%s10284_s1 + $0x18] sm:$0xff] }
0x3ad0   :  { %v4955_v6 = vpop.permute.xlu0 %4954 }
0x3ad1   :  { %v4958_v48 = vpop.permute.xlu1 %4957  ;;  %v4981_v34 = vperm.slane %v4955_v6, %v7268_v54 }
0x3ad2   :  { %v4983_v31 = vperm.slane %v4958_v48, %v7263_v51 }
0x3ad3   :  { %v4982_v38 = vsel %vm549_vm10, %v4981_v34, %v4980_v30 }
0x3ad4   :  { %v4985_v23 = vsel %vm549_vm10, %v4984_v59, %v4983_v31  ;;  %v4991_v11 = vsel %vm582_vm2, %v4982_v38, %v4990_v56  ;;  %v9872_v59 = vld [vmem:[%s10284_s1 + $0x10] sm:$0xff]  ;;  %v9890_v56 = vld [vmem:[%s10284_s1] sm:$0xff] }
0x3ad5   :  { %v4992_v29 = vsel %vm584_vm3, %v4985_v23, %v4991_v11 }
0x3ad6   :  { %v4994_v28 = vsel %vm587_vm4, %v4992_v29, 0.0  ;;  %v9897_v29 = vld [vmem:[%s10284_s1 + $0x28] sm:$0xff] }
0x3ad7   :  { %4995 = vadd.xlane.f32.xlu0 %v4994_v28 }
0x3b4a   :  { %v4996_v42 = vpop.xlane.xlu0 %4995 }
0x3b4b   :  { %6440 = vrcp.f32 %v4996_v42 }
0x3b51   :  { %v6441_v22 = vpop.eup %6440 }
0x3b52   :  { %v4998_v33 = vmul.f32 %v6441_v22, %v4996_v42  ;;  %v9903_v42 = vld [vmem:[%s10284_s1 + $0x8] sm:$0xff] }
0x3b54   :  { %v4999_v62 = vsub.f32 2.0, %v4998_v33  ;;  %v9909_v33 = vld [vmem:[%s10284_s1 + $0x38] sm:$0xff] }
0x3b56   :  { %v5000_v43 = vmul.f32 %v6441_v22, %v4999_v62 }
0x3b58   :  { %v5007_v63 = vperm.slane %v5000_v43, 5  ;;  %v5002_v49 = vperm.slane %v5000_v43, 0  ;;  %v5009_v39 = vperm.slane %v5000_v43, 7  ;;  %v5003_v35 = vperm.slane %v5000_v43, 1 }
0x3b59   :  { %v5004_v57 = vperm.slane %v5000_v43, 2  ;;  %v5008_v60 = vperm.slane %v5000_v43, 6 }
0x3b5a   :  { %v5028_v3 = vmul.f32 %v9795_v27, %v5007_v63  ;;  %v5019_v52 = vmul.f32 %v9756_v9, %v5002_v49  ;;  %v5018_v41 = vmul.f32 %v9753_v37, %v5002_v49  ;;  %v5033_v53 = vmul.f32 %v9812_v58, %v5009_v39 }
0x3b5b   :  { %v5021_v24 = vmul.f32 %v9767_v8, %v5003_v35  ;;  %v5020_v47 = vmul.f32 %v9759_v20, %v5003_v35  ;;  %v5023_v27 = vmul.f32 %v9772_v7, %v5004_v57  ;;  %v5022_v9 = vmul.f32 %v9769_v40, %v5004_v57  ;;  %v9922_v57 = vld [vmem:[%s10284_s1 + $0x40] sm:$0xff] }
0x3b5c   :  { %5086 = vperm.xlu0 %6077, %v5028_v3   ;;  %5041 = vperm.xlu2 %6076, %v5019_v52   ;;  %v5005_v37 = vperm.slane %v5000_v43, 3  ;;  %v5006_v8 = vperm.slane %v5000_v43, 4  ;;  %v5030_v7 = vmul.f32 %v9803_v44, %v5008_v60  ;;  %v5029_v40 = vmul.f32 %v9798_v17, %v5007_v63 }
0x3b5d   :  { %5036 = vperm.xlu1 %6075, %v5018_v41  }
0x3b5e   :  { %v5025_v25 = vmul.f32 %v9783_v1, %v5005_v37  ;;  %v5024_v45 = vmul.f32 %v9780_v15, %v5005_v37  ;;  %v5027_v20 = vmul.f32 %v9793_v50, %v5006_v8  ;;  %v5026_v58 = vmul.f32 %v9786_v5, %v5006_v8 }
0x3b5f   :  { %v5032_v1 = vmul.f32 %v9808_v19, %v5009_v39  ;;  %v5031_v15 = vmul.f32 %v9805_v46, %v5008_v60 }
0x3b64   :  { %5111 = vperm.xlu0 %6077, %v5033_v53   ;;  %5051 = vperm.xlu2 %6076, %v5021_v24  }
0x3b65   :  { %5046 = vperm.xlu1 %6075, %v5020_v47  }
0x3b6c   :  { %5061 = vperm.xlu2 %6076, %v5023_v27  }
0x3b6d   :  { %5056 = vperm.xlu1 %6075, %v5022_v9  }
0x3b74   :  { %5071 = vperm.xlu2 %6076, %v5025_v25  }
0x3b75   :  { %5066 = vperm.xlu1 %6075, %v5024_v45   ;;  %v9930_v45 = vld [vmem:[%s10284_s1 + $0x70] sm:$0xff] }
0x3b7c   :  { %5081 = vperm.xlu2 %6076, %v5027_v20  }
0x3b7d   :  { %5076 = vperm.xlu1 %6075, %v5026_v58  }
0x3b84   :  { %5096 = vperm.xlu2 %6076, %v5030_v7  }
0x3b85   :  { %5091 = vperm.xlu1 %6075, %v5029_v40  }
0x3b8c   :  { %5106 = vperm.xlu2 %6076, %v5032_v1  }
0x3b8d   :  { %5101 = vperm.xlu1 %6075, %v5031_v15  }
0x3b94   :  { %5246 = vrot.lane.b32.xlu2 %v9585_v13, %s6924_s21 }
0x3b95   :  { %5218 = vrot.lane.b32.xlu1 %v9628_v18, %s6924_s21  ;;  %v9878_v18 = vld [vmem:[%s10284_s1 + $0x20] sm:$0xff] }
0x3bb6   :  { %v5042_v5 = vpop.permute.xlu2 %5041 }
0x3bb7   :  { %v5115_v22 = vmul.f32 %v9903_v42, %v5042_v5 }
0x3bb9   :  { %v5131_v9 = vsel %vm150_vm0, %v5115_v22, 0.0 }
0x3bbe   :  { %v5052_v50 = vpop.permute.xlu2 %5051 }
0x3bbf   :  { %v5117_v38 = vmul.f32 %v9884_v10, %v5052_v50 }
0x3bc1   :  { %v5140_v52 = vsel %vm150_vm0, %v5117_v38, 0.0  ;;  %v9947_v38 = vld [vmem:[%s10284_s1 + $0x58] sm:$0xff] }
0x3bc6   :  { %v5062_v16 = vpop.permute.xlu2 %5061 }
0x3bc7   :  { %v5119_v28 = vmul.f32 %v9897_v29, %v5062_v16  ;;  %v9940_v16 = vld [vmem:[%s10284_s1 + $0x50] sm:$0xff] }
0x3bc9   :  { %v5149_v53 = vsel %vm150_vm0, %v5119_v28, 0.0 }
0x3bce   :  { %v5072_v6 = vpop.permute.xlu2 %5071  ;;  %v5087_v19 = vpop.permute.xlu0 %5086 }
0x3bcf   :  { %v5037_v44 = vpop.permute.xlu1 %5036  ;;  %v5121_v62 = vmul.f32 %v9909_v33, %v5072_v6 }
0x3bd0   :  { %v5114_v23 = vmul.f32 %v9890_v56, %v5037_v44  ;;  %v5124_v44 = vmul.f32 %v9940_v16, %v5087_v19 }
0x3bd1   :  { %v5158_v37 = vsel %vm150_vm0, %v5121_v62, 0.0 }
0x3bd2   :  { %v5130_v41 = vsel %vm150_vm0, %v5114_v23, 0.0  ;;  %v5175_v28 = vsel %vm150_vm0, %v5124_v44, 0.0 }
0x3bd3   :  { %v5132_v20 = vadd.f32 %v5131_v9, %v5130_v41 }
0x3bd5   :  { %v5133_v6 = vrot.slane %v5132_v20, 4 }
0x3bd6   :  { %v5082_v30 = vpop.permute.xlu2 %5081  ;;  %v5112_v24 = vpop.permute.xlu0 %5111 }
0x3bd7   :  { %v5047_v17 = vpop.permute.xlu1 %5046  ;;  %v5123_v63 = vmul.f32 %v9660_v14, %v5082_v30  ;;  %v5129_v40 = vmul.f32 %v9681_v4, %v5112_v24  ;;  %v5134_v22 = vadd.f32 %v5133_v6, %v5132_v20 }
0x3bd8   :  { %v5116_v13 = vmul.f32 %v9872_v59, %v5047_v17 }
0x3bd9   :  { %v5167_v58 = vsel %vm150_vm0, %v5123_v63, 0.0  ;;  %v5194_v30 = vsel %vm150_vm0, %v5129_v40, 0.0 }
0x3bda   :  { %v5139_v43 = vsel %vm150_vm0, %v5116_v13, 0.0 }
0x3bdb   :  { %v5141_v47 = vadd.f32 %v5140_v52, %v5139_v43 }
0x3bdd   :  { %v5142_v15 = vrot.slane %v5141_v47, 4 }
0x3bde   :  { %v9867_v34 = vpop.permute.xlu2 %5096 }
0x3bdf   :  { %v5057_v48 = vpop.permute.xlu1 %5056  ;;  %v5143_v13 = vadd.f32 %v5142_v15, %v5141_v47 }
0x3be0   :  { %v5118_v31 = vmul.f32 %v9878_v18, %v5057_v48 }
0x3be2   :  { %v5148_v49 = vsel %vm150_vm0, %v5118_v31, 0.0 }
0x3be3   :  { %v5150_v25 = vadd.f32 %v5149_v53, %v5148_v49  ;;  %v5144_v49 = vrot.slane %v5143_v13, 2 }
0x3be5   :  { %v5151_v5 = vrot.slane %v5150_v25, 4  ;;  %v5145_v9 = vadd.f32 %v5144_v49, %v5143_v13 }
0x3be6   :  { %v5107_v3 = vpop.permute.xlu2 %5106 }
0x3be7   :  { %v5067_v46 = vpop.permute.xlu1 %5066  ;;  %v5128_v8 = vmul.f32 %v9930_v45, %v5107_v3 }
0x3be8   :  { %v5120_v11 = vmul.f32 %v9649_v55, %v5067_v46 }
0x3be9   :  { %v5193_v50 = vsel %vm150_vm0, %v5128_v8, 0.0 }
0x3bea   :  { %v5157_v39 = vsel %vm150_vm0, %v5120_v11, 0.0  ;;  %v5195_v31 = vadd.f32 %v5194_v30, %v5193_v50  ;;  %v5152_v11 = vadd.f32 %v5151_v5, %v5150_v25  ;;  %v9957_v25 = vld [vmem:[%s10284_s1 + $0x68] sm:$0xff]  ;;  %v5146_v5 = vrot.slane %v5145_v9, 1 }
0x3beb   :  { %v5159_v60 = vadd.f32 %v5158_v37, %v5157_v39  ;;  %v5135_v39 = vrot.slane %v5134_v22, 2 }
0x3bec   :  { %v5196_v3 = vrot.slane %v5195_v31, 4  ;;  %v5153_v52 = vrot.slane %v5152_v11, 2 }
0x3bed   :  { %v5160_v17 = vrot.slane %v5159_v60, 4 }
0x3bee   :  { %v5197_v37 = vadd.f32 %v5196_v3, %v5195_v31  ;;  %v5154_v20 = vadd.f32 %v5153_v52, %v5152_v11  ;;  %v5147_v31 = vadd.f32 %v5146_v5, %v5145_v9 }
0x3bef   :  { %v5077_v35 = vpop.permute.xlu1 %5076  ;;  %v5161_v19 = vadd.f32 %v5160_v17, %v5159_v60  ;;  %v5136_v60 = vadd.f32 %v5135_v39, %v5134_v22 }
0x3bf0   :  { %v5122_v27 = vmul.f32 %v9922_v57, %v5077_v35  ;;  %v5126_v35 = vmul.f32 %v9671_v61, %v9867_v34  ;;  %v5198_v50 = vrot.slane %v5197_v37, 2  ;;  %v5155_v6 = vrot.slane %v5154_v20, 1 }
0x3bf1   :  { %v5162_v53 = vrot.slane %v5161_v19, 2  ;;  %v5137_v30 = vrot.slane %v5136_v60, 1 }
0x3bf2   :  { %v5166_v7 = vsel %vm150_vm0, %v5122_v27, 0.0 }
0x3bf3   :  { %v5168_v1 = vadd.f32 %v5167_v58, %v5166_v7  ;;  %v5184_v7 = vsel %vm150_vm0, %v5126_v35, 0.0  ;;  %v5163_v40 = vadd.f32 %v5162_v53, %v5161_v19 }
0x3bf5   :  { %v5169_v48 = vrot.slane %v5168_v1, 4 }
0x3bf7   :  { %v5092_v46 = vpop.permute.xlu1 %5091  ;;  %v5170_v43 = vadd.f32 %v5169_v48, %v5168_v1  ;;  %v5164_v48 = vrot.slane %v5163_v40, 1 }
0x3bf8   :  { %v5125_v23 = vmul.f32 %v9947_v38, %v5092_v46 }
0x3bf9   :  { %v5171_v24 = vrot.slane %v5170_v43, 2  ;;  %v5165_v19 = vadd.f32 %v5164_v48, %v5163_v40 }
0x3bfa   :  { %v5176_v62 = vsel %vm150_vm0, %v5125_v23, 0.0  ;;  %v5199_v23 = vadd.f32 %v5198_v50, %v5197_v37 }
0x3bfb   :  { %v5177_v63 = vadd.f32 %v5176_v62, %v5175_v28  ;;  %v5172_v1 = vadd.f32 %v5171_v24, %v5170_v43  ;;  %v5156_v28 = vadd.f32 %v5155_v6, %v5154_v20  ;;  %v5138_v62 = vadd.f32 %v5137_v30, %v5136_v60 }
0x3bfc   :  { %v5200_v3 = vrot.slane %v5199_v23, 1 }
0x3bfd   :  { %v5178_v41 = vrot.slane %v5177_v63, 4  ;;  %v5173_v46 = vrot.slane %v5172_v1, 1  ;;  %v5210_v43 = vsel %vm572_vm11, %v5147_v31, %v5138_v62 }
0x3bff   :  { %v5179_v47 = vadd.f32 %v5178_v41, %v5177_v63  ;;  %v5102_v27 = vpop.permute.xlu1 %5101  ;;  %v5174_v63 = vadd.f32 %v5173_v46, %v5172_v1  ;;  %v5211_v41 = vsel %vm574_vm12, %v5156_v28, %v5210_v43 }
0x3c00   :  { %v5127_v8 = vmul.f32 %v9957_v25, %v5102_v27  ;;  %v5212_v35 = vsel %vm576_vm13, %v5165_v19, %v5211_v41 }
0x3c01   :  { %v5180_v58 = vrot.slane %v5179_v47, 2  ;;  %v5213_v24 = vsel %vm578_vm14, %v5174_v63, %v5212_v35 }
0x3c02   :  { %v5185_v34 = vsel %vm150_vm0, %v5127_v8, 0.0 }
0x3c03   :  { %v5186_v15 = vadd.f32 %v5185_v34, %v5184_v7  ;;  %v5181_v44 = vadd.f32 %v5180_v58, %v5179_v47  ;;  %v5201_v47 = vadd.f32 %v5200_v3, %v5199_v23  ;;  %v5247_v7 = vpop.permute.xlu2 %5246  ;;  %v10329_v34 = vld [vmem:[#allocation24_spill] sm:$0xff] }
0x3c04   :  { %v214_v1 = vadd.f32 %v9574_v0, %v10329_v34 }
0x3c05   :  { %v5187_v17 = vrot.slane %v5186_v15, 4  ;;  %v5182_v11 = vrot.slane %v5181_v44, 1 }
0x3c07   :  { %v5188_v13 = vadd.f32 %v5187_v17, %v5186_v15  ;;  %v5183_v52 = vadd.f32 %v5182_v11, %v5181_v44  ;;  %v5219_v8 = vpop.permute.xlu1 %5218 }
0x3c09   :  { %v5189_v22 = vrot.slane %v5188_v13, 2  ;;  %v5214_v27 = vsel %vm580_vm15, %v5183_v52, %v5213_v24 }
0x3c0b   :  { %v5190_v49 = vadd.f32 %v5189_v22, %v5188_v13 }
0x3c0d   :  { %v5191_v39 = vrot.slane %v5190_v49, 1 }
0x3c0f   :  { %v5192_v53 = vadd.f32 %v5191_v39, %v5190_v49 }
0x3c11   :  { %v5215_v9 = vsel %vm582_vm2, %v5192_v53, %v5214_v27 }
0x3c12   :  { %v5216_v37 = vsel %vm584_vm3, %v5201_v47, %v5215_v9 }
0x3c13   :  { %v5221_v20 = vsel %vm150_vm0, %v5216_v37, %v5219_v8 }
0x3c14   :  { %6055 = vmatmul.msk.f32.vlgmr.msra.gmra.mxu2 %vm273_vm1, %v5221_v20 }
0x3c97   :  { %v5242_v58 = vpop.f32.mrf.mxu2 }
0x3c98   :  { %6442 = vtanh.f32 %v5242_v58 }
0x3c9e   :  { %v9971_v60 = vpop.eup %6442 }
0x3c9f   :  { %v5249_v40 = vsel %vm150_vm0, %v9971_v60, %v5247_v7 }
0x3ca0   :  { %6056 = vmatmul.msk.f32.vlgmr.msra.gmra.mxu3 %vm273_vm1, %v5249_v40 }
0x3d23   :  { %v5270_v15 = vpop.f32.mrf.mxu3 }
0x3d24   :  { %v5273_v5 = vadd.f32 %v5270_v15, %v214_v1 }
0x3d26   :  { %6444 = vtanh.f32 %v5273_v5  ;;  %v6057_v44 = vmul.f32 -1.442695, %v5273_v5 }
0x3d28   :  { %6446 = vpow2.f32 %v6057_v44 }
0x3d2c   :  { %v6445_v50 = vpop.eup %6444 }
0x3d2d   :  { %5296 = vrot.lane.b32.xlu0 %v6445_v50, %s6924_s21 }
0x3d2e   :  { %v6447_v6 = vpop.eup %6446 }
0x3d2f   :  { %v5277_v17 = vadd.f32 1.0, %v6447_v6 }
0x3d31   :  { %6448 = vrcp.f32 %v5277_v17  ;;  %v5289_v23 = vand.u32 2147483648, %v5277_v17  ;;  %vm5283_vm9 = vweird.f32 %v5277_v17  ;;  %v5287_v0 = vand.u32 2147483647, %v5277_v17 }
0x3d33   :  { %v5290_v28 = vor.u32 1.1754944e-38, %v5289_v23  ;;  %vm5288_vm6 = vcmp.eq.f32.partialorder %v5287_v0, 8.507059e+37 }
0x3d37   :  { %v6449_v30 = vpop.eup %6448 }
0x3d38   :  { %v5279_v48 = vmul.f32 %v6449_v30, %v5277_v17  ;;  %vm5284_vm8 = vweird.f32 %v6449_v30 }
0x3d39   :  { %vm5285_vm5 = vmor %vm5283_vm9, %vm5284_vm8 }
0x3d3a   :  { %v5280_v46 = vsub.f32 1.0, %v5279_v48 }
0x3d3c   :  { %v5281_v13 = vmul.f32 %v6449_v30, %v5280_v46 }
0x3d3e   :  { %v5282_v31 = vadd.f32 %v6449_v30, %v5281_v13 }
0x3d40   :  { %v5286_v11 = vsel %vm5285_vm5, %v6449_v30, %v5282_v31 }
0x3d41   :  { %v5291_v62 = vsel %vm5288_vm6, %v5290_v28, %v5286_v11 }
0x3d42   :  { %v5294_v63 = vmul.f32 %v5291_v62, %v9581_v26 }
0x3d9f   :  { %v5297_v22 = vpop.permute.xlu0 %5296 }
0x3da0   :  { %v5299_v19 = vmul.f32 %v5297_v22, %v5291_v62 }
0x3da2   :  { %5301 = vrot.lane.b32.xlu1 %v5299_v19, %s6923_s8 }
0x3e14   :  { %v5302_v49 = vpop.permute.xlu1 %5301 }
0x3e15   :  { %v5304_v43 = vadd.f32 %v5302_v49, %v5294_v63 }
0x3e17   :  { %6450 = vtanh.f32 %v5304_v43 }
0x3e1d   :  { %v6451_v3 = vpop.eup %6450 }
0x3e1e   :  { %5307 = vrot.lane.b32.xlu2 %v6451_v3, %s6924_s21 }
0x3e78   :  { %v5308_v52 = vpop.permute.xlu2 %5307 }
0x3e79   :  { %v5310_v41 = vmul.f32 %v5308_v52, %v5291_v62 }
0x3e7b   :  { %5312 = vrot.lane.b32.xlu0 %v5310_v41, %s6923_s8 }
0x3eed   :  { %v5313_v39 = vpop.permute.xlu0 %5312 }
0x3eee   :  { %v5315_v35 = vsel %vm150_vm0, %v5313_v39, %v5219_v8 }
0x3eef   :  { %6058 = vmatmul.msk.f32.vlgmr.msrb.gmra.mxu0 %vm273_vm1, %v5315_v35 }
0x3f6c   :  { %v5336_v53 = vpop.f32.mrf.mxu0 }
0x3f6d   :  { %v5337_v24 = vadd.f32 %v9618_v2, %v5336_v53 }
0x3f6f   :  { %6452 = vtanh.f32 %v5337_v24  ;;  %v6059_v47 = vmul.f32 -1.442695, %v5337_v24 }
0x3f71   :  { %6454 = vpow2.f32 %v6059_v47 }
0x3f75   :  { %v6453_v26 = vpop.eup %6452 }
0x3f76   :  { %5361 = vrot.lane.b32.xlu1 %v6453_v26, %s6924_s21 }
0x3f77   :  { %v6455_v27 = vpop.eup %6454 }
0x3f78   :  { %v5342_v9 = vadd.f32 1.0, %v6455_v27 }
0x3f7a   :  { %6456 = vrcp.f32 %v5342_v9  ;;  %v5354_v8 = vand.u32 2147483648, %v5342_v9  ;;  %vm5348_vm8 = vweird.f32 %v5342_v9  ;;  %v5352_v34 = vand.u32 2147483647, %v5342_v9 }
0x3f7c   :  { %v5355_v1 = vor.u32 1.1754944e-38, %v5354_v8  ;;  %vm5353_vm5 = vcmp.eq.f32.partialorder %v5352_v34, 8.507059e+37 }
0x3f80   :  { %v6457_v37 = vpop.eup %6456 }
0x3f81   :  { %v5344_v20 = vmul.f32 %v6457_v37, %v5342_v9  ;;  %vm5349_vm7 = vweird.f32 %v6457_v37 }
0x3f82   :  { %vm5350_vm9 = vmor %vm5348_vm8, %vm5349_vm7 }
0x3f83   :  { %v5345_v58 = vsub.f32 1.0, %v5344_v20 }
0x3f85   :  { %v5346_v7 = vmul.f32 %v6457_v37, %v5345_v58 }
0x3f87   :  { %v5347_v40 = vadd.f32 %v6457_v37, %v5346_v7 }
0x3f89   :  { %v5351_v2 = vsel %vm5350_vm9, %v6457_v37, %v5347_v40 }
0x3f8a   :  { %v5356_v5 = vsel %vm5353_vm5, %v5355_v1, %v5351_v2 }
0x3f8b   :  { %v5359_v44 = vmul.f32 %v5356_v5, %v9624_v36 }
0x3fe8   :  { %v5362_v15 = vpop.permute.xlu1 %5361 }
0x3fe9   :  { %v5364_v50 = vmul.f32 %v5362_v15, %v5356_v5 }
0x3feb   :  { %5366 = vrot.lane.b32.xlu2 %v5364_v50, %s6923_s8 }
0x4045   :  { %v5367_v6 = vpop.permute.xlu2 %5366 }
0x4046   :  { %v5369_v17 = vadd.f32 %v5367_v6, %v5359_v44 }
0x4048   :  { %6458 = vtanh.f32 %v5369_v17 }
0x404e   :  { %v6459_v30 = vpop.eup %6458 }
0x404f   :  { %5372 = vrot.lane.b32.xlu0 %v6459_v30, %s6924_s21 }
0x40c1   :  { %v5373_v48 = vpop.permute.xlu0 %5372 }
0x40c2   :  { %v9990_v46 = vmul.f32 %v5373_v48, %v5356_v5 }
0x40c4   :  { %5377 = vrot.lane.b32.xlu1 %v9990_v46, %s6923_s8 }
0x4136   :  { %v5378_v13 = vpop.permute.xlu1 %5377 }
0x4137   :  { %6060 = vmatmul.msk.f32.vlgmr.msrb.gmra.mxu1 %vm150_vm0, %v5378_v13 }
0x41b4   :  { %v5398_v31 = vpop.f32.mrf.mxu1 }
0x41b5   :  { %v5409_v23 = vperm.slane %v5398_v31, 0  ;;  %v5402_v0 = vrot.slane %v5398_v31, 1  ;;  %v5403_v11 = vrot.slane %v5398_v31, 2  ;;  %v5404_v41 = vrot.slane %v5398_v31, 3 }
0x41b6   :  { %v5405_v35 = vrot.slane %v5398_v31, 4  ;;  %v5406_v20 = vrot.slane %v5398_v31, 5  ;;  %v5407_v15 = vrot.slane %v5398_v31, 6  ;;  %v5408_v5 = vrot.slane %v5398_v31, 7 }
0x41b7   :  { %v5426_v36 = vmul.f32 %v9903_v42, %v5409_v23  ;;  %v5425_v28 = vmul.f32 %v9890_v56, %v5409_v23  ;;  %v5410_v22 = vperm.slane %v5402_v0, 0  ;;  %v5411_v49 = vperm.slane %v5403_v11, 0 }
0x41b8   :  { %v5412_v26 = vperm.slane %v5404_v41, 0  ;;  %v5413_v27 = vperm.slane %v5405_v35, 0  ;;  %v5414_v8 = vperm.slane %v5406_v20, 0  ;;  %v5415_v6 = vperm.slane %v5407_v15, 0 }
0x41b9   :  { %v5444_v62 = vsel %vm150_vm0, %v5426_v36, 0.0  ;;  %v5441_v19 = vsel %vm150_vm0, %v5425_v28, 0.0  ;;  %v5427_v63 = vmul.f32 %v9872_v59, %v5410_v22  ;;  %v5429_v3 = vmul.f32 %v9878_v18, %v5411_v49 }
0x41ba   :  { %5445 = vadd.xlane.f32.xlu0 %v5444_v62  ;;  %5442 = vadd.xlane.f32.xlu2 %v5441_v19  ;;  %v5428_v52 = vmul.f32 %v9884_v10, %v5410_v22  ;;  %v5430_v39 = vmul.f32 %v9897_v29, %v5411_v49  ;;  %v5432_v9 = vmul.f32 %v9909_v33, %v5412_v26  ;;  %v5416_v30 = vperm.slane %v5408_v5, 0 }
0x41bb   :  { %v5447_v43 = vsel %vm150_vm0, %v5427_v63, 0.0  ;;  %v5453_v53 = vsel %vm150_vm0, %v5429_v3, 0.0  ;;  %v5431_v37 = vmul.f32 %v9649_v55, %v5412_v26  ;;  %v5433_v58 = vmul.f32 %v9922_v57, %v5413_v27 }
0x41bc   :  { %5448 = vadd.xlane.f32.xlu1 %v5447_v43  ;;  %v5450_v24 = vsel %vm150_vm0, %v5428_v52, 0.0  ;;  %v5456_v47 = vsel %vm150_vm0, %v5430_v39, 0.0  ;;  %v5462_v7 = vsel %vm150_vm0, %v5432_v9, 0.0  ;;  %v5435_v2 = vmul.f32 %v9940_v16, %v5414_v8 }
0x41bd   :  { %v5459_v40 = vsel %vm150_vm0, %v5431_v37, 0.0  ;;  %v5465_v34 = vsel %vm150_vm0, %v5433_v58, 0.0  ;;  %v5434_v1 = vmul.f32 %v9660_v14, %v5413_v27  ;;  %v5436_v55 = vmul.f32 %v9947_v38, %v5414_v8 }
0x41be   :  { %v5471_v50 = vsel %vm150_vm0, %v5435_v2, 0.0  ;;  %v5438_v48 = vmul.f32 %v9957_v25, %v5415_v6  ;;  %v5437_v13 = vmul.f32 %v9671_v61, %v5415_v6  ;;  %v5439_v14 = vmul.f32 %v9930_v45, %v5416_v30 }
0x41bf   :  { %v5468_v44 = vsel %vm150_vm0, %v5434_v1, 0.0  ;;  %v5474_v17 = vsel %vm150_vm0, %v5436_v55, 0.0  ;;  %v5440_v11 = vmul.f32 %v9681_v4, %v5416_v30 }
0x41c0   :  { %v5480_v23 = vsel %vm150_vm0, %v5438_v48, 0.0  ;;  %v5477_v31 = vsel %vm150_vm0, %v5437_v13, 0.0  ;;  %v5483_v0 = vsel %vm150_vm0, %v5439_v14, 0.0 }
0x41c1   :  { %v5486_v36 = vsel %vm150_vm0, %v5440_v11, 0.0 }
0x41c2   :  { %5454 = vadd.xlane.f32.xlu0 %v5453_v53  ;;  %5451 = vadd.xlane.f32.xlu2 %v5450_v24 }
0x41c4   :  { %5457 = vadd.xlane.f32.xlu1 %v5456_v47 }
0x41ca   :  { %5463 = vadd.xlane.f32.xlu0 %v5462_v7  ;;  %5460 = vadd.xlane.f32.xlu2 %v5459_v40 }
0x41cc   :  { %5466 = vadd.xlane.f32.xlu1 %v5465_v34 }
0x41d2   :  { %5472 = vadd.xlane.f32.xlu0 %v5471_v50  ;;  %5469 = vadd.xlane.f32.xlu2 %v5468_v44 }
0x41d4   :  { %5475 = vadd.xlane.f32.xlu1 %v5474_v17 }
0x41da   :  { %5481 = vadd.xlane.f32.xlu0 %v5480_v23  ;;  %5478 = vadd.xlane.f32.xlu2 %v5477_v31 }
0x41dc   :  { %5484 = vadd.xlane.f32.xlu1 %v5483_v0 }
0x41e2   :  { %5487 = vadd.xlane.f32.xlu2 %v5486_v36 }
0x422d   :  { %v5446_v28 = vpop.xlane.xlu0 %5445  ;;  %v5443_v22 = vpop.xlane.xlu2 %5442 }
0x422e   :  { %v5506_v39 = vperm.slane %v5446_v28, %v7268_v54  ;;  %v5505_v35 = vperm.slane %v5443_v22, %v7263_v51 }
0x422f   :  { %v5449_v62 = vpop.xlane.xlu1 %5448 }
0x4230   :  { %v5508_v53 = vperm.slane %v5449_v62, %v7263_v51  ;;  %v5507_v58 = vsel %vm549_vm10, %v5506_v39, %v5505_v35 }
0x4235   :  { %v5455_v61 = vpop.xlane.xlu0 %5454  ;;  %v5452_v19 = vpop.xlane.xlu2 %5451 }
0x4236   :  { %v5509_v4 = vperm.slane %v5452_v19, %v7268_v54  ;;  %v5511_v9 = vperm.slane %v5455_v61, %v7263_v51 }
0x4237   :  { %v5458_v45 = vpop.xlane.xlu1 %5457 }
0x4238   :  { %v5512_v24 = vperm.slane %v5458_v45, %v7268_v54  ;;  %v5510_v26 = vsel %vm549_vm10, %v5509_v4, %v5508_v53 }
0x4239   :  { %v5529_v40 = vsel %vm572_vm11, %v5510_v26, %v5507_v58 }
0x423a   :  { %v5513_v8 = vsel %vm549_vm10, %v5512_v24, %v5511_v9 }
0x423b   :  { %v5530_v50 = vsel %vm574_vm12, %v5513_v8, %v5529_v40 }
0x423d   :  { %v10027_v63 = vpop.xlane.xlu0 %5463  ;;  %v10029_v49 = vpop.xlane.xlu2 %5460 }
0x423e   :  { %v5515_v47 = vperm.slane %v10027_v63, %v7268_v54  ;;  %v5514_v27 = vperm.slane %v10029_v49, %v7263_v51 }
0x423f   :  { %v10031_v43 = vpop.xlane.xlu1 %5466 }
0x4240   :  { %v5517_v34 = vperm.slane %v10031_v43, %v7263_v51  ;;  %v5516_v2 = vsel %vm549_vm10, %v5515_v47, %v5514_v27 }
0x4241   :  { %v5531_v6 = vsel %vm576_vm13, %v5516_v2, %v5530_v50 }
0x4245   :  { %v10033_v3 = vpop.xlane.xlu0 %5472  ;;  %v10035_v52 = vpop.xlane.xlu2 %5469 }
0x4246   :  { %v5518_v37 = vperm.slane %v10035_v52, %v7268_v54  ;;  %v5520_v44 = vperm.slane %v10033_v3, %v7263_v51 }
0x4247   :  { %v10038_v41 = vpop.xlane.xlu1 %5475 }
0x4248   :  { %v5521_v1 = vperm.slane %v10038_v41, %v7268_v54  ;;  %v5519_v15 = vsel %vm549_vm10, %v5518_v37, %v5517_v34 }
0x4249   :  { %v5532_v30 = vsel %vm578_vm14, %v5519_v15, %v5531_v6 }
0x424a   :  { %v5522_v48 = vsel %vm549_vm10, %v5521_v1, %v5520_v44 }
0x424b   :  { %v5533_v0 = vsel %vm580_vm15, %v5522_v48, %v5532_v30 }
0x424d   :  { %v10052_v20 = vpop.xlane.xlu2 %5478  ;;  %v10055_v7 = vpop.xlane.xlu0 %5481 }
0x424e   :  { %v5524_v55 = vperm.slane %v10055_v7, %v7268_v54  ;;  %v5523_v5 = vperm.slane %v10052_v20, %v7263_v51 }
0x424f   :  { %v10073_v17 = vpop.xlane.xlu1 %5484 }
0x4250   :  { %v5525_v13 = vsel %vm549_vm10, %v5524_v55, %v5523_v5  ;;  %v5526_v23 = vperm.slane %v10073_v17, %v7263_v51 }
0x4251   :  { %v5534_v36 = vsel %vm582_vm2, %v5525_v13, %v5533_v0 }
0x4255   :  { %v10078_v14 = vpop.xlane.xlu2 %5487 }
0x4256   :  { %v5527_v31 = vperm.slane %v10078_v14, %v7268_v54 }
0x4258   :  { %v5528_v11 = vsel %vm549_vm10, %v5527_v31, %v5526_v23 }
0x4259   :  { %v5535_v4 = vsel %vm584_vm3, %v5528_v11, %v5534_v36 }
0x425a   :  { %v5537_v39 = vsel %vm587_vm4, %v5535_v4, -inf }
0x425b   :  { %5538 = vmax.xlane.f32.xlu0 %v5537_v39 }
0x42ce   :  { %v10089_v35 = vpop.xlane.xlu0 %5538 }
0x42cf   :  { %v5541_v53 = vperm.slane %v10089_v35, 0  ;;  %v5542_v24 = vperm.slane %v10089_v35, 1  ;;  %v5543_v9 = vperm.slane %v10089_v35, 2  ;;  %v5544_v1 = vperm.slane %v10089_v35, 3 }
0x42d0   :  { %v5546_v44 = vperm.slane %v10089_v35, 5  ;;  %v5547_v0 = vperm.slane %v10089_v35, 6  ;;  %v5548_v39 = vperm.slane %v10089_v35, 7 }
0x42d1   :  { %v5557_v26 = vsub.f32 %v5443_v22, %v5541_v53  ;;  %v5558_v47 = vsub.f32 %v5446_v28, %v5541_v53  ;;  %v5559_v27 = vsub.f32 %v5449_v62, %v5542_v24  ;;  %v5561_v8 = vsub.f32 %v5455_v61, %v5543_v9 }
0x42d2   :  { %v5560_v34 = vsub.f32 %v5452_v19, %v5542_v24  ;;  %v5562_v2 = vsub.f32 %v5458_v45, %v5543_v9  ;;  %v5545_v28 = vperm.slane %v10089_v35, 4  ;;  %v5564_v61 = vsub.f32 %v10027_v63, %v5544_v1 }
0x42d3   :  { %v5573_v37 = vmul.f32 1.442695, %v5557_v26  ;;  %v5575_v58 = vmul.f32 1.442695, %v5558_v47  ;;  %v5577_v40 = vmul.f32 1.442695, %v5559_v27  ;;  %v5563_v19 = vsub.f32 %v10029_v49, %v5544_v1 }
0x42d4   :  { %v5581_v15 = vmul.f32 1.442695, %v5561_v8  ;;  %v5579_v55 = vmul.f32 1.442695, %v5560_v34  ;;  %v5583_v22 = vmul.f32 1.442695, %v5562_v2  ;;  %v5565_v45 = vsub.f32 %v10031_v43, %v5545_v28 }
0x42d5   :  { %6460 = vpow2.f32 %v5573_v37  ;;  %v5587_v6 = vmul.f32 1.442695, %v5564_v61  ;;  %v5585_v30 = vmul.f32 1.442695, %v5563_v19  ;;  %v5567_v49 = vsub.f32 %v10033_v3, %v5546_v44 }
0x42d6   :  { %6462 = vpow2.f32 %v5575_v58  ;;  %v5589_v13 = vmul.f32 1.442695, %v5565_v45  ;;  %v5566_v43 = vsub.f32 %v10035_v52, %v5545_v28  ;;  %v5568_v31 = vsub.f32 %v10038_v41, %v5546_v44 }
0x42d7   :  { %6464 = vpow2.f32 %v5577_v40  ;;  %v5593_v11 = vmul.f32 1.442695, %v5567_v49  ;;  %v5570_v24 = vsub.f32 %v10055_v7, %v5547_v0  ;;  %v5569_v41 = vsub.f32 %v10052_v20, %v5547_v0 }
0x42d8   :  { %6466 = vpow2.f32 %v5581_v15  ;;  %v5591_v36 = vmul.f32 1.442695, %v5566_v43  ;;  %v5595_v3 = vmul.f32 1.442695, %v5568_v31  ;;  %v5571_v26 = vsub.f32 %v10073_v17, %v5548_v39 }
0x42d9   :  { %6468 = vpow2.f32 %v5579_v55  ;;  %v5599_v35 = vmul.f32 1.442695, %v5570_v24  ;;  %v5597_v47 = vmul.f32 1.442695, %v5569_v41  ;;  %v5572_v20 = vsub.f32 %v10078_v14, %v5548_v39 }
0x42da   :  { %6470 = vpow2.f32 %v5583_v22  ;;  %v5601_v9 = vmul.f32 1.442695, %v5571_v26 }
0x42db   :  { %v10095_v5 = vpop.eup %6460  ;;  %6472 = vpow2.f32 %v5587_v6  ;;  %v5603_v17 = vmul.f32 1.442695, %v5572_v20 }
0x42dc   :  { %v10098_v62 = vpop.eup %6462  ;;  %5622 = vperm.xlu1 %6075, %v10095_v5   ;;  %6474 = vpow2.f32 %v5585_v30 }
0x42dd   :  { %v10101_v50 = vpop.eup %6464  ;;  %5625 = vperm.xlu2 %6076, %v10098_v62   ;;  %6476 = vpow2.f32 %v5589_v13 }
0x42de   :  { %5628 = vperm.xlu0 %6077, %v10101_v50   ;;  %v10109_v48 = vpop.eup %6466  ;;  %6478 = vpow2.f32 %v5593_v11 }
0x42df   :  { %v10111_v23 = vpop.eup %6468  ;;  %6480 = vpow2.f32 %v5591_v36 }
0x42e0   :  { %v10114_v63 = vpop.eup %6470  ;;  %6482 = vpow2.f32 %v5595_v3 }
0x42e1   :  { %v10122_v4 = vpop.eup %6472  ;;  %6484 = vpow2.f32 %v5599_v35 }
0x42e2   :  { %v10125_v53 = vpop.eup %6474  ;;  %6486 = vpow2.f32 %v5597_v47 }
0x42e3   :  { %v10128_v52 = vpop.eup %6476  ;;  %6488 = vpow2.f32 %v5601_v9 }
0x42e4   :  { %5634 = vperm.xlu1 %6075, %v10109_v48   ;;  %v10135_v27 = vpop.eup %6478  ;;  %6490 = vpow2.f32 %v5603_v17 }
0x42e5   :  { %5631 = vperm.xlu2 %6076, %v10111_v23   ;;  %v10137_v37 = vpop.eup %6480 }
0x42e6   :  { %5637 = vperm.xlu0 %6077, %v10114_v63   ;;  %v10140_v7 = vpop.eup %6482 }
0x42e7   :  { %v10145_v58 = vpop.eup %6484 }
0x42e8   :  { %v10147_v40 = vpop.eup %6486 }
0x42e9   :  { %v10150_v8 = vpop.eup %6488 }
0x42ea   :  { %v10154_v34 = vpop.eup %6490 }
0x42ec   :  { %5643 = vperm.xlu1 %6075, %v10122_v4  }
0x42ed   :  { %5640 = vperm.xlu2 %6076, %v10125_v53  }
0x42ee   :  { %5646 = vperm.xlu0 %6077, %v10128_v52  }
0x42f4   :  { %5652 = vperm.xlu1 %6075, %v10135_v27  }
0x42f5   :  { %5649 = vperm.xlu2 %6076, %v10137_v37  }
0x42f6   :  { %5655 = vperm.xlu0 %6077, %v10140_v7  }
0x42fc   :  { %5661 = vperm.xlu1 %6075, %v10145_v58  }
0x42fd   :  { %5658 = vperm.xlu2 %6076, %v10147_v40  }
0x42fe   :  { %5664 = vperm.xlu0 %6077, %v10150_v8  }
0x4305   :  { %5667 = vperm.xlu2 %6076, %v10154_v34  }
0x4337   :  { %v5626_v14 = vpop.permute.xlu2 %5625 }
0x4338   :  { %v5670_v43 = vperm.slane %v5626_v14, %v7268_v54 }
0x433f   :  { %v5632_v2 = vpop.permute.xlu2 %5631 }
0x4340   :  { %v5673_v31 = vperm.slane %v5632_v2, %v7268_v54 }
0x4347   :  { %v5641_v15 = vpop.permute.xlu2 %5640 }
0x4348   :  { %v5678_v36 = vperm.slane %v5641_v15, %v7263_v51 }
0x434e   :  { %v5623_v1 = vpop.permute.xlu1 %5622 }
0x434f   :  { %v5650_v61 = vpop.permute.xlu2 %5649  ;;  %v5669_v6 = vperm.slane %v5623_v1, %v7263_v51 }
0x4350   :  { %v5629_v55 = vpop.permute.xlu0 %5628  ;;  %v5682_v20 = vperm.slane %v5650_v61, %v7268_v54 }
0x4351   :  { %v5672_v44 = vperm.slane %v5629_v55, %v7263_v51  ;;  %v5671_v3 = vsel %vm549_vm10, %v5670_v43, %v5669_v6 }
0x4353   :  { %v5674_v39 = vsel %vm549_vm10, %v5673_v31, %v5672_v44 }
0x4354   :  { %v5693_v17 = vsel %vm572_vm11, %v5674_v39, %v5671_v3 }
0x4356   :  { %v5635_v28 = vpop.permute.xlu1 %5634 }
0x4357   :  { %v5659_v30 = vpop.permute.xlu2 %5658  ;;  %v5675_v49 = vperm.slane %v5635_v28, %v7263_v51 }
0x4358   :  { %v5638_v22 = vpop.permute.xlu0 %5637 }
0x4359   :  { %v5676_v13 = vperm.slane %v5638_v22, %v7268_v54  ;;  %v5687_v22 = vperm.slane %v5659_v30, %v7263_v51 }
0x435b   :  { %v5677_v41 = vsel %vm549_vm10, %v5676_v13, %v5675_v49 }
0x435c   :  { %v5694_v14 = vsel %vm574_vm12, %v5677_v41, %v5693_v17 }
0x435e   :  { %v5644_v19 = vpop.permute.xlu1 %5643 }
0x435f   :  { %v5679_v0 = vperm.slane %v5644_v19, %v7268_v54  ;;  %v5668_v15 = vpop.permute.xlu2 %5667 }
0x4360   :  { %v5647_v45 = vpop.permute.xlu0 %5646  ;;  %v5691_v61 = vperm.slane %v5668_v15, %v7268_v54 }
0x4361   :  { %v5681_v26 = vperm.slane %v5647_v45, %v7263_v51  ;;  %v5680_v35 = vsel %vm549_vm10, %v5679_v0, %v5678_v36 }
0x4362   :  { %v5695_v1 = vsel %vm576_vm13, %v5680_v35, %v5694_v14 }
0x4363   :  { %v5683_v2 = vsel %vm549_vm10, %v5682_v20, %v5681_v26 }
0x4364   :  { %v5696_v44 = vsel %vm578_vm14, %v5683_v2, %v5695_v1 }
0x4366   :  { %v5653_v11 = vpop.permute.xlu1 %5652 }
0x4367   :  { %v5684_v9 = vperm.slane %v5653_v11, %v7263_v51 }
0x4368   :  { %v5656_v24 = vpop.permute.xlu0 %5655 }
0x4369   :  { %v5685_v47 = vperm.slane %v5656_v24, %v7268_v54 }
0x436b   :  { %v5686_v55 = vsel %vm549_vm10, %v5685_v47, %v5684_v9 }
0x436c   :  { %v5697_v49 = vsel %vm580_vm15, %v5686_v55, %v5696_v44 }
0x436e   :  { %v5662_v28 = vpop.permute.xlu1 %5661 }
0x436f   :  { %v5688_v19 = vperm.slane %v5662_v28, %v7268_v54 }
0x4370   :  { %v5665_v45 = vpop.permute.xlu0 %5664 }
0x4371   :  { %v5690_v6 = vperm.slane %v5665_v45, %v7263_v51  ;;  %v5689_v13 = vsel %vm549_vm10, %v5688_v19, %v5687_v22 }
0x4372   :  { %v5698_v43 = vsel %vm582_vm2, %v5689_v13, %v5697_v49 }
0x4373   :  { %v5692_v31 = vsel %vm549_vm10, %v5691_v61, %v5690_v6  ;;  %vm5979_vm10 = vcmask 785408  }
0x4374   :  { %v5699_v0 = vsel %vm584_vm3, %v5692_v31, %v5698_v43 }
0x4375   :  { %v5701_v30 = vsel %vm587_vm4, %v5699_v0, 0.0 }
0x4376   :  { %5702 = vadd.xlane.f32.xlu1 %v5701_v30 }
0x43e9   :  { %v5703_v11 = vpop.xlane.xlu1 %5702 }
0x43ea   :  { %6492 = vrcp.f32 %v5703_v11 }
0x43f0   :  { %v6493_v36 = vpop.eup %6492 }
0x43f1   :  { %v5705_v39 = vmul.f32 %v6493_v36, %v5703_v11 }
0x43f3   :  { %v5706_v54 = vsub.f32 2.0, %v5705_v39 }
0x43f5   :  { %v5707_v3 = vmul.f32 %v6493_v36, %v5706_v54 }
0x43f7   :  { %v5714_v51 = vperm.slane %v5707_v3, 5  ;;  %v5709_v24 = vperm.slane %v5707_v3, 0  ;;  %v5710_v47 = vperm.slane %v5707_v3, 1  ;;  %v5711_v17 = vperm.slane %v5707_v3, 2 }
0x43f8   :  { %v5716_v1 = vperm.slane %v5707_v3, 7 }
0x43f9   :  { %v5735_v41 = vmul.f32 %v10135_v27, %v5714_v51  ;;  %v5726_v26 = vmul.f32 %v10098_v62, %v5709_v24  ;;  %v5725_v35 = vmul.f32 %v10095_v5, %v5709_v24  ;;  %v5728_v9 = vmul.f32 %v10111_v23, %v5710_v47 }
0x43fa   :  { %v5727_v20 = vmul.f32 %v10101_v50, %v5710_v47  ;;  %v5730_v27 = vmul.f32 %v10114_v63, %v5711_v17  ;;  %v5729_v62 = vmul.f32 %v10109_v48, %v5711_v17  ;;  %v5712_v5 = vperm.slane %v5707_v3, 3 }
0x43fb   :  { %5793 = vperm.xlu1 %6075, %v5735_v41   ;;  %5748 = vperm.xlu2 %6076, %v5726_v26   ;;  %v5715_v48 = vperm.slane %v5707_v3, 6 }
0x43fc   :  { %5743 = vperm.xlu0 %6077, %v5725_v35   ;;  %v5732_v23 = vmul.f32 %v10122_v4, %v5712_v5  ;;  %v5731_v50 = vmul.f32 %v10125_v53, %v5712_v5  ;;  %v5739_v4 = vmul.f32 %v10150_v8, %v5716_v1 }
0x43fd   :  { %v5737_v2 = vmul.f32 %v10147_v40, %v5715_v48  ;;  %v5738_v53 = vmul.f32 %v10145_v58, %v5715_v48 }
0x4403   :  { %5966 = vrot.lane.b32.xlu1 %v9566_v21, %s6923_s8  ;;  %5758 = vperm.xlu2 %6076, %v5728_v9   ;;  %v5713_v21 = vperm.slane %v5707_v3, 4 }
0x4404   :  { %5753 = vperm.xlu0 %6077, %v5727_v20  }
0x4405   :  { %v5734_v14 = vmul.f32 %v10137_v37, %v5713_v21  ;;  %v5733_v63 = vmul.f32 %v10128_v52, %v5713_v21  ;;  %v5740_v37 = vmul.f32 %v10154_v34, %v5716_v1  ;;  %v10330_v52 = vld [vmem:[#allocation22_spill] sm:$0xff] }
0x440b   :  { %5962 = vrot.lane.b32.xlu1 %v8769_v12, %s6926_s2  ;;  %5768 = vperm.xlu2 %6076, %v5730_v27   ;;  %v5736_v12 = vmul.f32 %v10140_v7, %v5714_v51  ;;  %v10331_v7 = vld [vmem:[#allocation19_spill] sm:$0xff] }
0x440c   :  { %5763 = vperm.xlu0 %6077, %v5729_v62  }
0x4413   :  { %5778 = vperm.xlu2 %6076, %v5732_v23  }
0x4414   :  { %5773 = vperm.xlu0 %6077, %v5731_v50  }
0x441b   :  { %5788 = vperm.xlu2 %6076, %v5734_v14   ;;  %v6734_v14 = vld [vmem:[%s10284_s1 + $0x60] sm:$0xff] }
0x441c   :  { %5783 = vperm.xlu0 %6077, %v5733_v63  }
0x4423   :  { %5803 = vperm.xlu2 %6076, %v5737_v2  }
0x4424   :  { %5798 = vperm.xlu0 %6077, %v5736_v12  }
0x442b   :  { %5813 = vperm.xlu2 %6076, %v5739_v4  }
0x442c   :  { %5808 = vperm.xlu0 %6077, %v5738_v53  }
0x4433   :  { %5925 = vrot.lane.b32.xlu2 %v9990_v46, %s6924_s21 }
0x4434   :  { %5818 = vperm.xlu0 %6077, %v5740_v37  }
0x443b   :  { %5958 = vrot.lane.b32.xlu2 %v10330_v52, %s6924_s21 }
0x443c   :  { %5954 = vrot.lane.b32.xlu0 %v10331_v7, %s6923_s8 }
0x4444   :  { %5970 = vrot.lane.b32.xlu0 %v9971_v60, %s6924_s21  ;;  %v6732_v60 = vld [vmem:[%s10284_s1 + $0x30] sm:$0xff] }
0x4455   :  { %v5749_v40 = vpop.permute.xlu2 %5748 }
0x4456   :  { %v5822_v30 = vmul.f32 %v9903_v42, %v5749_v40 }
0x4458   :  { %v5838_v51 = vsel %vm150_vm0, %v5822_v30, 0.0 }
0x445d   :  { %v5759_v8 = vpop.permute.xlu2 %5758 }
0x445e   :  { %v5824_v61 = vmul.f32 %v9884_v10, %v5759_v8  ;;  %v6733_v10 = vld [vmem:[%s10284_s1 + $0x48] sm:$0xff] }
0x4460   :  { %v5847_v36 = vsel %vm150_vm0, %v5824_v61, 0.0 }
0x4465   :  { %v5769_v15 = vpop.permute.xlu2 %5768 }
0x4466   :  { %v5826_v43 = vmul.f32 %v9897_v29, %v5769_v15 }
0x4468   :  { %v5856_v42 = vsel %vm150_vm0, %v5826_v43, 0.0  ;;  %v6736_v43 = vld [vmem:[%s10284_s1 + $0x78] sm:$0xff] }
0x446d   :  { %v5779_v28 = vpop.permute.xlu2 %5778  ;;  %v5794_v31 = vpop.permute.xlu1 %5793 }
0x446e   :  { %v5744_v58 = vpop.permute.xlu0 %5743  ;;  %v5831_v29 = vmul.f32 %v9940_v16, %v5794_v31 }
0x446f   :  { %v5821_v6 = vmul.f32 %v9890_v56, %v5744_v58 }
0x4470   :  { %v5882_v9 = vsel %vm150_vm0, %v5831_v29, 0.0 }
0x4471   :  { %v5837_v39 = vsel %vm150_vm0, %v5821_v6, 0.0 }
0x4472   :  { %v5839_v35 = vadd.f32 %v5838_v51, %v5837_v39 }
0x4474   :  { %v5840_v50 = vrot.slane %v5839_v35, 4 }
0x4475   :  { %v5789_v19 = vpop.permute.xlu2 %5788 }
0x4476   :  { %v5754_v55 = vpop.permute.xlu0 %5753  ;;  %v5830_v56 = vmul.f32 %v6733_v10, %v5789_v19  ;;  %v5841_v53 = vadd.f32 %v5840_v50, %v5839_v35  ;;  %v6735_v19 = vld [vmem:[%s10284_s1 + $0x70] sm:$0xff]  ;;  %s6927_s1 = smov [#allocation13]  }
0x4477   :  { %v5823_v45 = vmul.f32 %v9872_v59, %v5754_v55  ;;  %v5828_v59 = vmul.f32 %v9909_v33, %v5779_v28  ;;  %s5991_s28 = sshll.u32 %s6927_s1, 4  ;;  %s5992_s28 = int_to_ptr.vmem [resolvable:$true] %s5991_s28 }
0x4478   :  { %v5874_v16 = vsel %vm150_vm0, %v5830_v56, 0.0  ;;  %v5842_v28 = vrot.slane %v5841_v53, 2 }
0x4479   :  { %v5865_v24 = vsel %vm150_vm0, %v5828_v59, 0.0 }
0x447d   :  { %v5804_v13 = vpop.permute.xlu2 %5803 }
0x447e   :  { %v5764_v34 = vpop.permute.xlu0 %5763 }
0x447f   :  { %v5825_v44 = vmul.f32 %v9878_v18, %v5764_v34  ;;  %v5846_v18 = vsel %vm150_vm0, %v5823_v45, 0.0 }
0x4480   :  { %v5848_v33 = vadd.f32 %v5847_v36, %v5846_v18 }
0x4481   :  { %v5855_v11 = vsel %vm150_vm0, %v5825_v44, 0.0  ;;  %v10254_v44 = vpop.permute.xlu1 %5966 }
0x4482   :  { %v5857_v41 = vadd.f32 %v5856_v42, %v5855_v11  ;;  %v5849_v27 = vrot.slane %v5848_v33, 4 }
0x4484   :  { %v5858_v5 = vrot.slane %v5857_v41, 4  ;;  %v5850_v48 = vadd.f32 %v5849_v27, %v5848_v33 }
0x4485   :  { %v5814_v23 = vpop.permute.xlu2 %5813 }
0x4486   :  { %v5774_v22 = vpop.permute.xlu0 %5773  ;;  %v5859_v1 = vadd.f32 %v5858_v5, %v5857_v41  ;;  %v5851_v8 = vrot.slane %v5850_v48, 2 }
0x4487   :  { %v5827_v49 = vmul.f32 %v6732_v60, %v5774_v22 }
0x4488   :  { %v5860_v55 = vrot.slane %v5859_v1, 2  ;;  %v5852_v61 = vadd.f32 %v5851_v8, %v5850_v48 }
0x4489   :  { %v5963_v27 = vpop.permute.xlu1 %5962 }
0x448a   :  { %v5853_v11 = vrot.slane %v5852_v61, 1 }
0x448c   :  { %v5854_v51 = vadd.f32 %v5853_v11, %v5852_v61 }
0x448e   :  { %v5784_v46 = vpop.permute.xlu0 %5783 }
0x448f   :  { %v5829_v0 = vmul.f32 %v9922_v57, %v5784_v46  ;;  %v5864_v57 = vsel %vm150_vm0, %v5827_v49, 0.0  ;;  %v5835_v46 = vmul.f32 %v6735_v19, %v5814_v23  ;;  %v5861_v49 = vadd.f32 %v5860_v55, %v5859_v1 }
0x4490   :  { %v5866_v47 = vadd.f32 %v5865_v24, %v5864_v57  ;;  %v5981_v55 = vsel %vm150_vm0, %v9169_v32, %v10254_v44 }
0x4491   :  { %v5873_v54 = vsel %vm150_vm0, %v5829_v0, 0.0  ;;  %v5843_v0 = vadd.f32 %v5842_v28, %v5841_v53  ;;  %v5900_v18 = vsel %vm150_vm0, %v5835_v46, 0.0  ;;  %v5862_v39 = vrot.slane %v5861_v49, 1 }
0x4492   :  { %v5875_v20 = vadd.f32 %v5874_v16, %v5873_v54  ;;  %v5867_v21 = vrot.slane %v5866_v47, 4 }
0x4493   :  { %v5844_v42 = vrot.slane %v5843_v0, 1  ;;  %v5863_v35 = vadd.f32 %v5862_v39, %v5861_v49 }
0x4494   :  { %v5876_v63 = vrot.slane %v5875_v20, 4  ;;  %v5868_v37 = vadd.f32 %v5867_v21, %v5866_v47 }
0x4496   :  { %v5799_v3 = vpop.permute.xlu0 %5798  ;;  %v5877_v7 = vadd.f32 %v5876_v63, %v5875_v20  ;;  %v5869_v34 = vrot.slane %v5868_v37, 2 }
0x4497   :  { %v5832_v26 = vmul.f32 %v9947_v38, %v5799_v3  ;;  %v5833_v38 = vmul.f32 %v6734_v14, %v5804_v13 }
0x4498   :  { %v5878_v45 = vrot.slane %v5877_v7, 2  ;;  %v5870_v30 = vadd.f32 %v5869_v34, %v5868_v37 }
0x4499   :  { %v5883_v17 = vsel %vm150_vm0, %v5832_v26, 0.0  ;;  %v5891_v52 = vsel %vm150_vm0, %v5833_v38, 0.0 }
0x449a   :  { %v5884_v62 = vadd.f32 %v5883_v17, %v5882_v9  ;;  %v5879_v10 = vadd.f32 %v5878_v45, %v5877_v7  ;;  %v5871_v33 = vrot.slane %v5870_v30, 1  ;;  %v10332_v9 = vld [vmem:[#allocation21_spill] sm:$0xff]  ;;  %v5845_v17 = vadd.f32 %v5844_v42, %v5843_v0 }
0x449c   :  { %v5885_v2 = vrot.slane %v5884_v62, 4  ;;  %v5880_v3 = vrot.slane %v5879_v10, 1  ;;  %v5917_v14 = vsel %vm572_vm11, %v5854_v51, %v5845_v17 }
0x449d   :  { %v5918_v48 = vsel %vm574_vm12, %v5863_v35, %v5917_v14 }
0x449e   :  { %v5809_v12 = vpop.permute.xlu0 %5808  ;;  %v5886_v58 = vadd.f32 %v5885_v2, %v5884_v62  ;;  %v5872_v62 = vadd.f32 %v5871_v33, %v5870_v30  ;;  %v5881_v50 = vadd.f32 %v5880_v3, %v5879_v10 }
0x449f   :  { %v5834_v4 = vmul.f32 %v9957_v25, %v5809_v12  ;;  %v5926_v25 = vpop.permute.xlu2 %5925 }
0x44a0   :  { %v5887_v6 = vrot.slane %v5886_v58, 2  ;;  %v5919_v12 = vsel %vm576_vm13, %v5872_v62, %v5918_v48 }
0x44a1   :  { %v5892_v40 = vsel %vm150_vm0, %v5834_v4, 0.0  ;;  %v5920_v4 = vsel %vm578_vm14, %v5881_v50, %v5919_v12 }
0x44a2   :  { %v5893_v15 = vadd.f32 %v5892_v40, %v5891_v52  ;;  %v5888_v36 = vadd.f32 %v5887_v6, %v5886_v58 }
0x44a4   :  { %v5894_v22 = vrot.slane %v5893_v15, 4  ;;  %v5889_v24 = vrot.slane %v5888_v36, 1 }
0x44a6   :  { %v5895_v13 = vadd.f32 %v5894_v22, %v5893_v15  ;;  %v5819_v60 = vpop.permute.xlu0 %5818  ;;  %v5890_v38 = vadd.f32 %v5889_v24, %v5888_v36 }
0x44a7   :  { %v5836_v31 = vmul.f32 %v6736_v43, %v5819_v60  ;;  %v5959_v16 = vpop.permute.xlu2 %5958 }
0x44a8   :  { %v5896_v59 = vrot.slane %v5895_v13, 2  ;;  %v5921_v37 = vsel %vm580_vm15, %v5890_v38, %v5920_v4 }
0x44a9   :  { %v5901_v56 = vsel %vm150_vm0, %v5836_v31, 0.0 }
0x44aa   :  { %v5902_v29 = vadd.f32 %v5901_v56, %v5900_v18  ;;  %v5897_v57 = vadd.f32 %v5896_v59, %v5895_v13 }
0x44ac   :  { %v5903_v54 = vrot.slane %v5902_v29, 4  ;;  %v5898_v47 = vrot.slane %v5897_v57, 1 }
0x44ae   :  { %v5904_v41 = vadd.f32 %v5903_v54, %v5902_v29  ;;  %v5955_v26 = vpop.permute.xlu0 %5954  ;;  %v5899_v2 = vadd.f32 %v5898_v47, %v5897_v57 }
0x44af   :  { %v5977_v20 = vsel %vm150_vm0, %v10332_v9, %v5955_v26 }
0x44b0   :  { %v5905_v5 = vrot.slane %v5904_v41, 2  ;;  %v5978_v23 = vsel %vm273_vm1, %v5977_v20, %v5959_v16  ;;  %v5922_v52 = vsel %vm582_vm2, %v5899_v2, %v5921_v37 }
0x44b1   :  { %v5980_v21 = vsel %vm5979_vm10, %v5978_v23, %v5963_v27 }
0x44b2   :  { %v5906_v63 = vadd.f32 %v5905_v5, %v5904_v41  ;;  %5984 = vst [vmem:[#allocation13] sm:$0xff] %v5980_v21 }
0x44b4   :  { %v5907_v1 = vrot.slane %v5906_v63, 1 }
0x44b6   :  { %v5908_v53 = vadd.f32 %v5907_v1, %v5906_v63  ;;  %v5971_v15 = vpop.permute.xlu0 %5970 }
0x44b7   :  { %v5982_v28 = vsel %vm273_vm1, %v5981_v55, %v5971_v15 }
0x44b8   :  { %v5923_v7 = vsel %vm584_vm3, %v5908_v53, %v5922_v52 }
0x44b9   :  { %v5928_v40 = vsel %vm150_vm0, %v5923_v7, %v5926_v25 }
0x44ba   :  { %6061 = vmatmul.msk.f32.vlgmr.msra.gmra.mxu1 %vm273_vm1, %v5928_v40 }
0x4537   :  { %v5949_v8 = vpop.f32.mrf.mxu1 }
0x4538   :  { %6494 = vtanh.f32 %v5949_v8 }
0x453e   :  { %v6495_v58 = vpop.eup %6494 }
0x453f   :  { %5974 = vrot.lane.b32.xlu2 %v6495_v58, %s6926_s2 }
0x4599   :  { %v5975_v34 = vpop.permute.xlu2 %5974 }
0x459a   :  { %v5983_v22 = vsel %vm5979_vm10, %v5982_v28, %v5975_v34 }
0x459b   :  { %5985 = vst [vmem:[#allocation13 + $0x8] sm:$0xff] %v5983_v22 }
0x459c   :  { %5996 = dma.vmem_to_hbm [thread:$0]  %s5992_s28, 256, %s5994_s10, [#allocation4]  }
0x459d   :  { %6913 = dma.done.wait [#allocation4], 256  }
0x459e   :  { %6914 = vsyncadd [#allocation4], 4294967040 }
0x459f   :  { %6001 = vsyncpa [#allocation3], 1 }
0x45a0   :  { %6002 = vsyncpa [#allocation6], 1 }
0x45a1   :  { %6003 = vsyncpa [#allocation9], 1 }
0x45a2   :  { %6004 = vsyncpa [#allocation12], 1 }
0x45a3   :  { %6005 = vsyncpa [#allocation4], 1 }

</bundles_post_ra>
